<compile_context>
chip_gen: v5e
topology: v5e:2x2
jax: 0.10.0
libtpu: 0.0.40
codegen_flags: <defaults>
</compile_context>

<pallas_src>
import math

import jax
import jax.numpy as jnp
from jax import lax
from jax.experimental import pallas as pl
from jax.experimental.pallas import tpu as pltpu


# ----------------------------------------------------------------------------- kernel

def _middle_block_kernel(x_ref, dww_ref, dwb_ref, pww_ref, s_ref, c_ref,
                         o_ref, act_ref, sbuf_ref, dw_ref):
    # x_ref   : (B, H, W, C)   f32   batch block of input activations
    # dww_ref : (3, 9, C)      f32   depthwise taps (k = 3*dy + dx) for the 3 convs
    # dwb_ref : (3, C)         f32   depthwise biases
    # pww_ref : (3, C, C)      bf16  pointwise weights (Cin, Cout) -- MXU operands
    # s_ref   : (3, C)         f32   folded BN scale
    # c_ref   : (3, C)         f32   folded BN shift (includes pointwise bias)
    # act_ref : (B, H, W, C)   f32   scratch: activation between convs (residual path)
    # sbuf_ref: (3, H+2, W, C) f32   scratch: dx-shifted, dy-halo'd views of one sample
    # dw_ref  : (B*H*W, C)     bf16  scratch: staged depthwise output = matmul LHS
    B, H, W, C = x_ref.shape
    HW = H * W

    # Edge masks zeroing the column that wraps around in the W-rolls (built once,
    # ~2 vregs each; the multiply happens on the VPU).
    col = lax.broadcasted_iota(jnp.int32, (1, 1, W, C), 2)
    not_first = (col > 0).astype(jnp.float32)       # zeroes column 0
    not_last = (col < W - 1).astype(jnp.float32)    # zeroes column W-1

    # Zero ONLY the one-row dy halo (rows 0 and H+1); interior rows are fully
    # rewritten for every sample/conv.  Done once per grid step (not per sample)
    # and kept megacore-safe: each core re-initialises its own scratch copy.
    zrow = jnp.zeros((3, 1, W, C), jnp.float32)
    sbuf_ref[:, 0:1, :, :] = zrow
    sbuf_ref[:, H + 1:H + 2, :, :] = zrow

    def depthwise(src, i):
        # nn.ReLU + depthwise 3x3 (pad 1, bias) of conv i over the batch block.
        # One sample at a time (bounded vreg pressure); results staged to dw_ref
        # as the (B*H*W, C) pointwise-matmul LHS.  All indices are static.
        wts = dww_ref[i]                                      # (9, C)
        bias = dwb_ref[i].reshape(1, 1, 1, C)
        for b in range(B):
            a = jnp.maximum(src[b:b + 1], 0.0)                # hoisted ReLU, (1,H,W,C)
            # dx-shifted views of `a` (W shifts on the XLU); dy handled below by
            # plain row addressing into the halo'd scratch -> 9 aligned tap loads.
            sbuf_ref[1:2, 1:H + 1, :, :] = a
            sbuf_ref[0:1, 1:H + 1, :, :] = pltpu.roll(a, 1, axis=2) * not_first
            sbuf_ref[2:3, 1:H + 1, :, :] = pltpu.roll(a, W - 1, axis=2) * not_last
            acc = jnp.zeros((1, H, W, C), jnp.float32)
            for dy in range(3):
                for dx in range(3):
                    acc = acc + (sbuf_ref[dx:dx + 1, dy:dy + H, :, :]
                                 * wts[3 * dy + dx].reshape(1, 1, 1, C))
            acc = acc + bias
            dw_ref[b * HW:(b + 1) * HW, :] = acc.reshape(HW, C).astype(dw_ref.dtype)

    for i in range(3):                                        # conv1 -> conv2 -> conv3
        depthwise(x_ref if i == 0 else act_ref, i)
        # Pointwise 1x1 conv for the whole batch block: one (B*H*W, C) x (C, C)
        # MXU matmul (bf16 operands, f32 accumulation) fused with the folded-BN affine.
        pm = jnp.dot(dw_ref[...], pww_ref[i], preferred_element_type=jnp.float32)
        y = pm * s_ref[i].reshape(1, C) + c_ref[i].reshape(1, C)
        act_ref[...] = y.reshape(B, H, W, C)

    # Identity shortcut: reload x from VMEM at the epilogue rather than holding it
    # live across all three convs.
    o_ref[...] = (x_ref[...] + act_ref[...]).astype(o_ref.dtype)


# ----------------------------------------------------------------------------- wrapper

def _prep_params(params, C):
    dw_w, dw_b, pw_w, scale, shift = [], [], [], [], []
    for conv in params["convs"]:
        # depthwise weight (C,1,3,3) -> (9, C); tap order k = 3*dy + dx matches the kernel.
        dw_w.append(jnp.transpose(conv["dw_w"][:, 0], (1, 2, 0)).reshape(9, C))
        dw_b.append(conv["dw_b"])
        # pointwise weight (Cout,Cin,1,1) -> (Cin, Cout), cast once to bf16 for the MXU.
        pw_w.append(conv["pw_w"][:, :, 0, 0].T.astype(jnp.bfloat16))
        # Fold eval-mode BN: y = g*(pm + pw_b - mean)/sqrt(var+eps) + beta
        #                      = s*pm + (s*(pw_b - mean) + beta)
        g, b, m, v = conv["bn"]
        s = g / jnp.sqrt(v + 1e-5)
        scale.append(s)
        shift.append(s * (conv["pw_b"] - m) + b)
    return (jnp.stack(dw_w).astype(jnp.float32),      # (3, 9, C)
            jnp.stack(dw_b).astype(jnp.float32),      # (3, C)
            jnp.stack(pw_w),                          # (3, C, C) bf16
            jnp.stack(scale).astype(jnp.float32),     # (3, C)
            jnp.stack(shift).astype(jnp.float32))     # (3, C)


def _pick_batch_block(n, hw, target_m):
    """Largest divisor b of n with b*hw <= target_m, but keep >= 2 grid steps
    (megacore sharding) whenever n >= 2."""
    b_blk = 1
    for cand in range(1, n + 1):
        if n % cand:
            continue
        if cand * hw > max(target_m, hw):
            continue
        if n >= 2 and n // cand < 2:
            continue
        b_blk = cand
    return b_blk


def middle_flow_block_nhwc(params, x_nhwc, *, target_m=256):
    """MiddleFLowBlock forward, NHWC activations (preferred entry -- no transposes).

    target_m: desired pointwise-matmul M (= batch_block * H * W). 256 fills the
    v6e/v7x 256x256 MXU; 128 already fills v5e's 128x128 array.
    """
    x = x_nhwc.astype(jnp.float32)
    N, H, W, C = x.shape
    dw_w, dw_b, pw_w, scale, shift = _prep_params(params, C)

    b_blk = _pick_batch_block(N, H * W, target_m)
    grid = (N // b_blk,)

    return pl.pallas_call(
        _middle_block_kernel,
        out_shape=jax.ShapeDtypeStruct((N, H, W, C), jnp.float32),
        grid=grid,
        in_specs=[
            pl.BlockSpec((b_blk, H, W, C), lambda b: (b, 0, 0, 0)),
            pl.BlockSpec((3, 9, C), lambda b: (0, 0, 0)),
            pl.BlockSpec((3, C), lambda b: (0, 0)),
            pl.BlockSpec((3, C, C), lambda b: (0, 0, 0)),
            pl.BlockSpec((3, C), lambda b: (0, 0)),
            pl.BlockSpec((3, C), lambda b: (0, 0)),
        ],
        out_specs=pl.BlockSpec((b_blk, H, W, C), lambda b: (b, 0, 0, 0)),
        scratch_shapes=[
            pltpu.VMEM((b_blk, H, W, C), jnp.float32),      # activation between convs
            pltpu.VMEM((3, H + 2, W, C), jnp.float32),      # dx-shifted, dy-halo'd views
            pltpu.VMEM((b_blk * H * W, C), jnp.bfloat16),   # staged pointwise-matmul LHS
        ],
        compiler_params=pltpu.CompilerParams(dimension_semantics=("parallel",)),
    )(x, dw_w, dw_b, pw_w, scale, shift)


def middle_flow_block(params, x_nchw, *, target_m=256):
    """PyTorch-compatible NCHW wrapper.  In a full network keep activations NHWC and
    call middle_flow_block_nhwc directly: each transpose here is a separate XLA kernel
    doing a full HBM round trip comparable in cost to the fused block itself."""
    x = jnp.transpose(x_nchw, (0, 2, 3, 1))
    out = middle_flow_block_nhwc(params, x, target_m=target_m)
    return jnp.transpose(out, (0, 3, 1, 2))


# ----------------------------------------------------------------------------- reference

def middle_flow_block_reference(params, x_nchw):
    """Pure-JAX reference (mirrors the kernel's bf16 pointwise matmul operands)."""
    x = jnp.transpose(x_nchw, (0, 2, 3, 1)).astype(jnp.float32)
    N, H, W, C = x.shape
    act = x
    for conv in params["convs"]:
        a = jnp.maximum(act, 0.0)
        a_pad = jnp.pad(a, ((0, 0), (1, 1), (1, 1), (0, 0)))
        dw = jnp.zeros_like(a)
        for dy in range(3):
            for dx in range(3):
                w = conv["dw_w"][:, 0, dy, dx].reshape(1, 1, 1, C)
                dw = dw + a_pad[:, dy:dy + H, dx:dx + W, :] * w
        dw = dw + conv["dw_b"].reshape(1, 1, 1, C)
        pw = conv["pw_w"][:, :, 0, 0].T.astype(jnp.bfloat16)
        pm = jnp.dot(dw.reshape(-1, C).astype(jnp.bfloat16), pw,
                     preferred_element_type=jnp.float32)
        g, b, m, v = conv["bn"]
        s = g / jnp.sqrt(v + 1e-5)
        y = pm * s.reshape(1, C) + (s * (conv["pw_b"] - m) + b).reshape(1, C)
        act = y.reshape(N, H, W, C)
    return jnp.transpose(x + act, (0, 3, 1, 2))


# ----------------------------------------------------------------------------- params

class _Gen:
    def __init__(self, key):
        self.key = key

    def normal(self, shape, std):
        self.key, k = jax.random.split(self.key)
        return std * jax.random.normal(k, shape, jnp.float32)


def init_params(key, channels=256):
    g = _Gen(key)
    C = channels

    def conv():
        gamma = 1.0 + 0.1 * g.normal((C,), 1.0)
        beta = 0.1 * g.normal((C,), 1.0)
        mean = 0.1 * g.normal((C,), 1.0)
        var = 1.0 + 0.1 * jnp.abs(g.normal((C,), 1.0))
        return dict(
            dw_w=g.normal((C, 1, 3, 3), 1.0 / 3.0),
            dw_b=g.normal((C,), 0.02),
            pw_w=g.normal((C, C, 1, 1), 1.0 / math.sqrt(C)),
            pw_b=g.normal((C,), 0.02),
            bn=(gamma, beta, mean, var),
        )

    return dict(convs=[conv(), conv(), conv()])


# ----------------------------------------------------------------------------- main

if __name__ == "__main__":
    key = jax.random.PRNGKey(0)
    pkey, xkey = jax.random.split(key)
    params = init_params(pkey, channels=256)
    # NCHW input like the PyTorch module; MiddleFLowBlock is fixed at 256 channels.
    # N=4, 8x8 spatial -> batch block of 2 per grid step (M=128 matmul, 2 grid steps).
    x = jax.random.normal(xkey, (4, 256, 8, 8), jnp.float32)

    out = jax.jit(middle_flow_block)(params, x)
    jax.block_until_ready(out)
    assert out.shape == x.shape and out.dtype == jnp.float32

    ref = jax.jit(middle_flow_block_reference)(params, x)
    err = float(jnp.max(jnp.abs(out - ref)))
    assert err < 1e-2, f"max abs err vs reference = {err}"
    print("KERNEL_OK")
</pallas_src>

<mosaic_0001>
module attributes {stable_mosaic.version = 11 : i64} {
  func.func @_middle_block_kernel(%arg0: i32, %arg1: memref<2x8x8x256xf32, #tpu.memory_space<vmem>>, %arg2: memref<3x9x256xf32, #tpu.memory_space<vmem>>, %arg3: memref<3x256xf32, #tpu.memory_space<vmem>>, %arg4: memref<3x256x256xbf16, #tpu.memory_space<vmem>>, %arg5: memref<3x256xf32, #tpu.memory_space<vmem>>, %arg6: memref<3x256xf32, #tpu.memory_space<vmem>>, %arg7: memref<2x8x8x256xf32, #tpu.memory_space<vmem>>, %arg8: memref<2x8x8x256xf32, #tpu.memory_space<vmem>>, %arg9: memref<3x10x8x256xf32, #tpu.memory_space<vmem>>, %arg10: memref<128x256xbf16, #tpu.memory_space<vmem>>) attributes {dimension_semantics = [#tpu.dimension_semantics<parallel>], iteration_bounds = array<i64: 2>, scalar_prefetch = 0 : i64, scratch_operands = 3 : i64, tpu.core_type = #tpu.core_type<tc>, window_params = [{transform_indices = @transform_0, window_bounds = array<i64: 2, 8, 8, 256>}, {pipeline_mode = #tpu.pipeline_mode<synchronous>, transform_indices = @transform_1, window_bounds = array<i64: 3, 9, 256>}, {pipeline_mode = #tpu.pipeline_mode<synchronous>, transform_indices = @transform_2, window_bounds = array<i64: 3, 256>}, {pipeline_mode = #tpu.pipeline_mode<synchronous>, transform_indices = @transform_3, window_bounds = array<i64: 3, 256, 256>}, {pipeline_mode = #tpu.pipeline_mode<synchronous>, transform_indices = @transform_4, window_bounds = array<i64: 3, 256>}, {pipeline_mode = #tpu.pipeline_mode<synchronous>, transform_indices = @transform_5, window_bounds = array<i64: 3, 256>}, {transform_indices = @transform_6, window_bounds = array<i64: 2, 8, 8, 256>}]} {
    %0 = tpu.iota {dimensions = array<i32: 2>} : vector<1x1x8x256xi32>
    %c0_i32 = arith.constant 0 : i32
    %1 = vector.broadcast %c0_i32 : i32 to vector<1x1x8x256xi32>
    %2 = arith.cmpi sgt, %0, %1 : vector<1x1x8x256xi32>
    %3 = arith.extui %2 : vector<1x1x8x256xi1> to vector<1x1x8x256xi32>
    %4 = arith.sitofp %3 : vector<1x1x8x256xi32> to vector<1x1x8x256xf32>
    %c7_i32 = arith.constant 7 : i32
    %5 = vector.broadcast %c7_i32 : i32 to vector<1x1x8x256xi32>
    %6 = arith.cmpi slt, %0, %5 : vector<1x1x8x256xi32>
    %7 = arith.extui %6 : vector<1x1x8x256xi1> to vector<1x1x8x256xi32>
    %8 = arith.sitofp %7 : vector<1x1x8x256xi32> to vector<1x1x8x256xf32>
    %cst = arith.constant 0.000000e+00 : f32
    %9 = vector.broadcast %cst : f32 to vector<3x1x8x256xf32>
    %c0 = arith.constant 0 : index
    %c0_0 = arith.constant 0 : index
    %c0_1 = arith.constant 0 : index
    %c0_2 = arith.constant 0 : index
    %10 = vector.load %arg9[%c0, %c0_0, %c0_1, %c0_2] : memref<3x10x8x256xf32, #tpu.memory_space<vmem>>, vector<3x1x8x256xf32>
    tpu.vector_store %arg9[%c0, %c0_0, %c0_1, %c0_2], %9 {strides = array<i32>} : memref<3x10x8x256xf32, #tpu.memory_space<vmem>>, vector<3x1x8x256xf32>,
    %c0_3 = arith.constant 0 : index
    %c9 = arith.constant 9 : index
    %c0_4 = arith.constant 0 : index
    %c0_5 = arith.constant 0 : index
    %11 = vector.load %arg9[%c0_3, %c9, %c0_4, %c0_5] : memref<3x10x8x256xf32, #tpu.memory_space<vmem>>, vector<3x1x8x256xf32>
    tpu.vector_store %arg9[%c0_3, %c9, %c0_4, %c0_5], %9 {strides = array<i32>} : memref<3x10x8x256xf32, #tpu.memory_space<vmem>>, vector<3x1x8x256xf32>,
    %c0_6 = arith.constant 0 : index
    %c0_7 = arith.constant 0 : index
    %c0_8 = arith.constant 0 : index
    %12 = vector.load %arg2[%c0_6, %c0_7, %c0_8] : memref<3x9x256xf32, #tpu.memory_space<vmem>>, vector<1x9x256xf32>
    %13 = vector.shape_cast %12 : vector<1x9x256xf32> to vector<9x256xf32>
    %c0_9 = arith.constant 0 : index
    %c0_10 = arith.constant 0 : index
    %14 = vector.load %arg3[%c0_9, %c0_10] : memref<3x256xf32, #tpu.memory_space<vmem>>, vector<1x256xf32>
    %15 = vector.shape_cast %14 : vector<1x256xf32> to vector<256xf32>
    %16 = vector.shape_cast %15 : vector<256xf32> to vector<1x1x1x256xf32>
    %c0_11 = arith.constant 0 : index
    %c0_12 = arith.constant 0 : index
    %c0_13 = arith.constant 0 : index
    %c0_14 = arith.constant 0 : index
    %17 = vector.load %arg1[%c0_11, %c0_12, %c0_13, %c0_14] : memref<2x8x8x256xf32, #tpu.memory_space<vmem>>, vector<1x8x8x256xf32>
    %cst_15 = arith.constant 0.000000e+00 : f32
    %18 = vector.broadcast %cst_15 : f32 to vector<1x8x8x256xf32>
    %19 = arith.maximumf %17, %18 : vector<1x8x8x256xf32>
    %c1 = arith.constant 1 : index
    %c1_16 = arith.constant 1 : index
    %c0_17 = arith.constant 0 : index
    %c0_18 = arith.constant 0 : index
    %20 = vector.load %arg9[%c1, %c1_16, %c0_17, %c0_18] : memref<3x10x8x256xf32, #tpu.memory_space<vmem>>, vector<1x8x8x256xf32>
    tpu.vector_store %arg9[%c1, %c1_16, %c0_17, %c0_18], %19 {strides = array<i32>} : memref<3x10x8x256xf32, #tpu.memory_space<vmem>>, vector<1x8x8x256xf32>,
    %c1_i32 = arith.constant 1 : i32
    %21 = tpu.dynamic_rotate %19 by %c1_i32 dim 2 : vector<1x8x8x256xf32>, i32 -> vector<1x8x8x256xf32>
    %22 = vector.broadcast %4 : vector<1x1x8x256xf32> to vector<1x8x8x256xf32>
    %23 = arith.mulf %21, %22 : vector<1x8x8x256xf32>
    %c0_19 = arith.constant 0 : index
    %c1_20 = arith.constant 1 : index
    %c0_21 = arith.constant 0 : index
    %c0_22 = arith.constant 0 : index
    %24 = vector.load %arg9[%c0_19, %c1_20, %c0_21, %c0_22] : memref<3x10x8x256xf32, #tpu.memory_space<vmem>>, vector<1x8x8x256xf32>
    tpu.vector_store %arg9[%c0_19, %c1_20, %c0_21, %c0_22], %23 {strides = array<i32>} : memref<3x10x8x256xf32, #tpu.memory_space<vmem>>, vector<1x8x8x256xf32>,
    %c7_i32_23 = arith.constant 7 : i32
    %25 = tpu.dynamic_rotate %19 by %c7_i32_23 dim 2 : vector<1x8x8x256xf32>, i32 -> vector<1x8x8x256xf32>
    %26 = vector.broadcast %8 : vector<1x1x8x256xf32> to vector<1x8x8x256xf32>
    %27 = arith.mulf %25, %26 : vector<1x8x8x256xf32>
    %c2 = arith.constant 2 : index
    %c1_24 = arith.constant 1 : index
    %c0_25 = arith.constant 0 : index
    %c0_26 = arith.constant 0 : index
    %28 = vector.load %arg9[%c2, %c1_24, %c0_25, %c0_26] : memref<3x10x8x256xf32, #tpu.memory_space<vmem>>, vector<1x8x8x256xf32>
    tpu.vector_store %arg9[%c2, %c1_24, %c0_25, %c0_26], %27 {strides = array<i32>} : memref<3x10x8x256xf32, #tpu.memory_space<vmem>>, vector<1x8x8x256xf32>,
    %cst_27 = arith.constant 0.000000e+00 : f32
    %29 = vector.broadcast %cst_27 : f32 to vector<1x8x8x256xf32>
    %c0_28 = arith.constant 0 : index
    %c0_29 = arith.constant 0 : index
    %c0_30 = arith.constant 0 : index
    %c0_31 = arith.constant 0 : index
    %30 = vector.load %arg9[%c0_28, %c0_29, %c0_30, %c0_31] : memref<3x10x8x256xf32, #tpu.memory_space<vmem>>, vector<1x8x8x256xf32>
    %31 = vector.extract_strided_slice %13 {offsets = [0, 0], sizes = [1, 256], strides = [1, 1]} : vector<9x256xf32> to vector<1x256xf32>
    %32 = vector.shape_cast %31 : vector<1x256xf32> to vector<256xf32>
    %33 = vector.shape_cast %32 : vector<256xf32> to vector<1x1x1x256xf32>
    %34 = vector.broadcast %33 : vector<1x1x1x256xf32> to vector<1x8x8x256xf32>
    %35 = arith.mulf %30, %34 : vector<1x8x8x256xf32>
    %36 = arith.addf %29, %35 : vector<1x8x8x256xf32>
    %c1_32 = arith.constant 1 : index
    %c0_33 = arith.constant 0 : index
    %c0_34 = arith.constant 0 : index
    %c0_35 = arith.constant 0 : index
    %37 = vector.load %arg9[%c1_32, %c0_33, %c0_34, %c0_35] : memref<3x10x8x256xf32, #tpu.memory_space<vmem>>, vector<1x8x8x256xf32>
    %38 = vector.extract_strided_slice %13 {offsets = [1, 0], sizes = [1, 256], strides = [1, 1]} : vector<9x256xf32> to vector<1x256xf32>
    %39 = vector.shape_cast %38 : vector<1x256xf32> to vector<256xf32>
    %40 = vector.shape_cast %39 : vector<256xf32> to vector<1x1x1x256xf32>
    %41 = vector.broadcast %40 : vector<1x1x1x256xf32> to vector<1x8x8x256xf32>
    %42 = arith.mulf %37, %41 : vector<1x8x8x256xf32>
    %43 = arith.addf %36, %42 : vector<1x8x8x256xf32>
    %c2_36 = arith.constant 2 : index
    %c0_37 = arith.constant 0 : index
    %c0_38 = arith.constant 0 : index
    %c0_39 = arith.constant 0 : index
    %44 = vector.load %arg9[%c2_36, %c0_37, %c0_38, %c0_39] : memref<3x10x8x256xf32, #tpu.memory_space<vmem>>, vector<1x8x8x256xf32>
    %45 = vector.extract_strided_slice %13 {offsets = [2, 0], sizes = [1, 256], strides = [1, 1]} : vector<9x256xf32> to vector<1x256xf32>
    %46 = vector.shape_cast %45 : vector<1x256xf32> to vector<256xf32>
    %47 = vector.shape_cast %46 : vector<256xf32> to vector<1x1x1x256xf32>
    %48 = vector.broadcast %47 : vector<1x1x1x256xf32> to vector<1x8x8x256xf32>
    %49 = arith.mulf %44, %48 : vector<1x8x8x256xf32>
    %50 = arith.addf %43, %49 : vector<1x8x8x256xf32>
    %c0_40 = arith.constant 0 : index
    %c1_41 = arith.constant 1 : index
    %c0_42 = arith.constant 0 : index
    %c0_43 = arith.constant 0 : index
    %51 = vector.load %arg9[%c0_40, %c1_41, %c0_42, %c0_43] : memref<3x10x8x256xf32, #tpu.memory_space<vmem>>, vector<1x8x8x256xf32>
    %52 = vector.extract_strided_slice %13 {offsets = [3, 0], sizes = [1, 256], strides = [1, 1]} : vector<9x256xf32> to vector<1x256xf32>
    %53 = vector.shape_cast %52 : vector<1x256xf32> to vector<256xf32>
    %54 = vector.shape_cast %53 : vector<256xf32> to vector<1x1x1x256xf32>
    %55 = vector.broadcast %54 : vector<1x1x1x256xf32> to vector<1x8x8x256xf32>
    %56 = arith.mulf %51, %55 : vector<1x8x8x256xf32>
    %57 = arith.addf %50, %56 : vector<1x8x8x256xf32>
    %c1_44 = arith.constant 1 : index
    %c1_45 = arith.constant 1 : index
    %c0_46 = arith.constant 0 : index
    %c0_47 = arith.constant 0 : index
    %58 = vector.load %arg9[%c1_44, %c1_45, %c0_46, %c0_47] : memref<3x10x8x256xf32, #tpu.memory_space<vmem>>, vector<1x8x8x256xf32>
    %59 = vector.extract_strided_slice %13 {offsets = [4, 0], sizes = [1, 256], strides = [1, 1]} : vector<9x256xf32> to vector<1x256xf32>
    %60 = vector.shape_cast %59 : vector<1x256xf32> to vector<256xf32>
    %61 = vector.shape_cast %60 : vector<256xf32> to vector<1x1x1x256xf32>
    %62 = vector.broadcast %61 : vector<1x1x1x256xf32> to vector<1x8x8x256xf32>
    %63 = arith.mulf %58, %62 : vector<1x8x8x256xf32>
    %64 = arith.addf %57, %63 : vector<1x8x8x256xf32>
    %c2_48 = arith.constant 2 : index
    %c1_49 = arith.constant 1 : index
    %c0_50 = arith.constant 0 : index
    %c0_51 = arith.constant 0 : index
    %65 = vector.load %arg9[%c2_48, %c1_49, %c0_50, %c0_51] : memref<3x10x8x256xf32, #tpu.memory_space<vmem>>, vector<1x8x8x256xf32>
    %66 = vector.extract_strided_slice %13 {offsets = [5, 0], sizes = [1, 256], strides = [1, 1]} : vector<9x256xf32> to vector<1x256xf32>
    %67 = vector.shape_cast %66 : vector<1x256xf32> to vector<256xf32>
    %68 = vector.shape_cast %67 : vector<256xf32> to vector<1x1x1x256xf32>
    %69 = vector.broadcast %68 : vector<1x1x1x256xf32> to vector<1x8x8x256xf32>
    %70 = arith.mulf %65, %69 : vector<1x8x8x256xf32>
    %71 = arith.addf %64, %70 : vector<1x8x8x256xf32>
    %c0_52 = arith.constant 0 : index
    %c2_53 = arith.constant 2 : index
    %c0_54 = arith.constant 0 : index
    %c0_55 = arith.constant 0 : index
    %72 = vector.load %arg9[%c0_52, %c2_53, %c0_54, %c0_55] : memref<3x10x8x256xf32, #tpu.memory_space<vmem>>, vector<1x8x8x256xf32>
    %73 = vector.extract_strided_slice %13 {offsets = [6, 0], sizes = [1, 256], strides = [1, 1]} : vector<9x256xf32> to vector<1x256xf32>
    %74 = vector.shape_cast %73 : vector<1x256xf32> to vector<256xf32>
    %75 = vector.shape_cast %74 : vector<256xf32> to vector<1x1x1x256xf32>
    %76 = vector.broadcast %75 : vector<1x1x1x256xf32> to vector<1x8x8x256xf32>
    %77 = arith.mulf %72, %76 : vector<1x8x8x256xf32>
    %78 = arith.addf %71, %77 : vector<1x8x8x256xf32>
    %c1_56 = arith.constant 1 : index
    %c2_57 = arith.constant 2 : index
    %c0_58 = arith.constant 0 : index
    %c0_59 = arith.constant 0 : index
    %79 = vector.load %arg9[%c1_56, %c2_57, %c0_58, %c0_59] : memref<3x10x8x256xf32, #tpu.memory_space<vmem>>, vector<1x8x8x256xf32>
    %80 = vector.extract_strided_slice %13 {offsets = [7, 0], sizes = [1, 256], strides = [1, 1]} : vector<9x256xf32> to vector<1x256xf32>
    %81 = vector.shape_cast %80 : vector<1x256xf32> to vector<256xf32>
    %82 = vector.shape_cast %81 : vector<256xf32> to vector<1x1x1x256xf32>
    %83 = vector.broadcast %82 : vector<1x1x1x256xf32> to vector<1x8x8x256xf32>
    %84 = arith.mulf %79, %83 : vector<1x8x8x256xf32>
    %85 = arith.addf %78, %84 : vector<1x8x8x256xf32>
    %c2_60 = arith.constant 2 : index
    %c2_61 = arith.constant 2 : index
    %c0_62 = arith.constant 0 : index
    %c0_63 = arith.constant 0 : index
    %86 = vector.load %arg9[%c2_60, %c2_61, %c0_62, %c0_63] : memref<3x10x8x256xf32, #tpu.memory_space<vmem>>, vector<1x8x8x256xf32>
    %87 = vector.extract_strided_slice %13 {offsets = [8, 0], sizes = [1, 256], strides = [1, 1]} : vector<9x256xf32> to vector<1x256xf32>
    %88 = vector.shape_cast %87 : vector<1x256xf32> to vector<256xf32>
    %89 = vector.shape_cast %88 : vector<256xf32> to vector<1x1x1x256xf32>
    %90 = vector.broadcast %89 : vector<1x1x1x256xf32> to vector<1x8x8x256xf32>
    %91 = arith.mulf %86, %90 : vector<1x8x8x256xf32>
    %92 = arith.addf %85, %91 : vector<1x8x8x256xf32>
    %93 = vector.broadcast %16 : vector<1x1x1x256xf32> to vector<1x8x8x256xf32>
    %94 = arith.addf %92, %93 : vector<1x8x8x256xf32>
    %95 = vector.shape_cast %94 : vector<1x8x8x256xf32> to vector<64x256xf32>
    %96 = arith.truncf %95 : vector<64x256xf32> to vector<64x256xbf16>
    %c0_64 = arith.constant 0 : index
    %c0_65 = arith.constant 0 : index
    %97 = vector.load %arg10[%c0_64, %c0_65] : memref<128x256xbf16, #tpu.memory_space<vmem>>, vector<64x256xbf16>
    tpu.vector_store %arg10[%c0_64, %c0_65], %96 {strides = array<i32>} : memref<128x256xbf16, #tpu.memory_space<vmem>>, vector<64x256xbf16>,
    %c1_66 = arith.constant 1 : index
    %c0_67 = arith.constant 0 : index
    %c0_68 = arith.constant 0 : index
    %c0_69 = arith.constant 0 : index
    %98 = vector.load %arg1[%c1_66, %c0_67, %c0_68, %c0_69] : memref<2x8x8x256xf32, #tpu.memory_space<vmem>>, vector<1x8x8x256xf32>
    %cst_70 = arith.constant 0.000000e+00 : f32
    %99 = vector.broadcast %cst_70 : f32 to vector<1x8x8x256xf32>
    %100 = arith.maximumf %98, %99 : vector<1x8x8x256xf32>
    %c1_71 = arith.constant 1 : index
    %c1_72 = arith.constant 1 : index
    %c0_73 = arith.constant 0 : index
    %c0_74 = arith.constant 0 : index
    %101 = vector.load %arg9[%c1_71, %c1_72, %c0_73, %c0_74] : memref<3x10x8x256xf32, #tpu.memory_space<vmem>>, vector<1x8x8x256xf32>
    tpu.vector_store %arg9[%c1_71, %c1_72, %c0_73, %c0_74], %100 {strides = array<i32>} : memref<3x10x8x256xf32, #tpu.memory_space<vmem>>, vector<1x8x8x256xf32>,
    %c1_i32_75 = arith.constant 1 : i32
    %102 = tpu.dynamic_rotate %100 by %c1_i32_75 dim 2 : vector<1x8x8x256xf32>, i32 -> vector<1x8x8x256xf32>
    %103 = vector.broadcast %4 : vector<1x1x8x256xf32> to vector<1x8x8x256xf32>
    %104 = arith.mulf %102, %103 : vector<1x8x8x256xf32>
    %c0_76 = arith.constant 0 : index
    %c1_77 = arith.constant 1 : index
    %c0_78 = arith.constant 0 : index
    %c0_79 = arith.constant 0 : index
    %105 = vector.load %arg9[%c0_76, %c1_77, %c0_78, %c0_79] : memref<3x10x8x256xf32, #tpu.memory_space<vmem>>, vector<1x8x8x256xf32>
    tpu.vector_store %arg9[%c0_76, %c1_77, %c0_78, %c0_79], %104 {strides = array<i32>} : memref<3x10x8x256xf32, #tpu.memory_space<vmem>>, vector<1x8x8x256xf32>,
    %c7_i32_80 = arith.constant 7 : i32
    %106 = tpu.dynamic_rotate %100 by %c7_i32_80 dim 2 : vector<1x8x8x256xf32>, i32 -> vector<1x8x8x256xf32>
    %107 = vector.broadcast %8 : vector<1x1x8x256xf32> to vector<1x8x8x256xf32>
    %108 = arith.mulf %106, %107 : vector<1x8x8x256xf32>
    %c2_81 = arith.constant 2 : index
    %c1_82 = arith.constant 1 : index
    %c0_83 = arith.constant 0 : index
    %c0_84 = arith.constant 0 : index
    %109 = vector.load %arg9[%c2_81, %c1_82, %c0_83, %c0_84] : memref<3x10x8x256xf32, #tpu.memory_space<vmem>>, vector<1x8x8x256xf32>
    tpu.vector_store %arg9[%c2_81, %c1_82, %c0_83, %c0_84], %108 {strides = array<i32>} : memref<3x10x8x256xf32, #tpu.memory_space<vmem>>, vector<1x8x8x256xf32>,
    %cst_85 = arith.constant 0.000000e+00 : f32
    %110 = vector.broadcast %cst_85 : f32 to vector<1x8x8x256xf32>
    %c0_86 = arith.constant 0 : index
    %c0_87 = arith.constant 0 : index
    %c0_88 = arith.constant 0 : index
    %c0_89 = arith.constant 0 : index
    %111 = vector.load %arg9[%c0_86, %c0_87, %c0_88, %c0_89] : memref<3x10x8x256xf32, #tpu.memory_space<vmem>>, vector<1x8x8x256xf32>
    %112 = vector.extract_strided_slice %13 {offsets = [0, 0], sizes = [1, 256], strides = [1, 1]} : vector<9x256xf32> to vector<1x256xf32>
    %113 = vector.shape_cast %112 : vector<1x256xf32> to vector<256xf32>
    %114 = vector.shape_cast %113 : vector<256xf32> to vector<1x1x1x256xf32>
    %115 = vector.broadcast %114 : vector<1x1x1x256xf32> to vector<1x8x8x256xf32>
    %116 = arith.mulf %111, %115 : vector<1x8x8x256xf32>
    %117 = arith.addf %110, %116 : vector<1x8x8x256xf32>
    %c1_90 = arith.constant 1 : index
    %c0_91 = arith.constant 0 : index
    %c0_92 = arith.constant 0 : index
    %c0_93 = arith.constant 0 : index
    %118 = vector.load %arg9[%c1_90, %c0_91, %c0_92, %c0_93] : memref<3x10x8x256xf32, #tpu.memory_space<vmem>>, vector<1x8x8x256xf32>
    %119 = vector.extract_strided_slice %13 {offsets = [1, 0], sizes = [1, 256], strides = [1, 1]} : vector<9x256xf32> to vector<1x256xf32>
    %120 = vector.shape_cast %119 : vector<1x256xf32> to vector<256xf32>
    %121 = vector.shape_cast %120 : vector<256xf32> to vector<1x1x1x256xf32>
    %122 = vector.broadcast %121 : vector<1x1x1x256xf32> to vector<1x8x8x256xf32>
    %123 = arith.mulf %118, %122 : vector<1x8x8x256xf32>
    %124 = arith.addf %117, %123 : vector<1x8x8x256xf32>
    %c2_94 = arith.constant 2 : index
    %c0_95 = arith.constant 0 : index
    %c0_96 = arith.constant 0 : index
    %c0_97 = arith.constant 0 : index
    %125 = vector.load %arg9[%c2_94, %c0_95, %c0_96, %c0_97] : memref<3x10x8x256xf32, #tpu.memory_space<vmem>>, vector<1x8x8x256xf32>
    %126 = vector.extract_strided_slice %13 {offsets = [2, 0], sizes = [1, 256], strides = [1, 1]} : vector<9x256xf32> to vector<1x256xf32>
    %127 = vector.shape_cast %126 : vector<1x256xf32> to vector<256xf32>
    %128 = vector.shape_cast %127 : vector<256xf32> to vector<1x1x1x256xf32>
    %129 = vector.broadcast %128 : vector<1x1x1x256xf32> to vector<1x8x8x256xf32>
    %130 = arith.mulf %125, %129 : vector<1x8x8x256xf32>
    %131 = arith.addf %124, %130 : vector<1x8x8x256xf32>
    %c0_98 = arith.constant 0 : index
    %c1_99 = arith.constant 1 : index
    %c0_100 = arith.constant 0 : index
    %c0_101 = arith.constant 0 : index
    %132 = vector.load %arg9[%c0_98, %c1_99, %c0_100, %c0_101] : memref<3x10x8x256xf32, #tpu.memory_space<vmem>>, vector<1x8x8x256xf32>
    %133 = vector.extract_strided_slice %13 {offsets = [3, 0], sizes = [1, 256], strides = [1, 1]} : vector<9x256xf32> to vector<1x256xf32>
    %134 = vector.shape_cast %133 : vector<1x256xf32> to vector<256xf32>
    %135 = vector.shape_cast %134 : vector<256xf32> to vector<1x1x1x256xf32>
    %136 = vector.broadcast %135 : vector<1x1x1x256xf32> to vector<1x8x8x256xf32>
    %137 = arith.mulf %132, %136 : vector<1x8x8x256xf32>
    %138 = arith.addf %131, %137 : vector<1x8x8x256xf32>
    %c1_102 = arith.constant 1 : index
    %c1_103 = arith.constant 1 : index
    %c0_104 = arith.constant 0 : index
    %c0_105 = arith.constant 0 : index
    %139 = vector.load %arg9[%c1_102, %c1_103, %c0_104, %c0_105] : memref<3x10x8x256xf32, #tpu.memory_space<vmem>>, vector<1x8x8x256xf32>
    %140 = vector.extract_strided_slice %13 {offsets = [4, 0], sizes = [1, 256], strides = [1, 1]} : vector<9x256xf32> to vector<1x256xf32>
    %141 = vector.shape_cast %140 : vector<1x256xf32> to vector<256xf32>
    %142 = vector.shape_cast %141 : vector<256xf32> to vector<1x1x1x256xf32>
    %143 = vector.broadcast %142 : vector<1x1x1x256xf32> to vector<1x8x8x256xf32>
    %144 = arith.mulf %139, %143 : vector<1x8x8x256xf32>
    %145 = arith.addf %138, %144 : vector<1x8x8x256xf32>
    %c2_106 = arith.constant 2 : index
    %c1_107 = arith.constant 1 : index
    %c0_108 = arith.constant 0 : index
    %c0_109 = arith.constant 0 : index
    %146 = vector.load %arg9[%c2_106, %c1_107, %c0_108, %c0_109] : memref<3x10x8x256xf32, #tpu.memory_space<vmem>>, vector<1x8x8x256xf32>
    %147 = vector.extract_strided_slice %13 {offsets = [5, 0], sizes = [1, 256], strides = [1, 1]} : vector<9x256xf32> to vector<1x256xf32>
    %148 = vector.shape_cast %147 : vector<1x256xf32> to vector<256xf32>
    %149 = vector.shape_cast %148 : vector<256xf32> to vector<1x1x1x256xf32>
    %150 = vector.broadcast %149 : vector<1x1x1x256xf32> to vector<1x8x8x256xf32>
    %151 = arith.mulf %146, %150 : vector<1x8x8x256xf32>
    %152 = arith.addf %145, %151 : vector<1x8x8x256xf32>
    %c0_110 = arith.constant 0 : index
    %c2_111 = arith.constant 2 : index
    %c0_112 = arith.constant 0 : index
    %c0_113 = arith.constant 0 : index
    %153 = vector.load %arg9[%c0_110, %c2_111, %c0_112, %c0_113] : memref<3x10x8x256xf32, #tpu.memory_space<vmem>>, vector<1x8x8x256xf32>
    %154 = vector.extract_strided_slice %13 {offsets = [6, 0], sizes = [1, 256], strides = [1, 1]} : vector<9x256xf32> to vector<1x256xf32>
    %155 = vector.shape_cast %154 : vector<1x256xf32> to vector<256xf32>
    %156 = vector.shape_cast %155 : vector<256xf32> to vector<1x1x1x256xf32>
    %157 = vector.broadcast %156 : vector<1x1x1x256xf32> to vector<1x8x8x256xf32>
    %158 = arith.mulf %153, %157 : vector<1x8x8x256xf32>
    %159 = arith.addf %152, %158 : vector<1x8x8x256xf32>
    %c1_114 = arith.constant 1 : index
    %c2_115 = arith.constant 2 : index
    %c0_116 = arith.constant 0 : index
    %c0_117 = arith.constant 0 : index
    %160 = vector.load %arg9[%c1_114, %c2_115, %c0_116, %c0_117] : memref<3x10x8x256xf32, #tpu.memory_space<vmem>>, vector<1x8x8x256xf32>
    %161 = vector.extract_strided_slice %13 {offsets = [7, 0], sizes = [1, 256], strides = [1, 1]} : vector<9x256xf32> to vector<1x256xf32>
    %162 = vector.shape_cast %161 : vector<1x256xf32> to vector<256xf32>
    %163 = vector.shape_cast %162 : vector<256xf32> to vector<1x1x1x256xf32>
    %164 = vector.broadcast %163 : vector<1x1x1x256xf32> to vector<1x8x8x256xf32>
    %165 = arith.mulf %160, %164 : vector<1x8x8x256xf32>
    %166 = arith.addf %159, %165 : vector<1x8x8x256xf32>
    %c2_118 = arith.constant 2 : index
    %c2_119 = arith.constant 2 : index
    %c0_120 = arith.constant 0 : index
    %c0_121 = arith.constant 0 : index
    %167 = vector.load %arg9[%c2_118, %c2_119, %c0_120, %c0_121] : memref<3x10x8x256xf32, #tpu.memory_space<vmem>>, vector<1x8x8x256xf32>
    %168 = vector.extract_strided_slice %13 {offsets = [8, 0], sizes = [1, 256], strides = [1, 1]} : vector<9x256xf32> to vector<1x256xf32>
    %169 = vector.shape_cast %168 : vector<1x256xf32> to vector<256xf32>
    %170 = vector.shape_cast %169 : vector<256xf32> to vector<1x1x1x256xf32>
    %171 = vector.broadcast %170 : vector<1x1x1x256xf32> to vector<1x8x8x256xf32>
    %172 = arith.mulf %167, %171 : vector<1x8x8x256xf32>
    %173 = arith.addf %166, %172 : vector<1x8x8x256xf32>
    %174 = vector.broadcast %16 : vector<1x1x1x256xf32> to vector<1x8x8x256xf32>
    %175 = arith.addf %173, %174 : vector<1x8x8x256xf32>
    %176 = vector.shape_cast %175 : vector<1x8x8x256xf32> to vector<64x256xf32>
    %177 = arith.truncf %176 : vector<64x256xf32> to vector<64x256xbf16>
    %c64 = arith.constant 64 : index
    %c0_122 = arith.constant 0 : index
    %178 = vector.load %arg10[%c64, %c0_122] : memref<128x256xbf16, #tpu.memory_space<vmem>>, vector<64x256xbf16>
    tpu.vector_store %arg10[%c64, %c0_122], %177 {strides = array<i32>} : memref<128x256xbf16, #tpu.memory_space<vmem>>, vector<64x256xbf16>,
    %c0_123 = arith.constant 0 : index
    %c0_124 = arith.constant 0 : index
    %179 = vector.load %arg10[%c0_123, %c0_124] : memref<128x256xbf16, #tpu.memory_space<vmem>>, vector<128x256xbf16>
    %c0_125 = arith.constant 0 : index
    %c0_126 = arith.constant 0 : index
    %c0_127 = arith.constant 0 : index
    %180 = vector.load %arg4[%c0_125, %c0_126, %c0_127] : memref<3x256x256xbf16, #tpu.memory_space<vmem>>, vector<1x256x256xbf16>
    %181 = vector.shape_cast %180 : vector<1x256x256xbf16> to vector<256x256xbf16>
    %cst_128 = arith.constant dense<0.000000e+00> : vector<128x256xf32>
    %182 = tpu.matmul %179, %181, %cst_128 {dimension_numbers = #tpu.dot_dimension_numbers<[1], [0], [0], [1], [0, 0, 1, 1], [], []>} : vector<128x256xbf16>, vector<256x256xbf16>, vector<128x256xf32> -> vector<128x256xf32>
    %c0_129 = arith.constant 0 : index
    %c0_130 = arith.constant 0 : index
    %183 = vector.load %arg5[%c0_129, %c0_130] : memref<3x256xf32, #tpu.memory_space<vmem>>, vector<1x256xf32>
    %184 = vector.shape_cast %183 : vector<1x256xf32> to vector<256xf32>
    %185 = vector.shape_cast %184 : vector<256xf32> to vector<1x256xf32>
    %186 = vector.broadcast %185 : vector<1x256xf32> to vector<128x256xf32>
    %187 = arith.mulf %182, %186 : vector<128x256xf32>
    %c0_131 = arith.constant 0 : index
    %c0_132 = arith.constant 0 : index
    %188 = vector.load %arg6[%c0_131, %c0_132] : memref<3x256xf32, #tpu.memory_space<vmem>>, vector<1x256xf32>
    %189 = vector.shape_cast %188 : vector<1x256xf32> to vector<256xf32>
    %190 = vector.shape_cast %189 : vector<256xf32> to vector<1x256xf32>
    %191 = vector.broadcast %190 : vector<1x256xf32> to vector<128x256xf32>
    %192 = arith.addf %187, %191 : vector<128x256xf32>
    %193 = vector.shape_cast %192 : vector<128x256xf32> to vector<2x8x8x256xf32>
    %c0_133 = arith.constant 0 : index
    %c0_134 = arith.constant 0 : index
    %c0_135 = arith.constant 0 : index
    %c0_136 = arith.constant 0 : index
    %194 = vector.load %arg8[%c0_133, %c0_134, %c0_135, %c0_136] : memref<2x8x8x256xf32, #tpu.memory_space<vmem>>, vector<2x8x8x256xf32>
    tpu.vector_store %arg8[%c0_133, %c0_134, %c0_135, %c0_136], %193 {strides = array<i32>} : memref<2x8x8x256xf32, #tpu.memory_space<vmem>>, vector<2x8x8x256xf32>,
    %c1_137 = arith.constant 1 : index
    %c0_138 = arith.constant 0 : index
    %c0_139 = arith.constant 0 : index
    %195 = vector.load %arg2[%c1_137, %c0_138, %c0_139] : memref<3x9x256xf32, #tpu.memory_space<vmem>>, vector<1x9x256xf32>
    %196 = vector.shape_cast %195 : vector<1x9x256xf32> to vector<9x256xf32>
    %c1_140 = arith.constant 1 : index
    %c0_141 = arith.constant 0 : index
    %197 = vector.load %arg3[%c1_140, %c0_141] : memref<3x256xf32, #tpu.memory_space<vmem>>, vector<1x256xf32>
    %198 = vector.shape_cast %197 : vector<1x256xf32> to vector<256xf32>
    %199 = vector.shape_cast %198 : vector<256xf32> to vector<1x1x1x256xf32>
    %c0_142 = arith.constant 0 : index
    %c0_143 = arith.constant 0 : index
    %c0_144 = arith.constant 0 : index
    %c0_145 = arith.constant 0 : index
    %200 = vector.load %arg8[%c0_142, %c0_143, %c0_144, %c0_145] : memref<2x8x8x256xf32, #tpu.memory_space<vmem>>, vector<1x8x8x256xf32>
    %cst_146 = arith.constant 0.000000e+00 : f32
    %201 = vector.broadcast %cst_146 : f32 to vector<1x8x8x256xf32>
    %202 = arith.maximumf %200, %201 : vector<1x8x8x256xf32>
    %c1_147 = arith.constant 1 : index
    %c1_148 = arith.constant 1 : index
    %c0_149 = arith.constant 0 : index
    %c0_150 = arith.constant 0 : index
    %203 = vector.load %arg9[%c1_147, %c1_148, %c0_149, %c0_150] : memref<3x10x8x256xf32, #tpu.memory_space<vmem>>, vector<1x8x8x256xf32>
    tpu.vector_store %arg9[%c1_147, %c1_148, %c0_149, %c0_150], %202 {strides = array<i32>} : memref<3x10x8x256xf32, #tpu.memory_space<vmem>>, vector<1x8x8x256xf32>,
    %c1_i32_151 = arith.constant 1 : i32
    %204 = tpu.dynamic_rotate %202 by %c1_i32_151 dim 2 : vector<1x8x8x256xf32>, i32 -> vector<1x8x8x256xf32>
    %205 = vector.broadcast %4 : vector<1x1x8x256xf32> to vector<1x8x8x256xf32>
    %206 = arith.mulf %204, %205 : vector<1x8x8x256xf32>
    %c0_152 = arith.constant 0 : index
    %c1_153 = arith.constant 1 : index
    %c0_154 = arith.constant 0 : index
    %c0_155 = arith.constant 0 : index
    %207 = vector.load %arg9[%c0_152, %c1_153, %c0_154, %c0_155] : memref<3x10x8x256xf32, #tpu.memory_space<vmem>>, vector<1x8x8x256xf32>
    tpu.vector_store %arg9[%c0_152, %c1_153, %c0_154, %c0_155], %206 {strides = array<i32>} : memref<3x10x8x256xf32, #tpu.memory_space<vmem>>, vector<1x8x8x256xf32>,
    %c7_i32_156 = arith.constant 7 : i32
    %208 = tpu.dynamic_rotate %202 by %c7_i32_156 dim 2 : vector<1x8x8x256xf32>, i32 -> vector<1x8x8x256xf32>
    %209 = vector.broadcast %8 : vector<1x1x8x256xf32> to vector<1x8x8x256xf32>
    %210 = arith.mulf %208, %209 : vector<1x8x8x256xf32>
    %c2_157 = arith.constant 2 : index
    %c1_158 = arith.constant 1 : index
    %c0_159 = arith.constant 0 : index
    %c0_160 = arith.constant 0 : index
    %211 = vector.load %arg9[%c2_157, %c1_158, %c0_159, %c0_160] : memref<3x10x8x256xf32, #tpu.memory_space<vmem>>, vector<1x8x8x256xf32>
    tpu.vector_store %arg9[%c2_157, %c1_158, %c0_159, %c0_160], %210 {strides = array<i32>} : memref<3x10x8x256xf32, #tpu.memory_space<vmem>>, vector<1x8x8x256xf32>,
    %cst_161 = arith.constant 0.000000e+00 : f32
    %212 = vector.broadcast %cst_161 : f32 to vector<1x8x8x256xf32>
    %c0_162 = arith.constant 0 : index
    %c0_163 = arith.constant 0 : index
    %c0_164 = arith.constant 0 : index
    %c0_165 = arith.constant 0 : index
    %213 = vector.load %arg9[%c0_162, %c0_163, %c0_164, %c0_165] : memref<3x10x8x256xf32, #tpu.memory_space<vmem>>, vector<1x8x8x256xf32>
    %214 = vector.extract_strided_slice %196 {offsets = [0, 0], sizes = [1, 256], strides = [1, 1]} : vector<9x256xf32> to vector<1x256xf32>
    %215 = vector.shape_cast %214 : vector<1x256xf32> to vector<256xf32>
    %216 = vector.shape_cast %215 : vector<256xf32> to vector<1x1x1x256xf32>
    %217 = vector.broadcast %216 : vector<1x1x1x256xf32> to vector<1x8x8x256xf32>
    %218 = arith.mulf %213, %217 : vector<1x8x8x256xf32>
    %219 = arith.addf %212, %218 : vector<1x8x8x256xf32>
    %c1_166 = arith.constant 1 : index
    %c0_167 = arith.constant 0 : index
    %c0_168 = arith.constant 0 : index
    %c0_169 = arith.constant 0 : index
    %220 = vector.load %arg9[%c1_166, %c0_167, %c0_168, %c0_169] : memref<3x10x8x256xf32, #tpu.memory_space<vmem>>, vector<1x8x8x256xf32>
    %221 = vector.extract_strided_slice %196 {offsets = [1, 0], sizes = [1, 256], strides = [1, 1]} : vector<9x256xf32> to vector<1x256xf32>
    %222 = vector.shape_cast %221 : vector<1x256xf32> to vector<256xf32>
    %223 = vector.shape_cast %222 : vector<256xf32> to vector<1x1x1x256xf32>
    %224 = vector.broadcast %223 : vector<1x1x1x256xf32> to vector<1x8x8x256xf32>
    %225 = arith.mulf %220, %224 : vector<1x8x8x256xf32>
    %226 = arith.addf %219, %225 : vector<1x8x8x256xf32>
    %c2_170 = arith.constant 2 : index
    %c0_171 = arith.constant 0 : index
    %c0_172 = arith.constant 0 : index
    %c0_173 = arith.constant 0 : index
    %227 = vector.load %arg9[%c2_170, %c0_171, %c0_172, %c0_173] : memref<3x10x8x256xf32, #tpu.memory_space<vmem>>, vector<1x8x8x256xf32>
    %228 = vector.extract_strided_slice %196 {offsets = [2, 0], sizes = [1, 256], strides = [1, 1]} : vector<9x256xf32> to vector<1x256xf32>
    %229 = vector.shape_cast %228 : vector<1x256xf32> to vector<256xf32>
    %230 = vector.shape_cast %229 : vector<256xf32> to vector<1x1x1x256xf32>
    %231 = vector.broadcast %230 : vector<1x1x1x256xf32> to vector<1x8x8x256xf32>
    %232 = arith.mulf %227, %231 : vector<1x8x8x256xf32>
    %233 = arith.addf %226, %232 : vector<1x8x8x256xf32>
    %c0_174 = arith.constant 0 : index
    %c1_175 = arith.constant 1 : index
    %c0_176 = arith.constant 0 : index
    %c0_177 = arith.constant 0 : index
    %234 = vector.load %arg9[%c0_174, %c1_175, %c0_176, %c0_177] : memref<3x10x8x256xf32, #tpu.memory_space<vmem>>, vector<1x8x8x256xf32>
    %235 = vector.extract_strided_slice %196 {offsets = [3, 0], sizes = [1, 256], strides = [1, 1]} : vector<9x256xf32> to vector<1x256xf32>
    %236 = vector.shape_cast %235 : vector<1x256xf32> to vector<256xf32>
    %237 = vector.shape_cast %236 : vector<256xf32> to vector<1x1x1x256xf32>
    %238 = vector.broadcast %237 : vector<1x1x1x256xf32> to vector<1x8x8x256xf32>
    %239 = arith.mulf %234, %238 : vector<1x8x8x256xf32>
    %240 = arith.addf %233, %239 : vector<1x8x8x256xf32>
    %c1_178 = arith.constant 1 : index
    %c1_179 = arith.constant 1 : index
    %c0_180 = arith.constant 0 : index
    %c0_181 = arith.constant 0 : index
    %241 = vector.load %arg9[%c1_178, %c1_179, %c0_180, %c0_181] : memref<3x10x8x256xf32, #tpu.memory_space<vmem>>, vector<1x8x8x256xf32>
    %242 = vector.extract_strided_slice %196 {offsets = [4, 0], sizes = [1, 256], strides = [1, 1]} : vector<9x256xf32> to vector<1x256xf32>
    %243 = vector.shape_cast %242 : vector<1x256xf32> to vector<256xf32>
    %244 = vector.shape_cast %243 : vector<256xf32> to vector<1x1x1x256xf32>
    %245 = vector.broadcast %244 : vector<1x1x1x256xf32> to vector<1x8x8x256xf32>
    %246 = arith.mulf %241, %245 : vector<1x8x8x256xf32>
    %247 = arith.addf %240, %246 : vector<1x8x8x256xf32>
    %c2_182 = arith.constant 2 : index
    %c1_183 = arith.constant 1 : index
    %c0_184 = arith.constant 0 : index
    %c0_185 = arith.constant 0 : index
    %248 = vector.load %arg9[%c2_182, %c1_183, %c0_184, %c0_185] : memref<3x10x8x256xf32, #tpu.memory_space<vmem>>, vector<1x8x8x256xf32>
    %249 = vector.extract_strided_slice %196 {offsets = [5, 0], sizes = [1, 256], strides = [1, 1]} : vector<9x256xf32> to vector<1x256xf32>
    %250 = vector.shape_cast %249 : vector<1x256xf32> to vector<256xf32>
    %251 = vector.shape_cast %250 : vector<256xf32> to vector<1x1x1x256xf32>
    %252 = vector.broadcast %251 : vector<1x1x1x256xf32> to vector<1x8x8x256xf32>
    %253 = arith.mulf %248, %252 : vector<1x8x8x256xf32>
    %254 = arith.addf %247, %253 : vector<1x8x8x256xf32>
    %c0_186 = arith.constant 0 : index
    %c2_187 = arith.constant 2 : index
    %c0_188 = arith.constant 0 : index
    %c0_189 = arith.constant 0 : index
    %255 = vector.load %arg9[%c0_186, %c2_187, %c0_188, %c0_189] : memref<3x10x8x256xf32, #tpu.memory_space<vmem>>, vector<1x8x8x256xf32>
    %256 = vector.extract_strided_slice %196 {offsets = [6, 0], sizes = [1, 256], strides = [1, 1]} : vector<9x256xf32> to vector<1x256xf32>
    %257 = vector.shape_cast %256 : vector<1x256xf32> to vector<256xf32>
    %258 = vector.shape_cast %257 : vector<256xf32> to vector<1x1x1x256xf32>
    %259 = vector.broadcast %258 : vector<1x1x1x256xf32> to vector<1x8x8x256xf32>
    %260 = arith.mulf %255, %259 : vector<1x8x8x256xf32>
    %261 = arith.addf %254, %260 : vector<1x8x8x256xf32>
    %c1_190 = arith.constant 1 : index
    %c2_191 = arith.constant 2 : index
    %c0_192 = arith.constant 0 : index
    %c0_193 = arith.constant 0 : index
    %262 = vector.load %arg9[%c1_190, %c2_191, %c0_192, %c0_193] : memref<3x10x8x256xf32, #tpu.memory_space<vmem>>, vector<1x8x8x256xf32>
    %263 = vector.extract_strided_slice %196 {offsets = [7, 0], sizes = [1, 256], strides = [1, 1]} : vector<9x256xf32> to vector<1x256xf32>
    %264 = vector.shape_cast %263 : vector<1x256xf32> to vector<256xf32>
    %265 = vector.shape_cast %264 : vector<256xf32> to vector<1x1x1x256xf32>
    %266 = vector.broadcast %265 : vector<1x1x1x256xf32> to vector<1x8x8x256xf32>
    %267 = arith.mulf %262, %266 : vector<1x8x8x256xf32>
    %268 = arith.addf %261, %267 : vector<1x8x8x256xf32>
    %c2_194 = arith.constant 2 : index
    %c2_195 = arith.constant 2 : index
    %c0_196 = arith.constant 0 : index
    %c0_197 = arith.constant 0 : index
    %269 = vector.load %arg9[%c2_194, %c2_195, %c0_196, %c0_197] : memref<3x10x8x256xf32, #tpu.memory_space<vmem>>, vector<1x8x8x256xf32>
    %270 = vector.extract_strided_slice %196 {offsets = [8, 0], sizes = [1, 256], strides = [1, 1]} : vector<9x256xf32> to vector<1x256xf32>
    %271 = vector.shape_cast %270 : vector<1x256xf32> to vector<256xf32>
    %272 = vector.shape_cast %271 : vector<256xf32> to vector<1x1x1x256xf32>
    %273 = vector.broadcast %272 : vector<1x1x1x256xf32> to vector<1x8x8x256xf32>
    %274 = arith.mulf %269, %273 : vector<1x8x8x256xf32>
    %275 = arith.addf %268, %274 : vector<1x8x8x256xf32>
    %276 = vector.broadcast %199 : vector<1x1x1x256xf32> to vector<1x8x8x256xf32>
    %277 = arith.addf %275, %276 : vector<1x8x8x256xf32>
    %278 = vector.shape_cast %277 : vector<1x8x8x256xf32> to vector<64x256xf32>
    %279 = arith.truncf %278 : vector<64x256xf32> to vector<64x256xbf16>
    %c0_198 = arith.constant 0 : index
    %c0_199 = arith.constant 0 : index
    %280 = vector.load %arg10[%c0_198, %c0_199] : memref<128x256xbf16, #tpu.memory_space<vmem>>, vector<64x256xbf16>
    tpu.vector_store %arg10[%c0_198, %c0_199], %279 {strides = array<i32>} : memref<128x256xbf16, #tpu.memory_space<vmem>>, vector<64x256xbf16>,
    %c1_200 = arith.constant 1 : index
    %c0_201 = arith.constant 0 : index
    %c0_202 = arith.constant 0 : index
    %c0_203 = arith.constant 0 : index
    %281 = vector.load %arg8[%c1_200, %c0_201, %c0_202, %c0_203] : memref<2x8x8x256xf32, #tpu.memory_space<vmem>>, vector<1x8x8x256xf32>
    %cst_204 = arith.constant 0.000000e+00 : f32
    %282 = vector.broadcast %cst_204 : f32 to vector<1x8x8x256xf32>
    %283 = arith.maximumf %281, %282 : vector<1x8x8x256xf32>
    %c1_205 = arith.constant 1 : index
    %c1_206 = arith.constant 1 : index
    %c0_207 = arith.constant 0 : index
    %c0_208 = arith.constant 0 : index
    %284 = vector.load %arg9[%c1_205, %c1_206, %c0_207, %c0_208] : memref<3x10x8x256xf32, #tpu.memory_space<vmem>>, vector<1x8x8x256xf32>
    tpu.vector_store %arg9[%c1_205, %c1_206, %c0_207, %c0_208], %283 {strides = array<i32>} : memref<3x10x8x256xf32, #tpu.memory_space<vmem>>, vector<1x8x8x256xf32>,
    %c1_i32_209 = arith.constant 1 : i32
    %285 = tpu.dynamic_rotate %283 by %c1_i32_209 dim 2 : vector<1x8x8x256xf32>, i32 -> vector<1x8x8x256xf32>
    %286 = vector.broadcast %4 : vector<1x1x8x256xf32> to vector<1x8x8x256xf32>
    %287 = arith.mulf %285, %286 : vector<1x8x8x256xf32>
    %c0_210 = arith.constant 0 : index
    %c1_211 = arith.constant 1 : index
    %c0_212 = arith.constant 0 : index
    %c0_213 = arith.constant 0 : index
    %288 = vector.load %arg9[%c0_210, %c1_211, %c0_212, %c0_213] : memref<3x10x8x256xf32, #tpu.memory_space<vmem>>, vector<1x8x8x256xf32>
    tpu.vector_store %arg9[%c0_210, %c1_211, %c0_212, %c0_213], %287 {strides = array<i32>} : memref<3x10x8x256xf32, #tpu.memory_space<vmem>>, vector<1x8x8x256xf32>,
    %c7_i32_214 = arith.constant 7 : i32
    %289 = tpu.dynamic_rotate %283 by %c7_i32_214 dim 2 : vector<1x8x8x256xf32>, i32 -> vector<1x8x8x256xf32>
    %290 = vector.broadcast %8 : vector<1x1x8x256xf32> to vector<1x8x8x256xf32>
    %291 = arith.mulf %289, %290 : vector<1x8x8x256xf32>
    %c2_215 = arith.constant 2 : index
    %c1_216 = arith.constant 1 : index
    %c0_217 = arith.constant 0 : index
    %c0_218 = arith.constant 0 : index
    %292 = vector.load %arg9[%c2_215, %c1_216, %c0_217, %c0_218] : memref<3x10x8x256xf32, #tpu.memory_space<vmem>>, vector<1x8x8x256xf32>
    tpu.vector_store %arg9[%c2_215, %c1_216, %c0_217, %c0_218], %291 {strides = array<i32>} : memref<3x10x8x256xf32, #tpu.memory_space<vmem>>, vector<1x8x8x256xf32>,
    %cst_219 = arith.constant 0.000000e+00 : f32
    %293 = vector.broadcast %cst_219 : f32 to vector<1x8x8x256xf32>
    %c0_220 = arith.constant 0 : index
    %c0_221 = arith.constant 0 : index
    %c0_222 = arith.constant 0 : index
    %c0_223 = arith.constant 0 : index
    %294 = vector.load %arg9[%c0_220, %c0_221, %c0_222, %c0_223] : memref<3x10x8x256xf32, #tpu.memory_space<vmem>>, vector<1x8x8x256xf32>
    %295 = vector.extract_strided_slice %196 {offsets = [0, 0], sizes = [1, 256], strides = [1, 1]} : vector<9x256xf32> to vector<1x256xf32>
    %296 = vector.shape_cast %295 : vector<1x256xf32> to vector<256xf32>
    %297 = vector.shape_cast %296 : vector<256xf32> to vector<1x1x1x256xf32>
    %298 = vector.broadcast %297 : vector<1x1x1x256xf32> to vector<1x8x8x256xf32>
    %299 = arith.mulf %294, %298 : vector<1x8x8x256xf32>
    %300 = arith.addf %293, %299 : vector<1x8x8x256xf32>
    %c1_224 = arith.constant 1 : index
    %c0_225 = arith.constant 0 : index
    %c0_226 = arith.constant 0 : index
    %c0_227 = arith.constant 0 : index
    %301 = vector.load %arg9[%c1_224, %c0_225, %c0_226, %c0_227] : memref<3x10x8x256xf32, #tpu.memory_space<vmem>>, vector<1x8x8x256xf32>
    %302 = vector.extract_strided_slice %196 {offsets = [1, 0], sizes = [1, 256], strides = [1, 1]} : vector<9x256xf32> to vector<1x256xf32>
    %303 = vector.shape_cast %302 : vector<1x256xf32> to vector<256xf32>
    %304 = vector.shape_cast %303 : vector<256xf32> to vector<1x1x1x256xf32>
    %305 = vector.broadcast %304 : vector<1x1x1x256xf32> to vector<1x8x8x256xf32>
    %306 = arith.mulf %301, %305 : vector<1x8x8x256xf32>
    %307 = arith.addf %300, %306 : vector<1x8x8x256xf32>
    %c2_228 = arith.constant 2 : index
    %c0_229 = arith.constant 0 : index
    %c0_230 = arith.constant 0 : index
    %c0_231 = arith.constant 0 : index
    %308 = vector.load %arg9[%c2_228, %c0_229, %c0_230, %c0_231] : memref<3x10x8x256xf32, #tpu.memory_space<vmem>>, vector<1x8x8x256xf32>
    %309 = vector.extract_strided_slice %196 {offsets = [2, 0], sizes = [1, 256], strides = [1, 1]} : vector<9x256xf32> to vector<1x256xf32>
    %310 = vector.shape_cast %309 : vector<1x256xf32> to vector<256xf32>
    %311 = vector.shape_cast %310 : vector<256xf32> to vector<1x1x1x256xf32>
    %312 = vector.broadcast %311 : vector<1x1x1x256xf32> to vector<1x8x8x256xf32>
    %313 = arith.mulf %308, %312 : vector<1x8x8x256xf32>
    %314 = arith.addf %307, %313 : vector<1x8x8x256xf32>
    %c0_232 = arith.constant 0 : index
    %c1_233 = arith.constant 1 : index
    %c0_234 = arith.constant 0 : index
    %c0_235 = arith.constant 0 : index
    %315 = vector.load %arg9[%c0_232, %c1_233, %c0_234, %c0_235] : memref<3x10x8x256xf32, #tpu.memory_space<vmem>>, vector<1x8x8x256xf32>
    %316 = vector.extract_strided_slice %196 {offsets = [3, 0], sizes = [1, 256], strides = [1, 1]} : vector<9x256xf32> to vector<1x256xf32>
    %317 = vector.shape_cast %316 : vector<1x256xf32> to vector<256xf32>
    %318 = vector.shape_cast %317 : vector<256xf32> to vector<1x1x1x256xf32>
    %319 = vector.broadcast %318 : vector<1x1x1x256xf32> to vector<1x8x8x256xf32>
    %320 = arith.mulf %315, %319 : vector<1x8x8x256xf32>
    %321 = arith.addf %314, %320 : vector<1x8x8x256xf32>
    %c1_236 = arith.constant 1 : index
    %c1_237 = arith.constant 1 : index
    %c0_238 = arith.constant 0 : index
    %c0_239 = arith.constant 0 : index
    %322 = vector.load %arg9[%c1_236, %c1_237, %c0_238, %c0_239] : memref<3x10x8x256xf32, #tpu.memory_space<vmem>>, vector<1x8x8x256xf32>
    %323 = vector.extract_strided_slice %196 {offsets = [4, 0], sizes = [1, 256], strides = [1, 1]} : vector<9x256xf32> to vector<1x256xf32>
    %324 = vector.shape_cast %323 : vector<1x256xf32> to vector<256xf32>
    %325 = vector.shape_cast %324 : vector<256xf32> to vector<1x1x1x256xf32>
    %326 = vector.broadcast %325 : vector<1x1x1x256xf32> to vector<1x8x8x256xf32>
    %327 = arith.mulf %322, %326 : vector<1x8x8x256xf32>
    %328 = arith.addf %321, %327 : vector<1x8x8x256xf32>
    %c2_240 = arith.constant 2 : index
    %c1_241 = arith.constant 1 : index
    %c0_242 = arith.constant 0 : index
    %c0_243 = arith.constant 0 : index
    %329 = vector.load %arg9[%c2_240, %c1_241, %c0_242, %c0_243] : memref<3x10x8x256xf32, #tpu.memory_space<vmem>>, vector<1x8x8x256xf32>
    %330 = vector.extract_strided_slice %196 {offsets = [5, 0], sizes = [1, 256], strides = [1, 1]} : vector<9x256xf32> to vector<1x256xf32>
    %331 = vector.shape_cast %330 : vector<1x256xf32> to vector<256xf32>
    %332 = vector.shape_cast %331 : vector<256xf32> to vector<1x1x1x256xf32>
    %333 = vector.broadcast %332 : vector<1x1x1x256xf32> to vector<1x8x8x256xf32>
    %334 = arith.mulf %329, %333 : vector<1x8x8x256xf32>
    %335 = arith.addf %328, %334 : vector<1x8x8x256xf32>
    %c0_244 = arith.constant 0 : index
    %c2_245 = arith.constant 2 : index
    %c0_246 = arith.constant 0 : index
    %c0_247 = arith.constant 0 : index
    %336 = vector.load %arg9[%c0_244, %c2_245, %c0_246, %c0_247] : memref<3x10x8x256xf32, #tpu.memory_space<vmem>>, vector<1x8x8x256xf32>
    %337 = vector.extract_strided_slice %196 {offsets = [6, 0], sizes = [1, 256], strides = [1, 1]} : vector<9x256xf32> to vector<1x256xf32>
    %338 = vector.shape_cast %337 : vector<1x256xf32> to vector<256xf32>
    %339 = vector.shape_cast %338 : vector<256xf32> to vector<1x1x1x256xf32>
    %340 = vector.broadcast %339 : vector<1x1x1x256xf32> to vector<1x8x8x256xf32>
    %341 = arith.mulf %336, %340 : vector<1x8x8x256xf32>
    %342 = arith.addf %335, %341 : vector<1x8x8x256xf32>
    %c1_248 = arith.constant 1 : index
    %c2_249 = arith.constant 2 : index
    %c0_250 = arith.constant 0 : index
    %c0_251 = arith.constant 0 : index
    %343 = vector.load %arg9[%c1_248, %c2_249, %c0_250, %c0_251] : memref<3x10x8x256xf32, #tpu.memory_space<vmem>>, vector<1x8x8x256xf32>
    %344 = vector.extract_strided_slice %196 {offsets = [7, 0], sizes = [1, 256], strides = [1, 1]} : vector<9x256xf32> to vector<1x256xf32>
    %345 = vector.shape_cast %344 : vector<1x256xf32> to vector<256xf32>
    %346 = vector.shape_cast %345 : vector<256xf32> to vector<1x1x1x256xf32>
    %347 = vector.broadcast %346 : vector<1x1x1x256xf32> to vector<1x8x8x256xf32>
    %348 = arith.mulf %343, %347 : vector<1x8x8x256xf32>
    %349 = arith.addf %342, %348 : vector<1x8x8x256xf32>
    %c2_252 = arith.constant 2 : index
    %c2_253 = arith.constant 2 : index
    %c0_254 = arith.constant 0 : index
    %c0_255 = arith.constant 0 : index
    %350 = vector.load %arg9[%c2_252, %c2_253, %c0_254, %c0_255] : memref<3x10x8x256xf32, #tpu.memory_space<vmem>>, vector<1x8x8x256xf32>
    %351 = vector.extract_strided_slice %196 {offsets = [8, 0], sizes = [1, 256], strides = [1, 1]} : vector<9x256xf32> to vector<1x256xf32>
    %352 = vector.shape_cast %351 : vector<1x256xf32> to vector<256xf32>
    %353 = vector.shape_cast %352 : vector<256xf32> to vector<1x1x1x256xf32>
    %354 = vector.broadcast %353 : vector<1x1x1x256xf32> to vector<1x8x8x256xf32>
    %355 = arith.mulf %350, %354 : vector<1x8x8x256xf32>
    %356 = arith.addf %349, %355 : vector<1x8x8x256xf32>
    %357 = vector.broadcast %199 : vector<1x1x1x256xf32> to vector<1x8x8x256xf32>
    %358 = arith.addf %356, %357 : vector<1x8x8x256xf32>
    %359 = vector.shape_cast %358 : vector<1x8x8x256xf32> to vector<64x256xf32>
    %360 = arith.truncf %359 : vector<64x256xf32> to vector<64x256xbf16>
    %c64_256 = arith.constant 64 : index
    %c0_257 = arith.constant 0 : index
    %361 = vector.load %arg10[%c64_256, %c0_257] : memref<128x256xbf16, #tpu.memory_space<vmem>>, vector<64x256xbf16>
    tpu.vector_store %arg10[%c64_256, %c0_257], %360 {strides = array<i32>} : memref<128x256xbf16, #tpu.memory_space<vmem>>, vector<64x256xbf16>,
    %c0_258 = arith.constant 0 : index
    %c0_259 = arith.constant 0 : index
    %362 = vector.load %arg10[%c0_258, %c0_259] : memref<128x256xbf16, #tpu.memory_space<vmem>>, vector<128x256xbf16>
    %c1_260 = arith.constant 1 : index
    %c0_261 = arith.constant 0 : index
    %c0_262 = arith.constant 0 : index
    %363 = vector.load %arg4[%c1_260, %c0_261, %c0_262] : memref<3x256x256xbf16, #tpu.memory_space<vmem>>, vector<1x256x256xbf16>
    %364 = vector.shape_cast %363 : vector<1x256x256xbf16> to vector<256x256xbf16>
    %cst_263 = arith.constant dense<0.000000e+00> : vector<128x256xf32>
    %365 = tpu.matmul %362, %364, %cst_263 {dimension_numbers = #tpu.dot_dimension_numbers<[1], [0], [0], [1], [0, 0, 1, 1], [], []>} : vector<128x256xbf16>, vector<256x256xbf16>, vector<128x256xf32> -> vector<128x256xf32>
    %c1_264 = arith.constant 1 : index
    %c0_265 = arith.constant 0 : index
    %366 = vector.load %arg5[%c1_264, %c0_265] : memref<3x256xf32, #tpu.memory_space<vmem>>, vector<1x256xf32>
    %367 = vector.shape_cast %366 : vector<1x256xf32> to vector<256xf32>
    %368 = vector.shape_cast %367 : vector<256xf32> to vector<1x256xf32>
    %369 = vector.broadcast %368 : vector<1x256xf32> to vector<128x256xf32>
    %370 = arith.mulf %365, %369 : vector<128x256xf32>
    %c1_266 = arith.constant 1 : index
    %c0_267 = arith.constant 0 : index
    %371 = vector.load %arg6[%c1_266, %c0_267] : memref<3x256xf32, #tpu.memory_space<vmem>>, vector<1x256xf32>
    %372 = vector.shape_cast %371 : vector<1x256xf32> to vector<256xf32>
    %373 = vector.shape_cast %372 : vector<256xf32> to vector<1x256xf32>
    %374 = vector.broadcast %373 : vector<1x256xf32> to vector<128x256xf32>
    %375 = arith.addf %370, %374 : vector<128x256xf32>
    %376 = vector.shape_cast %375 : vector<128x256xf32> to vector<2x8x8x256xf32>
    %c0_268 = arith.constant 0 : index
    %c0_269 = arith.constant 0 : index
    %c0_270 = arith.constant 0 : index
    %c0_271 = arith.constant 0 : index
    %377 = vector.load %arg8[%c0_268, %c0_269, %c0_270, %c0_271] : memref<2x8x8x256xf32, #tpu.memory_space<vmem>>, vector<2x8x8x256xf32>
    tpu.vector_store %arg8[%c0_268, %c0_269, %c0_270, %c0_271], %376 {strides = array<i32>} : memref<2x8x8x256xf32, #tpu.memory_space<vmem>>, vector<2x8x8x256xf32>,
    %c2_272 = arith.constant 2 : index
    %c0_273 = arith.constant 0 : index
    %c0_274 = arith.constant 0 : index
    %378 = vector.load %arg2[%c2_272, %c0_273, %c0_274] : memref<3x9x256xf32, #tpu.memory_space<vmem>>, vector<1x9x256xf32>
    %379 = vector.shape_cast %378 : vector<1x9x256xf32> to vector<9x256xf32>
    %c2_275 = arith.constant 2 : index
    %c0_276 = arith.constant 0 : index
    %380 = vector.load %arg3[%c2_275, %c0_276] : memref<3x256xf32, #tpu.memory_space<vmem>>, vector<1x256xf32>
    %381 = vector.shape_cast %380 : vector<1x256xf32> to vector<256xf32>
    %382 = vector.shape_cast %381 : vector<256xf32> to vector<1x1x1x256xf32>
    %c0_277 = arith.constant 0 : index
    %c0_278 = arith.constant 0 : index
    %c0_279 = arith.constant 0 : index
    %c0_280 = arith.constant 0 : index
    %383 = vector.load %arg8[%c0_277, %c0_278, %c0_279, %c0_280] : memref<2x8x8x256xf32, #tpu.memory_space<vmem>>, vector<1x8x8x256xf32>
    %cst_281 = arith.constant 0.000000e+00 : f32
    %384 = vector.broadcast %cst_281 : f32 to vector<1x8x8x256xf32>
    %385 = arith.maximumf %383, %384 : vector<1x8x8x256xf32>
    %c1_282 = arith.constant 1 : index
    %c1_283 = arith.constant 1 : index
    %c0_284 = arith.constant 0 : index
    %c0_285 = arith.constant 0 : index
    %386 = vector.load %arg9[%c1_282, %c1_283, %c0_284, %c0_285] : memref<3x10x8x256xf32, #tpu.memory_space<vmem>>, vector<1x8x8x256xf32>
    tpu.vector_store %arg9[%c1_282, %c1_283, %c0_284, %c0_285], %385 {strides = array<i32>} : memref<3x10x8x256xf32, #tpu.memory_space<vmem>>, vector<1x8x8x256xf32>,
    %c1_i32_286 = arith.constant 1 : i32
    %387 = tpu.dynamic_rotate %385 by %c1_i32_286 dim 2 : vector<1x8x8x256xf32>, i32 -> vector<1x8x8x256xf32>
    %388 = vector.broadcast %4 : vector<1x1x8x256xf32> to vector<1x8x8x256xf32>
    %389 = arith.mulf %387, %388 : vector<1x8x8x256xf32>
    %c0_287 = arith.constant 0 : index
    %c1_288 = arith.constant 1 : index
    %c0_289 = arith.constant 0 : index
    %c0_290 = arith.constant 0 : index
    %390 = vector.load %arg9[%c0_287, %c1_288, %c0_289, %c0_290] : memref<3x10x8x256xf32, #tpu.memory_space<vmem>>, vector<1x8x8x256xf32>
    tpu.vector_store %arg9[%c0_287, %c1_288, %c0_289, %c0_290], %389 {strides = array<i32>} : memref<3x10x8x256xf32, #tpu.memory_space<vmem>>, vector<1x8x8x256xf32>,
    %c7_i32_291 = arith.constant 7 : i32
    %391 = tpu.dynamic_rotate %385 by %c7_i32_291 dim 2 : vector<1x8x8x256xf32>, i32 -> vector<1x8x8x256xf32>
    %392 = vector.broadcast %8 : vector<1x1x8x256xf32> to vector<1x8x8x256xf32>
    %393 = arith.mulf %391, %392 : vector<1x8x8x256xf32>
    %c2_292 = arith.constant 2 : index
    %c1_293 = arith.constant 1 : index
    %c0_294 = arith.constant 0 : index
    %c0_295 = arith.constant 0 : index
    %394 = vector.load %arg9[%c2_292, %c1_293, %c0_294, %c0_295] : memref<3x10x8x256xf32, #tpu.memory_space<vmem>>, vector<1x8x8x256xf32>
    tpu.vector_store %arg9[%c2_292, %c1_293, %c0_294, %c0_295], %393 {strides = array<i32>} : memref<3x10x8x256xf32, #tpu.memory_space<vmem>>, vector<1x8x8x256xf32>,
    %cst_296 = arith.constant 0.000000e+00 : f32
    %395 = vector.broadcast %cst_296 : f32 to vector<1x8x8x256xf32>
    %c0_297 = arith.constant 0 : index
    %c0_298 = arith.constant 0 : index
    %c0_299 = arith.constant 0 : index
    %c0_300 = arith.constant 0 : index
    %396 = vector.load %arg9[%c0_297, %c0_298, %c0_299, %c0_300] : memref<3x10x8x256xf32, #tpu.memory_space<vmem>>, vector<1x8x8x256xf32>
    %397 = vector.extract_strided_slice %379 {offsets = [0, 0], sizes = [1, 256], strides = [1, 1]} : vector<9x256xf32> to vector<1x256xf32>
    %398 = vector.shape_cast %397 : vector<1x256xf32> to vector<256xf32>
    %399 = vector.shape_cast %398 : vector<256xf32> to vector<1x1x1x256xf32>
    %400 = vector.broadcast %399 : vector<1x1x1x256xf32> to vector<1x8x8x256xf32>
    %401 = arith.mulf %396, %400 : vector<1x8x8x256xf32>
    %402 = arith.addf %395, %401 : vector<1x8x8x256xf32>
    %c1_301 = arith.constant 1 : index
    %c0_302 = arith.constant 0 : index
    %c0_303 = arith.constant 0 : index
    %c0_304 = arith.constant 0 : index
    %403 = vector.load %arg9[%c1_301, %c0_302, %c0_303, %c0_304] : memref<3x10x8x256xf32, #tpu.memory_space<vmem>>, vector<1x8x8x256xf32>
    %404 = vector.extract_strided_slice %379 {offsets = [1, 0], sizes = [1, 256], strides = [1, 1]} : vector<9x256xf32> to vector<1x256xf32>
    %405 = vector.shape_cast %404 : vector<1x256xf32> to vector<256xf32>
    %406 = vector.shape_cast %405 : vector<256xf32> to vector<1x1x1x256xf32>
    %407 = vector.broadcast %406 : vector<1x1x1x256xf32> to vector<1x8x8x256xf32>
    %408 = arith.mulf %403, %407 : vector<1x8x8x256xf32>
    %409 = arith.addf %402, %408 : vector<1x8x8x256xf32>
    %c2_305 = arith.constant 2 : index
    %c0_306 = arith.constant 0 : index
    %c0_307 = arith.constant 0 : index
    %c0_308 = arith.constant 0 : index
    %410 = vector.load %arg9[%c2_305, %c0_306, %c0_307, %c0_308] : memref<3x10x8x256xf32, #tpu.memory_space<vmem>>, vector<1x8x8x256xf32>
    %411 = vector.extract_strided_slice %379 {offsets = [2, 0], sizes = [1, 256], strides = [1, 1]} : vector<9x256xf32> to vector<1x256xf32>
    %412 = vector.shape_cast %411 : vector<1x256xf32> to vector<256xf32>
    %413 = vector.shape_cast %412 : vector<256xf32> to vector<1x1x1x256xf32>
    %414 = vector.broadcast %413 : vector<1x1x1x256xf32> to vector<1x8x8x256xf32>
    %415 = arith.mulf %410, %414 : vector<1x8x8x256xf32>
    %416 = arith.addf %409, %415 : vector<1x8x8x256xf32>
    %c0_309 = arith.constant 0 : index
    %c1_310 = arith.constant 1 : index
    %c0_311 = arith.constant 0 : index
    %c0_312 = arith.constant 0 : index
    %417 = vector.load %arg9[%c0_309, %c1_310, %c0_311, %c0_312] : memref<3x10x8x256xf32, #tpu.memory_space<vmem>>, vector<1x8x8x256xf32>
    %418 = vector.extract_strided_slice %379 {offsets = [3, 0], sizes = [1, 256], strides = [1, 1]} : vector<9x256xf32> to vector<1x256xf32>
    %419 = vector.shape_cast %418 : vector<1x256xf32> to vector<256xf32>
    %420 = vector.shape_cast %419 : vector<256xf32> to vector<1x1x1x256xf32>
    %421 = vector.broadcast %420 : vector<1x1x1x256xf32> to vector<1x8x8x256xf32>
    %422 = arith.mulf %417, %421 : vector<1x8x8x256xf32>
    %423 = arith.addf %416, %422 : vector<1x8x8x256xf32>
    %c1_313 = arith.constant 1 : index
    %c1_314 = arith.constant 1 : index
    %c0_315 = arith.constant 0 : index
    %c0_316 = arith.constant 0 : index
    %424 = vector.load %arg9[%c1_313, %c1_314, %c0_315, %c0_316] : memref<3x10x8x256xf32, #tpu.memory_space<vmem>>, vector<1x8x8x256xf32>
    %425 = vector.extract_strided_slice %379 {offsets = [4, 0], sizes = [1, 256], strides = [1, 1]} : vector<9x256xf32> to vector<1x256xf32>
    %426 = vector.shape_cast %425 : vector<1x256xf32> to vector<256xf32>
    %427 = vector.shape_cast %426 : vector<256xf32> to vector<1x1x1x256xf32>
    %428 = vector.broadcast %427 : vector<1x1x1x256xf32> to vector<1x8x8x256xf32>
    %429 = arith.mulf %424, %428 : vector<1x8x8x256xf32>
    %430 = arith.addf %423, %429 : vector<1x8x8x256xf32>
    %c2_317 = arith.constant 2 : index
    %c1_318 = arith.constant 1 : index
    %c0_319 = arith.constant 0 : index
    %c0_320 = arith.constant 0 : index
    %431 = vector.load %arg9[%c2_317, %c1_318, %c0_319, %c0_320] : memref<3x10x8x256xf32, #tpu.memory_space<vmem>>, vector<1x8x8x256xf32>
    %432 = vector.extract_strided_slice %379 {offsets = [5, 0], sizes = [1, 256], strides = [1, 1]} : vector<9x256xf32> to vector<1x256xf32>
    %433 = vector.shape_cast %432 : vector<1x256xf32> to vector<256xf32>
    %434 = vector.shape_cast %433 : vector<256xf32> to vector<1x1x1x256xf32>
    %435 = vector.broadcast %434 : vector<1x1x1x256xf32> to vector<1x8x8x256xf32>
    %436 = arith.mulf %431, %435 : vector<1x8x8x256xf32>
    %437 = arith.addf %430, %436 : vector<1x8x8x256xf32>
    %c0_321 = arith.constant 0 : index
    %c2_322 = arith.constant 2 : index
    %c0_323 = arith.constant 0 : index
    %c0_324 = arith.constant 0 : index
    %438 = vector.load %arg9[%c0_321, %c2_322, %c0_323, %c0_324] : memref<3x10x8x256xf32, #tpu.memory_space<vmem>>, vector<1x8x8x256xf32>
    %439 = vector.extract_strided_slice %379 {offsets = [6, 0], sizes = [1, 256], strides = [1, 1]} : vector<9x256xf32> to vector<1x256xf32>
    %440 = vector.shape_cast %439 : vector<1x256xf32> to vector<256xf32>
    %441 = vector.shape_cast %440 : vector<256xf32> to vector<1x1x1x256xf32>
    %442 = vector.broadcast %441 : vector<1x1x1x256xf32> to vector<1x8x8x256xf32>
    %443 = arith.mulf %438, %442 : vector<1x8x8x256xf32>
    %444 = arith.addf %437, %443 : vector<1x8x8x256xf32>
    %c1_325 = arith.constant 1 : index
    %c2_326 = arith.constant 2 : index
    %c0_327 = arith.constant 0 : index
    %c0_328 = arith.constant 0 : index
    %445 = vector.load %arg9[%c1_325, %c2_326, %c0_327, %c0_328] : memref<3x10x8x256xf32, #tpu.memory_space<vmem>>, vector<1x8x8x256xf32>
    %446 = vector.extract_strided_slice %379 {offsets = [7, 0], sizes = [1, 256], strides = [1, 1]} : vector<9x256xf32> to vector<1x256xf32>
    %447 = vector.shape_cast %446 : vector<1x256xf32> to vector<256xf32>
    %448 = vector.shape_cast %447 : vector<256xf32> to vector<1x1x1x256xf32>
    %449 = vector.broadcast %448 : vector<1x1x1x256xf32> to vector<1x8x8x256xf32>
    %450 = arith.mulf %445, %449 : vector<1x8x8x256xf32>
    %451 = arith.addf %444, %450 : vector<1x8x8x256xf32>
    %c2_329 = arith.constant 2 : index
    %c2_330 = arith.constant 2 : index
    %c0_331 = arith.constant 0 : index
    %c0_332 = arith.constant 0 : index
    %452 = vector.load %arg9[%c2_329, %c2_330, %c0_331, %c0_332] : memref<3x10x8x256xf32, #tpu.memory_space<vmem>>, vector<1x8x8x256xf32>
    %453 = vector.extract_strided_slice %379 {offsets = [8, 0], sizes = [1, 256], strides = [1, 1]} : vector<9x256xf32> to vector<1x256xf32>
    %454 = vector.shape_cast %453 : vector<1x256xf32> to vector<256xf32>
    %455 = vector.shape_cast %454 : vector<256xf32> to vector<1x1x1x256xf32>
    %456 = vector.broadcast %455 : vector<1x1x1x256xf32> to vector<1x8x8x256xf32>
    %457 = arith.mulf %452, %456 : vector<1x8x8x256xf32>
    %458 = arith.addf %451, %457 : vector<1x8x8x256xf32>
    %459 = vector.broadcast %382 : vector<1x1x1x256xf32> to vector<1x8x8x256xf32>
    %460 = arith.addf %458, %459 : vector<1x8x8x256xf32>
    %461 = vector.shape_cast %460 : vector<1x8x8x256xf32> to vector<64x256xf32>
    %462 = arith.truncf %461 : vector<64x256xf32> to vector<64x256xbf16>
    %c0_333 = arith.constant 0 : index
    %c0_334 = arith.constant 0 : index
    %463 = vector.load %arg10[%c0_333, %c0_334] : memref<128x256xbf16, #tpu.memory_space<vmem>>, vector<64x256xbf16>
    tpu.vector_store %arg10[%c0_333, %c0_334], %462 {strides = array<i32>} : memref<128x256xbf16, #tpu.memory_space<vmem>>, vector<64x256xbf16>,
    %c1_335 = arith.constant 1 : index
    %c0_336 = arith.constant 0 : index
    %c0_337 = arith.constant 0 : index
    %c0_338 = arith.constant 0 : index
    %464 = vector.load %arg8[%c1_335, %c0_336, %c0_337, %c0_338] : memref<2x8x8x256xf32, #tpu.memory_space<vmem>>, vector<1x8x8x256xf32>
    %cst_339 = arith.constant 0.000000e+00 : f32
    %465 = vector.broadcast %cst_339 : f32 to vector<1x8x8x256xf32>
    %466 = arith.maximumf %464, %465 : vector<1x8x8x256xf32>
    %c1_340 = arith.constant 1 : index
    %c1_341 = arith.constant 1 : index
    %c0_342 = arith.constant 0 : index
    %c0_343 = arith.constant 0 : index
    %467 = vector.load %arg9[%c1_340, %c1_341, %c0_342, %c0_343] : memref<3x10x8x256xf32, #tpu.memory_space<vmem>>, vector<1x8x8x256xf32>
    tpu.vector_store %arg9[%c1_340, %c1_341, %c0_342, %c0_343], %466 {strides = array<i32>} : memref<3x10x8x256xf32, #tpu.memory_space<vmem>>, vector<1x8x8x256xf32>,
    %c1_i32_344 = arith.constant 1 : i32
    %468 = tpu.dynamic_rotate %466 by %c1_i32_344 dim 2 : vector<1x8x8x256xf32>, i32 -> vector<1x8x8x256xf32>
    %469 = vector.broadcast %4 : vector<1x1x8x256xf32> to vector<1x8x8x256xf32>
    %470 = arith.mulf %468, %469 : vector<1x8x8x256xf32>
    %c0_345 = arith.constant 0 : index
    %c1_346 = arith.constant 1 : index
    %c0_347 = arith.constant 0 : index
    %c0_348 = arith.constant 0 : index
    %471 = vector.load %arg9[%c0_345, %c1_346, %c0_347, %c0_348] : memref<3x10x8x256xf32, #tpu.memory_space<vmem>>, vector<1x8x8x256xf32>
    tpu.vector_store %arg9[%c0_345, %c1_346, %c0_347, %c0_348], %470 {strides = array<i32>} : memref<3x10x8x256xf32, #tpu.memory_space<vmem>>, vector<1x8x8x256xf32>,
    %c7_i32_349 = arith.constant 7 : i32
    %472 = tpu.dynamic_rotate %466 by %c7_i32_349 dim 2 : vector<1x8x8x256xf32>, i32 -> vector<1x8x8x256xf32>
    %473 = vector.broadcast %8 : vector<1x1x8x256xf32> to vector<1x8x8x256xf32>
    %474 = arith.mulf %472, %473 : vector<1x8x8x256xf32>
    %c2_350 = arith.constant 2 : index
    %c1_351 = arith.constant 1 : index
    %c0_352 = arith.constant 0 : index
    %c0_353 = arith.constant 0 : index
    %475 = vector.load %arg9[%c2_350, %c1_351, %c0_352, %c0_353] : memref<3x10x8x256xf32, #tpu.memory_space<vmem>>, vector<1x8x8x256xf32>
    tpu.vector_store %arg9[%c2_350, %c1_351, %c0_352, %c0_353], %474 {strides = array<i32>} : memref<3x10x8x256xf32, #tpu.memory_space<vmem>>, vector<1x8x8x256xf32>,
    %cst_354 = arith.constant 0.000000e+00 : f32
    %476 = vector.broadcast %cst_354 : f32 to vector<1x8x8x256xf32>
    %c0_355 = arith.constant 0 : index
    %c0_356 = arith.constant 0 : index
    %c0_357 = arith.constant 0 : index
    %c0_358 = arith.constant 0 : index
    %477 = vector.load %arg9[%c0_355, %c0_356, %c0_357, %c0_358] : memref<3x10x8x256xf32, #tpu.memory_space<vmem>>, vector<1x8x8x256xf32>
    %478 = vector.extract_strided_slice %379 {offsets = [0, 0], sizes = [1, 256], strides = [1, 1]} : vector<9x256xf32> to vector<1x256xf32>
    %479 = vector.shape_cast %478 : vector<1x256xf32> to vector<256xf32>
    %480 = vector.shape_cast %479 : vector<256xf32> to vector<1x1x1x256xf32>
    %481 = vector.broadcast %480 : vector<1x1x1x256xf32> to vector<1x8x8x256xf32>
    %482 = arith.mulf %477, %481 : vector<1x8x8x256xf32>
    %483 = arith.addf %476, %482 : vector<1x8x8x256xf32>
    %c1_359 = arith.constant 1 : index
    %c0_360 = arith.constant 0 : index
    %c0_361 = arith.constant 0 : index
    %c0_362 = arith.constant 0 : index
    %484 = vector.load %arg9[%c1_359, %c0_360, %c0_361, %c0_362] : memref<3x10x8x256xf32, #tpu.memory_space<vmem>>, vector<1x8x8x256xf32>
    %485 = vector.extract_strided_slice %379 {offsets = [1, 0], sizes = [1, 256], strides = [1, 1]} : vector<9x256xf32> to vector<1x256xf32>
    %486 = vector.shape_cast %485 : vector<1x256xf32> to vector<256xf32>
    %487 = vector.shape_cast %486 : vector<256xf32> to vector<1x1x1x256xf32>
    %488 = vector.broadcast %487 : vector<1x1x1x256xf32> to vector<1x8x8x256xf32>
    %489 = arith.mulf %484, %488 : vector<1x8x8x256xf32>
    %490 = arith.addf %483, %489 : vector<1x8x8x256xf32>
    %c2_363 = arith.constant 2 : index
    %c0_364 = arith.constant 0 : index
    %c0_365 = arith.constant 0 : index
    %c0_366 = arith.constant 0 : index
    %491 = vector.load %arg9[%c2_363, %c0_364, %c0_365, %c0_366] : memref<3x10x8x256xf32, #tpu.memory_space<vmem>>, vector<1x8x8x256xf32>
    %492 = vector.extract_strided_slice %379 {offsets = [2, 0], sizes = [1, 256], strides = [1, 1]} : vector<9x256xf32> to vector<1x256xf32>
    %493 = vector.shape_cast %492 : vector<1x256xf32> to vector<256xf32>
    %494 = vector.shape_cast %493 : vector<256xf32> to vector<1x1x1x256xf32>
    %495 = vector.broadcast %494 : vector<1x1x1x256xf32> to vector<1x8x8x256xf32>
    %496 = arith.mulf %491, %495 : vector<1x8x8x256xf32>
    %497 = arith.addf %490, %496 : vector<1x8x8x256xf32>
    %c0_367 = arith.constant 0 : index
    %c1_368 = arith.constant 1 : index
    %c0_369 = arith.constant 0 : index
    %c0_370 = arith.constant 0 : index
    %498 = vector.load %arg9[%c0_367, %c1_368, %c0_369, %c0_370] : memref<3x10x8x256xf32, #tpu.memory_space<vmem>>, vector<1x8x8x256xf32>
    %499 = vector.extract_strided_slice %379 {offsets = [3, 0], sizes = [1, 256], strides = [1, 1]} : vector<9x256xf32> to vector<1x256xf32>
    %500 = vector.shape_cast %499 : vector<1x256xf32> to vector<256xf32>
    %501 = vector.shape_cast %500 : vector<256xf32> to vector<1x1x1x256xf32>
    %502 = vector.broadcast %501 : vector<1x1x1x256xf32> to vector<1x8x8x256xf32>
    %503 = arith.mulf %498, %502 : vector<1x8x8x256xf32>
    %504 = arith.addf %497, %503 : vector<1x8x8x256xf32>
    %c1_371 = arith.constant 1 : index
    %c1_372 = arith.constant 1 : index
    %c0_373 = arith.constant 0 : index
    %c0_374 = arith.constant 0 : index
    %505 = vector.load %arg9[%c1_371, %c1_372, %c0_373, %c0_374] : memref<3x10x8x256xf32, #tpu.memory_space<vmem>>, vector<1x8x8x256xf32>
    %506 = vector.extract_strided_slice %379 {offsets = [4, 0], sizes = [1, 256], strides = [1, 1]} : vector<9x256xf32> to vector<1x256xf32>
    %507 = vector.shape_cast %506 : vector<1x256xf32> to vector<256xf32>
    %508 = vector.shape_cast %507 : vector<256xf32> to vector<1x1x1x256xf32>
    %509 = vector.broadcast %508 : vector<1x1x1x256xf32> to vector<1x8x8x256xf32>
    %510 = arith.mulf %505, %509 : vector<1x8x8x256xf32>
    %511 = arith.addf %504, %510 : vector<1x8x8x256xf32>
    %c2_375 = arith.constant 2 : index
    %c1_376 = arith.constant 1 : index
    %c0_377 = arith.constant 0 : index
    %c0_378 = arith.constant 0 : index
    %512 = vector.load %arg9[%c2_375, %c1_376, %c0_377, %c0_378] : memref<3x10x8x256xf32, #tpu.memory_space<vmem>>, vector<1x8x8x256xf32>
    %513 = vector.extract_strided_slice %379 {offsets = [5, 0], sizes = [1, 256], strides = [1, 1]} : vector<9x256xf32> to vector<1x256xf32>
    %514 = vector.shape_cast %513 : vector<1x256xf32> to vector<256xf32>
    %515 = vector.shape_cast %514 : vector<256xf32> to vector<1x1x1x256xf32>
    %516 = vector.broadcast %515 : vector<1x1x1x256xf32> to vector<1x8x8x256xf32>
    %517 = arith.mulf %512, %516 : vector<1x8x8x256xf32>
    %518 = arith.addf %511, %517 : vector<1x8x8x256xf32>
    %c0_379 = arith.constant 0 : index
    %c2_380 = arith.constant 2 : index
    %c0_381 = arith.constant 0 : index
    %c0_382 = arith.constant 0 : index
    %519 = vector.load %arg9[%c0_379, %c2_380, %c0_381, %c0_382] : memref<3x10x8x256xf32, #tpu.memory_space<vmem>>, vector<1x8x8x256xf32>
    %520 = vector.extract_strided_slice %379 {offsets = [6, 0], sizes = [1, 256], strides = [1, 1]} : vector<9x256xf32> to vector<1x256xf32>
    %521 = vector.shape_cast %520 : vector<1x256xf32> to vector<256xf32>
    %522 = vector.shape_cast %521 : vector<256xf32> to vector<1x1x1x256xf32>
    %523 = vector.broadcast %522 : vector<1x1x1x256xf32> to vector<1x8x8x256xf32>
    %524 = arith.mulf %519, %523 : vector<1x8x8x256xf32>
    %525 = arith.addf %518, %524 : vector<1x8x8x256xf32>
    %c1_383 = arith.constant 1 : index
    %c2_384 = arith.constant 2 : index
    %c0_385 = arith.constant 0 : index
    %c0_386 = arith.constant 0 : index
    %526 = vector.load %arg9[%c1_383, %c2_384, %c0_385, %c0_386] : memref<3x10x8x256xf32, #tpu.memory_space<vmem>>, vector<1x8x8x256xf32>
    %527 = vector.extract_strided_slice %379 {offsets = [7, 0], sizes = [1, 256], strides = [1, 1]} : vector<9x256xf32> to vector<1x256xf32>
    %528 = vector.shape_cast %527 : vector<1x256xf32> to vector<256xf32>
    %529 = vector.shape_cast %528 : vector<256xf32> to vector<1x1x1x256xf32>
    %530 = vector.broadcast %529 : vector<1x1x1x256xf32> to vector<1x8x8x256xf32>
    %531 = arith.mulf %526, %530 : vector<1x8x8x256xf32>
    %532 = arith.addf %525, %531 : vector<1x8x8x256xf32>
    %c2_387 = arith.constant 2 : index
    %c2_388 = arith.constant 2 : index
    %c0_389 = arith.constant 0 : index
    %c0_390 = arith.constant 0 : index
    %533 = vector.load %arg9[%c2_387, %c2_388, %c0_389, %c0_390] : memref<3x10x8x256xf32, #tpu.memory_space<vmem>>, vector<1x8x8x256xf32>
    %534 = vector.extract_strided_slice %379 {offsets = [8, 0], sizes = [1, 256], strides = [1, 1]} : vector<9x256xf32> to vector<1x256xf32>
    %535 = vector.shape_cast %534 : vector<1x256xf32> to vector<256xf32>
    %536 = vector.shape_cast %535 : vector<256xf32> to vector<1x1x1x256xf32>
    %537 = vector.broadcast %536 : vector<1x1x1x256xf32> to vector<1x8x8x256xf32>
    %538 = arith.mulf %533, %537 : vector<1x8x8x256xf32>
    %539 = arith.addf %532, %538 : vector<1x8x8x256xf32>
    %540 = vector.broadcast %382 : vector<1x1x1x256xf32> to vector<1x8x8x256xf32>
    %541 = arith.addf %539, %540 : vector<1x8x8x256xf32>
    %542 = vector.shape_cast %541 : vector<1x8x8x256xf32> to vector<64x256xf32>
    %543 = arith.truncf %542 : vector<64x256xf32> to vector<64x256xbf16>
    %c64_391 = arith.constant 64 : index
    %c0_392 = arith.constant 0 : index
    %544 = vector.load %arg10[%c64_391, %c0_392] : memref<128x256xbf16, #tpu.memory_space<vmem>>, vector<64x256xbf16>
    tpu.vector_store %arg10[%c64_391, %c0_392], %543 {strides = array<i32>} : memref<128x256xbf16, #tpu.memory_space<vmem>>, vector<64x256xbf16>,
    %c0_393 = arith.constant 0 : index
    %c0_394 = arith.constant 0 : index
    %545 = vector.load %arg10[%c0_393, %c0_394] : memref<128x256xbf16, #tpu.memory_space<vmem>>, vector<128x256xbf16>
    %c2_395 = arith.constant 2 : index
    %c0_396 = arith.constant 0 : index
    %c0_397 = arith.constant 0 : index
    %546 = vector.load %arg4[%c2_395, %c0_396, %c0_397] : memref<3x256x256xbf16, #tpu.memory_space<vmem>>, vector<1x256x256xbf16>
    %547 = vector.shape_cast %546 : vector<1x256x256xbf16> to vector<256x256xbf16>
    %cst_398 = arith.constant dense<0.000000e+00> : vector<128x256xf32>
    %548 = tpu.matmul %545, %547, %cst_398 {dimension_numbers = #tpu.dot_dimension_numbers<[1], [0], [0], [1], [0, 0, 1, 1], [], []>} : vector<128x256xbf16>, vector<256x256xbf16>, vector<128x256xf32> -> vector<128x256xf32>
    %c2_399 = arith.constant 2 : index
    %c0_400 = arith.constant 0 : index
    %549 = vector.load %arg5[%c2_399, %c0_400] : memref<3x256xf32, #tpu.memory_space<vmem>>, vector<1x256xf32>
    %550 = vector.shape_cast %549 : vector<1x256xf32> to vector<256xf32>
    %551 = vector.shape_cast %550 : vector<256xf32> to vector<1x256xf32>
    %552 = vector.broadcast %551 : vector<1x256xf32> to vector<128x256xf32>
    %553 = arith.mulf %548, %552 : vector<128x256xf32>
    %c2_401 = arith.constant 2 : index
    %c0_402 = arith.constant 0 : index
    %554 = vector.load %arg6[%c2_401, %c0_402] : memref<3x256xf32, #tpu.memory_space<vmem>>, vector<1x256xf32>
    %555 = vector.shape_cast %554 : vector<1x256xf32> to vector<256xf32>
    %556 = vector.shape_cast %555 : vector<256xf32> to vector<1x256xf32>
    %557 = vector.broadcast %556 : vector<1x256xf32> to vector<128x256xf32>
    %558 = arith.addf %553, %557 : vector<128x256xf32>
    %559 = vector.shape_cast %558 : vector<128x256xf32> to vector<2x8x8x256xf32>
    %c0_403 = arith.constant 0 : index
    %c0_404 = arith.constant 0 : index
    %c0_405 = arith.constant 0 : index
    %c0_406 = arith.constant 0 : index
    %560 = vector.load %arg8[%c0_403, %c0_404, %c0_405, %c0_406] : memref<2x8x8x256xf32, #tpu.memory_space<vmem>>, vector<2x8x8x256xf32>
    tpu.vector_store %arg8[%c0_403, %c0_404, %c0_405, %c0_406], %559 {strides = array<i32>} : memref<2x8x8x256xf32, #tpu.memory_space<vmem>>, vector<2x8x8x256xf32>,
    %c0_407 = arith.constant 0 : index
    %c0_408 = arith.constant 0 : index
    %c0_409 = arith.constant 0 : index
    %c0_410 = arith.constant 0 : index
    %561 = vector.load %arg1[%c0_407, %c0_408, %c0_409, %c0_410] : memref<2x8x8x256xf32, #tpu.memory_space<vmem>>, vector<2x8x8x256xf32>
    %c0_411 = arith.constant 0 : index
    %c0_412 = arith.constant 0 : index
    %c0_413 = arith.constant 0 : index
    %c0_414 = arith.constant 0 : index
    %562 = vector.load %arg8[%c0_411, %c0_412, %c0_413, %c0_414] : memref<2x8x8x256xf32, #tpu.memory_space<vmem>>, vector<2x8x8x256xf32>
    %563 = arith.addf %561, %562 : vector<2x8x8x256xf32>
    %c0_415 = arith.constant 0 : index
    %c0_416 = arith.constant 0 : index
    %c0_417 = arith.constant 0 : index
    %c0_418 = arith.constant 0 : index
    %564 = vector.load %arg7[%c0_415, %c0_416, %c0_417, %c0_418] : memref<2x8x8x256xf32, #tpu.memory_space<vmem>>, vector<2x8x8x256xf32>
    tpu.vector_store %arg7[%c0_415, %c0_416, %c0_417, %c0_418], %563 {strides = array<i32>} : memref<2x8x8x256xf32, #tpu.memory_space<vmem>>, vector<2x8x8x256xf32>,
    return
  }
  func.func @transform_0(%arg0: i32) -> (i32, i32, i32, i32) {
    %c0_i32 = arith.constant 0 : i32
    %c0_i32_0 = arith.constant 0 : i32
    %c0_i32_1 = arith.constant 0 : i32
    %c0_i32_2 = arith.constant 0 : i32
    return %arg0, %c0_i32, %c0_i32_0, %c0_i32_1 : i32, i32, i32, i32
  }
  func.func @transform_1(%arg0: i32) -> (i32, i32, i32) {
    %c0_i32 = arith.constant 0 : i32
    %c0_i32_0 = arith.constant 0 : i32
    %c0_i32_1 = arith.constant 0 : i32
    %c0_i32_2 = arith.constant 0 : i32
    return %c0_i32, %c0_i32_0, %c0_i32_1 : i32, i32, i32
  }
  func.func @transform_2(%arg0: i32) -> (i32, i32) {
    %c0_i32 = arith.constant 0 : i32
    %c0_i32_0 = arith.constant 0 : i32
    %c0_i32_1 = arith.constant 0 : i32
    return %c0_i32, %c0_i32_0 : i32, i32
  }
  func.func @transform_3(%arg0: i32) -> (i32, i32, i32) {
    %c0_i32 = arith.constant 0 : i32
    %c0_i32_0 = arith.constant 0 : i32
    %c0_i32_1 = arith.constant 0 : i32
    %c0_i32_2 = arith.constant 0 : i32
    return %c0_i32, %c0_i32_0, %c0_i32_1 : i32, i32, i32
  }
  func.func @transform_4(%arg0: i32) -> (i32, i32) {
    %c0_i32 = arith.constant 0 : i32
    %c0_i32_0 = arith.constant 0 : i32
    %c0_i32_1 = arith.constant 0 : i32
    return %c0_i32, %c0_i32_0 : i32, i32
  }
  func.func @transform_5(%arg0: i32) -> (i32, i32) {
    %c0_i32 = arith.constant 0 : i32
    %c0_i32_0 = arith.constant 0 : i32
    %c0_i32_1 = arith.constant 0 : i32
    return %c0_i32, %c0_i32_0 : i32, i32
  }
  func.func @transform_6(%arg0: i32) -> (i32, i32, i32, i32) {
    %c0_i32 = arith.constant 0 : i32
    %c0_i32_0 = arith.constant 0 : i32
    %c0_i32_1 = arith.constant 0 : i32
    %c0_i32_2 = arith.constant 0 : i32
    return %arg0, %c0_i32, %c0_i32_0, %c0_i32_1 : i32, i32, i32, i32
  }
}

</mosaic_0001>

<bundles_post_ra>
// kernel: middle_flow_block.1
= control target key start
LH: loop header
LB: loop body
LE: loop exit
PB: predicated region body
PF: predicated region fallthrough
CT: control target
= control target key end

     0   :  { %11 = vsyncpa [#allocation6], 0  ;;  %s10191_s0 = inlined_call_operand.vmem [shape: f32[4,8,8,256], index: 0, kind: input, shape index: {}]   ;;  %s10192_s1 = inlined_call_operand.vmem [shape: f32[3,9,256], index: 1, kind: input, shape index: {}]   ;;  %s10193_s2 = inlined_call_operand.vmem [shape: f32[3,256], index: 2, kind: input, shape index: {}]   ;;  %s10194_s3 = inlined_call_operand.vmem [shape: bf16[3,256,256], index: 3, kind: input, shape index: {}]   ;;  %s10195_s4 = inlined_call_operand.vmem [shape: f32[3,256], index: 4, kind: input, shape index: {}]   ;;  %s10196_s5 = inlined_call_operand.vmem [shape: f32[3,256], index: 5, kind: input, shape index: {}]   ;;  %s10197_s6 = inlined_call_operand.hbm [shape: f32[4,8,8,256], index: 6, kind: output, shape index: {}]  }
   0x1   :  { %13 = vsyncpa [#allocation6 + $0x1], 0  ;;  %s7001_s21 = smov 0   ;;  %s7003_s22 = smov 0  }
   0x2   :  { %s7005_s23 = smov 0   ;;  %s7007_s24 = smov 0  }
   0x3 LB: > { %s7022_s25 = sadd.s32 4294967295, %s6961_s24   ;;  %s6012_s26 = sadd.s32 4294967294, %s6961_s24   ;;  %s6961_s24 = sphi %s7007_s24, %s10379_s24   ;;  %s6957_s23 = sphi %s7005_s23, %s10378_s23   ;;  %s6953_s22 = sphi %s7003_s22, %s10377_s22   ;;  %s6949_s21 = sphi %s7001_s21, %s10376_s21  }
   0x4   : > { %s7026_s27 = sadd.s32 1, %s6961_s24   ;;  %s157_s28 = sadd.s32 1, %s6957_s23 }
   0x5   : > { %s154_s29 = ssub.s32 %s6961_s24, %s7026_s27  ;;  %p167_p0 = scmp.ne.s32.totalorder %s6957_s23, %s6953_s22 }
   0x6   : > { %p155_p1 = scmp.eq.s32.totalorder %s154_s29, 0  ;;  %p168_p2 = scmp.eq.s32.totalorder %s7022_s25, 1 }
   0x7   : > { %p173_p3 = scmp.ne.s32.totalorder %s6953_s22, %s6949_s21  ;;  %p174_p4 = scmp.eq.s32.totalorder %s6012_s26, 1 }
   0x8   : > { %s7037_s30 = scalar_select %p155_p1, %s6957_s23, %s157_s28  }
   0x9   : > { %p7039_p5 = por %p168_p2, %p167_p0  ;;  %p7043_p6 = por %p174_p4, %p173_p3 }
   0xa   : > { %p6015_p7 = scmp.ge.s32.totalorder %s6961_s24, 1  ;;  %p217_p8 = scmp.lt.s32.totalorder %s6961_s24, 3 }
   0xc   : > { %p218_p9 = pnand %p6015_p7, %p217_p8 }
   0xe   : > { %221 = sbr.rel (%p218_p9) target bundleno = 872 (0x368), region = 44 }
  0x13   : > { %v6160_v0 = vld [vmem:[%s10194_s3 + $0x70] sm:$0xf]  ;;  %v6730_v1 = vld [vmem:[%s10194_s3 + $0x74] sm:$0xf0]  ;;  %v6729_v5 = vld [vmem:[%s10194_s3 + $0x74] sm:$0xf] }
  0x14   : > { %v6224_v2 = vld [vmem:[%s10194_s3 + $0xf0] sm:$0xf]  ;;  %v6161_v3 = vor.u32 %v6730_v1, %v6160_v0  ;;  %v6746_v4 = vld [vmem:[%s10194_s3 + $0xf4] sm:$0xf0]  ;;  %v6162_v6 = vld [vmem:[%s10194_s3 + $0x78] sm:$0xf0] }
  0x15   : > { %v6225_v7 = vor.u32 %v6746_v4, %v6224_v2  ;;  %v6165_v8 = vor.u32 %v6729_v5, %v6162_v6  ;;  %v6745_v9 = vld [vmem:[%s10194_s3 + $0xf4] sm:$0xf]  ;;  %v6226_v10 = vld [vmem:[%s10194_s3 + $0xf8] sm:$0xf0]  ;;  %v6152_v11 = vld [vmem:[%s10194_s3 + $0x60] sm:$0xf] }
  0x16   : > { %1818 = vmatpush.bf16.msra.mxu0 %v6161_v3  ;;  %v6229_v12 = vor.u32 %v6745_v9, %v6226_v10  ;;  %v6728_v13 = vld [vmem:[%s10194_s3 + $0x64] sm:$0xf0]  ;;  %v6216_v14 = vld [vmem:[%s10194_s3 + $0xe0] sm:$0xf]  ;;  %v6727_v18 = vld [vmem:[%s10194_s3 + $0x64] sm:$0xf]  ;;  %v256_v10 = vlaneseq }
  0x17   : > { %v6744_v15 = vld [vmem:[%s10194_s3 + $0xe4] sm:$0xf0]  ;;  %1867 = vmatpush.bf16.msra.mxu1 %v6225_v7  ;;  %1916 = vmatpush.bf16.msra.mxu2 %v6165_v8  ;;  %v6153_v16 = vor.u32 %v6728_v13, %v6152_v11  ;;  %v6154_v19 = vld [vmem:[%s10194_s3 + $0x68] sm:$0xf0]  ;;  %v6743_v20 = vld [vmem:[%s10194_s3 + $0xe4] sm:$0xf] }
  0x18   : > { %v6217_v17 = vor.u32 %v6744_v15, %v6216_v14  ;;  %1965 = vmatpush.bf16.msra.mxu3 %v6229_v12  ;;  %v6157_v21 = vor.u32 %v6727_v18, %v6154_v19  ;;  %v6218_v22 = vld [vmem:[%s10194_s3 + $0xe8] sm:$0xf0]  ;;  %v6144_v23 = vld [vmem:[%s10194_s3 + $0x50] sm:$0xf]  ;;  %v6726_v24 = vld [vmem:[%s10194_s3 + $0x54] sm:$0xf0] }
  0x19   : > { %v6221_v25 = vor.u32 %v6743_v20, %v6218_v22  ;;  %v6208_v26 = vld [vmem:[%s10194_s3 + $0xd0] sm:$0xf]  ;;  %v6742_v27 = vld [vmem:[%s10194_s3 + $0xd4] sm:$0xf0]  ;;  %v6725_v28 = vld [vmem:[%s10194_s3 + $0x54] sm:$0xf]  ;;  %v6145_v29 = vor.u32 %v6726_v24, %v6144_v23 }
  0x1a   : > { %1819 = vmatpush.bf16.msra.mxu0 %v6153_v16  ;;  %v6146_v30 = vld [vmem:[%s10194_s3 + $0x58] sm:$0xf0]  ;;  %v6741_v31 = vld [vmem:[%s10194_s3 + $0xd4] sm:$0xf]  ;;  %v6209_v33 = vor.u32 %v6742_v27, %v6208_v26  ;;  %v6136_v35 = vld [vmem:[%s10194_s3 + $0x40] sm:$0xf] }
  0x1b   : > { %v6210_v32 = vld [vmem:[%s10194_s3 + $0xd8] sm:$0xf0]  ;;  %1868 = vmatpush.bf16.msra.mxu1 %v6217_v17  ;;  %1917 = vmatpush.bf16.msra.mxu2 %v6157_v21  ;;  %v6149_v34 = vor.u32 %v6725_v28, %v6146_v30  ;;  %v6724_v36 = vld [vmem:[%s10194_s3 + $0x44] sm:$0xf0]  ;;  %v6200_v37 = vld [vmem:[%s10194_s3 + $0xc0] sm:$0xf] }
  0x1c   : > { %1966 = vmatpush.bf16.msra.mxu3 %v6221_v25  ;;  %v6213_v38 = vor.u32 %v6741_v31, %v6210_v32  ;;  %v6740_v39 = vld [vmem:[%s10194_s3 + $0xc4] sm:$0xf0]  ;;  %v6723_v40 = vld [vmem:[%s10194_s3 + $0x44] sm:$0xf]  ;;  %v6138_v41 = vld [vmem:[%s10194_s3 + $0x48] sm:$0xf0]  ;;  %v6137_v44 = vor.u32 %v6724_v36, %v6136_v35 }
  0x1d   : > { %v6739_v42 = vld [vmem:[%s10194_s3 + $0xc4] sm:$0xf]  ;;  %v6202_v43 = vld [vmem:[%s10194_s3 + $0xc8] sm:$0xf0]  ;;  %v6128_v45 = vld [vmem:[%s10194_s3 + $0x30] sm:$0xf]  ;;  %v6201_v47 = vor.u32 %v6740_v39, %v6200_v37  ;;  %v6141_v48 = vor.u32 %v6723_v40, %v6138_v41 }
  0x1e   : > { %1820 = vmatpush.bf16.msra.mxu0 %v6145_v29  ;;  %v6722_v46 = vld [vmem:[%s10194_s3 + $0x34] sm:$0xf0]  ;;  %v6192_v49 = vld [vmem:[%s10194_s3 + $0xb0] sm:$0xf]  ;;  %v6721_v51 = vld [vmem:[%s10194_s3 + $0x34] sm:$0xf]  ;;  %v6205_v52 = vor.u32 %v6739_v42, %v6202_v43 }
  0x1f   : > { %1869 = vmatpush.bf16.msra.mxu1 %v6209_v33  ;;  %1918 = vmatpush.bf16.msra.mxu2 %v6149_v34  ;;  %v6738_v50 = vld [vmem:[%s10194_s3 + $0xb4] sm:$0xf0]  ;;  %v6130_v53 = vld [vmem:[%s10194_s3 + $0x38] sm:$0xf0]  ;;  %v6737_v54 = vld [vmem:[%s10194_s3 + $0xb4] sm:$0xf]  ;;  %v6129_v60 = vor.u32 %v6722_v46, %v6128_v45 }
  0x20   : > { %1967 = vmatpush.bf16.msra.mxu3 %v6213_v38  ;;  %v6194_v55 = vld [vmem:[%s10194_s3 + $0xb8] sm:$0xf0]  ;;  %v6120_v56 = vld [vmem:[%s10194_s3 + $0x20] sm:$0xf]  ;;  %v6720_v57 = vld [vmem:[%s10194_s3 + $0x24] sm:$0xf0]  ;;  %v6193_v1 = vor.u32 %v6738_v50, %v6192_v49  ;;  %v6133_v2 = vor.u32 %v6721_v51, %v6130_v53 }
  0x21   : > { %v6184_v58 = vld [vmem:[%s10194_s3 + $0xa0] sm:$0xf]  ;;  %v6736_v59 = vld [vmem:[%s10194_s3 + $0xa4] sm:$0xf0]  ;;  %v6719_v61 = vld [vmem:[%s10194_s3 + $0x24] sm:$0xf]  ;;  %v6197_v6 = vor.u32 %v6737_v54, %v6194_v55  ;;  %v6121_v14 = vor.u32 %v6720_v57, %v6120_v56 }
  0x22   : > { %1821 = vmatpush.bf16.msra.mxu0 %v6137_v44  ;;  %v6122_v62 = vld [vmem:[%s10194_s3 + $0x28] sm:$0xf0]  ;;  %v6735_v63 = vld [vmem:[%s10194_s3 + $0xa4] sm:$0xf]  ;;  %v6112_v3 = vld [vmem:[%s10194_s3 + $0x10] sm:$0xf]  ;;  %v6185_v15 = vor.u32 %v6736_v59, %v6184_v58 }
  0x23   : > { %v6186_v0 = vld [vmem:[%s10194_s3 + $0xa8] sm:$0xf0]  ;;  %1870 = vmatpush.bf16.msra.mxu1 %v6201_v47  ;;  %1919 = vmatpush.bf16.msra.mxu2 %v6141_v48  ;;  %v6718_v4 = vld [vmem:[%s10194_s3 + $0x14] sm:$0xf0]  ;;  %v7202_v5 = vld [vmem:[%s10194_s3 + $0x90] sm:$0xf]  ;;  %v6125_v19 = vor.u32 %v6719_v61, %v6122_v62 }
  0x24   : > { %1968 = vmatpush.bf16.msra.mxu3 %v6205_v52  ;;  %v7207_v7 = vld [vmem:[%s10194_s3 + $0x94] sm:$0xf0]  ;;  %v7212_v8 = vld [vmem:[%s10194_s3 + $0x14] sm:$0xf]  ;;  %v6114_v9 = vld [vmem:[%s10194_s3 + $0x18] sm:$0xf0]  ;;  %v6189_v20 = vor.u32 %v6735_v63, %v6186_v0  ;;  %v6113_v21 = vor.u32 %v6718_v4, %v6112_v3 }
  0x25   : > { %v7220_v11 = vld [vmem:[%s10194_s3 + $0x94] sm:$0xf]  ;;  %v7225_v12 = vld [vmem:[%s10194_s3 + $0x98] sm:$0xf0]  ;;  %v7230_v13 = vld [vmem:[%s10194_s3] sm:$0xf]  ;;  %v6177_v25 = vor.u32 %v7207_v7, %v7202_v5  ;;  %v6117_v26 = vor.u32 %v7212_v8, %v6114_v9 }
  0x26   : > { %1822 = vmatpush.bf16.msra.mxu0 %v6129_v60  ;;  %v7235_v16 = vld [vmem:[%s10194_s3 + $0x4] sm:$0xf0]  ;;  %v7240_v17 = vld [vmem:[%s10194_s3 + $0x80] sm:$0xf]  ;;  %v7250_v22 = vld [vmem:[%s10194_s3 + $0x4] sm:$0xf]  ;;  %v6181_v30 = vor.u32 %v7220_v11, %v7225_v12 }
  0x27   : > { %v7245_v18 = vld [vmem:[%s10194_s3 + $0x84] sm:$0xf0]  ;;  %1871 = vmatpush.bf16.msra.mxu1 %v6193_v1  ;;  %1920 = vmatpush.bf16.msra.mxu2 %v6133_v2  ;;  %v7255_v23 = vld [vmem:[%s10194_s3 + $0x8] sm:$0xf0]  ;;  %v7260_v24 = vld [vmem:[%s10194_s3 + $0x84] sm:$0xf]  ;;  %v6105_v31 = vor.u32 %v7235_v16, %v7230_v13 }
  0x28   : > { %1969 = vmatpush.bf16.msra.mxu3 %v6197_v6  ;;  %v7268_v27 = vld [vmem:[%s10194_s3 + $0x88] sm:$0xf0]  ;;  %s6017_s17 = sshll.u32 %s7022_s25, 1  ;;  %v257_v28 = vshrl.u32 %v256_v10, 7  ;;  %v7274_v29 = vld [vmem:[%s10192_s1] sm:$0xff]  ;;  %v6169_v32 = vor.u32 %v7245_v18, %v7240_v17  ;;  %v6109_v33 = vor.u32 %v7250_v22, %v7255_v23  ;;  %v6963_v37 = vmov 0.0  }
  0x29   : > { %p249_p10 = scmp.lt.s32.totalorder %s6017_s17, 3  ;;  %v7287_v34 = vld [vmem:[%s10192_s1 + $0x8] sm:$0xff]  ;;  %v6173_v35 = vor.u32 %v7260_v24, %v7268_v27  ;;  %v7292_v36 = vperm.slane %v7274_v29, 0  ;;  %v7302_v41 = vperm.slane %v7274_v29, 1  ;;  %v7309_v44 = vperm.slane %v7274_v29, 2  ;;  %s245_s19 = sand.u32 1, %s6953_s22  }
  0x2a   : > { %1823 = vmatpush.bf16.msra.mxu0 %v6121_v14  ;;  %vm258_vm0 = vcmp.gt.s32.totalorder %v257_v28, 0  ;;  %vm261_vm1 = vcmp.lt.s32.totalorder %v257_v28, 7  ;;  %v7299_v40 = vperm.slane %v7287_v34, 0  ;;  %v7306_v43 = vperm.slane %v7287_v34, 1  ;;  %s6016_s9 = sshll.u32 %s245_s19, 8  ;;  %s6844_s12 = sshll.u32 %s7022_s25, 8 }
  0x2b   : > { %10256 = vst [vmem:[#allocation8_spill] sm:$0xff] %v7292_v36  ;;  %1872 = vmatpush.bf16.msra.mxu1 %v6185_v15  ;;  %1921 = vmatpush.bf16.msra.mxu2 %v6125_v19  ;;  %s10381_s17 = smov (!%p249_p10, %s6017_s17), 3  ;;  %v7294_v38 = vsel %vm258_vm0, 1.0, %v6963_v37  ;;  %v7296_v39 = vsel %vm261_vm1, 1.0, %v6963_v37  ;;  %v447_v42 = vmul.f32 0.0, %v7292_v36  ;;  %v7312_v45 = vperm.slane %v7287_v34, 2  ;;  %s5946_s15 = scalar_lea.hbm %s10197_s6, %s6844_s12 }
  0x2c   : > { %10257 = vst [vmem:[#allocation9_spill] sm:$0xff] %v7299_v40  ;;  %1970 = vmatpush.bf16.msra.mxu3 %v6189_v20  ;;  %s6698_s28 = sshll.u32 %s10381_s17, 7  ;;  %v448_v46 = vmul.f32 0.0, %v7299_v40  ;;  %v498_v47 = vmul.f32 0.0, %v7302_v41  ;;  %v7317_v48 = vperm.slane %v7274_v29, 3  ;;  %v7320_v49 = vperm.slane %v7287_v34, 3 }
  0x2d   : > { %10258 = vst [vmem:[#allocation10_spill] sm:$0xff] %v7309_v44  ;;  %s7325_s10 = scalar_lea.vmem %s10191_s0, %s6698_s28  ;;  %v499_v50 = vmul.f32 0.0, %v7306_v43  ;;  %v549_v51 = vmul.f32 0.0, %v7309_v44  ;;  %v7330_v52 = vmul.f32 0.0, %v7312_v45  ;;  %v7333_v53 = vperm.slane %v7274_v29, 4  ;;  %s10033_s11 = scalar_lea.vmem [#allocation5], %s6016_s9 }
  0x2e   : > { %10259 = vst [vmem:[#allocation11_spill] sm:$0xff] %v7312_v45  ;;  %1824 = vmatpush.bf16.msra.mxu0 %v6113_v21  ;;  %v282_v54 = vld [vmem:[%s7325_s10] sm:$0xff]  ;;  %v283_v55 = vld [vmem:[%s7325_s10 + $0x8] sm:$0xff]  ;;  %v284_v56 = vld [vmem:[%s7325_s10 + $0x10] sm:$0xff]  ;;  %v514_v57 = vadd.f32 %v498_v47, %v447_v42  ;;  %v7339_v58 = vperm.slane %v7287_v34, 4  ;;  %v7342_v59 = vperm.slane %v7274_v29, 5 }
  0x2f   : > { %10260 = vst [vmem:[#allocation12_spill] sm:$0xff] %v7317_v48  ;;  %1873 = vmatpush.bf16.msra.mxu1 %v6177_v25  ;;  %1922 = vmatpush.bf16.msra.mxu2 %v6117_v26  ;;  %v7345_v60 = vperm.slane %v7287_v34, 5  ;;  %v285_v61 = vld [vmem:[%s7325_s10 + $0x18] sm:$0xff]  ;;  %v286_v62 = vld [vmem:[%s7325_s10 + $0x20] sm:$0xff]  ;;  %v287_v63 = vld [vmem:[%s7325_s10 + $0x28] sm:$0xff]  ;;  %v298_v0 = vmax.f32 %v282_v54, 0.0  ;;  %v515_v3 = vadd.f32 %v499_v50, %v448_v46 }
  0x30   : > { %10261 = vst [vmem:[#allocation13_spill] sm:$0xff] %v7320_v49  ;;  %1971 = vmatpush.bf16.msra.mxu3 %v6181_v30  ;;  %v299_v1 = vmax.f32 %v283_v55, 0.0  ;;  %v7350_v2 = vmax.f32 %v284_v56, 0.0  ;;  %v7352_v4 = vmax.f32 %v285_v61, 0.0  ;;  %v7354_v5 = vmax.f32 %v286_v62, 0.0  ;;  %s5947_s25 = sshll.u32 %s10033_s11, 4  ;;  %s5948_s25 = int_to_ptr.vmem [resolvable:$true] %s5947_s25 }
  0x31   : > { %10262 = vst [vmem:[#allocation14_spill] sm:$0xff] %v7333_v53  ;;  %v7356_v6 = vmax.f32 %v287_v63, 0.0  ;;  %v7358_v7 = vadd.f32 %v549_v51, %v514_v57  ;;  %v331_v8 = vrot.slane %v298_v0, 7  ;;  %v380_v11 = vrot.slane %v298_v0, 1  ;;  %s5949_s16 = sshll.u32 %s5946_s15, 4  ;;  %s5934_s17 = scalar_lea.sflag [#allocation6], %s245_s19  ;;  %s5950_s16 = int_to_ptr.hbm [resolvable:$true] %s5949_s16 }
  0x32   : > { %10263 = vst [vmem:[#allocation15_spill] sm:$0xff] %v7339_v58  ;;  %1825 = vmatpush.bf16.msra.mxu0 %v6105_v31  ;;  %v332_v9 = vrot.slane %v299_v1, 7  ;;  %v333_v10 = vrot.slane %v7350_v2, 7  ;;  %v334_v12 = vrot.slane %v7352_v4, 7  ;;  %v335_v13 = vrot.slane %v7354_v5, 7  ;;  %s6913_s18 = sshra.s32 %s5950_s16, 4  ;;  %s6914_s18 = int_to_ptr.hbm [resolvable:$true] %s6913_s18 }
  0x33   : > { %10264 = vst [vmem:[#allocation16_spill] sm:$0xff] %v7358_v7  ;;  %1874 = vmatpush.bf16.msra.mxu1 %v6169_v32  ;;  %1923 = vmatpush.bf16.msra.mxu2 %v6109_v33  ;;  %v336_v14 = vrot.slane %v7356_v6, 7  ;;  %v381_v15 = vrot.slane %v299_v1, 1  ;;  %v347_v16 = vmul.f32 %v7294_v38, %v331_v8  ;;  %v382_v19 = vrot.slane %v7350_v2, 1  ;;  %s6915_s20 = scalar_lea.hbm %s6914_s18, 256  ;;  %s6919_s29 = scalar_lea.hbm %s10197_s6, 512 }
  0x34   : > { %1972 = vmatpush.bf16.msra.mxu3 %v6173_v35  ;;  %v348_v17 = vmul.f32 %v7294_v38, %v332_v9  ;;  %v349_v18 = vmul.f32 %v7294_v38, %v333_v10  ;;  %v350_v20 = vmul.f32 %v7294_v38, %v334_v12  ;;  %v7370_v21 = vmul.f32 %v7294_v38, %v335_v13  ;;  %p6916_p11 = scmp.ne.s32.totalorder %s6914_s18, %s6915_s20  ;;  %p6920_p0 = scmp.lt.s32.totalorder %s6914_s18, %s10197_s6 }
  0x35   : > { %v7373_v22 = vmul.f32 %v7294_v38, %v336_v14  ;;  %v383_v23 = vrot.slane %v7352_v4, 1  ;;  %v384_v24 = vrot.slane %v7354_v5, 1  ;;  %v385_v25 = vrot.slane %v7356_v6, 1  ;;  %p6921_p1 = scmp.lt.s32.totalorder %s6919_s29, %s6915_s20 }
  0x36   : > { %v396_v26 = vmul.f32 %v7296_v39, %v380_v11  ;;  %v397_v27 = vmul.f32 %v7296_v39, %v381_v15  ;;  %v398_v28 = vmul.f32 %v7296_v39, %v382_v19  ;;  %v449_v31 = vmul.f32 %v7292_v36, %v347_v16  ;;  %p6917_p12 = pnand %p6916_p11, %p7039_p5 }
  0x37   : > { %v7382_v30 = vmul.f32 %v7296_v39, %v383_v23  ;;  %v450_v32 = vmul.f32 %v7299_v40, %v348_v17  ;;  %v7387_v33 = vmul.f32 %v7296_v39, %v384_v24  ;;  %v7390_v35 = vmul.f32 %v7296_v39, %v385_v25  ;;  %p6922_p2 = por %p6921_p1, %p6920_p0 }
  0x38   : > { %v7393_v37 = vmul.f32 %v7292_v36, %v349_v18  ;;  %v7396_v42 = vmul.f32 %v7299_v40, %v350_v20  ;;  %v7400_v46 = vmul.f32 %v7292_v36, %v7370_v21  ;;  %v7404_v47 = vmul.f32 %v7299_v40, %v7373_v22  ;;  %p6918_p13 = pneg %p6917_p12 }
  0x39   : > { %v500_v50 = vmul.f32 %v7302_v41, %v298_v0  ;;  %v501_v51 = vmul.f32 %v7306_v43, %v299_v1  ;;  %v551_v54 = vmul.f32 %v7309_v44, %v396_v26  ;;  %v552_v55 = vmul.f32 %v7312_v45, %v397_v27 }
  0x3a   : > { %v7411_v56 = vmul.f32 %v7309_v44, %v398_v28  ;;  %v7415_v57 = vmul.f32 %v7312_v45, %v7382_v30  ;;  %v7419_v63 = vmul.f32 %v7309_v44, %v7387_v33  ;;  %v7423_v8 = vmul.f32 %v7312_v45, %v7390_v35  ;;  %p6923_p3 = pnand %p6922_p2, %p6918_p13 }
  0x3b   : > { %v516_v61 = vadd.f32 %v500_v50, %v449_v31  ;;  %v517_v62 = vadd.f32 %v501_v51, %v450_v32  ;;  %v7426_v9 = vadd.f32 %v7330_v52, %v515_v3  ;;  %v599_v10 = vmul.f32 %v7317_v48, %v347_v16 }
  0x3c   : > { %v600_v11 = vmul.f32 %v7320_v49, %v348_v17  ;;  %v601_v12 = vmul.f32 %v7317_v48, %v349_v18  ;;  %v602_v15 = vmul.f32 %v7320_v49, %v350_v20  ;;  %v649_v19 = vmul.f32 %v7333_v53, %v298_v0 }
  0x3d   : > { %10265 = vst [vmem:[#allocation17_spill] sm:$0xff] %v7426_v9  ;;  %v567_v13 = vadd.f32 %v551_v54, %v516_v61  ;;  %v568_v14 = vadd.f32 %v552_v55, %v517_v62  ;;  %v615_v23 = vadd.f32 %v599_v10, %v7358_v7  ;;  %v650_v25 = vmul.f32 %v7339_v58, %v299_v1  ;;  %v7451_v62 = vld [vmem:[%s10192_s1 + $0x10] ss:$0 sm:$0xff] }
  0x3e   : > { %v616_v24 = vadd.f32 %v600_v11, %v7426_v9  ;;  %v651_v52 = vmul.f32 %v7333_v53, %v7350_v2  ;;  %v652_v17 = vmul.f32 %v7339_v58, %v7352_v4  ;;  %v699_v31 = vmul.f32 %v7342_v59, %v396_v26 }
  0x3f   : > { %v617_v3 = vadd.f32 %v601_v12, %v567_v13  ;;  %v618_v16 = vadd.f32 %v602_v15, %v568_v14  ;;  %v665_v32 = vadd.f32 %v649_v19, %v615_v23  ;;  %v700_v0 = vmul.f32 %v7345_v60, %v397_v27  ;;  %v7465_v19 = vld [vmem:[%s10192_s1 + $0x18] ss:$0 sm:$0xff] }
  0x40   : > { %v666_v50 = vadd.f32 %v650_v25, %v616_v24  ;;  %v701_v51 = vmul.f32 %v7342_v59, %v398_v28  ;;  %v702_v1 = vmul.f32 %v7345_v60, %v7382_v30  ;;  %v7446_v61 = vperm.slane %v7274_v29, 6  ;;  %v281_v25 = vld [vmem:[%s10193_s2] ss:$4 sm:$0x3] }
  0x41   : > { %v667_v54 = vadd.f32 %v651_v52, %v617_v3  ;;  %v668_v55 = vadd.f32 %v652_v17, %v618_v16  ;;  %v715_v26 = vadd.f32 %v699_v31, %v665_v32  ;;  %v7454_v11 = vperm.slane %v7287_v34, 6 }
  0x42   : > { %v716_v10 = vadd.f32 %v700_v0, %v666_v50  ;;  %v7457_v27 = vperm.slane %v7274_v29, 7  ;;  %v750_v14 = vmul.f32 %v7446_v61, %v349_v18  ;;  %v752_v15 = vmul.f32 %v7446_v61, %v7370_v21  ;;  %v288_v50 = vld [vmem:[%s7325_s10 + $0x30] sm:$0xff] }
  0x43   : > { %v717_v12 = vadd.f32 %v701_v51, %v667_v54  ;;  %v718_v13 = vadd.f32 %v702_v1, %v668_v55  ;;  %v751_v23 = vmul.f32 %v7454_v11, %v350_v20  ;;  %v753_v24 = vmul.f32 %v7454_v11, %v7373_v22  ;;  %v289_v1 = vld [vmem:[%s7325_s10 + $0x38] sm:$0xff] }
  0x44   : > { %v7471_v29 = vperm.slane %v7287_v34, 7  ;;  %v801_v18 = vmul.f32 %v7457_v27, %v7350_v2  ;;  %v766_v52 = vadd.f32 %v750_v14, %v715_v26  ;;  %v803_v20 = vmul.f32 %v7457_v27, %v7354_v5  ;;  %v291_v14 = vld [vmem:[%s7325_s10 + $0x48] sm:$0xff] }
  0x45   : > { %v768_v3 = vadd.f32 %v752_v15, %v717_v12  ;;  %v852_v16 = vmul.f32 %v7451_v62, %v398_v28  ;;  %v767_v17 = vadd.f32 %v751_v23, %v716_v10  ;;  %v769_v34 = vadd.f32 %v753_v24, %v718_v13  ;;  %v290_v28 = vld [vmem:[%s7325_s10 + $0x40] sm:$0xff] }
  0x46   : > { %10266 = vst [vmem:[#allocation18_spill] sm:$0xff] %v7471_v29  ;;  %v802_v31 = vmul.f32 %v7471_v29, %v7352_v4  ;;  %v804_v32 = vmul.f32 %v7471_v29, %v7356_v6  ;;  %v817_v0 = vadd.f32 %v801_v18, %v766_v52  ;;  %v853_v54 = vmul.f32 %v7465_v19, %v7382_v30 }
  0x47   : > { %v819_v51 = vadd.f32 %v803_v20, %v768_v3  ;;  %v854_v55 = vmul.f32 %v7451_v62, %v7387_v33  ;;  %v855_v12 = vmul.f32 %v7465_v19, %v7390_v35  ;;  %v7494_v13 = vperm.slane %v281_v25, 0 }
  0x48   : > { %v818_v26 = vadd.f32 %v802_v31, %v767_v17  ;;  %v820_v10 = vadd.f32 %v804_v32, %v769_v34  ;;  %v868_v15 = vadd.f32 %v852_v16, %v817_v0  ;;  %v7497_v24 = vperm.slane %v281_v25, 1 }
  0x49   : > { %v870_v23 = vadd.f32 %v854_v55, %v819_v51  ;;  %v7499_v18 = vmax.f32 %v288_v50, 0.0  ;;  %v7501_v3 = vmax.f32 %v289_v1, 0.0  ;;  %v7503_v20 = vmax.f32 %v290_v28, 0.0 }
  0x4a   : > { %v869_v30 = vadd.f32 %v853_v54, %v818_v26  ;;  %v871_v52 = vadd.f32 %v855_v12, %v820_v10  ;;  %v889_v17 = vadd.f32 %v7494_v13, %v868_v15  ;;  %v7507_v31 = vmax.f32 %v291_v14, 0.0 }
  0x4b   : > { %v891_v34 = vadd.f32 %v7494_v13, %v870_v23  ;;  %v337_v32 = vrot.slane %v7499_v18, 7  ;;  %v338_v50 = vrot.slane %v7501_v3, 7  ;;  %v339_v0 = vrot.slane %v7503_v20, 7 }
  0x4c   : > { %v890_v16 = vadd.f32 %v7497_v24, %v869_v30  ;;  %v892_v25 = vadd.f32 %v7497_v24, %v871_v52  ;;  %v340_v51 = vrot.slane %v7507_v31, 7  ;;  %v386_v55 = vrot.slane %v7499_v18, 1 }
  0x4d   : > { %v7516_v54 = vmul.f32 %v7294_v38, %v337_v32  ;;  %v387_v1 = vrot.slane %v7501_v3, 1  ;;  %v7521_v10 = vmul.f32 %v7294_v38, %v338_v50  ;;  %v7524_v12 = vmul.f32 %v7294_v38, %v339_v0 }
  0x4e   : > { %v905_v28 = vpack.c.bf16 %v890_v16, %v889_v17  ;;  %v906_v26 = vpack.c.bf16 %v892_v25, %v891_v34  ;;  %v7527_v14 = vmul.f32 %v7294_v38, %v340_v51  ;;  %v388_v15 = vrot.slane %v7503_v20, 1 }
  0x4f   : > { %v389_v23 = vrot.slane %v7507_v31, 1  ;;  %v7532_v30 = vmul.f32 %v7296_v39, %v386_v55  ;;  %v7535_v52 = vmul.f32 %v7296_v39, %v387_v1  ;;  %v7539_v17 = vmul.f32 %v7292_v36, %v7516_v54 }
  0x50   : > { %913 = vst [vmem:[#allocation4] sm:$0xff] %v905_v28  ;;  %v7543_v34 = vmul.f32 %v7299_v40, %v7521_v10  ;;  %v7547_v32 = vmul.f32 %v7292_v36, %v7524_v12  ;;  %v7550_v16 = vmul.f32 %v7296_v39, %v388_v15  ;;  %v7557_v50 = vmul.f32 %v7299_v40, %v7527_v14 }
  0x51   : > { %914 = vst [vmem:[#allocation4 + $0x8] sm:$0xff] %v906_v26  ;;  %v7553_v25 = vmul.f32 %v7296_v39, %v389_v23  ;;  %v502_v0 = vmul.f32 %v7302_v41, %v7350_v2  ;;  %v503_v51 = vmul.f32 %v7306_v43, %v7352_v4  ;;  %v504_v55 = vmul.f32 %v7302_v41, %v7354_v5 }
  0x52   : > { %10267 = vst [vmem:[#allocation19_spill] sm:$0xff] %v7557_v50  ;;  %v505_v1 = vmul.f32 %v7306_v43, %v7356_v6  ;;  %v7569_v28 = vmul.f32 %v7309_v44, %v7532_v30  ;;  %v7574_v15 = vmul.f32 %v7312_v45, %v7535_v52  ;;  %v7578_v2 = vmul.f32 %v7309_v44, %v7550_v16 }
  0x53   : > { %v518_v26 = vadd.f32 %v502_v0, %v7393_v37  ;;  %v7582_v4 = vmul.f32 %v7312_v45, %v7553_v25  ;;  %v519_v23 = vadd.f32 %v503_v51, %v7396_v42  ;;  %v520_v9 = vadd.f32 %v504_v55, %v7400_v46 }
  0x54   : > { %10268 = vst [vmem:[#allocation20_spill] sm:$0xff] %v7569_v28  ;;  %v521_v7 = vadd.f32 %v505_v1, %v7404_v47  ;;  %v603_v37 = vmul.f32 %v7317_v48, %v7370_v21  ;;  %v653_v21 = vmul.f32 %v7333_v53, %v7354_v5  ;;  %v654_v55 = vmul.f32 %v7339_v58, %v7356_v6  ;;  %v293_v28 = vld [vmem:[%s7325_s10 + $0x58] sm:$0xff] }
  0x55   : > { %10269 = vst [vmem:[#allocation21_spill] sm:$0xff] %v7574_v15  ;;  %v569_v0 = vadd.f32 %v7411_v56, %v518_v26  ;;  %v604_v15 = vmul.f32 %v7320_v49, %v7373_v22  ;;  %v570_v42 = vadd.f32 %v7415_v57, %v519_v23  ;;  %v571_v46 = vadd.f32 %v7419_v63, %v520_v9  ;;  %v292_v23 = vld [vmem:[%s7325_s10 + $0x50] sm:$0xff] }
  0x56   : > { %10270 = vst [vmem:[#allocation22_spill] sm:$0xff] %v7578_v2  ;;  %v605_v2 = vmul.f32 %v7317_v48, %v7516_v54  ;;  %v572_v47 = vadd.f32 %v7423_v8, %v521_v7  ;;  %v655_v1 = vmul.f32 %v7333_v53, %v7499_v18  ;;  %v656_v57 = vmul.f32 %v7339_v58, %v7501_v3 }
  0x57   : > { %10271 = vst [vmem:[#allocation23_spill] sm:$0xff] %v7582_v4  ;;  %v606_v4 = vmul.f32 %v7320_v49, %v7521_v10  ;;  %v6040_v56 = vld [vmem:[#allocation4] sm:$0xf]  ;;  %v6699_v51 = vld [vmem:[#allocation4 + $0x4] sm:$0xf]  ;;  %v619_v22 = vadd.f32 %v603_v37, %v569_v0  ;;  %v620_v9 = vadd.f32 %v604_v15, %v570_v42  ;;  %v703_v5 = vmul.f32 %v7342_v59, %v7387_v33 }
  0x58   : > { %v6700_v26 = vld [vmem:[#allocation4 + $0x4] sm:$0xf0]  ;;  %v6042_v63 = vld [vmem:[#allocation4 + $0x8] sm:$0xf0]  ;;  %v621_v7 = vadd.f32 %v605_v2, %v571_v46  ;;  %v704_v6 = vmul.f32 %v7345_v60, %v7390_v35  ;;  %v705_v58 = vmul.f32 %v7342_v59, %v7532_v30  ;;  %v706_v15 = vmul.f32 %v7345_v60, %v7535_v52 }
  0x59   : > { %v622_v8 = vadd.f32 %v606_v4, %v572_v47  ;;  %v6041_v49 = vor.u32 %v6700_v26, %v6040_v56  ;;  %v6045_v37 = vor.u32 %v6699_v51, %v6042_v63  ;;  %v669_v0 = vadd.f32 %v653_v21, %v619_v22 }
  0x5a   : > { %v670_v53 = vadd.f32 %v654_v55, %v620_v9  ;;  %v671_v48 = vadd.f32 %v655_v1, %v621_v7  ;;  %v754_v2 = vmul.f32 %v7446_v61, %v7516_v54  ;;  %v7619_v4 = vmax.f32 %v292_v23, 0.0  ;;  %v295_v1 = vld [vmem:[%s7325_s10 + $0x68] sm:$0xff] }
  0x5b   : > { %v672_v50 = vadd.f32 %v656_v57, %v622_v8  ;;  %1826 = vmatmul.bf16.vlgmr.msra.gmra.mxu0 %v6041_v49  ;;  %1875 = vmatmul.bf16.vlgmr.msra.gmra.mxu1 %v6045_v37  ;;  %v719_v33 = vadd.f32 %v703_v5, %v669_v0  ;;  %v755_v46 = vmul.f32 %v7454_v11, %v7521_v10  ;;  %v7623_v47 = vmax.f32 %v293_v28, 0.0 }
  0x5c   : > { %1924 = vmatmul.bf16.vlgmr.msra.gmra.mxu2 %v6041_v49  ;;  %1973 = vmatmul.bf16.vlgmr.msra.gmra.mxu3 %v6045_v37  ;;  %v720_v35 = vadd.f32 %v704_v6, %v670_v53  ;;  %v721_v42 = vadd.f32 %v705_v58, %v671_v48  ;;  %v756_v56 = vmul.f32 %v7446_v61, %v7524_v12  ;;  %v294_v58 = vld [vmem:[%s7325_s10 + $0x60] sm:$0xff]  ;;  %v7649_v6 = vmax.f32 %v295_v1, 0.0 }
  0x5d   : > { %v722_v21 = vadd.f32 %v706_v15, %v672_v50  ;;  %v757_v54 = vmul.f32 %v7454_v11, %v7527_v14  ;;  %v770_v51 = vadd.f32 %v754_v2, %v719_v33  ;;  %v805_v49 = vmul.f32 %v7457_v27, %v7499_v18 }
  0x5e   : > { %v771_v22 = vadd.f32 %v755_v46, %v720_v35  ;;  %v806_v48 = vmul.f32 %v7471_v29, %v7501_v3  ;;  %v807_v53 = vmul.f32 %v7457_v27, %v7503_v20  ;;  %v772_v10 = vadd.f32 %v756_v56, %v721_v42 }
  0x5f   : > { %v773_v50 = vadd.f32 %v757_v54, %v722_v21  ;;  %v808_v28 = vmul.f32 %v7471_v29, %v7507_v31  ;;  %v856_v55 = vmul.f32 %v7451_v62, %v7532_v30  ;;  %v821_v57 = vadd.f32 %v805_v49, %v770_v51 }
  0x60   : > { %v822_v26 = vadd.f32 %v806_v48, %v771_v22  ;;  %v857_v63 = vmul.f32 %v7465_v19, %v7535_v52  ;;  %v858_v9 = vmul.f32 %v7451_v62, %v7550_v16  ;;  %v823_v7 = vadd.f32 %v807_v53, %v772_v10 }
  0x61   : > { %v824_v8 = vadd.f32 %v808_v28, %v773_v50  ;;  %v859_v5 = vmul.f32 %v7465_v19, %v7553_v25  ;;  %v7647_v23 = vmax.f32 %v294_v58, 0.0  ;;  %v872_v37 = vadd.f32 %v856_v55, %v821_v57 }
  0x62   : > { %v873_v0 = vadd.f32 %v857_v63, %v822_v26  ;;  %v341_v30 = vrot.slane %v7619_v4, 7  ;;  %v874_v15 = vadd.f32 %v858_v9, %v823_v7  ;;  %v342_v52 = vrot.slane %v7623_v47, 7 }
  0x63   : > { %v875_v33 = vadd.f32 %v859_v5, %v824_v8  ;;  %v343_v2 = vrot.slane %v7647_v23, 7  ;;  %v893_v35 = vadd.f32 %v7494_v13, %v872_v37  ;;  %v344_v46 = vrot.slane %v7649_v6, 7 }
  0x64   : > { %v894_v42 = vadd.f32 %v7497_v24, %v873_v0  ;;  %v7658_v21 = vmul.f32 %v7294_v38, %v341_v30  ;;  %v895_v56 = vadd.f32 %v7494_v13, %v874_v15  ;;  %v7663_v51 = vmul.f32 %v7294_v38, %v342_v52 }
  0x65   : > { %v896_v54 = vadd.f32 %v7497_v24, %v875_v33  ;;  %v7666_v22 = vmul.f32 %v7294_v38, %v343_v2  ;;  %v7669_v48 = vmul.f32 %v7294_v38, %v344_v46  ;;  %v390_v53 = vrot.slane %v7619_v4, 1 }
  0x66   : > { %v907_v49 = vpack.c.bf16 %v894_v42, %v893_v35  ;;  %v391_v58 = vrot.slane %v7623_v47, 1  ;;  %v392_v50 = vrot.slane %v7647_v23, 1  ;;  %v393_v28 = vrot.slane %v7649_v6, 1  ;;  %v10275_v42 = vld [vmem:[#allocation19_spill] sm:$0xff] }
  0x67   : > { %v908_v10 = vpack.c.bf16 %v896_v54, %v895_v56  ;;  %v7677_v55 = vmul.f32 %v7292_v36, %v7658_v21  ;;  %v7680_v1 = vmul.f32 %v7296_v39, %v390_v53  ;;  %v7687_v26 = vmul.f32 %v7299_v40, %v7663_v51  ;;  %v10277_v54 = vld [vmem:[#allocation20_spill] sm:$0xff]  ;;  %v10278_v53 = vld [vmem:[#allocation13_spill] sm:$0xff] }
  0x68   : > { %915 = vst [vmem:[#allocation4 + $0x10] sm:$0xff] %v907_v49  ;;  %v7683_v57 = vmul.f32 %v7296_v39, %v391_v58  ;;  %v7691_v63 = vmul.f32 %v7292_v36, %v7666_v22  ;;  %v7694_v9 = vmul.f32 %v7296_v39, %v392_v50  ;;  %v7697_v7 = vmul.f32 %v7296_v39, %v393_v28  ;;  %v10279_v28 = vld [vmem:[#allocation21_spill] sm:$0xff] }
  0x69   : > { %916 = vst [vmem:[#allocation4 + $0x18] sm:$0xff] %v908_v10  ;;  %v7701_v8 = vmul.f32 %v7299_v40, %v7669_v48  ;;  %v506_v5 = vmul.f32 %v7302_v41, %v7499_v18  ;;  %v507_v37 = vmul.f32 %v7306_v43, %v7501_v3  ;;  %v508_v0 = vmul.f32 %v7302_v41, %v7503_v20  ;;  %v296_v40 = vld [vmem:[%s7325_s10 + $0x70] sm:$0xff] }
  0x6a   : > { %v509_v30 = vmul.f32 %v7306_v43, %v7507_v31  ;;  %v7713_v15 = vmul.f32 %v7309_v44, %v7680_v1  ;;  %v7718_v52 = vmul.f32 %v7312_v45, %v7683_v57  ;;  %v7722_v18 = vmul.f32 %v7309_v44, %v7694_v9 }
  0x6b   : > { %v522_v33 = vadd.f32 %v506_v5, %v7539_v17  ;;  %v7726_v3 = vmul.f32 %v7312_v45, %v7697_v7  ;;  %v523_v2 = vadd.f32 %v507_v37, %v7543_v34  ;;  %v524_v35 = vadd.f32 %v508_v0, %v7547_v32  ;;  %v10276_v17 = vld [vmem:[#allocation12_spill] sm:$0xff]  ;;  %v10280_v5 = vld [vmem:[#allocation22_spill] sm:$0xff]  ;;  %v10281_v37 = vld [vmem:[#allocation23_spill] sm:$0xff] }
  0x6c   : > { %10272 = vst [vmem:[#allocation24_spill] sm:$0xff] %v7718_v52  ;;  %v525_v46 = vadd.f32 %v509_v30, %v10275_v42  ;;  %v607_v56 = vmul.f32 %v10276_v17, %v7524_v12  ;;  %v608_v58 = vmul.f32 %v10278_v53, %v7527_v14  ;;  %v609_v10 = vmul.f32 %v10276_v17, %v7658_v21  ;;  %v10282_v12 = vld [vmem:[#allocation14_spill] sm:$0xff] }
  0x6d   : > { %10273 = vst [vmem:[#allocation25_spill] sm:$0xff] %v7722_v18  ;;  %v573_v49 = vadd.f32 %v10277_v54, %v522_v33  ;;  %v610_v50 = vmul.f32 %v10278_v53, %v7663_v51  ;;  %v574_v34 = vadd.f32 %v10279_v28, %v523_v2  ;;  %v575_v32 = vadd.f32 %v10280_v5, %v524_v35  ;;  %v10283_v54 = vld [vmem:[#allocation15_spill] sm:$0xff] }
  0x6e   : > { %10274 = vst [vmem:[#allocation26_spill] sm:$0xff] %v7726_v3  ;;  %v576_v0 = vadd.f32 %v10281_v37, %v525_v46  ;;  %v657_v30 = vmul.f32 %v10282_v12, %v7503_v20  ;;  %v658_v45 = vmul.f32 %v10283_v54, %v7507_v31  ;;  %v659_v44 = vmul.f32 %v10282_v12, %v7619_v4  ;;  %v297_v3 = vld [vmem:[%s7325_s10 + $0x78] sm:$0xff] }
  0x6f   : > { %v6048_v33 = vld [vmem:[#allocation4 + $0x10] sm:$0xf]  ;;  %v6701_v42 = vld [vmem:[#allocation4 + $0x14] sm:$0xf]  ;;  %v623_v14 = vadd.f32 %v607_v56, %v573_v49  ;;  %v660_v2 = vmul.f32 %v10283_v54, %v7623_v47  ;;  %v624_v5 = vadd.f32 %v608_v58, %v574_v34  ;;  %v625_v46 = vadd.f32 %v609_v10, %v575_v32 }
  0x70   : > { %v6702_v28 = vld [vmem:[#allocation4 + $0x14] sm:$0xf0]  ;;  %v6050_v35 = vld [vmem:[#allocation4 + $0x18] sm:$0xf0]  ;;  %v626_v37 = vadd.f32 %v610_v50, %v576_v0  ;;  %v707_v20 = vmul.f32 %v7342_v59, %v7550_v16  ;;  %v708_v31 = vmul.f32 %v7345_v60, %v7553_v25  ;;  %v709_v54 = vmul.f32 %v7342_v59, %v7680_v1 }
  0x71   : > { %v6049_v36 = vor.u32 %v6702_v28, %v6048_v33  ;;  %v6053_v56 = vor.u32 %v6701_v42, %v6050_v35  ;;  %v673_v49 = vadd.f32 %v657_v30, %v623_v14  ;;  %v674_v18 = vadd.f32 %v658_v45, %v624_v5 }
  0x72   : > { %v675_v52 = vadd.f32 %v659_v44, %v625_v46  ;;  %v676_v12 = vadd.f32 %v660_v2, %v626_v37  ;;  %v710_v58 = vmul.f32 %v7345_v60, %v7683_v57  ;;  %v758_v10 = vmul.f32 %v7446_v61, %v7658_v21 }
  0x73   : > { %1831 = vmatmul.bf16.gmra.mxu0 %v6049_v36  ;;  %1880 = vmatmul.bf16.gmra.mxu1 %v6053_v56  ;;  %v723_v16 = vadd.f32 %v707_v20, %v673_v49  ;;  %v7763_v50 = vmax.f32 %v296_v40, 0.0  ;;  %v724_v25 = vadd.f32 %v708_v31, %v674_v18  ;;  %v759_v44 = vmul.f32 %v7454_v11, %v7663_v51 }
  0x74   : > { %1929 = vmatmul.bf16.gmra.mxu2 %v6049_v36  ;;  %1978 = vmatmul.bf16.gmra.mxu3 %v6053_v56  ;;  %v725_v45 = vadd.f32 %v709_v54, %v675_v52  ;;  %v7767_v34 = vmax.f32 %v297_v3, 0.0  ;;  %v726_v32 = vadd.f32 %v710_v58, %v676_v12  ;;  %v760_v0 = vmul.f32 %v7446_v61, %v7666_v22 }
  0x75   : > { %v761_v30 = vmul.f32 %v7454_v11, %v7669_v48  ;;  %v774_v33 = vadd.f32 %v758_v10, %v723_v16  ;;  %v775_v21 = vadd.f32 %v759_v44, %v724_v25  ;;  %v809_v36 = vmul.f32 %v7457_v27, %v7619_v4 }
  0x76   : > { %v810_v40 = vmul.f32 %v7471_v29, %v7623_v47  ;;  %v811_v51 = vmul.f32 %v7457_v27, %v7647_v23  ;;  %v776_v52 = vadd.f32 %v760_v0, %v725_v45  ;;  %v812_v3 = vmul.f32 %v7471_v29, %v7649_v6 }
  0x77   : > { %v777_v18 = vadd.f32 %v761_v30, %v726_v32  ;;  %v860_v12 = vmul.f32 %v7451_v62, %v7680_v1  ;;  %v825_v42 = vadd.f32 %v809_v36, %v774_v33  ;;  %v861_v54 = vmul.f32 %v7465_v19, %v7683_v57 }
  0x78   : > { %v826_v14 = vadd.f32 %v810_v40, %v775_v21  ;;  %v862_v2 = vmul.f32 %v7451_v62, %v7694_v9  ;;  %v827_v28 = vadd.f32 %v811_v51, %v776_v52  ;;  %v863_v5 = vmul.f32 %v7465_v19, %v7697_v7 }
  0x79   : > { %v828_v35 = vadd.f32 %v812_v3, %v777_v18  ;;  %v345_v46 = vrot.slane %v7763_v50, 7  ;;  %v876_v37 = vadd.f32 %v860_v12, %v825_v42  ;;  %v346_v56 = vrot.slane %v7767_v34, 7 }
  0x7a   : > { %v877_v20 = vadd.f32 %v861_v54, %v826_v14  ;;  %v394_v1 = vrot.slane %v7763_v50, 1  ;;  %v878_v49 = vadd.f32 %v862_v2, %v827_v28  ;;  %v395_v58 = vrot.slane %v7767_v34, 1  ;;  %v10284_v54 = vld [vmem:[#allocation14_spill] sm:$0xff]  ;;  %v10285_v2 = vld [vmem:[#allocation15_spill] sm:$0xff]  ;;  %v10286_v28 = vld [vmem:[#allocation24_spill] sm:$0xff] }
  0x7b   : > { %v879_v31 = vadd.f32 %v863_v5, %v828_v35  ;;  %v361_v57 = vmul.f32 %v7294_v38, %v345_v46  ;;  %v897_v16 = vadd.f32 %v7494_v13, %v876_v37  ;;  %v362_v25 = vmul.f32 %v7294_v38, %v346_v56 }
  0x7c   : > { %v898_v10 = vadd.f32 %v7497_v24, %v877_v20  ;;  %v7798_v45 = vmul.f32 %v7296_v39, %v394_v1  ;;  %v899_v44 = vadd.f32 %v7494_v13, %v878_v49  ;;  %v7803_v0 = vmul.f32 %v7296_v39, %v395_v58 }
  0x7d   : > { %v900_v32 = vadd.f32 %v7497_v24, %v879_v31  ;;  %v510_v30 = vmul.f32 %v7302_v41, %v7619_v4  ;;  %v511_v21 = vmul.f32 %v7306_v43, %v7623_v47  ;;  %v512_v36 = vmul.f32 %v7302_v41, %v7647_v23 }
  0x7e   : > { %v909_v33 = vpack.c.bf16 %v898_v10, %v897_v16  ;;  %v513_v40 = vmul.f32 %v7306_v43, %v7649_v6  ;;  %v611_v18 = vmul.f32 %v10276_v17, %v7666_v22  ;;  %v612_v3 = vmul.f32 %v10278_v53, %v7669_v48 }
  0x7f   : > { %v910_v51 = vpack.c.bf16 %v900_v32, %v899_v44  ;;  %v526_v52 = vadd.f32 %v510_v30, %v7677_v55  ;;  %v527_v4 = vadd.f32 %v511_v21, %v7687_v26  ;;  %v528_v47 = vadd.f32 %v512_v36, %v7691_v63  ;;  %v10287_v26 = vld [vmem:[#allocation25_spill] sm:$0xff]  ;;  %v10288_v63 = vld [vmem:[#allocation26_spill] sm:$0xff] }
  0x80   : > { %917 = vst [vmem:[#allocation4 + $0x20] sm:$0xff] %v909_v33  ;;  %v529_v12 = vadd.f32 %v513_v40, %v7701_v8  ;;  %v613_v42 = vmul.f32 %v10276_v17, %v361_v57  ;;  %v614_v55 = vmul.f32 %v10278_v53, %v362_v25  ;;  %v661_v22 = vmul.f32 %v10284_v54, %v7647_v23 }
  0x81   : > { %918 = vst [vmem:[#allocation4 + $0x28] sm:$0xff] %v910_v51  ;;  %v577_v14 = vadd.f32 %v7713_v15, %v526_v52  ;;  %v662_v48 = vmul.f32 %v10285_v2, %v7649_v6  ;;  %v578_v35 = vadd.f32 %v10286_v28, %v527_v4  ;;  %v579_v5 = vadd.f32 %v10287_v26, %v528_v47  ;;  %v6777_v47 = vld [vmem:[%s10194_s3 + $0x174] sm:$0xf] }
  0x82   : > { %v580_v46 = vadd.f32 %v10288_v63, %v529_v12  ;;  %v663_v8 = vmul.f32 %v10284_v54, %v7763_v50  ;;  %v664_v15 = vmul.f32 %v10285_v2, %v7767_v34  ;;  %v711_v20 = vmul.f32 %v7342_v59, %v7694_v9  ;;  %v6389_v63 = vld [vmem:[%s10194_s3 + $0x170] sm:$0xf] }
  0x83   : > { %v627_v37 = vadd.f32 %v611_v18, %v577_v14  ;;  %v712_v23 = vmul.f32 %v7345_v60, %v7697_v7  ;;  %v628_v6 = vadd.f32 %v612_v3, %v578_v35  ;;  %v629_v56 = vadd.f32 %v613_v42, %v579_v5  ;;  %v6455_v5 = vld [vmem:[%s10194_s3 + $0x1f8] sm:$0xf0] }
  0x84   : > { %v630_v1 = vadd.f32 %v614_v55, %v580_v46  ;;  %v713_v49 = vmul.f32 %v7342_v59, %v7798_v45  ;;  %v714_v58 = vmul.f32 %v7345_v60, %v7803_v0  ;;  %v762_v16 = vmul.f32 %v7446_v61, %v361_v57  ;;  %v6793_v55 = vld [vmem:[%s10194_s3 + $0x1f4] sm:$0xf]  ;;  %v6778_v46 = vld [vmem:[%s10194_s3 + $0x174] sm:$0xf0] }
  0x85   : > { %v677_v31 = vadd.f32 %v661_v22, %v627_v37  ;;  %v763_v10 = vmul.f32 %v7454_v11, %v362_v25  ;;  %v678_v44 = vadd.f32 %v662_v48, %v628_v6  ;;  %v679_v32 = vadd.f32 %v663_v8, %v629_v56  ;;  %v6022_v22 = vld [vmem:[%s7325_s10 + $0x80] sm:$0xff] }
  0x86   : > { %v680_v9 = vadd.f32 %v664_v15, %v630_v1  ;;  %v7846_v30 = vmul.f32 0.0, %v7446_v61  ;;  %v7849_v36 = vmul.f32 0.0, %v7454_v11  ;;  %v813_v40 = vmul.f32 %v7457_v27, %v7763_v50  ;;  %v6023_v1 = vld [vmem:[%s7325_s10 + $0x88] sm:$0xff] }
  0x87   : > { %v6056_v7 = vld [vmem:[#allocation4 + $0x20] sm:$0xf]  ;;  %v6703_v33 = vld [vmem:[#allocation4 + $0x24] sm:$0xf]  ;;  %v727_v21 = vadd.f32 %v711_v20, %v677_v31  ;;  %v814_v57 = vmul.f32 %v7471_v29, %v7767_v34  ;;  %v728_v52 = vadd.f32 %v712_v23, %v678_v44  ;;  %v729_v18 = vadd.f32 %v713_v49, %v679_v32  ;;  %v6391_v34 = vld [vmem:[%s10194_s3 + $0x178] sm:$0xf0] }
  0x88   : > { %10289 = vst [vmem:[#allocation19_spill] sm:$0xff] %v7846_v30  ;;  %v6704_v25 = vld [vmem:[#allocation4 + $0x24] sm:$0xf0]  ;;  %v6058_v51 = vld [vmem:[#allocation4 + $0x28] sm:$0xf0]  ;;  %v730_v3 = vadd.f32 %v714_v58, %v680_v9  ;;  %v7856_v4 = vmul.f32 0.0, %v7457_v27  ;;  %v864_v26 = vmul.f32 %v7451_v62, %v7798_v45  ;;  %v865_v45 = vmul.f32 %v7465_v19, %v7803_v0 }
  0x89   : > { %10290 = vst [vmem:[#allocation20_spill] sm:$0xff] %v7849_v36  ;;  %v6057_v12 = vor.u32 %v6704_v25, %v6056_v7  ;;  %v6061_v42 = vor.u32 %v6703_v33, %v6058_v51  ;;  %v778_v14 = vadd.f32 %v762_v16, %v727_v21  ;;  %v7862_v50 = vmul.f32 0.0, %v7471_v29  ;;  %v6453_v20 = vld [vmem:[%s10194_s3 + $0x1f0] sm:$0xf]  ;;  %v6794_v23 = vld [vmem:[%s10194_s3 + $0x1f4] sm:$0xf0] }
  0x8a   : > { %10291 = vst [vmem:[#allocation21_spill] sm:$0xff] %v7856_v4  ;;  %v779_v48 = vadd.f32 %v763_v10, %v728_v52  ;;  %v780_v28 = vadd.f32 %v7846_v30, %v729_v18  ;;  %v781_v35 = vadd.f32 %v7849_v36, %v730_v3  ;;  %v7887_v37 = vmul.f32 0.0, %v7451_v62  ;;  %v6024_v49 = vld [vmem:[%s7325_s10 + $0x90] sm:$0xff]  ;;  %v6025_v31 = vld [vmem:[%s7325_s10 + $0x98] sm:$0xff]  ;;  %v6026_v9 = vld [vmem:[%s7325_s10 + $0xa0] sm:$0xff] }
  0x8b   : > { %10292 = vst [vmem:[#allocation22_spill] sm:$0xff] %v7862_v50  ;;  %1836 = vmatmul.bf16.gmra.mxu0 %v6057_v12  ;;  %1885 = vmatmul.bf16.gmra.mxu1 %v6061_v42  ;;  %v829_v8 = vadd.f32 %v813_v40, %v778_v14  ;;  %v7890_v15 = vmul.f32 0.0, %v7465_v19  ;;  %v7903_v58 = vmax.f32 %v6022_v22, 0.0  ;;  %v6394_v10 = vor.u32 %v6777_v47, %v6391_v34 }
  0x8c   : > { %10293 = vst [vmem:[#allocation23_spill] sm:$0xff] %v7887_v37  ;;  %1934 = vmatmul.bf16.gmra.mxu2 %v6057_v12  ;;  %1983 = vmatmul.bf16.gmra.mxu3 %v6061_v42  ;;  %v830_v6 = vadd.f32 %v814_v57, %v779_v48  ;;  %v831_v0 = vadd.f32 %v7856_v4, %v780_v28  ;;  %v6027_v57 = vld [vmem:[%s7325_s10 + $0xa8] sm:$0xff]  ;;  %v7910_v51 = vmax.f32 %v6023_v1, 0.0  ;;  %v7912_v52 = vmax.f32 %v6024_v49, 0.0 }
  0x8d   : > { %10294 = vst [vmem:[#allocation15_spill] sm:$0xff] %v7890_v15  ;;  %v832_v56 = vadd.f32 %v7862_v50, %v781_v35  ;;  %v880_v16 = vadd.f32 %v864_v26, %v829_v8  ;;  %v6458_v44 = vor.u32 %v6793_v55, %v6455_v5  ;;  %v6390_v32 = vor.u32 %v6778_v46, %v6389_v63 }
  0x8e   : > { %v881_v7 = vadd.f32 %v865_v45, %v830_v6  ;;  %v882_v33 = vadd.f32 %v7887_v37, %v831_v0  ;;  %v6454_v40 = vor.u32 %v6794_v23, %v6453_v20  ;;  %3756 = vmatpush.bf16.msrb.mxu2 %v6394_v10  ;;  %v7914_v18 = vmax.f32 %v6025_v31, 0.0 }
  0x8f   : > { %v883_v21 = vadd.f32 %v7890_v15, %v832_v56  ;;  %v901_v25 = vadd.f32 %v7494_v13, %v880_v16  ;;  %3805 = vmatpush.bf16.msrb.mxu3 %v6458_v44  ;;  %3658 = vmatpush.bf16.msrb.mxu0 %v6390_v32  ;;  %v7919_v42 = vmax.f32 %v6026_v9, 0.0  ;;  %v7921_v14 = vmax.f32 %v6027_v57, 0.0  ;;  %v10295_v44 = vld [vmem:[#allocation8_spill] sm:$0xff] }
  0x90   : > { %v902_v3 = vadd.f32 %v7497_v24, %v881_v7  ;;  %v903_v47 = vadd.f32 %v7494_v13, %v882_v33  ;;  %3707 = vmatpush.bf16.msrb.mxu1 %v6454_v40  ;;  %v970_v34 = vrot.slane %v7903_v58, 7  ;;  %v971_v55 = vrot.slane %v7910_v51, 7 }
  0x91   : > { %v904_v12 = vadd.f32 %v7497_v24, %v883_v21  ;;  %v972_v22 = vrot.slane %v7912_v52, 7  ;;  %v973_v35 = vrot.slane %v7914_v18, 7  ;;  %v974_v26 = vrot.slane %v7919_v42, 7  ;;  %v10296_v21 = vld [vmem:[#allocation9_spill] sm:$0xff] }
  0x92   : > { %v911_v48 = vpack.c.bf16 %v902_v3, %v901_v25  ;;  %v975_v5 = vrot.slane %v7921_v14, 7  ;;  %v986_v63 = vmul.f32 %v7294_v38, %v970_v34  ;;  %v987_v46 = vmul.f32 %v7294_v38, %v971_v55 }
  0x93   : > { %v912_v28 = vpack.c.bf16 %v904_v12, %v903_v47  ;;  %v7932_v8 = vmul.f32 %v7294_v38, %v972_v22  ;;  %v7935_v45 = vmul.f32 %v7294_v38, %v973_v35  ;;  %v7938_v20 = vmul.f32 %v7294_v38, %v974_v26  ;;  %v10299_v22 = vld [vmem:[#allocation10_spill] sm:$0xff] }
  0x94   : > { %919 = vst [vmem:[#allocation4 + $0x30] sm:$0xff] %v911_v48  ;;  %v1018_v23 = vrot.slane %v7903_v58, 1  ;;  %v1019_v6 = vrot.slane %v7910_v51, 1  ;;  %v7943_v0 = vmul.f32 %v7294_v38, %v975_v5  ;;  %v1020_v56 = vrot.slane %v7912_v52, 1 }
  0x95   : > { %920 = vst [vmem:[#allocation4 + $0x38] sm:$0xff] %v912_v28  ;;  %v1021_v1 = vrot.slane %v7914_v18, 1  ;;  %v1022_v49 = vrot.slane %v7919_v42, 1  ;;  %v1023_v31 = vrot.slane %v7921_v14, 1  ;;  %v1084_v32 = vmul.f32 %v986_v63, %v10295_v44  ;;  %v10300_v28 = vld [vmem:[#allocation11_spill] sm:$0xff] }
  0x96   : > { %v1034_v16 = vmul.f32 %v7296_v39, %v1018_v23  ;;  %v1035_v10 = vmul.f32 %v7296_v39, %v1019_v6  ;;  %v7953_v9 = vmul.f32 %v7296_v39, %v1020_v56  ;;  %v1085_v40 = vmul.f32 %v987_v46, %v10296_v21 }
  0x97   : > { %v7956_v7 = vmul.f32 %v7296_v39, %v1021_v1  ;;  %v7959_v33 = vmul.f32 %v7296_v39, %v1022_v49  ;;  %v7963_v57 = vmul.f32 %v7296_v39, %v1023_v31  ;;  %v7967_v25 = vmul.f32 %v7932_v8, %v10295_v44 }
  0x98   : > { %v7971_v3 = vmul.f32 %v7935_v45, %v10296_v21  ;;  %v7975_v47 = vmul.f32 %v7938_v20, %v10295_v44  ;;  %v7979_v12 = vmul.f32 %v7943_v0, %v10296_v21  ;;  %v1132_v34 = vmul.f32 %v7903_v58, %v7302_v41 }
  0x99   : > { %v1133_v55 = vmul.f32 %v7910_v51, %v7306_v43  ;;  %v1180_v48 = vmul.f32 %v1034_v16, %v10299_v22  ;;  %v1181_v35 = vmul.f32 %v1035_v10, %v10300_v28  ;;  %v7989_v26 = vmul.f32 %v7953_v9, %v10299_v22 }
  0x9a   : > { %10297 = vst [vmem:[#allocation24_spill] sm:$0xff] %v7975_v47  ;;  %v7993_v5 = vmul.f32 %v7956_v7, %v10300_v28  ;;  %v7997_v23 = vmul.f32 %v7959_v33, %v10299_v22  ;;  %v1148_v1 = vadd.f32 %v1132_v34, %v1084_v32  ;;  %v8001_v31 = vmul.f32 %v7963_v57, %v10300_v28 }
  0x9b   : > { %10298 = vst [vmem:[#allocation25_spill] sm:$0xff] %v7979_v12  ;;  %v6064_v6 = vld [vmem:[#allocation4 + $0x30] sm:$0xf]  ;;  %v6705_v56 = vld [vmem:[#allocation4 + $0x34] sm:$0xf]  ;;  %v1149_v49 = vadd.f32 %v1133_v55, %v1085_v40  ;;  %v1226_v15 = vmul.f32 %v986_v63, %v10276_v17  ;;  %v1227_v4 = vmul.f32 %v987_v46, %v10278_v53  ;;  %v1228_v36 = vmul.f32 %v7932_v8, %v10276_v17  ;;  %v10305_v63 = vld [vmem:[#allocation16_spill] sm:$0xff] }
  0x9c   : > { %10301 = vst [vmem:[#allocation26_spill] sm:$0xff] %v7989_v26  ;;  %v6706_v37 = vld [vmem:[#allocation4 + $0x34] sm:$0xf0]  ;;  %v6066_v50 = vld [vmem:[#allocation4 + $0x38] sm:$0xf0]  ;;  %v1229_v30 = vmul.f32 %v7935_v45, %v10278_v53  ;;  %v1274_v32 = vmul.f32 %v7903_v58, %v10284_v54  ;;  %v6028_v40 = vld [vmem:[%s7325_s10 + $0xb0] sm:$0xff]  ;;  %v1275_v46 = vmul.f32 %v7910_v51, %v10285_v2  ;;  %v1276_v17 = vmul.f32 %v7912_v52, %v10284_v54 }
  0x9d   : > { %10302 = vst [vmem:[#allocation8_spill] sm:$0xff] %v7993_v5  ;;  %v6065_v34 = vor.u32 %v6706_v37, %v6064_v6  ;;  %v6069_v55 = vor.u32 %v6705_v56, %v6066_v50  ;;  %v6029_v5 = vld [vmem:[%s7325_s10 + $0xb8] sm:$0xff]  ;;  %v1242_v26 = vadd.f32 %v1226_v15, %v10305_v63  ;;  %v10306_v12 = vld [vmem:[#allocation17_spill] sm:$0xff]  ;;  %v1277_v50 = vmul.f32 %v7914_v18, %v10285_v2 }
  0x9e   : > { %10303 = vst [vmem:[#allocation9_spill] sm:$0xff] %v7997_v23  ;;  %v1196_v23 = vadd.f32 %v1180_v48, %v1148_v1  ;;  %v1243_v47 = vadd.f32 %v1227_v4, %v10306_v12  ;;  %v8021_v37 = vmax.f32 %v6028_v40, 0.0  ;;  %v1322_v4 = vmul.f32 %v1034_v16, %v7342_v59  ;;  %v6447_v63 = vld [vmem:[%s10194_s3 + $0x1e8] sm:$0xf0] }
  0x9f   : > { %10304 = vst [vmem:[#allocation10_spill] sm:$0xff] %v8001_v31  ;;  %v1197_v31 = vadd.f32 %v1181_v35, %v1149_v49  ;;  %1841 = vmatmul.bf16.gmra.mxu0 %v6065_v34  ;;  %1890 = vmatmul.bf16.gmra.mxu1 %v6069_v55  ;;  %v1290_v15 = vadd.f32 %v1274_v32, %v1242_v26  ;;  %v8024_v12 = vmax.f32 %v6029_v5, 0.0 }
  0xa0   : > { %v1244_v53 = vadd.f32 %v1228_v36, %v1196_v23  ;;  %1939 = vmatmul.bf16.gmra.mxu2 %v6065_v34  ;;  %1988 = vmatmul.bf16.gmra.mxu3 %v6069_v55  ;;  %v1291_v48 = vadd.f32 %v1275_v46, %v1243_v47  ;;  %v1323_v6 = vmul.f32 %v1035_v10, %v7345_v60  ;;  %v6791_v55 = vld [vmem:[%s10194_s3 + $0x1e4] sm:$0xf]  ;;  %v6381_v46 = vld [vmem:[%s10194_s3 + $0x160] sm:$0xf] }
  0xa1   : > { %v1245_v58 = vadd.f32 %v1229_v30, %v1197_v31  ;;  %v1324_v30 = vmul.f32 %v7953_v9, %v7342_v59  ;;  %v1325_v36 = vmul.f32 %v7956_v7, %v7345_v60  ;;  %v1338_v23 = vadd.f32 %v1322_v4, %v1290_v15  ;;  %v6776_v4 = vld [vmem:[%s10194_s3 + $0x164] sm:$0xf0] }
  0xa2   : > { %v1292_v51 = vadd.f32 %v1276_v17, %v1244_v53  ;;  %v1370_v56 = vmul.f32 %v7932_v8, %v7446_v61  ;;  %v1371_v47 = vmul.f32 %v7935_v45, %v7454_v11  ;;  %v1339_v16 = vadd.f32 %v1323_v6, %v1291_v48  ;;  %v6775_v8 = vld [vmem:[%s10194_s3 + $0x164] sm:$0xf]  ;;  %v6383_v45 = vld [vmem:[%s10194_s3 + $0x168] sm:$0xf0] }
  0xa3   : > { %v1293_v35 = vadd.f32 %v1277_v50, %v1245_v58  ;;  %v1372_v17 = vmul.f32 %v7938_v20, %v7446_v61  ;;  %v1373_v53 = vmul.f32 %v7943_v0, %v7454_v11  ;;  %v1418_v1 = vmul.f32 %v7912_v52, %v7457_v27 }
  0xa4   : > { %v1340_v26 = vadd.f32 %v1324_v30, %v1292_v51  ;;  %v1386_v5 = vadd.f32 %v1370_v56, %v1338_v23  ;;  %v1419_v49 = vmul.f32 %v7914_v18, %v7471_v29  ;;  %v1387_v31 = vadd.f32 %v1371_v47, %v1339_v16  ;;  %v6445_v51 = vld [vmem:[%s10194_s3 + $0x1e0] sm:$0xf]  ;;  %v6031_v23 = vld [vmem:[%s7325_s10 + $0xc8] sm:$0xff] }
  0xa5   : > { %v1341_v10 = vadd.f32 %v1325_v36, %v1293_v35  ;;  %v1420_v40 = vmul.f32 %v7919_v42, %v7457_v27  ;;  %v1421_v34 = vmul.f32 %v7921_v14, %v7471_v29  ;;  %v1466_v15 = vmul.f32 %v7451_v62, %v7953_v9  ;;  %v6792_v35 = vld [vmem:[%s10194_s3 + $0x1e4] sm:$0xf0]  ;;  %v6030_v36 = vld [vmem:[%s7325_s10 + $0xc0] sm:$0xff] }
  0xa6   : > { %v1388_v32 = vadd.f32 %v1372_v17, %v1340_v26  ;;  %v1434_v50 = vadd.f32 %v1418_v1, %v1386_v5  ;;  %v1467_v48 = vmul.f32 %v7465_v19, %v7956_v7  ;;  %v1435_v6 = vadd.f32 %v1419_v49, %v1387_v31 }
  0xa7   : > { %v1389_v58 = vadd.f32 %v1373_v53, %v1341_v10  ;;  %v1468_v9 = vmul.f32 %v7451_v62, %v7959_v33  ;;  %v1469_v7 = vmul.f32 %v7465_v19, %v7963_v57  ;;  %v6386_v16 = vor.u32 %v6775_v8, %v6383_v45 }
  0xa8   : > { %v1436_v30 = vadd.f32 %v1420_v40, %v1388_v32  ;;  %v1482_v47 = vadd.f32 %v1466_v15, %v1434_v50  ;;  %v6450_v26 = vor.u32 %v6791_v55, %v6447_v63  ;;  %v1483_v17 = vadd.f32 %v1467_v48, %v1435_v6 }
  0xa9   : > { %v1437_v56 = vadd.f32 %v1421_v34, %v1389_v58  ;;  %v6382_v10 = vor.u32 %v6776_v4, %v6381_v46  ;;  %v6446_v5 = vor.u32 %v6792_v35, %v6445_v51  ;;  %3757 = vmatpush.bf16.msrb.mxu2 %v6386_v16  ;;  %v8082_v31 = vmax.f32 %v6030_v36, 0.0 }
  0xaa   : > { %v1484_v53 = vadd.f32 %v1468_v9, %v1436_v30  ;;  %v1498_v49 = vadd.f32 %v1482_v47, %v7494_v13  ;;  %3806 = vmatpush.bf16.msrb.mxu3 %v6450_v26  ;;  %v8084_v62 = vmax.f32 %v6031_v23, 0.0  ;;  %v1499_v19 = vadd.f32 %v1483_v17, %v7497_v24 }
  0xab   : > { %v1485_v1 = vadd.f32 %v1469_v7, %v1437_v56  ;;  %3659 = vmatpush.bf16.msrb.mxu0 %v6382_v10  ;;  %3708 = vmatpush.bf16.msrb.mxu1 %v6446_v5  ;;  %v976_v8 = vrot.slane %v8021_v37, 7  ;;  %v977_v45 = vrot.slane %v8024_v12, 7  ;;  %v978_v34 = vrot.slane %v8082_v31, 7 }
  0xac   : > { %v1500_v32 = vadd.f32 %v1484_v53, %v7494_v13  ;;  %v979_v55 = vrot.slane %v8084_v62, 7  ;;  %v1024_v63 = vrot.slane %v8021_v37, 1  ;;  %v1514_v46 = vpack.c.bf16 %v1499_v19, %v1498_v49  ;;  %v10310_v19 = vld [vmem:[#allocation24_spill] sm:$0xff] }
  0xad   : > { %v1501_v40 = vadd.f32 %v1485_v1, %v7497_v24  ;;  %v8095_v58 = vmul.f32 %v7294_v38, %v976_v8  ;;  %v8098_v50 = vmul.f32 %v7294_v38, %v977_v45  ;;  %v1025_v15 = vrot.slane %v8024_v12, 1  ;;  %v10312_v45 = vld [vmem:[#allocation25_spill] sm:$0xff] }
  0xae   : > { %v8102_v4 = vmul.f32 %v7294_v38, %v978_v34  ;;  %v8105_v51 = vmul.f32 %v7294_v38, %v979_v55  ;;  %v1026_v35 = vrot.slane %v8082_v31, 1  ;;  %1522 = vst [vmem:[#allocation4 + $0x40] sm:$0xff] %v1514_v46  ;;  %v1027_v6 = vrot.slane %v8084_v62, 1  ;;  %v10313_v34 = vld [vmem:[#allocation12_spill] sm:$0xff] }
  0xaf   : > { %v1515_v48 = vpack.c.bf16 %v1501_v40, %v1500_v32  ;;  %v8110_v30 = vmul.f32 %v7296_v39, %v1024_v63  ;;  %v8113_v9 = vmul.f32 %v7296_v39, %v1025_v15  ;;  %v8117_v7 = vmul.f32 %v8095_v58, %v10295_v44  ;;  %v10314_v63 = vld [vmem:[#allocation13_spill] sm:$0xff] }
  0xb0   : > { %v8120_v36 = vmul.f32 %v7296_v39, %v1026_v35  ;;  %v8124_v23 = vmul.f32 %v8098_v50, %v10296_v21  ;;  %v8128_v56 = vmul.f32 %v8102_v4, %v10295_v44  ;;  %v8132_v47 = vmul.f32 %v8105_v51, %v10296_v21 }
  0xb1   : > { %1523 = vst [vmem:[#allocation4 + $0x48] sm:$0xff] %v1515_v48  ;;  %v8135_v16 = vmul.f32 %v7296_v39, %v1027_v6  ;;  %v1134_v26 = vmul.f32 %v7912_v52, %v7302_v41  ;;  %v1135_v17 = vmul.f32 %v7914_v18, %v7306_v43  ;;  %v1136_v53 = vmul.f32 %v7919_v42, %v7302_v41  ;;  %v10317_v6 = vld [vmem:[#allocation9_spill] sm:$0xff] }
  0xb2   : > { %v1137_v10 = vmul.f32 %v7921_v14, %v7306_v43  ;;  %v8147_v5 = vmul.f32 %v8110_v30, %v10299_v22  ;;  %v8151_v1 = vmul.f32 %v8113_v9, %v10300_v28  ;;  %v8155_v52 = vmul.f32 %v8120_v36, %v10299_v22 }
  0xb3   : > { %v1150_v18 = vadd.f32 %v1134_v26, %v7967_v25  ;;  %v1151_v49 = vadd.f32 %v1135_v17, %v7971_v3  ;;  %v1152_v32 = vadd.f32 %v1136_v53, %v10310_v19  ;;  %v8162_v8 = vmul.f32 %v8135_v16, %v10300_v28  ;;  %v10315_v25 = vld [vmem:[#allocation26_spill] sm:$0xff]  ;;  %v10316_v3 = vld [vmem:[#allocation8_spill] sm:$0xff] }
  0xb4   : > { %10307 = vst [vmem:[#allocation11_spill] sm:$0xff] %v8147_v5  ;;  %v1153_v40 = vadd.f32 %v1137_v10, %v10312_v45  ;;  %v1230_v55 = vmul.f32 %v7938_v20, %v10313_v34  ;;  %v1231_v46 = vmul.f32 %v7943_v0, %v10314_v63  ;;  %v1232_v15 = vmul.f32 %v8095_v58, %v10313_v34  ;;  %v10318_v19 = vld [vmem:[#allocation10_spill] sm:$0xff]  ;;  %v6033_v5 = vld [vmem:[%s7325_s10 + $0xd8] sm:$0xff] }
  0xb5   : > { %10308 = vst [vmem:[#allocation16_spill] sm:$0xff] %v8151_v1  ;;  %v1198_v48 = vadd.f32 %v10315_v25, %v1150_v18  ;;  %v1199_v35 = vadd.f32 %v10316_v3, %v1151_v49  ;;  %v1200_v26 = vadd.f32 %v10317_v6, %v1152_v32  ;;  %v1233_v17 = vmul.f32 %v8098_v50, %v10314_v63  ;;  %v6072_v53 = vld [vmem:[#allocation4 + $0x40] sm:$0xf]  ;;  %v6707_v10 = vld [vmem:[#allocation4 + $0x44] sm:$0xf] }
  0xb6   : > { %10309 = vst [vmem:[#allocation17_spill] sm:$0xff] %v8155_v52  ;;  %v1201_v20 = vadd.f32 %v10318_v19, %v1153_v40  ;;  %v1278_v0 = vmul.f32 %v7919_v42, %v10284_v54  ;;  %v1279_v45 = vmul.f32 %v7921_v14, %v10285_v2  ;;  %v1280_v18 = vmul.f32 %v8021_v37, %v10284_v54  ;;  %v6032_v52 = vld [vmem:[%s7325_s10 + $0xd0] sm:$0xff] }
  0xb7   : > { %10311 = vst [vmem:[#allocation24_spill] sm:$0xff] %v8162_v8  ;;  %v1246_v32 = vadd.f32 %v1230_v55, %v1198_v48  ;;  %v1247_v3 = vadd.f32 %v1231_v46, %v1199_v35  ;;  %v1248_v6 = vadd.f32 %v1232_v15, %v1200_v26  ;;  %v1281_v8 = vmul.f32 %v8024_v12, %v10285_v2 }
  0xb8   : > { %v6708_v49 = vld [vmem:[#allocation4 + $0x44] sm:$0xf0]  ;;  %v6074_v25 = vld [vmem:[#allocation4 + $0x48] sm:$0xf0]  ;;  %v1249_v19 = vadd.f32 %v1233_v17, %v1201_v20  ;;  %v1326_v42 = vmul.f32 %v7959_v33, %v7342_v59  ;;  %v1327_v54 = vmul.f32 %v7963_v57, %v7345_v60  ;;  %v1328_v46 = vmul.f32 %v8110_v30, %v7342_v59 }
  0xb9   : > { %v6073_v1 = vor.u32 %v6708_v49, %v6072_v53  ;;  %v6077_v40 = vor.u32 %v6707_v10, %v6074_v25  ;;  %v1294_v14 = vadd.f32 %v1278_v0, %v1246_v32  ;;  %v1295_v63 = vadd.f32 %v1279_v45, %v1247_v3  ;;  %v6789_v45 = vld [vmem:[%s10194_s3 + $0x1d4] sm:$0xf]  ;;  %v6373_v49 = vld [vmem:[%s10194_s3 + $0x150] sm:$0xf] }
  0xba   : > { %v1296_v34 = vadd.f32 %v1280_v18, %v1248_v6  ;;  %v1297_v55 = vadd.f32 %v1281_v8, %v1249_v19  ;;  %v1329_v15 = vmul.f32 %v8113_v9, %v7345_v60  ;;  %v8195_v48 = vmax.f32 %v6032_v52, 0.0  ;;  %v6439_v18 = vld [vmem:[%s10194_s3 + $0x1d8] sm:$0xf0]  ;;  %v8233_v3 = vld [vmem:[%s10192_s1 + $0x10] ss:$0 sm:$0xff] }
  0xbb   : > { %1846 = vmatmul.bf16.gmra.mxu0 %v6073_v1  ;;  %1895 = vmatmul.bf16.gmra.mxu1 %v6077_v40  ;;  %v1342_v33 = vadd.f32 %v1326_v42, %v1294_v14  ;;  %v1343_v35 = vadd.f32 %v1327_v54, %v1295_v63  ;;  %v1374_v26 = vmul.f32 %v8095_v58, %v7446_v61  ;;  %v8199_v17 = vmax.f32 %v6033_v5, 0.0  ;;  %v6773_v5 = vld [vmem:[%s10194_s3 + $0x154] sm:$0xf]  ;;  %v6774_v42 = vld [vmem:[%s10194_s3 + $0x154] sm:$0xf0] }
  0xbc   : > { %1944 = vmatmul.bf16.gmra.mxu2 %v6073_v1  ;;  %1993 = vmatmul.bf16.gmra.mxu3 %v6077_v40  ;;  %v1344_v57 = vadd.f32 %v1328_v46, %v1296_v34  ;;  %v1345_v53 = vadd.f32 %v1329_v15, %v1297_v55  ;;  %v1375_v8 = vmul.f32 %v8098_v50, %v7454_v11  ;;  %v6375_v50 = vld [vmem:[%s10194_s3 + $0x158] sm:$0xf0]  ;;  %v8240_v40 = vld [vmem:[%s10192_s1 + $0x18] ss:$0 sm:$0xff]  ;;  %v6437_v14 = vld [vmem:[%s10194_s3 + $0x1d0] sm:$0xf] }
  0xbd   : > { %v1376_v10 = vmul.f32 %v8102_v4, %v7446_v61  ;;  %v1377_v52 = vmul.f32 %v8105_v51, %v7454_v11  ;;  %v1390_v1 = vadd.f32 %v1374_v26, %v1342_v33  ;;  %v1422_v54 = vmul.f32 %v8021_v37, %v7457_v27  ;;  %v6034_v33 = vld [vmem:[%s7325_s10 + $0xe0] sm:$0xff] }
  0xbe   : > { %v1423_v58 = vmul.f32 %v8024_v12, %v7471_v29  ;;  %v1391_v34 = vadd.f32 %v1375_v8, %v1343_v35  ;;  %v1424_v20 = vmul.f32 %v8082_v31, %v7457_v27  ;;  %v1425_v0 = vmul.f32 %v8084_v62, %v7471_v29  ;;  %v6035_v35 = vld [vmem:[%s7325_s10 + $0xe8] sm:$0xff] }
  0xbf   : > { %v1392_v63 = vadd.f32 %v1376_v10, %v1344_v57  ;;  %v1393_v25 = vadd.f32 %v1377_v52, %v1345_v53  ;;  %v1438_v32 = vadd.f32 %v1422_v54, %v1390_v1  ;;  %v1470_v6 = vmul.f32 %v8233_v3, %v8110_v30  ;;  %v6790_v30 = vld [vmem:[%s10194_s3 + $0x1d4] sm:$0xf0] }
  0xc0   : > { %v1471_v19 = vmul.f32 %v8240_v40, %v8113_v9  ;;  %v1439_v55 = vadd.f32 %v1423_v58, %v1391_v34  ;;  %v1472_v15 = vmul.f32 %v8233_v3, %v8120_v36  ;;  %v1473_v9 = vmul.f32 %v8240_v40, %v8135_v16 }
  0xc1   : > { %v1440_v46 = vadd.f32 %v1424_v20, %v1392_v63  ;;  %v1441_v26 = vadd.f32 %v1425_v0, %v1393_v25  ;;  %v1486_v57 = vadd.f32 %v1470_v6, %v1438_v32  ;;  %v6378_v53 = vor.u32 %v6773_v5, %v6375_v50 }
  0xc2   : > { %v6442_v8 = vor.u32 %v6789_v45, %v6439_v18  ;;  %v1487_v10 = vadd.f32 %v1471_v19, %v1439_v55  ;;  %v6374_v1 = vor.u32 %v6774_v42, %v6373_v49  ;;  %v6438_v54 = vor.u32 %v6790_v30, %v6437_v14 }
  0xc3   : > { %v1488_v52 = vadd.f32 %v1472_v15, %v1440_v46  ;;  %v1489_v29 = vadd.f32 %v1473_v9, %v1441_v26  ;;  %v1502_v58 = vadd.f32 %v1486_v57, %v7494_v13  ;;  %3758 = vmatpush.bf16.msrb.mxu2 %v6378_v53  ;;  %v8260_v34 = vmax.f32 %v6034_v33, 0.0 }
  0xc4   : > { %3807 = vmatpush.bf16.msrb.mxu3 %v6442_v8  ;;  %v8262_v63 = vmax.f32 %v6035_v35, 0.0  ;;  %v1503_v20 = vadd.f32 %v1487_v10, %v7497_v24  ;;  %3660 = vmatpush.bf16.msrb.mxu0 %v6374_v1  ;;  %v980_v5 = vrot.slane %v8195_v48, 7  ;;  %v981_v50 = vrot.slane %v8199_v17, 7 }
  0xc5   : > { %v1504_v0 = vadd.f32 %v1488_v52, %v7494_v13  ;;  %3709 = vmatpush.bf16.msrb.mxu1 %v6438_v54  ;;  %v1505_v45 = vadd.f32 %v1489_v29, %v7497_v24  ;;  %v982_v18 = vrot.slane %v8260_v34, 7  ;;  %v1028_v25 = vrot.slane %v8195_v48, 1 }
  0xc6   : > { %v983_v49 = vrot.slane %v8262_v63, 7  ;;  %v1516_v32 = vpack.c.bf16 %v1503_v20, %v1502_v58  ;;  %v8273_v6 = vmul.f32 %v7294_v38, %v980_v5  ;;  %v8276_v19 = vmul.f32 %v7294_v38, %v981_v50  ;;  %v10322_v50 = vld [vmem:[#allocation12_spill] sm:$0xff] }
  0xc7   : > { %v1029_v42 = vrot.slane %v8199_v17, 1  ;;  %v1517_v14 = vpack.c.bf16 %v1505_v45, %v1504_v0  ;;  %v8280_v30 = vmul.f32 %v7294_v38, %v982_v18  ;;  %v1030_v55 = vrot.slane %v8260_v34, 1  ;;  %v10323_v18 = vld [vmem:[#allocation13_spill] sm:$0xff] }
  0xc8   : > { %v8283_v29 = vmul.f32 %v7294_v38, %v983_v49  ;;  %1524 = vst [vmem:[#allocation4 + $0x50] sm:$0xff] %v1516_v32  ;;  %v1031_v46 = vrot.slane %v8262_v63, 1  ;;  %v8288_v15 = vmul.f32 %v7296_v39, %v1028_v25  ;;  %v8295_v33 = vmul.f32 %v8273_v6, %v10295_v44  ;;  %v10326_v32 = vld [vmem:[#allocation17_spill] sm:$0xff] }
  0xc9   : > { %v8291_v9 = vmul.f32 %v7296_v39, %v1029_v42  ;;  %1525 = vst [vmem:[#allocation4 + $0x58] sm:$0xff] %v1517_v14  ;;  %v8298_v35 = vmul.f32 %v7296_v39, %v1030_v55  ;;  %v8302_v26 = vmul.f32 %v8276_v19, %v10296_v21  ;;  %v8306_v57 = vmul.f32 %v8280_v30, %v10295_v44  ;;  %v10327_v55 = vld [vmem:[#allocation24_spill] sm:$0xff] }
  0xca   : > { %v8310_v53 = vmul.f32 %v8283_v29, %v10296_v21  ;;  %v8313_v8 = vmul.f32 %v7296_v39, %v1031_v46  ;;  %v1138_v10 = vmul.f32 %v8021_v37, %v7302_v41  ;;  %v1139_v52 = vmul.f32 %v8024_v12, %v7306_v43  ;;  %v10328_v46 = vld [vmem:[#allocation14_spill] sm:$0xff] }
  0xcb   : > { %v1140_v1 = vmul.f32 %v8082_v31, %v7302_v41  ;;  %v1141_v44 = vmul.f32 %v8084_v62, %v7306_v43  ;;  %v8325_v54 = vmul.f32 %v8288_v15, %v10299_v22  ;;  %v8329_v21 = vmul.f32 %v8291_v9, %v10300_v28 }
  0xcc   : > { %v8333_v37 = vmul.f32 %v8298_v35, %v10299_v22  ;;  %v1154_v12 = vadd.f32 %v1138_v10, %v8117_v7  ;;  %v1155_v58 = vadd.f32 %v1139_v52, %v8124_v23  ;;  %v8340_v0 = vmul.f32 %v8313_v8, %v10300_v28  ;;  %v10324_v7 = vld [vmem:[#allocation11_spill] sm:$0xff]  ;;  %v10325_v23 = vld [vmem:[#allocation16_spill] sm:$0xff] }
  0xcd   : > { %10319 = vst [vmem:[#allocation25_spill] sm:$0xff] %v8329_v21  ;;  %v1156_v20 = vadd.f32 %v1140_v1, %v8128_v56  ;;  %v1157_v5 = vadd.f32 %v1141_v44, %v8132_v47  ;;  %v1234_v45 = vmul.f32 %v8102_v4, %v10322_v50  ;;  %v1235_v49 = vmul.f32 %v8105_v51, %v10323_v18 }
  0xce   : > { %10320 = vst [vmem:[#allocation26_spill] sm:$0xff] %v8333_v37  ;;  %v1236_v22 = vmul.f32 %v8273_v6, %v10322_v50  ;;  %v1202_v25 = vadd.f32 %v10324_v7, %v1154_v12  ;;  %v1203_v56 = vadd.f32 %v10325_v23, %v1155_v58  ;;  %v1237_v28 = vmul.f32 %v8276_v19, %v10323_v18  ;;  %v6036_v23 = vld [vmem:[%s7325_s10 + $0xf0] sm:$0xff] }
  0xcf   : > { %10321 = vst [vmem:[#allocation8_spill] sm:$0xff] %v8340_v0  ;;  %v1204_v42 = vadd.f32 %v10326_v32, %v1156_v20  ;;  %v6080_v47 = vld [vmem:[#allocation4 + $0x50] sm:$0xf]  ;;  %v6709_v14 = vld [vmem:[#allocation4 + $0x54] sm:$0xf]  ;;  %v1205_v4 = vadd.f32 %v10327_v55, %v1157_v5  ;;  %v1282_v51 = vmul.f32 %v8082_v31, %v10328_v46  ;;  %v1283_v10 = vmul.f32 %v8084_v62, %v10285_v2  ;;  %v6037_v0 = vld [vmem:[%s7325_s10 + $0xf8] sm:$0xff] }
  0xd0   : > { %v1284_v52 = vmul.f32 %v8195_v48, %v10328_v46  ;;  %v6710_v1 = vld [vmem:[#allocation4 + $0x54] sm:$0xf0]  ;;  %v6082_v44 = vld [vmem:[#allocation4 + $0x58] sm:$0xf0]  ;;  %v1250_v12 = vadd.f32 %v1234_v45, %v1202_v25  ;;  %v1251_v58 = vadd.f32 %v1235_v49, %v1203_v56  ;;  %v1285_v7 = vmul.f32 %v8199_v17, %v10285_v2 }
  0xd1   : > { %v1252_v20 = vadd.f32 %v1236_v22, %v1204_v42  ;;  %v6081_v32 = vor.u32 %v6710_v1, %v6080_v47  ;;  %v6085_v5 = vor.u32 %v6709_v14, %v6082_v44  ;;  %v1253_v55 = vadd.f32 %v1237_v28, %v1205_v4 }
  0xd2   : > { %v1330_v31 = vmul.f32 %v8120_v36, %v7342_v59  ;;  %v1298_v62 = vadd.f32 %v1282_v51, %v1250_v12  ;;  %v1299_v37 = vadd.f32 %v1283_v10, %v1251_v58  ;;  %v1331_v46 = vmul.f32 %v8135_v16, %v7345_v60  ;;  %v6787_v12 = vld [vmem:[%s10194_s3 + $0x1c4] sm:$0xf]  ;;  %v6431_v58 = vld [vmem:[%s10194_s3 + $0x1c8] sm:$0xf0] }
  0xd3   : > { %v1300_v21 = vadd.f32 %v1284_v52, %v1252_v20  ;;  %1851 = vmatmul.bf16.gmra.mxu0 %v6081_v32  ;;  %1900 = vmatmul.bf16.gmra.mxu1 %v6085_v5  ;;  %v1301_v45 = vadd.f32 %v1285_v7, %v1253_v55  ;;  %v1332_v49 = vmul.f32 %v8288_v15, %v7342_v59  ;;  %v8373_v25 = vmax.f32 %v6036_v23, 0.0  ;;  %v6365_v20 = vld [vmem:[%s10194_s3 + $0x140] sm:$0xf]  ;;  %v6772_v55 = vld [vmem:[%s10194_s3 + $0x144] sm:$0xf0] }
  0xd4   : > { %v1333_v22 = vmul.f32 %v8291_v9, %v7345_v60  ;;  %1949 = vmatmul.bf16.gmra.mxu2 %v6081_v32  ;;  %1998 = vmatmul.bf16.gmra.mxu3 %v6085_v5  ;;  %v1346_v36 = vadd.f32 %v1330_v31, %v1298_v62  ;;  %v1347_v56 = vadd.f32 %v1331_v46, %v1299_v37  ;;  %v8377_v28 = vmax.f32 %v6037_v0, 0.0  ;;  %v10329_v46 = vld [vmem:[#allocation18_spill] sm:$0xff]  ;;  %v6429_v31 = vld [vmem:[%s10194_s3 + $0x1c0] sm:$0xf]  ;;  %v6788_v62 = vld [vmem:[%s10194_s3 + $0x1c4] sm:$0xf0] }
  0xd5   : > { %v1378_v42 = vmul.f32 %v8273_v6, %v7446_v61  ;;  %v1348_v16 = vadd.f32 %v1332_v49, %v1300_v21  ;;  %v1379_v14 = vmul.f32 %v8276_v19, %v7454_v11  ;;  %v1380_v4 = vmul.f32 %v8280_v30, %v7446_v61  ;;  %v6771_v21 = vld [vmem:[%s10194_s3 + $0x144] sm:$0xf]  ;;  %v6367_v19 = vld [vmem:[%s10194_s3 + $0x148] sm:$0xf0] }
  0xd6   : > { %v1349_v47 = vadd.f32 %v1333_v22, %v1301_v45  ;;  %v1381_v51 = vmul.f32 %v8283_v29, %v7454_v11  ;;  %v1426_v37 = vmul.f32 %v8195_v48, %v7457_v27  ;;  %v1427_v6 = vmul.f32 %v8199_v17, %v10329_v46 }
  0xd7   : > { %v1394_v10 = vadd.f32 %v1378_v42, %v1346_v36  ;;  %v1395_v0 = vadd.f32 %v1379_v14, %v1347_v56  ;;  %v1396_v52 = vadd.f32 %v1380_v4, %v1348_v16  ;;  %v1428_v1 = vmul.f32 %v8260_v34, %v7457_v27 }
  0xd8   : > { %v1429_v44 = vmul.f32 %v8262_v63, %v10329_v46  ;;  %v1397_v7 = vadd.f32 %v1381_v51, %v1349_v47  ;;  %v1474_v32 = vmul.f32 %v8233_v3, %v8288_v15  ;;  %v1475_v5 = vmul.f32 %v8240_v40, %v8291_v9 }
  0xd9   : > { %v1442_v23 = vadd.f32 %v1426_v37, %v1394_v10  ;;  %v1443_v45 = vadd.f32 %v1427_v6, %v1395_v0  ;;  %v1444_v49 = vadd.f32 %v1428_v1, %v1396_v52  ;;  %v1476_v15 = vmul.f32 %v8233_v3, %v8298_v35 }
  0xda   : > { %v1477_v9 = vmul.f32 %v8240_v40, %v8313_v8  ;;  %v1445_v22 = vadd.f32 %v1429_v44, %v1397_v7  ;;  %v6370_v56 = vor.u32 %v6771_v21, %v6367_v19  ;;  %v6434_v42 = vor.u32 %v6787_v12, %v6431_v58 }
  0xdb   : > { %v1490_v36 = vadd.f32 %v1474_v32, %v1442_v23  ;;  %v1491_v16 = vadd.f32 %v1475_v5, %v1443_v45  ;;  %v1492_v47 = vadd.f32 %v1476_v15, %v1444_v49  ;;  %v6366_v14 = vor.u32 %v6772_v55, %v6365_v20 }
  0xdc   : > { %v6430_v4 = vor.u32 %v6788_v62, %v6429_v31  ;;  %v1493_v51 = vadd.f32 %v1477_v9, %v1445_v22  ;;  %3759 = vmatpush.bf16.msrb.mxu2 %v6370_v56  ;;  %3808 = vmatpush.bf16.msrb.mxu3 %v6434_v42  ;;  %v984_v37 = vrot.slane %v8373_v25, 7  ;;  %v985_v6 = vrot.slane %v8377_v28, 7  ;;  %v10330_v9 = vld [vmem:[#allocation25_spill] sm:$0xff] }
  0xdd   : > { %v1506_v10 = vadd.f32 %v1490_v36, %v7494_v13  ;;  %v1507_v0 = vadd.f32 %v1491_v16, %v7497_v24  ;;  %v1508_v52 = vadd.f32 %v1492_v47, %v7494_v13  ;;  %3661 = vmatpush.bf16.msrb.mxu0 %v6366_v14  ;;  %v1032_v21 = vrot.slane %v8373_v25, 1  ;;  %v6769_v47 = vld [vmem:[%s10194_s3 + $0x134] sm:$0xf]  ;;  %v6359_v14 = vld [vmem:[%s10194_s3 + $0x138] sm:$0xf0] }
  0xde   : > { %3710 = vmatpush.bf16.msrb.mxu1 %v6430_v4  ;;  %v1033_v19 = vrot.slane %v8377_v28, 1  ;;  %v1509_v1 = vadd.f32 %v1493_v51, %v7497_v24  ;;  %v1000_v44 = vmul.f32 %v7294_v38, %v984_v37  ;;  %v1001_v12 = vmul.f32 %v7294_v38, %v985_v6 }
  0xdf   : > { %v1142_v58 = vmul.f32 %v8195_v48, %v7302_v41  ;;  %v1518_v20 = vpack.c.bf16 %v1507_v0, %v1506_v10  ;;  %v1048_v7 = vmul.f32 %v7296_v39, %v1032_v21  ;;  %v1143_v32 = vmul.f32 %v8199_v17, %v7306_v43  ;;  %v8498_v21 = vld [vmem:[%s10195_s4] ss:$4 sm:$0x3] }
  0xe0   : > { %v1049_v23 = vmul.f32 %v7296_v39, %v1033_v19  ;;  %v1519_v5 = vpack.c.bf16 %v1509_v1, %v1508_v52  ;;  %v1144_v55 = vmul.f32 %v8260_v34, %v7302_v41  ;;  %v1145_v31 = vmul.f32 %v8262_v63, %v7306_v43  ;;  %v6770_v52 = vld [vmem:[%s10194_s3 + $0x134] sm:$0xf0] }
  0xe1   : > { %v1158_v62 = vadd.f32 %v1142_v58, %v8295_v33  ;;  %1526 = vst [vmem:[#allocation4 + $0x60] sm:$0xff] %v1518_v20  ;;  %v1159_v48 = vadd.f32 %v1143_v32, %v8302_v26  ;;  %v1238_v45 = vmul.f32 %v8280_v30, %v10322_v50  ;;  %v1239_v49 = vmul.f32 %v8283_v29, %v10323_v18  ;;  %v10331_v26 = vld [vmem:[#allocation14_spill] sm:$0xff] }
  0xe2   : > { %v1240_v17 = vmul.f32 %v1000_v44, %v10322_v50  ;;  %1527 = vst [vmem:[#allocation4 + $0x68] sm:$0xff] %v1519_v5  ;;  %v1160_v15 = vadd.f32 %v1144_v55, %v8306_v57  ;;  %v1161_v41 = vadd.f32 %v1145_v31, %v8310_v53  ;;  %v1241_v33 = vmul.f32 %v1001_v12, %v10323_v18  ;;  %v10332_v50 = vld [vmem:[#allocation26_spill] sm:$0xff]  ;;  %v10333_v57 = vld [vmem:[#allocation8_spill] sm:$0xff]  ;;  %v6786_v31 = vld [vmem:[%s10194_s3 + $0x1b4] sm:$0xf0] }
  0xe3   : > { %v1206_v43 = vadd.f32 %v8325_v54, %v1158_v62  ;;  %v1207_v22 = vadd.f32 %v10330_v9, %v1159_v48  ;;  %v1286_v36 = vmul.f32 %v8260_v34, %v10331_v26  ;;  %v1287_v30 = vmul.f32 %v8262_v63, %v10285_v2 }
  0xe4   : > { %v1288_v29 = vmul.f32 %v8373_v25, %v10331_v26  ;;  %v1208_v56 = vadd.f32 %v10332_v50, %v1160_v15  ;;  %v1209_v42 = vadd.f32 %v10333_v57, %v1161_v41  ;;  %v1289_v54 = vmul.f32 %v8377_v28, %v10285_v2 }
  0xe5   : > { %v1254_v53 = vadd.f32 %v1238_v45, %v1206_v43  ;;  %v1255_v18 = vadd.f32 %v1239_v49, %v1207_v22  ;;  %v1334_v16 = vmul.f32 %v8298_v35, %v7342_v59  ;;  %v1335_v34 = vmul.f32 %v8313_v8, %v7345_v60  ;;  %v6785_v35 = vld [vmem:[%s10194_s3 + $0x1b4] sm:$0xf]  ;;  %v6357_v8 = vld [vmem:[%s10194_s3 + $0x130] sm:$0xf]  ;;  %v1876_v49 = vpop.f32.mrf.mxu1 }
  0xe6   : > { %v1336_v63 = vmul.f32 %v1048_v7, %v7342_v59  ;;  %v1256_v4 = vadd.f32 %v1240_v17, %v1208_v56  ;;  %v1257_v51 = vadd.f32 %v1241_v33, %v1209_v42  ;;  %v1337_v10 = vmul.f32 %v1049_v23, %v7345_v60  ;;  %v6423_v59 = vld [vmem:[%s10194_s3 + $0x1b8] sm:$0xf0]  ;;  %v2052_v17 = vld [vmem:[%s10196_s5] ss:$4 sm:$0x3]  ;;  %v10336_v56 = vld [vmem:[#allocation21_spill] sm:$0xff] }
  0xe7   : > { %v1302_v2 = vadd.f32 %v1286_v36, %v1254_v53  ;;  %v1303_v37 = vadd.f32 %v1287_v30, %v1255_v18  ;;  %v1382_v6 = vmul.f32 %v1000_v44, %v7446_v61  ;;  %v1383_v0 = vmul.f32 %v1001_v12, %v7454_v11  ;;  %v6421_v11 = vld [vmem:[%s10194_s3 + $0x1b0] sm:$0xf]  ;;  %v10335_v33 = vld [vmem:[#allocation20_spill] sm:$0xff] }
  0xe8   : > { %v1430_v60 = vmul.f32 %v8373_v25, %v7457_v27  ;;  %v6088_v19 = vld [vmem:[#allocation4 + $0x60] sm:$0xf]  ;;  %v6711_v1 = vld [vmem:[#allocation4 + $0x64] sm:$0xf]  ;;  %v1304_v58 = vadd.f32 %v1288_v29, %v1256_v4  ;;  %v1305_v20 = vadd.f32 %v1289_v54, %v1257_v51  ;;  %v1431_v61 = vmul.f32 %v8377_v28, %v10329_v46  ;;  %v1827_v46 = vpop.f32.mrf.mxu0  ;;  %v10337_v42 = vld [vmem:[#allocation22_spill] sm:$0xff] }
  0xe9   : > { %v1350_v32 = vadd.f32 %v1334_v16, %v1302_v2  ;;  %v6712_v27 = vld [vmem:[#allocation4 + $0x64] sm:$0xf0]  ;;  %v6090_v25 = vld [vmem:[#allocation4 + $0x68] sm:$0xf0]  ;;  %v1351_v44 = vadd.f32 %v1335_v34, %v1303_v37  ;;  %v1478_v12 = vmul.f32 %v8233_v3, %v1048_v7  ;;  %v1479_v5 = vmul.f32 %v8240_v40, %v1049_v23  ;;  %v8516_v7 = vld [vmem:[%s10192_s1 + $0x20] sm:$0xff] }
  0xea   : > { %v6362_v55 = vor.u32 %v6769_v47, %v6359_v14  ;;  %v6089_v62 = vor.u32 %v6712_v27, %v6088_v19  ;;  %v6093_v48 = vor.u32 %v6711_v1, %v6090_v25  ;;  %v1352_v45 = vadd.f32 %v1336_v63, %v1304_v58  ;;  %v10334_v23 = vld [vmem:[#allocation19_spill] sm:$0xff] }
  0xeb   : > { %v1353_v28 = vadd.f32 %v1337_v10, %v1305_v20  ;;  %v1398_v15 = vadd.f32 %v1382_v6, %v1350_v32  ;;  %v1399_v41 = vadd.f32 %v1383_v0, %v1351_v44  ;;  %v6426_v3 = vor.u32 %v6785_v35, %v6423_v59  ;;  %v10339_v14 = vld [vmem:[#allocation23_spill] sm:$0xff]  ;;  %v1925_v0 = vpop.f32.mrf.mxu2 }
  0xec   : > { %3760 = vmatpush.bf16.msrb.mxu2 %v6362_v55  ;;  %v6358_v40 = vor.u32 %v6770_v52, %v6357_v8  ;;  %1856 = vmatmul.bf16.gmra.mxu0 %v6089_v62  ;;  %v1400_v43 = vadd.f32 %v1352_v45, %v10334_v23  ;;  %v6422_v22 = vor.u32 %v6786_v31, %v6421_v11  ;;  %v8521_v26 = vperm.slane %v8498_v21, 0  ;;  %v10340_v51 = vld [vmem:[#allocation15_spill] sm:$0xff] }
  0xed   : > { %1905 = vmatmul.bf16.gmra.mxu1 %v6093_v48  ;;  %v1401_v9 = vadd.f32 %v1353_v28, %v10335_v33  ;;  %1954 = vmatmul.bf16.gmra.mxu2 %v6089_v62  ;;  %v1446_v36 = vadd.f32 %v1430_v60, %v1398_v15  ;;  %v1447_v30 = vadd.f32 %v1431_v61, %v1399_v41  ;;  %v8523_v50 = vperm.slane %v2052_v17, 0  ;;  %v1974_v60 = vpop.f32.mrf.mxu3  ;;  %v8553_v61 = vld [vmem:[%s10192_s1 + $0x28] sm:$0xff]  ;;  %v1878_v44 = vpop.f32.mrf.mxu1 }
  0xee   : > { %2003 = vmatmul.bf16.gmra.mxu3 %v6093_v48  ;;  %v1877_v29 = vadd.f32 %v1876_v49, %v1827_v46  ;;  %v1448_v57 = vadd.f32 %v1400_v43, %v10336_v56  ;;  %3662 = vmatpush.bf16.msrb.mxu0 %v6358_v40  ;;  %v8528_v54 = vperm.slane %v8516_v7, 0  ;;  %v8531_v18 = vperm.slane %v8516_v7, 1 }
  0xef   : > { %v1449_v53 = vadd.f32 %v1401_v9, %v10337_v42  ;;  %3809 = vmatpush.bf16.msrb.mxu3 %v6426_v3  ;;  %v1494_v16 = vadd.f32 %v1478_v12, %v1446_v36  ;;  %v1495_v34 = vadd.f32 %v1479_v5, %v1447_v30  ;;  %3711 = vmatpush.bf16.msrb.mxu1 %v6422_v22  ;;  %v8535_v47 = vperm.slane %v8516_v7, 2 }
  0xf0   : > { %v2020_v63 = vmul.f32 %v8521_v26, %v1877_v29  ;;  %v1496_v4 = vadd.f32 %v1448_v57, %v10339_v14  ;;  %v2291_v10 = vmul.f32 0.0, %v8528_v54  ;;  %v2341_v35 = vmul.f32 0.0, %v8531_v18 }
  0xf1   : > { %10338 = vst [vmem:[#allocation9_spill] sm:$0xff] %v8535_v47  ;;  %v1497_v2 = vadd.f32 %v1449_v53, %v10340_v51  ;;  %v1510_v59 = vadd.f32 %v1494_v16, %v7494_v13  ;;  %v1511_v8 = vadd.f32 %v1495_v34, %v7497_v24  ;;  %v2391_v6 = vmul.f32 0.0, %v8535_v47  ;;  %v8603_v51 = vld [vmem:[%s10193_s2 + $0x1] ss:$4 sm:$0x3] }
  0xf2   : > { %v2058_v37 = vadd.f32 %v8523_v50, %v2020_v63  ;;  %v1512_v52 = vadd.f32 %v1496_v4, %v7494_v13  ;;  %v2357_v1 = vadd.f32 %v2341_v35, %v2291_v10  ;;  %v8548_v32 = vperm.slane %v8516_v7, 3 }
  0xf3   : > { %v1513_v19 = vadd.f32 %v1497_v2, %v7497_v24  ;;  %v1520_v58 = vpack.c.bf16 %v1511_v8, %v1510_v59  ;;  %v8556_v27 = vperm.slane %v8516_v7, 4  ;;  %v1975_v25 = vadd.f32 %v1974_v60, %v1925_v0  ;;  %v1829_v24 = vpop.f32.mrf.mxu0  ;;  %v6767_v2 = vld [vmem:[%s10194_s3 + $0x124] sm:$0xf]  ;;  %v1927_v10 = vpop.f32.mrf.mxu2 }
  0xf4   : > { %v2145_v20 = vmax.f32 %v2058_v37, 0.0  ;;  %v8559_v13 = vperm.slane %v8498_v21, 1  ;;  %v8561_v55 = vadd.f32 %v2391_v6, %v2357_v1  ;;  %v8564_v31 = vperm.slane %v8516_v7, 5 }
  0xf5   : > { %v1521_v11 = vpack.c.bf16 %v1513_v19, %v1512_v52  ;;  %1528 = vst [vmem:[#allocation4 + $0x70] sm:$0xff] %v1520_v58  ;;  %v8567_v48 = vperm.slane %v2052_v17, 1  ;;  %v8570_v45 = vperm.slane %v8553_v61, 0  ;;  %v8573_v21 = vperm.slane %v8553_v61, 1  ;;  %v1976_v35 = vpop.f32.mrf.mxu3 }
  0xf6   : > { %v2177_v12 = vrot.slane %v2145_v20, 7  ;;  %v2225_v5 = vrot.slane %v2145_v20, 1  ;;  %v2021_v62 = vmul.f32 %v8559_v13, %v1975_v25  ;;  %v2343_v49 = vmul.f32 %v8531_v18, %v2145_v20  ;;  %v6415_v25 = vld [vmem:[%s10194_s3 + $0x1a8] sm:$0xf0] }
  0xf7   : > { %1529 = vst [vmem:[#allocation4 + $0x78] sm:$0xff] %v1521_v11  ;;  %v8579_v15 = vperm.slane %v8553_v61, 2  ;;  %v2491_v41 = vmul.f32 %v8556_v27, %v2145_v20  ;;  %v2292_v3 = vmul.f32 0.0, %v8570_v45  ;;  %v2342_v40 = vmul.f32 0.0, %v8573_v21  ;;  %v6351_v20 = vld [vmem:[%s10194_s3 + $0x128] sm:$0xf0] }
  0xf8   : > { %10341 = vst [vmem:[#allocation10_spill] sm:$0xff] %v8570_v45  ;;  %v2193_v28 = vmul.f32 %v7294_v38, %v2177_v12  ;;  %v2241_v46 = vmul.f32 %v7296_v39, %v2225_v5  ;;  %v2059_v17 = vadd.f32 %v8567_v48, %v2021_v62  ;;  %v8588_v33 = vperm.slane %v8553_v61, 3  ;;  %v6783_v11 = vld [vmem:[%s10194_s3 + $0x1a4] sm:$0xf] }
  0xf9   : > { %10342 = vst [vmem:[#allocation12_spill] sm:$0xff] %v8573_v21  ;;  %v8591_v9 = vperm.slane %v8553_v61, 4  ;;  %v2358_v30 = vadd.f32 %v2342_v40, %v2292_v3  ;;  %v2392_v29 = vmul.f32 0.0, %v8579_v15  ;;  %v8597_v42 = vperm.slane %v8553_v61, 5 }
  0xfa   : > { %v2293_v23 = vmul.f32 %v8528_v54, %v2193_v28  ;;  %v2441_v43 = vmul.f32 %v8548_v32, %v2193_v28  ;;  %v2393_v22 = vmul.f32 %v8535_v47, %v2241_v46  ;;  %v2146_v36 = vmax.f32 %v2059_v17, 0.0 }
  0xfb   : > { %v1879_v53 = vadd.f32 %v1878_v44, %v1829_v24  ;;  %v2541_v63 = vmul.f32 %v8564_v31, %v2241_v46  ;;  %v8608_v6 = vadd.f32 %v2392_v29, %v2358_v30  ;;  %v8612_v60 = vperm.slane %v8516_v7, 6  ;;  %v1832_v24 = vpop.f32.mrf.mxu0  ;;  %v1881_v44 = vpop.f32.mrf.mxu1 }
  0xfc   : > { %v2359_v56 = vadd.f32 %v2343_v49, %v2293_v23  ;;  %v2457_v57 = vadd.f32 %v2441_v43, %v8561_v55  ;;  %v6096_v16 = vld [vmem:[#allocation4 + $0x70] sm:$0xf]  ;;  %v6713_v34 = vld [vmem:[#allocation4 + $0x74] sm:$0xf]  ;;  %v2178_v14 = vrot.slane %v2146_v36, 7  ;;  %v2226_v4 = vrot.slane %v2146_v36, 1 }
  0xfd   : > { %10343 = vst [vmem:[#allocation13_spill] sm:$0xff] %v8608_v6  ;;  %v2022_v0 = vmul.f32 %v8521_v26, %v1879_v53  ;;  %v2344_v5 = vmul.f32 %v8573_v21, %v2146_v36  ;;  %v2492_v62 = vmul.f32 %v8591_v9, %v2146_v36  ;;  %v8631_v17 = vperm.slane %v8516_v7, 7  ;;  %v6768_v7 = vld [vmem:[%s10194_s3 + $0x124] sm:$0xf0] }
  0xfe   : > { %v6714_v59 = vld [vmem:[#allocation4 + $0x74] sm:$0xf0]  ;;  %v6098_v8 = vld [vmem:[#allocation4 + $0x78] sm:$0xf0]  ;;  %v2507_v37 = vadd.f32 %v2491_v41, %v2457_v57  ;;  %v2194_v1 = vmul.f32 %v7294_v38, %v2178_v14  ;;  %v2242_v58 = vmul.f32 %v7296_v39, %v2226_v4  ;;  %v2409_v12 = vadd.f32 %v2393_v22, %v2359_v56  ;;  %v6349_v56 = vld [vmem:[%s10194_s3 + $0x120] sm:$0xf] }
  0xff   : > { %v6097_v52 = vor.u32 %v6714_v59, %v6096_v16  ;;  %v6101_v19 = vor.u32 %v6713_v34, %v6098_v8  ;;  %v2060_v28 = vadd.f32 %v8523_v50, %v2022_v0  ;;  %v8634_v40 = vperm.slane %v8603_v51, 0  ;;  %v6413_v57 = vld [vmem:[%s10194_s3 + $0x1a0] sm:$0xf]  ;;  %v6784_v14 = vld [vmem:[%s10194_s3 + $0x1a4] sm:$0xf0] }
 0x100   : > { %v2557_v46 = vadd.f32 %v2541_v63, %v2507_v37  ;;  %v2294_v49 = vmul.f32 %v8570_v45, %v2194_v1  ;;  %v2442_v41 = vmul.f32 %v8588_v33, %v2194_v1  ;;  %v6354_v23 = vor.u32 %v6767_v2, %v6351_v20  ;;  %v1930_v20 = vpop.f32.mrf.mxu2 }
 0x101   : > { %1861 = vmatmul.bf16.gmra.mxu0 %v6097_v52  ;;  %1910 = vmatmul.bf16.gmra.mxu1 %v6101_v19  ;;  %v2147_v3 = vmax.f32 %v2060_v28, 0.0  ;;  %v6418_v43 = vor.u32 %v6783_v11, %v6415_v25  ;;  %v2394_v36 = vmul.f32 %v8579_v15, %v2242_v58  ;;  %v1977_v29 = vadd.f32 %v1976_v35, %v1927_v10  ;;  %v1979_v11 = vpop.f32.mrf.mxu3 }
 0x102   : > { %1959 = vmatmul.bf16.gmra.mxu2 %v6097_v52  ;;  %2008 = vmatmul.bf16.gmra.mxu3 %v6101_v19  ;;  %v2360_v22 = vadd.f32 %v2344_v5, %v2294_v49  ;;  %v2458_v30 = vadd.f32 %v2442_v41, %v8608_v6  ;;  %v2542_v53 = vmul.f32 %v8597_v42, %v2242_v58  ;;  %v8649_v63 = vperm.slane %v8553_v61, 6 }
 0x103   : > { %v2179_v16 = vrot.slane %v2147_v3, 7  ;;  %v2227_v34 = vrot.slane %v2147_v3, 1  ;;  %3761 = vmatpush.bf16.msrb.mxu2 %v6354_v23  ;;  %3810 = vmatpush.bf16.msrb.mxu3 %v6418_v43  ;;  %v2345_v2 = vmul.f32 %v8531_v18, %v2147_v3  ;;  %v2023_v10 = vmul.f32 %v8559_v13, %v1977_v29  ;;  %v1834_v23 = vpop.f32.mrf.mxu0  ;;  %v1883_v43 = vpop.f32.mrf.mxu1 }
 0x104   : > { %v2508_v4 = vadd.f32 %v2492_v62, %v2458_v30  ;;  %v8657_v35 = vperm.slane %v8553_v61, 7  ;;  %v2493_v37 = vmul.f32 %v8556_v27, %v2147_v3  ;;  %v6350_v0 = vor.u32 %v6768_v7, %v6349_v56  ;;  %v8669_v62 = vld [vmem:[%s10192_s1 + $0x30] ss:$0 sm:$0xff] }
 0x105   : > { %v2195_v59 = vmul.f32 %v7294_v38, %v2179_v16  ;;  %v2243_v8 = vmul.f32 %v7296_v39, %v2227_v34  ;;  %v2410_v52 = vadd.f32 %v2394_v36, %v2360_v22  ;;  %v2061_v19 = vadd.f32 %v8567_v48, %v2023_v10 }
 0x106   : > { %v6414_v1 = vor.u32 %v6784_v14, %v6413_v57  ;;  %v1882_v58 = vadd.f32 %v1881_v44, %v1832_v24  ;;  %v2641_v61 = vmul.f32 %v8631_v17, %v2147_v3  ;;  %v8672_v28 = vperm.slane %v8603_v51, 1  ;;  %3663 = vmatpush.bf16.msrb.mxu0 %v6350_v0 }
 0x107   : > { %v2295_v25 = vmul.f32 %v8528_v54, %v2195_v59  ;;  %v2443_v5 = vmul.f32 %v8548_v32, %v2195_v59  ;;  %v2558_v49 = vadd.f32 %v2542_v53, %v2508_v4  ;;  %v2591_v24 = vmul.f32 %v8612_v60, %v2195_v59 }
 0x108   : > { %v2148_v44 = vmax.f32 %v2061_v19, 0.0  ;;  %3712 = vmatpush.bf16.msrb.mxu1 %v6414_v1  ;;  %v2024_v41 = vmul.f32 %v8521_v26, %v1882_v58  ;;  %v2395_v3 = vmul.f32 %v8535_v47, %v2243_v8  ;;  %v1980_v30 = vadd.f32 %v1979_v11, %v1930_v20  ;;  %v8697_v11 = vld [vmem:[%s10192_s1 + $0x38] ss:$0 sm:$0xff] }
 0x109   : > { %v2361_v22 = vadd.f32 %v2345_v2, %v2295_v25  ;;  %v2459_v36 = vadd.f32 %v2443_v5, %v2409_v12  ;;  %v2543_v29 = vmul.f32 %v8564_v31, %v2243_v8  ;;  %v2607_v56 = vadd.f32 %v2591_v24, %v2557_v46  ;;  %v6765_v12 = vld [vmem:[%s10194_s3 + $0x114] sm:$0xf]  ;;  %v6343_v46 = vld [vmem:[%s10194_s3 + $0x118] sm:$0xf0] }
 0x10a   : > { %v2180_v51 = vrot.slane %v2148_v44, 7  ;;  %v2228_v7 = vrot.slane %v2148_v44, 1  ;;  %v2691_v53 = vmul.f32 %v8669_v62, %v2243_v8  ;;  %v2346_v16 = vmul.f32 %v8573_v21, %v2148_v44 }
 0x10b   : > { %v2509_v57 = vadd.f32 %v2493_v37, %v2459_v36  ;;  %v1884_v34 = vadd.f32 %v1883_v43, %v1834_v23  ;;  %v2657_v14 = vadd.f32 %v2641_v61, %v2607_v56  ;;  %v2062_v10 = vadd.f32 %v8523_v50, %v2024_v41  ;;  %v6407_v56 = vld [vmem:[%s10194_s3 + $0x198] sm:$0xf0] }
 0x10c   : > { %v2196_v4 = vmul.f32 %v7294_v38, %v2180_v51  ;;  %v2244_v2 = vmul.f32 %v7296_v39, %v2228_v7  ;;  %v2411_v59 = vadd.f32 %v2395_v3, %v2361_v22  ;;  %v2494_v8 = vmul.f32 %v8591_v9, %v2148_v44 }
 0x10d   : > { %v2025_v37 = vmul.f32 %v8559_v13, %v1980_v30  ;;  %v6346_v0 = vor.u32 %v6765_v12, %v6343_v46  ;;  %v2707_v19 = vadd.f32 %v2691_v53, %v2657_v14  ;;  %v2642_v20 = vmul.f32 %v8657_v35, %v2148_v44  ;;  %v1932_v14 = vpop.f32.mrf.mxu2 }
 0x10e   : > { %v2296_v1 = vmul.f32 %v8570_v45, %v2196_v4  ;;  %v2444_v58 = vmul.f32 %v8588_v33, %v2196_v4  ;;  %v2559_v25 = vadd.f32 %v2543_v29, %v2509_v57  ;;  %v2592_v5 = vmul.f32 %v8649_v63, %v2196_v4  ;;  %v6781_v29 = vld [vmem:[%s10194_s3 + $0x194] sm:$0xf]  ;;  %v1981_v4 = vpop.f32.mrf.mxu3 }
 0x10f   : > { %v2149_v61 = vmax.f32 %v2062_v10, 0.0  ;;  %v2026_v24 = vmul.f32 %v8521_v26, %v1884_v34  ;;  %3762 = vmatpush.bf16.msrb.mxu2 %v6346_v0  ;;  %v2396_v23 = vmul.f32 %v8579_v15, %v2244_v2  ;;  %v2063_v22 = vadd.f32 %v8567_v48, %v2025_v37 }
 0x110   : > { %v2362_v41 = vadd.f32 %v2346_v16, %v2296_v1  ;;  %v2460_v43 = vadd.f32 %v2444_v58, %v2410_v52  ;;  %v2544_v44 = vmul.f32 %v8597_v42, %v2244_v2  ;;  %v2608_v3 = vadd.f32 %v2592_v5, %v2558_v49 }
 0x111   : > { %v2181_v36 = vrot.slane %v2149_v61, 7  ;;  %v2229_v30 = vrot.slane %v2149_v61, 1  ;;  %v2728_v51 = vadd.f32 %v8634_v40, %v2707_v19  ;;  %v2692_v52 = vmul.f32 %v8697_v11, %v2244_v2 }
 0x112   : > { %v2510_v7 = vadd.f32 %v2494_v8, %v2460_v43  ;;  %v2347_v57 = vmul.f32 %v8531_v18, %v2149_v61  ;;  %v2658_v53 = vadd.f32 %v2642_v20, %v2608_v3  ;;  %v2150_v34 = vmax.f32 %v2063_v22, 0.0 }
 0x113   : > { %v2197_v49 = vmul.f32 %v7294_v38, %v2181_v36  ;;  %v2245_v16 = vmul.f32 %v7296_v39, %v2229_v30  ;;  %v2412_v10 = vadd.f32 %v2396_v23, %v2362_v41  ;;  %v2495_v12 = vmul.f32 %v8556_v27, %v2149_v61  ;;  %v1837_v30 = vpop.f32.mrf.mxu0 }
 0x114   : > { %v2643_v46 = vmul.f32 %v8631_v17, %v2149_v61  ;;  %v6410_v37 = vor.u32 %v6781_v29, %v6407_v56  ;;  %v2560_v0 = vadd.f32 %v2544_v44, %v2510_v7  ;;  %v2708_v8 = vadd.f32 %v2692_v52, %v2658_v53  ;;  %v1886_v29 = vpop.f32.mrf.mxu1 }
 0x115   : > { %v2297_v2 = vmul.f32 %v8528_v54, %v2197_v49  ;;  %v2445_v19 = vmul.f32 %v8548_v32, %v2197_v49  ;;  %v2593_v1 = vmul.f32 %v8612_v60, %v2197_v49  ;;  %v2182_v58 = vrot.slane %v2150_v34, 7 }
 0x116   : > { %v2064_v20 = vadd.f32 %v8523_v50, %v2026_v24  ;;  %3811 = vmatpush.bf16.msrb.mxu3 %v6410_v37  ;;  %v1982_v5 = vadd.f32 %v1981_v4, %v1932_v14  ;;  %v2729_v41 = vadd.f32 %v8672_v28, %v2708_v8  ;;  %v2397_v23 = vmul.f32 %v8535_v47, %v2245_v16 }
 0x117   : > { %v2461_v43 = vadd.f32 %v2445_v19, %v2411_v59  ;;  %v2230_v61 = vrot.slane %v2150_v34, 1  ;;  %v2545_v22 = vmul.f32 %v8564_v31, %v2245_v16  ;;  %v2609_v44 = vadd.f32 %v2593_v1, %v2559_v25  ;;  %v6341_v25 = vld [vmem:[%s10194_s3 + $0x110] sm:$0xf] }
 0x118   : > { %v2693_v3 = vmul.f32 %v8669_v62, %v2245_v16  ;;  %v2198_v36 = vmul.f32 %v7294_v38, %v2182_v58  ;;  %v2744_v56 = vpack.c.bf16 %v2729_v41, %v2728_v51  ;;  %v2363_v7 = vadd.f32 %v2347_v57, %v2297_v2  ;;  %v6766_v16 = vld [vmem:[%s10194_s3 + $0x114] sm:$0xf0] }
 0x119   : > { %v2511_v24 = vadd.f32 %v2495_v12, %v2461_v43  ;;  %v2246_v52 = vmul.f32 %v7296_v39, %v2230_v61  ;;  %v2659_v53 = vadd.f32 %v2643_v46, %v2609_v44  ;;  %v2348_v51 = vmul.f32 %v8573_v21, %v2150_v34  ;;  %v6405_v44 = vld [vmem:[%s10194_s3 + $0x190] sm:$0xf] }
 0x11a   : > { %v2298_v49 = vmul.f32 %v8570_v45, %v2198_v36  ;;  %v2446_v59 = vmul.f32 %v8588_v33, %v2198_v36  ;;  %v2594_v14 = vmul.f32 %v8649_v63, %v2198_v36  ;;  %2752 = vst [vmem:[#allocation4] sm:$0xff] %v2744_v56  ;;  %v2496_v57 = vmul.f32 %v8591_v9, %v2150_v34 }
 0x11b   : > { %v2709_v4 = vadd.f32 %v2693_v3, %v2659_v53  ;;  %v2644_v37 = vmul.f32 %v8657_v35, %v2150_v34  ;;  %v2151_v2 = vmax.f32 %v2064_v20, 0.0  ;;  %v2027_v19 = vmul.f32 %v8559_v13, %v1982_v5 }
 0x11c   : > { %v2462_v12 = vadd.f32 %v2446_v59, %v2412_v10  ;;  %v2610_v46 = vadd.f32 %v2594_v14, %v2560_v0  ;;  %v2364_v8 = vadd.f32 %v2348_v51, %v2298_v49  ;;  %v6342_v1 = vor.u32 %v6766_v16, %v6341_v25  ;;  %v6782_v10 = vld [vmem:[%s10194_s3 + $0x194] sm:$0xf0]  ;;  %v1935_v49 = vpop.f32.mrf.mxu2  ;;  %v1984_v59 = vpop.f32.mrf.mxu3 }
 0x11d   : > { %v2413_v58 = vadd.f32 %v2397_v23, %v2363_v7  ;;  %v2561_v41 = vadd.f32 %v2545_v22, %v2511_v24  ;;  %v2694_v61 = vmul.f32 %v8697_v11, %v2246_v52  ;;  %v2398_v34 = vmul.f32 %v8579_v15, %v2246_v52 }
 0x11e   : > { %v2660_v43 = vadd.f32 %v2644_v37, %v2610_v46  ;;  %v2512_v0 = vadd.f32 %v2496_v57, %v2462_v12  ;;  %v2183_v20 = vrot.slane %v2151_v2, 7  ;;  %v2231_v3 = vrot.slane %v2151_v2, 1  ;;  %3664 = vmatpush.bf16.msrb.mxu0 %v6342_v1  ;;  %v1839_v57 = vpop.f32.mrf.mxu0 }
 0x11f   : > { %v2730_v5 = vadd.f32 %v8634_v40, %v2709_v4  ;;  %v2546_v23 = vmul.f32 %v8597_v42, %v2246_v52  ;;  %v2065_v36 = vadd.f32 %v8567_v48, %v2027_v19  ;;  %v2414_v56 = vadd.f32 %v2398_v34, %v2364_v8  ;;  %v1888_v52 = vpop.f32.mrf.mxu1 }
 0x120   : > { %v2710_v22 = vadd.f32 %v2694_v61, %v2660_v43  ;;  %v2199_v7 = vmul.f32 %v7294_v38, %v2183_v20  ;;  %v2349_v24 = vmul.f32 %v8531_v18, %v2151_v2  ;;  %v6406_v53 = vor.u32 %v6782_v10, %v6405_v44 }
 0x121   : > { %v2247_v25 = vmul.f32 %v7296_v39, %v2231_v3  ;;  %v2497_v16 = vmul.f32 %v8556_v27, %v2151_v2  ;;  %v2152_v51 = vmax.f32 %v2065_v36, 0.0  ;;  %v2562_v4 = vadd.f32 %v2546_v23, %v2512_v0 }
 0x122   : > { %v2731_v14 = vadd.f32 %v8672_v28, %v2710_v22  ;;  %v2299_v12 = vmul.f32 %v8528_v54, %v2199_v7  ;;  %v2447_v46 = vmul.f32 %v8548_v32, %v2199_v7  ;;  %3713 = vmatpush.bf16.msrb.mxu1 %v6406_v53  ;;  %v1887_v37 = vadd.f32 %v1886_v29, %v1837_v30 }
 0x123   : > { %v2595_v19 = vmul.f32 %v8612_v60, %v2199_v7  ;;  %v2645_v1 = vmul.f32 %v8631_v17, %v2151_v2  ;;  %v2184_v43 = vrot.slane %v2152_v51, 7  ;;  %v2232_v44 = vrot.slane %v2152_v51, 1 }
 0x124   : > { %v2745_v8 = vpack.c.bf16 %v2731_v14, %v2730_v5  ;;  %v2365_v61 = vadd.f32 %v2349_v24, %v2299_v12  ;;  %v1985_v10 = vadd.f32 %v1984_v59, %v1935_v49  ;;  %v1889_v34 = vadd.f32 %v1888_v52, %v1839_v57 }
 0x125   : > { %v2399_v20 = vmul.f32 %v8535_v47, %v2247_v25  ;;  %v2463_v0 = vadd.f32 %v2447_v46, %v2413_v58  ;;  %v2611_v3 = vadd.f32 %v2595_v19, %v2561_v41  ;;  %v2200_v23 = vmul.f32 %v7294_v38, %v2184_v43  ;;  %v6763_v58 = vld [vmem:[%s10194_s3 + $0x104] sm:$0xf]  ;;  %v6335_v41 = vld [vmem:[%s10194_s3 + $0x108] sm:$0xf0] }
 0x126   : > { %2753 = vst [vmem:[#allocation4 + $0x8] sm:$0xff] %v2745_v8  ;;  %v2547_v22 = vmul.f32 %v8564_v31, %v2247_v25  ;;  %v2695_v30 = vmul.f32 %v8669_v62, %v2247_v25  ;;  %v2248_v29 = vmul.f32 %v7296_v39, %v2232_v44  ;;  %v2028_v2 = vmul.f32 %v8521_v26, %v1887_v37  ;;  %v6779_v46 = vld [vmem:[%s10194_s3 + $0x184] sm:$0xf]  ;;  %v6399_v37 = vld [vmem:[%s10194_s3 + $0x188] sm:$0xf0] }
 0x127   : > { %v2661_v5 = vadd.f32 %v2645_v1, %v2611_v3  ;;  %v2300_v36 = vmul.f32 %v8570_v45, %v2200_v23  ;;  %v2448_v7 = vmul.f32 %v8588_v33, %v2200_v23  ;;  %v2596_v24 = vmul.f32 %v8649_v63, %v2200_v23 }
 0x128   : > { %v2415_v53 = vadd.f32 %v2399_v20, %v2365_v61  ;;  %v2350_v49 = vmul.f32 %v8573_v21, %v2152_v51  ;;  %v2498_v59 = vmul.f32 %v8591_v9, %v2152_v51  ;;  %v2646_v14 = vmul.f32 %v8657_v35, %v2152_v51 }
 0x129   : > { %v2513_v25 = vadd.f32 %v2497_v16, %v2463_v0  ;;  %v2711_v57 = vadd.f32 %v2695_v30, %v2661_v5  ;;  %v2464_v52 = vadd.f32 %v2448_v7, %v2414_v56  ;;  %v2612_v12 = vadd.f32 %v2596_v24, %v2562_v4  ;;  %v6333_v16 = vld [vmem:[%s10194_s3 + $0x100] sm:$0xf]  ;;  %v6764_v56 = vld [vmem:[%s10194_s3 + $0x104] sm:$0xf0]  ;;  %v1937_v5 = vpop.f32.mrf.mxu2 }
 0x12a   : > { %v2366_v8 = vadd.f32 %v2350_v49, %v2300_v36  ;;  %v2066_v19 = vadd.f32 %v8523_v50, %v2028_v2  ;;  %v2029_v1 = vmul.f32 %v8559_v13, %v1985_v10  ;;  %v6338_v43 = vor.u32 %v6763_v58, %v6335_v41  ;;  %v1986_v36 = vpop.f32.mrf.mxu3  ;;  %v6397_v24 = vld [vmem:[%s10194_s3 + $0x180] sm:$0xf] }
 0x12b   : > { %v2514_v51 = vadd.f32 %v2498_v59, %v2464_v52  ;;  %v2662_v4 = vadd.f32 %v2646_v14, %v2612_v12  ;;  %v2696_v61 = vmul.f32 %v8697_v11, %v2248_v29  ;;  %v2030_v44 = vmul.f32 %v8521_v26, %v1889_v34  ;;  %v6780_v34 = vld [vmem:[%s10194_s3 + $0x184] sm:$0xf0] }
 0x12c   : > { %v2400_v20 = vmul.f32 %v8579_v15, %v2248_v29  ;;  %v2153_v0 = vmax.f32 %v2066_v19, 0.0  ;;  %v2067_v10 = vadd.f32 %v8567_v48, %v2029_v1  ;;  %3763 = vmatpush.bf16.msrb.mxu2 %v6338_v43  ;;  %v6402_v3 = vor.u32 %v6779_v46, %v6399_v37 }
 0x12d   : > { %v2563_v23 = vadd.f32 %v2547_v22, %v2513_v25  ;;  %v2548_v30 = vmul.f32 %v8597_v42, %v2248_v29  ;;  %v2712_v2 = vadd.f32 %v2696_v61, %v2662_v4  ;;  %v6334_v7 = vor.u32 %v6764_v56, %v6333_v16  ;;  %v6748_v6 = vld [vmem:[#allocation4 + $0x4] sm:$0xf0] }
 0x12e   : > { %v2732_v58 = vadd.f32 %v8634_v40, %v2711_v57  ;;  %v2416_v41 = vadd.f32 %v2400_v20, %v2366_v8  ;;  %v2185_v49 = vrot.slane %v2153_v0, 7  ;;  %v2233_v59 = vrot.slane %v2153_v0, 1  ;;  %3812 = vmatpush.bf16.msrb.mxu3 %v6402_v3 }
 0x12f   : > { %v2564_v22 = vadd.f32 %v2548_v30, %v2514_v51  ;;  %v2733_v29 = vadd.f32 %v8672_v28, %v2712_v2  ;;  %v2154_v14 = vmax.f32 %v2067_v10, 0.0  ;;  %v2068_v25 = vadd.f32 %v8523_v50, %v2030_v44  ;;  %3665 = vmatpush.bf16.msrb.mxu0 %v6334_v7 }
 0x130   : > { %v2201_v52 = vmul.f32 %v7294_v38, %v2185_v49  ;;  %v2249_v12 = vmul.f32 %v7296_v39, %v2233_v59  ;;  %v1987_v46 = vadd.f32 %v1986_v36, %v1937_v5  ;;  %v6398_v37 = vor.u32 %v6780_v34, %v6397_v24  ;;  %v1842_v24 = vpop.f32.mrf.mxu0  ;;  %v1891_v34 = vpop.f32.mrf.mxu1 }
 0x131   : > { %v2746_v19 = vpack.c.bf16 %v2733_v29, %v2732_v58  ;;  %v2351_v57 = vmul.f32 %v8531_v18, %v2153_v0  ;;  %v2186_v8 = vrot.slane %v2154_v14, 7  ;;  %v2234_v1 = vrot.slane %v2154_v14, 1 }
 0x132   : > { %v2301_v43 = vmul.f32 %v8528_v54, %v2201_v52  ;;  %v2449_v16 = vmul.f32 %v8548_v32, %v2201_v52  ;;  %v2499_v56 = vmul.f32 %v8556_v27, %v2153_v0  ;;  %v2647_v51 = vmul.f32 %v8631_v17, %v2153_v0  ;;  %3714 = vmatpush.bf16.msrb.mxu1 %v6398_v37 }
 0x133   : > { %2754 = vst [vmem:[#allocation4 + $0x10] sm:$0xff] %v2746_v19  ;;  %v2597_v4 = vmul.f32 %v8612_v60, %v2201_v52  ;;  %v2202_v61 = vmul.f32 %v7294_v38, %v2186_v8  ;;  %v2352_v44 = vmul.f32 %v8573_v21, %v2154_v14  ;;  %v2155_v20 = vmax.f32 %v2068_v25, 0.0 }
 0x134   : > { %v2401_v10 = vmul.f32 %v8535_v47, %v2249_v12  ;;  %v2465_v3 = vadd.f32 %v2449_v16, %v2415_v53  ;;  %v2697_v30 = vmul.f32 %v8669_v62, %v2249_v12  ;;  %v2250_v2 = vmul.f32 %v7296_v39, %v2234_v1 }
 0x135   : > { %v2367_v5 = vadd.f32 %v2351_v57, %v2301_v43  ;;  %v2613_v36 = vadd.f32 %v2597_v4, %v2563_v23  ;;  %v2302_v0 = vmul.f32 %v8570_v45, %v2202_v61  ;;  %v2450_v7 = vmul.f32 %v8588_v33, %v2202_v61 }
 0x136   : > { %v2515_v58 = vadd.f32 %v2499_v56, %v2465_v3  ;;  %v2549_v49 = vmul.f32 %v8564_v31, %v2249_v12  ;;  %v2598_v59 = vmul.f32 %v8649_v63, %v2202_v61  ;;  %v2031_v29 = vmul.f32 %v8559_v13, %v1987_v46 }
 0x137   : > { %v2663_v53 = vadd.f32 %v2647_v51, %v2613_v36  ;;  %v2368_v25 = vadd.f32 %v2352_v44, %v2302_v0  ;;  %v2466_v52 = vadd.f32 %v2450_v7, %v2416_v41  ;;  %v2500_v37 = vmul.f32 %v8591_v9, %v2154_v14 }
 0x138   : > { %v2614_v19 = vadd.f32 %v2598_v59, %v2564_v22  ;;  %v2648_v23 = vmul.f32 %v8657_v35, %v2154_v14  ;;  %v2187_v57 = vrot.slane %v2155_v20, 7  ;;  %v2235_v8 = vrot.slane %v2155_v20, 1 }
 0x139   : > { %v2417_v1 = vadd.f32 %v2401_v10, %v2367_v5  ;;  %v2713_v43 = vadd.f32 %v2697_v30, %v2663_v53  ;;  %v2402_v16 = vmul.f32 %v8579_v15, %v2250_v2  ;;  %v2550_v12 = vmul.f32 %v8597_v42, %v2250_v2  ;;  %v1989_v53 = vpop.f32.mrf.mxu3 }
 0x13a   : > { %v2565_v56 = vadd.f32 %v2549_v49, %v2515_v58  ;;  %v2664_v4 = vadd.f32 %v2648_v23, %v2614_v19  ;;  %v2698_v46 = vmul.f32 %v8697_v11, %v2250_v2  ;;  %v2203_v51 = vmul.f32 %v7294_v38, %v2187_v57  ;;  %v1844_v23 = vpop.f32.mrf.mxu0  ;;  %v1893_v57 = vpop.f32.mrf.mxu1 }
 0x13b   : > { %v2418_v41 = vadd.f32 %v2402_v16, %v2368_v25  ;;  %v2516_v61 = vadd.f32 %v2500_v37, %v2466_v52  ;;  %v2353_v22 = vmul.f32 %v8531_v18, %v2155_v20  ;;  %v2069_v14 = vadd.f32 %v8567_v48, %v2031_v29  ;;  %v1940_v29 = vpop.f32.mrf.mxu2 }
 0x13c   : > { %v2714_v44 = vadd.f32 %v2698_v46, %v2664_v4  ;;  %v2251_v10 = vmul.f32 %v7296_v39, %v2235_v8  ;;  %v2303_v3 = vmul.f32 %v8528_v54, %v2203_v51  ;;  %v2451_v30 = vmul.f32 %v8548_v32, %v2203_v51 }
 0x13d   : > { %v2734_v5 = vadd.f32 %v8634_v40, %v2713_v43  ;;  %v2501_v36 = vmul.f32 %v8556_v27, %v2155_v20  ;;  %v2599_v2 = vmul.f32 %v8612_v60, %v2203_v51  ;;  %v2156_v0 = vmax.f32 %v2069_v14, 0.0 }
 0x13e   : > { %v2735_v7 = vadd.f32 %v8672_v28, %v2714_v44  ;;  %v2467_v58 = vadd.f32 %v2451_v30, %v2417_v1  ;;  %v2649_v49 = vmul.f32 %v8631_v17, %v2155_v20  ;;  %v1892_v59 = vadd.f32 %v1891_v34, %v1842_v24 }
 0x13f   : > { %v2369_v25 = vadd.f32 %v2353_v22, %v2303_v3  ;;  %v2615_v52 = vadd.f32 %v2599_v2, %v2565_v56  ;;  %v2188_v37 = vrot.slane %v2156_v0, 7  ;;  %v2236_v19 = vrot.slane %v2156_v0, 1 }
 0x140   : > { %v2566_v8 = vadd.f32 %v2550_v12, %v2516_v61  ;;  %v2747_v43 = vpack.c.bf16 %v2735_v7, %v2734_v5  ;;  %v2403_v16 = vmul.f32 %v8535_v47, %v2251_v10  ;;  %v2551_v4 = vmul.f32 %v8564_v31, %v2251_v10 }
 0x141   : > { %v2665_v46 = vadd.f32 %v2649_v49, %v2615_v52  ;;  %v2699_v1 = vmul.f32 %v8669_v62, %v2251_v10  ;;  %v2204_v20 = vmul.f32 %v7294_v38, %v2188_v37  ;;  %v2354_v24 = vmul.f32 %v8573_v21, %v2156_v0 }
 0x142   : > { %2755 = vst [vmem:[#allocation4 + $0x18] sm:$0xff] %v2747_v43  ;;  %v2517_v34 = vadd.f32 %v2501_v36, %v2467_v58  ;;  %v2252_v56 = vmul.f32 %v7296_v39, %v2236_v19  ;;  %v2032_v51 = vmul.f32 %v8521_v26, %v1892_v59  ;;  %v1990_v22 = vadd.f32 %v1989_v53, %v1940_v29 }
 0x143   : > { %v2419_v12 = vadd.f32 %v2403_v16, %v2369_v25  ;;  %v2304_v61 = vmul.f32 %v8570_v45, %v2204_v20  ;;  %v2452_v14 = vmul.f32 %v8588_v33, %v2204_v20  ;;  %v1894_v44 = vadd.f32 %v1893_v57, %v1844_v23  ;;  %v8861_v16 = vpop.f32.mrf.mxu3 }
 0x144   : > { %v2502_v3 = vmul.f32 %v8591_v9, %v2156_v0  ;;  %v2600_v10 = vmul.f32 %v8649_v63, %v2204_v20  ;;  %v2650_v30 = vmul.f32 %v8657_v35, %v2156_v0  ;;  %v2070_v5 = vadd.f32 %v8523_v50, %v2032_v51  ;;  %v8865_v20 = vpop.f32.mrf.mxu0 }
 0x145   : > { %v2715_v36 = vadd.f32 %v2699_v1, %v2665_v46  ;;  %v2370_v2 = vadd.f32 %v2354_v24, %v2304_v61  ;;  %v2468_v7 = vadd.f32 %v2452_v14, %v2418_v41  ;;  %v2033_v58 = vmul.f32 %v8559_v13, %v1990_v22  ;;  %v8859_v41 = vpop.f32.mrf.mxu2  ;;  %v8867_v24 = vpop.f32.mrf.mxu1 }
 0x146   : > { %v2567_v49 = vadd.f32 %v2551_v4, %v2517_v34  ;;  %v2404_v59 = vmul.f32 %v8579_v15, %v2252_v56  ;;  %v2616_v29 = vadd.f32 %v2600_v10, %v2566_v8  ;;  %v2157_v53 = vmax.f32 %v2070_v5, 0.0 }
 0x147   : > { %v2518_v25 = vadd.f32 %v2502_v3, %v2468_v7  ;;  %v2552_v52 = vmul.f32 %v8597_v42, %v2252_v56  ;;  %v2071_v37 = vadd.f32 %v8567_v48, %v2033_v58  ;;  %v2034_v19 = vmul.f32 %v8521_v26, %v1894_v44 }
 0x148   : > { %v2666_v0 = vadd.f32 %v2650_v30, %v2616_v29  ;;  %v2700_v23 = vmul.f32 %v8697_v11, %v2252_v56  ;;  %v2189_v57 = vrot.slane %v2157_v53, 7  ;;  %v2237_v43 = vrot.slane %v2157_v53, 1 }
 0x149   : > { %v2736_v4 = vadd.f32 %v8634_v40, %v2715_v36  ;;  %v2420_v8 = vadd.f32 %v2404_v59, %v2370_v2  ;;  %v2355_v46 = vmul.f32 %v8531_v18, %v2157_v53  ;;  %v2158_v1 = vmax.f32 %v2071_v37, 0.0 }
 0x14a   : > { %v2568_v34 = vadd.f32 %v2552_v52, %v2518_v25  ;;  %v2716_v51 = vadd.f32 %v2700_v23, %v2666_v0  ;;  %v2205_v56 = vmul.f32 %v7294_v38, %v2189_v57  ;;  %v2253_v22 = vmul.f32 %v7296_v39, %v2237_v43 }
 0x14b   : > { %v2651_v61 = vmul.f32 %v8631_v17, %v2157_v53  ;;  %v2190_v14 = vrot.slane %v2158_v1, 7  ;;  %v2238_v44 = vrot.slane %v2158_v1, 1  ;;  %v2072_v3 = vadd.f32 %v8523_v50, %v2034_v19 }
 0x14c   : > { %v2737_v10 = vadd.f32 %v8672_v28, %v2716_v51  ;;  %v2305_v30 = vmul.f32 %v8528_v54, %v2205_v56  ;;  %v2453_v5 = vmul.f32 %v8548_v32, %v2205_v56  ;;  %v2601_v36 = vmul.f32 %v8612_v60, %v2205_v56 }
 0x14d   : > { %v2503_v2 = vmul.f32 %v8556_v27, %v2157_v53  ;;  %v2206_v7 = vmul.f32 %v7294_v38, %v2190_v14  ;;  %v2356_v58 = vmul.f32 %v8573_v21, %v2158_v1  ;;  %v2504_v59 = vmul.f32 %v8591_v9, %v2158_v1  ;;  %v1945_v21 = vpop.f32.mrf.mxu2 }
 0x14e   : > { %v2748_v29 = vpack.c.bf16 %v2737_v10, %v2736_v4  ;;  %v2469_v25 = vadd.f32 %v2453_v5, %v2419_v12  ;;  %v2617_v52 = vadd.f32 %v2601_v36, %v2567_v49  ;;  %v2701_v37 = vmul.f32 %v8669_v62, %v2253_v22 }
 0x14f   : > { %v8883_v19 = vmul.f32 %v7296_v39, %v2238_v44  ;;  %v2306_v0 = vmul.f32 %v8570_v45, %v2206_v7  ;;  %v2454_v23 = vmul.f32 %v8588_v33, %v2206_v7  ;;  %v2602_v53 = vmul.f32 %v8649_v63, %v2206_v7  ;;  %v6271_v45 = vld [vmem:[#allocation4 + $0x8] sm:$0xf0]  ;;  %v1994_v7 = vpop.f32.mrf.mxu3 }
 0x150   : > { %2756 = vst [vmem:[#allocation4 + $0x20] sm:$0xff] %v2748_v29  ;;  %v2371_v57 = vadd.f32 %v2355_v46, %v2305_v30  ;;  %v2667_v43 = vadd.f32 %v2651_v61, %v2617_v52  ;;  %v2159_v51 = vmax.f32 %v2072_v3, 0.0  ;;  %v2405_v56 = vmul.f32 %v8535_v47, %v2253_v22  ;;  %v6747_v52 = vld [vmem:[#allocation4 + $0x4] sm:$0xf] }
 0x151   : > { %v2519_v4 = vadd.f32 %v2503_v2, %v2469_v25  ;;  %v2470_v12 = vadd.f32 %v2454_v23, %v2420_v8  ;;  %v2618_v49 = vadd.f32 %v2602_v53, %v2568_v34  ;;  %v2652_v14 = vmul.f32 %v8657_v35, %v2158_v1  ;;  %v1849_v8 = vpop.f32.mrf.mxu0  ;;  %v1898_v34 = vpop.f32.mrf.mxu1  ;;  %v6269_v25 = vld [vmem:[#allocation4] sm:$0xf] }
 0x152   : > { %v2717_v10 = vadd.f32 %v2701_v37, %v2667_v43  ;;  %v2191_v44 = vrot.slane %v2159_v51, 7  ;;  %v2239_v5 = vrot.slane %v2159_v51, 1  ;;  %v2553_v36 = vmul.f32 %v8564_v31, %v2253_v22 }
 0x153   : > { %v2372_v29 = vadd.f32 %v2356_v58, %v2306_v0  ;;  %v2668_v46 = vadd.f32 %v2652_v14, %v2618_v49  ;;  %v2702_v61 = vmul.f32 %v8697_v11, %v8883_v19  ;;  %v8894_v3 = vmul.f32 0.0, %v8612_v60 }
 0x154   : > { %v2520_v1 = vadd.f32 %v2504_v59, %v2470_v12  ;;  %v2207_v30 = vmul.f32 %v7294_v38, %v2191_v44  ;;  %v2255_v2 = vmul.f32 %v7296_v39, %v2239_v5  ;;  %v2421_v22 = vadd.f32 %v2405_v56, %v2371_v57 }
 0x155   : > { %10344 = vst [vmem:[#allocation11_spill] sm:$0xff] %v8894_v3  ;;  %v2718_v37 = vadd.f32 %v2702_v61, %v2668_v46  ;;  %v2505_v58 = vmul.f32 %v8556_v27, %v2159_v51  ;;  %v6270_v0 = vor.u32 %v6748_v6, %v6269_v25  ;;  %v6274_v23 = vor.u32 %v6747_v52, %v6271_v45  ;;  %v6750_v25 = vld [vmem:[#allocation4 + $0x14] sm:$0xf0] }
 0x156   : > { %v2738_v53 = vadd.f32 %v8634_v40, %v2717_v10  ;;  %v2455_v43 = vmul.f32 %v8548_v32, %v2207_v30  ;;  %v2569_v49 = vadd.f32 %v2553_v36, %v2519_v4  ;;  %v2603_v14 = vmul.f32 %v8612_v60, %v2207_v30 }
 0x157   : > { %v2739_v59 = vadd.f32 %v8672_v28, %v2718_v37  ;;  %v2653_v12 = vmul.f32 %v8631_v17, %v2159_v51  ;;  %v8905_v57 = vmul.f32 0.0, %v8631_v17  ;;  %3666 = vmatmul.bf16.vlgmr.msrb.gmra.mxu0 %v6270_v0  ;;  %3715 = vmatmul.bf16.vlgmr.msrb.gmra.mxu1 %v6274_v23  ;;  %v1992_v6 = vadd.f32 %v8861_v16, %v8859_v41 }
 0x158   : > { %v2471_v45 = vadd.f32 %v2455_v43, %v2421_v22  ;;  %v2555_v56 = vmul.f32 %v8564_v31, %v2255_v2  ;;  %v2619_v10 = vadd.f32 %v2603_v14, %v2569_v49  ;;  %v8911_v4 = vmul.f32 0.0, %v8669_v62  ;;  %3764 = vmatmul.bf16.vlgmr.msrb.gmra.mxu2 %v6270_v0  ;;  %3813 = vmatmul.bf16.vlgmr.msrb.gmra.mxu3 %v6274_v23  ;;  %v1947_v23 = vpop.f32.mrf.mxu2 }
 0x159   : > { %10345 = vst [vmem:[#allocation16_spill] sm:$0xff] %v8905_v57  ;;  %v2749_v44 = vpack.c.bf16 %v2739_v59, %v2738_v53  ;;  %v2703_v51 = vmul.f32 %v8669_v62, %v2255_v2  ;;  %v2035_v5 = vmul.f32 %v8559_v13, %v1992_v6  ;;  %v2406_v36 = vmul.f32 %v8579_v15, %v8883_v19  ;;  %v1996_v53 = vpop.f32.mrf.mxu3 }
 0x15a   : > { %10346 = vst [vmem:[#allocation17_spill] sm:$0xff] %v8911_v4  ;;  %v2521_v46 = vadd.f32 %v2505_v58, %v2471_v45  ;;  %v2669_v61 = vadd.f32 %v2653_v12, %v2619_v10  ;;  %v8918_v41 = vmul.f32 0.0, %v8649_v63  ;;  %v1897_v16 = vadd.f32 %v8867_v24, %v8865_v20 }
 0x15b   : > { %2757 = vst [vmem:[#allocation4 + $0x28] sm:$0xff] %v2749_v44  ;;  %v2073_v30 = vadd.f32 %v8567_v48, %v2035_v5  ;;  %v2554_v22 = vmul.f32 %v8597_v42, %v8883_v19  ;;  %v1995_v62 = vadd.f32 %v1994_v7, %v1945_v21  ;;  %v1899_v2 = vadd.f32 %v1898_v34, %v1849_v8  ;;  %v6277_v19 = vld [vmem:[#allocation4 + $0x10] sm:$0xf]  ;;  %v6279_v21 = vld [vmem:[#allocation4 + $0x18] sm:$0xf0]  ;;  %v1852_v7 = vpop.f32.mrf.mxu0  ;;  %v1901_v8 = vpop.f32.mrf.mxu1 }
 0x15c   : > { %10347 = vst [vmem:[#allocation24_spill] sm:$0xff] %v8918_v41  ;;  %v2571_v52 = vadd.f32 %v2555_v56, %v2521_v46  ;;  %v2719_v37 = vadd.f32 %v2703_v51, %v2669_v61  ;;  %v8926_v58 = vmul.f32 0.0, %v8657_v35  ;;  %v2036_v0 = vmul.f32 %v8521_v26, %v1897_v16 }
 0x15d   : > { %v2160_v43 = vmax.f32 %v2073_v30, 0.0  ;;  %v2422_v20 = vadd.f32 %v2406_v36, %v2372_v29  ;;  %v8930_v24 = vmul.f32 0.0, %v8697_v11  ;;  %v2037_v49 = vmul.f32 %v8559_v13, %v1995_v62  ;;  %v6749_v29 = vld [vmem:[#allocation4 + $0x14] sm:$0xf] }
 0x15e   : > { %10348 = vst [vmem:[#allocation18_spill] sm:$0xff] %v8926_v58  ;;  %v2570_v34 = vadd.f32 %v2554_v22, %v2520_v1  ;;  %v2074_v14 = vadd.f32 %v8523_v50, %v2036_v0  ;;  %v2038_v59 = vmul.f32 %v8521_v26, %v1899_v2  ;;  %v6278_v12 = vor.u32 %v6750_v25, %v6277_v19 }
 0x15f   : > { %10349 = vst [vmem:[#allocation25_spill] sm:$0xff] %v8930_v24  ;;  %v2621_v6 = vadd.f32 %v8894_v3, %v2571_v52  ;;  %v2192_v45 = vrot.slane %v2160_v43, 7  ;;  %v2240_v56 = vrot.slane %v2160_v43, 1  ;;  %v1997_v10 = vadd.f32 %v1996_v53, %v1947_v23 }
 0x160   : > { %v8937_v44 = vadd.f32 %v8634_v40, %v2719_v37  ;;  %v2777_v51 = vmax.f32 %v2074_v14, 0.0  ;;  %v6282_v5 = vor.u32 %v6749_v29, %v6279_v21  ;;  %v1902_v36 = vadd.f32 %v1901_v8, %v1852_v7 }
 0x161   : > { %v2208_v46 = vmul.f32 %v7294_v38, %v2192_v45  ;;  %v2256_v1 = vmul.f32 %v7296_v39, %v2240_v56  ;;  %v2506_v61 = vmul.f32 %v8591_v9, %v2160_v43  ;;  %v2075_v16 = vadd.f32 %v8567_v48, %v2037_v49 }
 0x162   : > { %v2654_v30 = vmul.f32 %v8657_v35, %v2160_v43  ;;  %v2809_v22 = vrot.slane %v2777_v51, 7  ;;  %v2857_v62 = vrot.slane %v2777_v51, 1  ;;  %v2076_v2 = vadd.f32 %v8523_v50, %v2038_v59 }
 0x163   : > { %v2671_v25 = vadd.f32 %v8905_v57, %v2621_v6  ;;  %v2456_v52 = vmul.f32 %v8588_v33, %v2208_v46  ;;  %v2604_v37 = vmul.f32 %v8649_v63, %v2208_v46  ;;  %v8949_v0 = vmul.f32 %v8559_v13, %v1997_v10 }
 0x164   : > { %v2556_v23 = vmul.f32 %v8597_v42, %v2256_v1  ;;  %v2825_v53 = vmul.f32 %v7294_v38, %v2809_v22  ;;  %v2873_v49 = vmul.f32 %v7296_v39, %v2857_v62  ;;  %v2971_v43 = vmul.f32 %v2777_v51, %v8531_v18 }
 0x165   : > { %v2472_v19 = vadd.f32 %v2456_v52, %v2422_v20  ;;  %v2620_v21 = vadd.f32 %v2604_v37, %v2570_v34  ;;  %v2704_v7 = vmul.f32 %v8697_v11, %v2256_v1  ;;  %v2778_v8 = vmax.f32 %v2075_v16, 0.0 }
 0x166   : > { %v2923_v14 = vmul.f32 %v2825_v53, %v8528_v54  ;;  %v3065_v59 = vmul.f32 %v2825_v53, %v8548_v32  ;;  %v3113_v6 = vmul.f32 %v2777_v51, %v8556_v27  ;;  %v2779_v45 = vmax.f32 %v2076_v2, 0.0 }
 0x167   : > { %v2522_v56 = vadd.f32 %v2506_v61, %v2472_v19  ;;  %v2670_v29 = vadd.f32 %v2654_v30, %v2620_v21  ;;  %v2810_v10 = vrot.slane %v2778_v8, 7  ;;  %v2858_v46 = vrot.slane %v2778_v8, 1  ;;  %3671 = vmatmul.bf16.gmra.mxu0 %v6278_v12  ;;  %3720 = vmatmul.bf16.gmra.mxu1 %v6282_v5  ;;  %v10350_v30 = vld [vmem:[#allocation12_spill] sm:$0xff] }
 0x168   : > { %v2721_v22 = vadd.f32 %v8911_v4, %v2671_v25  ;;  %v2987_v20 = vadd.f32 %v2971_v43, %v2923_v14  ;;  %v3019_v34 = vmul.f32 %v2873_v49, %v8535_v47  ;;  %v3081_v11 = vadd.f32 %v3065_v59, %v8561_v55  ;;  %3769 = vmatmul.bf16.gmra.mxu2 %v6278_v12  ;;  %v10351_v55 = vld [vmem:[#allocation10_spill] sm:$0xff] }
 0x169   : > { %v2572_v1 = vadd.f32 %v2556_v23, %v2522_v56  ;;  %v2720_v16 = vadd.f32 %v2704_v7, %v2670_v29  ;;  %v3161_v62 = vmul.f32 %v2873_v49, %v8564_v31  ;;  %v2826_v51 = vmul.f32 %v7294_v38, %v2810_v10  ;;  %3818 = vmatmul.bf16.gmra.mxu3 %v6282_v5  ;;  %v10352_v29 = vld [vmem:[#allocation13_spill] sm:$0xff] }
 0x16a   : > { %v2874_v61 = vmul.f32 %v7296_v39, %v2858_v46  ;;  %v2972_v2 = vmul.f32 %v2778_v8, %v10350_v30  ;;  %v2811_v52 = vrot.slane %v2779_v45, 7  ;;  %v2859_v37 = vrot.slane %v2779_v45, 1 }
 0x16b   : > { %v2622_v25 = vadd.f32 %v8918_v41, %v2572_v1  ;;  %v2741_v53 = vadd.f32 %v8672_v28, %v2720_v16  ;;  %v3129_v43 = vadd.f32 %v3113_v6, %v3081_v11  ;;  %v2924_v12 = vmul.f32 %v2826_v51, %v10351_v55 }
 0x16c   : > { %v3035_v23 = vadd.f32 %v3019_v34, %v2987_v20  ;;  %v3066_v19 = vmul.f32 %v2826_v51, %v8588_v33  ;;  %v2827_v49 = vmul.f32 %v7294_v38, %v2811_v52  ;;  %v2040_v5 = vmul.f32 %v8521_v26, %v1902_v36 }
 0x16d   : > { %v2672_v21 = vadd.f32 %v8926_v58, %v2622_v25  ;;  %v2750_v7 = vpack.c.bf16 %v2741_v53, %v8937_v44  ;;  %v2988_v14 = vadd.f32 %v2972_v2, %v2924_v12  ;;  %v2875_v59 = vmul.f32 %v7296_v39, %v2859_v37  ;;  %v1950_v25 = vpop.f32.mrf.mxu2  ;;  %v1999_v53 = vpop.f32.mrf.mxu3 }
 0x16e   : > { %v3020_v56 = vmul.f32 %v2874_v61, %v8579_v15  ;;  %v3082_v6 = vadd.f32 %v3066_v19, %v10352_v29  ;;  %v2925_v10 = vmul.f32 %v2827_v49, %v8528_v54  ;;  %v3067_v46 = vmul.f32 %v2827_v49, %v8548_v32  ;;  %v6287_v19 = vld [vmem:[#allocation4 + $0x28] sm:$0xf0] }
 0x16f   : > { %v2742_v20 = vadd.f32 %v8634_v40, %v2721_v22  ;;  %v2722_v34 = vadd.f32 %v8930_v24, %v2672_v21  ;;  %2758 = vst [vmem:[#allocation4 + $0x30] sm:$0xff] %v2750_v7  ;;  %v3177_v36 = vadd.f32 %v3161_v62, %v3129_v43  ;;  %v3114_v11 = vmul.f32 %v2778_v8, %v8591_v9  ;;  %v6752_v62 = vld [vmem:[#allocation4 + $0x24] sm:$0xf0]  ;;  %v6751_v24 = vld [vmem:[#allocation4 + $0x24] sm:$0xf] }
 0x170   : > { %v8982_v44 = vadd.f32 %v3020_v56, %v2988_v14  ;;  %v3162_v1 = vmul.f32 %v2874_v61, %v8597_v42  ;;  %v2973_v16 = vmul.f32 %v2779_v45, %v8531_v18  ;;  %v3083_v51 = vadd.f32 %v3067_v46, %v3035_v23  ;;  %v6285_v56 = vld [vmem:[#allocation4 + $0x20] sm:$0xf] }
 0x171   : > { %v2743_v2 = vadd.f32 %v8672_v28, %v2722_v34  ;;  %v3021_v52 = vmul.f32 %v2875_v59, %v8535_v47  ;;  %v3115_v37 = vmul.f32 %v2779_v45, %v8556_v27  ;;  %v3209_v22 = vmul.f32 %v2827_v49, %v8612_v60 }
 0x172   : > { %v3130_v43 = vadd.f32 %v3114_v11, %v3082_v6  ;;  %v2989_v8 = vadd.f32 %v2973_v16, %v2925_v10  ;;  %v3257_v12 = vmul.f32 %v2779_v45, %v8631_v17  ;;  %v2077_v61 = vadd.f32 %v8567_v48, %v8949_v0  ;;  %v8998_v45 = vld [vmem:[%s10192_s1 + $0x30] ss:$0 sm:$0xff] }
 0x173   : > { %v2751_v23 = vpack.c.bf16 %v2743_v2, %v2742_v20  ;;  %v3131_v21 = vadd.f32 %v3115_v37, %v3083_v51  ;;  %v3225_v7 = vadd.f32 %v3209_v22, %v3177_v36  ;;  %v2078_v14 = vadd.f32 %v8523_v50, %v2040_v5  ;;  %v1854_v20 = vpop.f32.mrf.mxu0  ;;  %v1903_v36 = vpop.f32.mrf.mxu1 }
 0x174   : > { %v3163_v29 = vmul.f32 %v2875_v59, %v8564_v31  ;;  %v2780_v49 = vmax.f32 %v2077_v61, 0.0  ;;  %v2000_v46 = vadd.f32 %v1999_v53, %v1950_v25  ;;  %v6286_v34 = vor.u32 %v6752_v62, %v6285_v56 }
 0x175   : > { %2759 = vst [vmem:[#allocation4 + $0x38] sm:$0xff] %v2751_v23  ;;  %v3273_v6 = vadd.f32 %v3257_v12, %v3225_v7  ;;  %v3305_v0 = vmul.f32 %v8998_v45, %v2875_v59  ;;  %v2781_v10 = vmax.f32 %v2078_v14, 0.0  ;;  %v6290_v5 = vor.u32 %v6751_v24, %v6287_v19 }
 0x176   : > { %v3178_v11 = vadd.f32 %v3162_v1, %v3130_v43  ;;  %v3037_v16 = vadd.f32 %v3021_v52, %v2989_v8  ;;  %v2812_v51 = vrot.slane %v2780_v49, 7  ;;  %v2860_v2 = vrot.slane %v2780_v49, 1 }
 0x177   : > { %v3179_v37 = vadd.f32 %v3163_v29, %v3131_v21  ;;  %v3321_v22 = vadd.f32 %v3305_v0, %v3273_v6  ;;  %v2813_v25 = vrot.slane %v2781_v10, 7  ;;  %v2861_v53 = vrot.slane %v2781_v10, 1  ;;  %3676 = vmatmul.bf16.gmra.mxu0 %v6286_v34  ;;  %3725 = vmatmul.bf16.gmra.mxu1 %v6290_v5 }
 0x178   : > { %v2828_v62 = vmul.f32 %v7294_v38, %v2812_v51  ;;  %v2876_v12 = vmul.f32 %v7296_v39, %v2860_v2  ;;  %v2041_v59 = vmul.f32 %v8559_v13, %v2000_v46  ;;  %v1904_v61 = vadd.f32 %v1903_v36, %v1854_v20  ;;  %3774 = vmatmul.bf16.gmra.mxu2 %v6286_v34  ;;  %v1952_v46 = vpop.f32.mrf.mxu2  ;;  %v2001_v34 = vpop.f32.mrf.mxu3 }
 0x179   : > { %v2974_v24 = vmul.f32 %v2780_v49, %v10350_v30  ;;  %v3116_v1 = vmul.f32 %v2780_v49, %v8591_v9  ;;  %v2829_v52 = vmul.f32 %v7294_v38, %v2813_v25  ;;  %v2877_v43 = vmul.f32 %v7296_v39, %v2861_v53  ;;  %3823 = vmatmul.bf16.gmra.mxu3 %v6290_v5  ;;  %v9023_v5 = vld [vmem:[%s10192_s1 + $0x38] ss:$0 sm:$0xff] }
 0x17a   : > { %v2926_v8 = vmul.f32 %v2828_v62, %v10351_v55  ;;  %v3068_v19 = vmul.f32 %v2828_v62, %v8588_v33  ;;  %v3258_v23 = vmul.f32 %v2780_v49, %v8657_v35  ;;  %v2975_v21 = vmul.f32 %v2781_v10, %v8531_v18 }
 0x17b   : > { %v3337_v7 = vadd.f32 %v3321_v22, %v8634_v40  ;;  %v3210_v14 = vmul.f32 %v2828_v62, %v8649_v63  ;;  %v2927_v56 = vmul.f32 %v2829_v52, %v8528_v54  ;;  %v3117_v29 = vmul.f32 %v2781_v10, %v8556_v27  ;;  %v1906_v4 = vpop.f32.mrf.mxu1 }
 0x17c   : > { %v3022_v6 = vmul.f32 %v2876_v12, %v8579_v15  ;;  %v3084_v0 = vadd.f32 %v3068_v19, %v8982_v44  ;;  %v3069_v20 = vmul.f32 %v2829_v52, %v8548_v32  ;;  %v3259_v49 = vmul.f32 %v2781_v10, %v8631_v17 }
 0x17d   : > { %v3226_v36 = vadd.f32 %v3210_v14, %v3178_v11  ;;  %v3306_v51 = vmul.f32 %v9023_v5, %v2876_v12  ;;  %v3023_v2 = vmul.f32 %v2877_v43, %v8535_v47  ;;  %v3211_v22 = vmul.f32 %v2829_v52, %v8612_v60  ;;  %v1857_v14 = vpop.f32.mrf.mxu0 }
 0x17e   : > { %v2990_v25 = vadd.f32 %v2974_v24, %v2926_v8  ;;  %v2991_v53 = vadd.f32 %v2975_v21, %v2927_v56  ;;  %v3085_v62 = vadd.f32 %v3069_v20, %v3037_v16  ;;  %v2079_v44 = vadd.f32 %v8567_v48, %v2041_v59 }
 0x17f   : > { %v3132_v19 = vadd.f32 %v3116_v1, %v3084_v0  ;;  %v3274_v58 = vadd.f32 %v3258_v23, %v3226_v36  ;;  %v3227_v10 = vadd.f32 %v3211_v22, %v3179_v37  ;;  %v2042_v11 = vmul.f32 %v8521_v26, %v1904_v61 }
 0x180   : > { %v3164_v41 = vmul.f32 %v2876_v12, %v8597_v42  ;;  %v3165_v57 = vmul.f32 %v2877_v43, %v8564_v31  ;;  %v3307_v3 = vmul.f32 %v8998_v45, %v2877_v43  ;;  %v2782_v47 = vmax.f32 %v2079_v44, 0.0  ;;  %v1955_v22 = vpop.f32.mrf.mxu2 }
 0x181   : > { %v3322_v52 = vadd.f32 %v3306_v51, %v3274_v58  ;;  %v3133_v24 = vadd.f32 %v3117_v29, %v3085_v62  ;;  %v3275_v8 = vadd.f32 %v3259_v49, %v3227_v10  ;;  %v2080_v16 = vadd.f32 %v8523_v50, %v2042_v11 }
 0x182   : > { %v2814_v59 = vrot.slane %v2782_v47, 7  ;;  %v2862_v1 = vrot.slane %v2782_v47, 1  ;;  %v2002_v23 = vadd.f32 %v2001_v34, %v1952_v46  ;;  %v1907_v37 = vadd.f32 %v1906_v4, %v1857_v14  ;;  %v2004_v46 = vpop.f32.mrf.mxu3 }
 0x183   : > { %v3038_v21 = vadd.f32 %v3022_v6, %v2990_v25  ;;  %v3180_v61 = vadd.f32 %v3164_v41, %v3132_v19  ;;  %v3338_v56 = vadd.f32 %v3322_v52, %v8672_v28  ;;  %v3039_v0 = vadd.f32 %v3023_v2, %v2991_v53 }
 0x184   : > { %v3323_v12 = vadd.f32 %v3307_v3, %v3275_v8  ;;  %v2830_v20 = vmul.f32 %v7294_v38, %v2814_v59  ;;  %v2878_v43 = vmul.f32 %v7296_v39, %v2862_v1  ;;  %v2783_v36 = vmax.f32 %v2080_v16, 0.0 }
 0x185   : > { %v3353_v58 = vpack.c.bf16 %v3338_v56, %v3337_v7  ;;  %v3181_v29 = vadd.f32 %v3165_v57, %v3133_v24  ;;  %v2976_v49 = vmul.f32 %v2782_v47, %v10350_v30  ;;  %v3118_v51 = vmul.f32 %v2782_v47, %v8591_v9 }
 0x186   : > { %v2928_v4 = vmul.f32 %v2830_v20, %v10351_v55  ;;  %v3070_v41 = vmul.f32 %v2830_v20, %v8588_v33  ;;  %v2043_v34 = vmul.f32 %v8559_v13, %v2002_v23  ;;  %v2044_v3 = vmul.f32 %v8521_v26, %v1907_v37 }
 0x187   : > { %3361 = vst [vmem:[#allocation4 + $0x40] sm:$0xff] %v3353_v58  ;;  %v3212_v6 = vmul.f32 %v2830_v20, %v8649_v63  ;;  %v3260_v7 = vmul.f32 %v2782_v47, %v8657_v35  ;;  %v2815_v57 = vrot.slane %v2783_v36, 7  ;;  %v2863_v2 = vrot.slane %v2783_v36, 1 }
 0x188   : > { %v3339_v25 = vadd.f32 %v3323_v12, %v8634_v40  ;;  %v3024_v53 = vmul.f32 %v2878_v43, %v8579_v15  ;;  %v3086_v62 = vadd.f32 %v3070_v41, %v3038_v21  ;;  %v2005_v44 = vadd.f32 %v2004_v46, %v1955_v22  ;;  %v10353_v22 = vld [vmem:[#allocation9_spill] sm:$0xff]  ;;  %v1859_v41 = vpop.f32.mrf.mxu0 }
 0x189   : > { %v2992_v19 = vadd.f32 %v2976_v49, %v2928_v4  ;;  %v3166_v10 = vmul.f32 %v2878_v43, %v8597_v42  ;;  %v3228_v11 = vadd.f32 %v3212_v6, %v3180_v61  ;;  %v2831_v14 = vmul.f32 %v7294_v38, %v2815_v57 }
 0x18a   : > { %v3134_v52 = vadd.f32 %v3118_v51, %v3086_v62  ;;  %v2879_v24 = vmul.f32 %v7296_v39, %v2863_v2  ;;  %v2081_v8 = vadd.f32 %v8567_v48, %v2043_v34  ;;  %v2082_v47 = vadd.f32 %v8523_v50, %v2044_v3  ;;  %v1908_v34 = vpop.f32.mrf.mxu1 }
 0x18b   : > { %v3276_v16 = vadd.f32 %v3260_v7, %v3228_v11  ;;  %v3308_v59 = vmul.f32 %v9023_v5, %v2878_v43  ;;  %v2929_v1 = vmul.f32 %v2831_v14, %v8528_v54  ;;  %v3071_v23 = vmul.f32 %v2831_v14, %v8548_v32 }
 0x18c   : > { %v2977_v37 = vmul.f32 %v2783_v36, %v8531_v18  ;;  %v3119_v21 = vmul.f32 %v2783_v36, %v8556_v27  ;;  %v3213_v61 = vmul.f32 %v2831_v14, %v8612_v60  ;;  %v3261_v56 = vmul.f32 %v2783_v36, %v8631_v17 }
 0x18d   : > { %v3040_v12 = vadd.f32 %v3024_v53, %v2992_v19  ;;  %v3324_v20 = vadd.f32 %v3308_v59, %v3276_v16  ;;  %v3087_v58 = vadd.f32 %v3071_v23, %v3039_v0  ;;  %v2784_v49 = vmax.f32 %v2081_v8, 0.0 }
 0x18e   : > { %v3182_v51 = vadd.f32 %v3166_v10, %v3134_v52  ;;  %v3025_v46 = vmul.f32 %v2879_v24, %v10353_v22  ;;  %v3229_v43 = vadd.f32 %v3213_v61, %v3181_v29  ;;  %v2785_v4 = vmax.f32 %v2082_v47, 0.0 }
 0x18f   : > { %v3340_v3 = vadd.f32 %v3324_v20, %v8672_v28  ;;  %v2993_v6 = vadd.f32 %v2977_v37, %v2929_v1  ;;  %v3167_v7 = vmul.f32 %v2879_v24, %v8564_v31  ;;  %v2816_v57 = vrot.slane %v2784_v49, 7 }
 0x190   : > { %v3135_v2 = vadd.f32 %v3119_v21, %v3087_v58  ;;  %v3277_v62 = vadd.f32 %v3261_v56, %v3229_v43  ;;  %v3309_v36 = vmul.f32 %v8998_v45, %v2879_v24  ;;  %v2864_v53 = vrot.slane %v2784_v49, 1 }
 0x191   : > { %v3354_v0 = vpack.c.bf16 %v3340_v3, %v3339_v25  ;;  %v2832_v19 = vmul.f32 %v7294_v38, %v2816_v57  ;;  %v2045_v10 = vmul.f32 %v8559_v13, %v2005_v44  ;;  %v1909_v29 = vadd.f32 %v1908_v34, %v1859_v41  ;;  %v6754_v57 = vld [vmem:[#allocation4 + $0x34] sm:$0xf0] }
 0x192   : > { %v3325_v11 = vadd.f32 %v3309_v36, %v3277_v62  ;;  %v2880_v14 = vmul.f32 %v7296_v39, %v2864_v53  ;;  %v2817_v52 = vrot.slane %v2785_v4, 7  ;;  %v2865_v8 = vrot.slane %v2785_v4, 1 }
 0x193   : > { %3362 = vst [vmem:[#allocation4 + $0x48] sm:$0xff] %v3354_v0  ;;  %v3041_v47 = vadd.f32 %v3025_v46, %v2993_v6  ;;  %v2930_v16 = vmul.f32 %v2832_v19, %v10351_v55  ;;  %v3072_v59 = vmul.f32 %v2832_v19, %v8588_v33  ;;  %v3214_v24 = vmul.f32 %v2832_v19, %v8649_v63  ;;  %v6295_v0 = vld [vmem:[#allocation4 + $0x38] sm:$0xf0] }
 0x194   : > { %v3183_v1 = vadd.f32 %v3167_v7, %v3135_v2  ;;  %v2978_v25 = vmul.f32 %v2784_v49, %v10350_v30  ;;  %v3120_v23 = vmul.f32 %v2784_v49, %v8591_v9  ;;  %v3262_v44 = vmul.f32 %v2784_v49, %v8657_v35 }
 0x195   : > { %v3088_v37 = vadd.f32 %v3072_v59, %v3040_v12  ;;  %v3230_v21 = vadd.f32 %v3214_v24, %v3182_v51  ;;  %v2833_v61 = vmul.f32 %v7294_v38, %v2817_v52  ;;  %v2979_v56 = vmul.f32 %v2785_v4, %v8531_v18 }
 0x196   : > { %v3341_v20 = vadd.f32 %v3325_v11, %v8634_v40  ;;  %v3026_v58 = vmul.f32 %v2880_v14, %v8579_v15  ;;  %v2881_v46 = vmul.f32 %v7296_v39, %v2865_v8  ;;  %v2083_v43 = vadd.f32 %v8567_v48, %v2045_v10  ;;  %v6293_v8 = vld [vmem:[#allocation4 + $0x30] sm:$0xf] }
 0x197   : > { %v2994_v41 = vadd.f32 %v2978_v25, %v2930_v16  ;;  %v3278_v34 = vadd.f32 %v3262_v44, %v3230_v21  ;;  %v3310_v3 = vmul.f32 %v9023_v5, %v2880_v14  ;;  %v2931_v49 = vmul.f32 %v2833_v61, %v8528_v54  ;;  %v6753_v25 = vld [vmem:[#allocation4 + $0x34] sm:$0xf] }
 0x198   : > { %v3073_v12 = vmul.f32 %v2833_v61, %v8548_v32  ;;  %v3121_v51 = vmul.f32 %v2785_v4, %v8556_v27  ;;  %v3215_v6 = vmul.f32 %v2833_v61, %v8612_v60  ;;  %v3263_v7 = vmul.f32 %v2785_v4, %v8631_v17  ;;  %v1957_v61 = vpop.f32.mrf.mxu2 }
 0x199   : > { %v3136_v2 = vadd.f32 %v3120_v23, %v3088_v37  ;;  %v3326_v62 = vadd.f32 %v3310_v3, %v3278_v34  ;;  %v2995_v36 = vadd.f32 %v2979_v56, %v2931_v49  ;;  %v3027_v53 = vmul.f32 %v2881_v46, %v10353_v22  ;;  %v2006_v56 = vpop.f32.mrf.mxu3 }
 0x19a   : > { %v3089_v19 = vadd.f32 %v3073_v12, %v3041_v47  ;;  %v3231_v10 = vadd.f32 %v3215_v6, %v3183_v1  ;;  %v3311_v11 = vmul.f32 %v8998_v45, %v2881_v46  ;;  %v2786_v52 = vmax.f32 %v2083_v43, 0.0  ;;  %v6825_v47 = vld [vmem:[%s10194_s3 + $0x274] sm:$0xf] }
 0x19b   : > { %v3168_v16 = vmul.f32 %v2880_v14, %v8597_v42  ;;  %v3342_v59 = vadd.f32 %v3326_v62, %v8672_v28  ;;  %v2046_v24 = vmul.f32 %v8521_v26, %v1909_v29  ;;  %v6294_v4 = vor.u32 %v6754_v57, %v6293_v8  ;;  %v6622_v14 = vld [vmem:[%s10194_s3 + $0x278] sm:$0xf0] }
 0x19c   : > { %v3279_v23 = vadd.f32 %v3263_v7, %v3231_v10  ;;  %v2818_v44 = vrot.slane %v2786_v52, 7  ;;  %v2866_v37 = vrot.slane %v2786_v52, 1  ;;  %v6298_v21 = vor.u32 %v6753_v25, %v6295_v0 }
 0x19d   : > { %v3042_v1 = vadd.f32 %v3026_v58, %v2994_v41  ;;  %v3184_v43 = vadd.f32 %v3168_v16, %v3136_v2  ;;  %v3355_v34 = vpack.c.bf16 %v3342_v59, %v3341_v20  ;;  %v3169_v29 = vmul.f32 %v2881_v46, %v8564_v31  ;;  %3681 = vmatmul.bf16.gmra.mxu0 %v6294_v4  ;;  %v6841_v20 = vld [vmem:[%s10194_s3 + $0x2f4] sm:$0xf]  ;;  %v6686_v58 = vld [vmem:[%s10194_s3 + $0x2f8] sm:$0xf0]  ;;  %v6620_v59 = vld [vmem:[%s10194_s3 + $0x270] sm:$0xf] }
 0x19e   : > { %v3043_v3 = vadd.f32 %v3027_v53, %v2995_v36  ;;  %v3137_v49 = vadd.f32 %v3121_v51, %v3089_v19  ;;  %v3327_v12 = vadd.f32 %v3311_v11, %v3279_v23  ;;  %v2834_v6 = vmul.f32 %v7294_v38, %v2818_v44  ;;  %3730 = vmatmul.bf16.gmra.mxu1 %v6298_v21  ;;  %v1862_v44 = vpop.f32.mrf.mxu0 }
 0x19f   : > { %3363 = vst [vmem:[#allocation4 + $0x50] sm:$0xff] %v3355_v34  ;;  %v2084_v7 = vadd.f32 %v8523_v50, %v2046_v24  ;;  %3779 = vmatmul.bf16.gmra.mxu2 %v6294_v4  ;;  %3828 = vmatmul.bf16.gmra.mxu3 %v6298_v21  ;;  %v2007_v57 = vadd.f32 %v2006_v56, %v1957_v61  ;;  %v6826_v24 = vld [vmem:[%s10194_s3 + $0x274] sm:$0xf0]  ;;  %v6684_v21 = vld [vmem:[%s10194_s3 + $0x2f0] sm:$0xf] }
 0x1a0   : > { %v6625_v62 = vor.u32 %v6825_v47, %v6622_v14  ;;  %v2882_v46 = vmul.f32 %v7296_v39, %v2866_v37  ;;  %v2932_v41 = vmul.f32 %v2834_v6, %v10351_v55  ;;  %v2980_v51 = vmul.f32 %v2786_v52, %v10350_v30  ;;  %v1911_v37 = vpop.f32.mrf.mxu1  ;;  %v6842_v61 = vld [vmem:[%s10194_s3 + $0x2f4] sm:$0xf0] }
 0x1a1   : > { %v3074_v2 = vmul.f32 %v2834_v6, %v8588_v33  ;;  %v3122_v36 = vmul.f32 %v2786_v52, %v8591_v9  ;;  %v3216_v53 = vmul.f32 %v2834_v6, %v8649_v63  ;;  %v3264_v0 = vmul.f32 %v2786_v52, %v8657_v35 }
 0x1a2   : > { %v2787_v19 = vmax.f32 %v2084_v7, 0.0  ;;  %5597 = vmatpush.bf16.msra.mxu2 %v6625_v62  ;;  %v3185_v10 = vadd.f32 %v3169_v29, %v3137_v49  ;;  %v2047_v8 = vmul.f32 %v8559_v13, %v2007_v57  ;;  %v6689_v16 = vor.u32 %v6841_v20, %v6686_v58 }
 0x1a3   : > { %v3090_v11 = vadd.f32 %v3074_v2, %v3042_v1  ;;  %v3343_v4 = vadd.f32 %v3327_v12, %v8634_v40  ;;  %v3232_v25 = vadd.f32 %v3216_v53, %v3184_v43  ;;  %v2996_v56 = vadd.f32 %v2980_v51, %v2932_v41 }
 0x1a4   : > { %v2819_v23 = vrot.slane %v2787_v19, 7  ;;  %v2867_v52 = vrot.slane %v2787_v19, 1  ;;  %v3028_v47 = vmul.f32 %v2882_v46, %v8579_v15  ;;  %v3170_v14 = vmul.f32 %v2882_v46, %v8597_v42  ;;  %5646 = vmatpush.bf16.msra.mxu3 %v6689_v16 }
 0x1a5   : > { %v3312_v1 = vmul.f32 %v9023_v5, %v2882_v46  ;;  %v3280_v43 = vadd.f32 %v3264_v0, %v3232_v25  ;;  %v2981_v29 = vmul.f32 %v2787_v19, %v8531_v18  ;;  %v2085_v49 = vadd.f32 %v8567_v48, %v2047_v8 }
 0x1a6   : > { %v2835_v34 = vmul.f32 %v7294_v38, %v2819_v23  ;;  %v3138_v12 = vadd.f32 %v3122_v36, %v3090_v11  ;;  %v1912_v6 = vadd.f32 %v1911_v37, %v1862_v44  ;;  %v6621_v7 = vor.u32 %v6826_v24, %v6620_v59  ;;  %v1960_v23 = vpop.f32.mrf.mxu2 }
 0x1a7   : > { %v6685_v57 = vor.u32 %v6842_v61, %v6684_v21  ;;  %v3328_v62 = vadd.f32 %v3312_v1, %v3280_v43  ;;  %v2883_v20 = vmul.f32 %v7296_v39, %v2867_v52  ;;  %v3044_v46 = vadd.f32 %v3028_v47, %v2996_v56  ;;  %v2009_v52 = vpop.f32.mrf.mxu3 }
 0x1a8   : > { %v2933_v58 = vmul.f32 %v2835_v34, %v8528_v54  ;;  %v3075_v41 = vmul.f32 %v2835_v34, %v8548_v32  ;;  %v3123_v51 = vmul.f32 %v2787_v19, %v8556_v27  ;;  %v3217_v2 = vmul.f32 %v2835_v34, %v8612_v60  ;;  %5499 = vmatpush.bf16.msra.mxu0 %v6621_v7 }
 0x1a9   : > { %v2788_v53 = vmax.f32 %v2085_v49, 0.0  ;;  %5548 = vmatpush.bf16.msra.mxu1 %v6685_v57  ;;  %v3344_v36 = vadd.f32 %v3328_v62, %v8672_v28  ;;  %v3265_v11 = vmul.f32 %v2787_v19, %v8631_v17  ;;  %v2048_v8 = vmul.f32 %v8521_v26, %v1912_v6 }
 0x1aa   : > { %v3091_v0 = vadd.f32 %v3075_v41, %v3043_v3  ;;  %v2997_v16 = vadd.f32 %v2981_v29, %v2933_v58  ;;  %v3233_v59 = vadd.f32 %v3217_v2, %v3185_v10  ;;  %v3186_v44 = vadd.f32 %v3170_v14, %v3138_v12  ;;  %v1864_v14 = vpop.f32.mrf.mxu0 }
 0x1ab   : > { %v2820_v24 = vrot.slane %v2788_v53, 7  ;;  %v2868_v25 = vrot.slane %v2788_v53, 1  ;;  %v3356_v37 = vpack.c.bf16 %v3344_v36, %v3343_v4  ;;  %v3029_v21 = vmul.f32 %v2883_v20, %v10353_v22  ;;  %v1913_v4 = vpop.f32.mrf.mxu1 }
 0x1ac   : > { %v3171_v61 = vmul.f32 %v2883_v20, %v8564_v31  ;;  %v3139_v56 = vadd.f32 %v3123_v51, %v3091_v0  ;;  %v3281_v47 = vadd.f32 %v3265_v11, %v3233_v59  ;;  %v3313_v3 = vmul.f32 %v8998_v45, %v2883_v20  ;;  %v6303_v59 = vld [vmem:[#allocation4 + $0x48] sm:$0xf0] }
 0x1ad   : > { %v2836_v19 = vmul.f32 %v7294_v38, %v2820_v24  ;;  %3364 = vst [vmem:[#allocation4 + $0x58] sm:$0xff] %v3356_v37  ;;  %v2884_v1 = vmul.f32 %v7296_v39, %v2868_v25  ;;  %v2982_v10 = vmul.f32 %v2788_v53, %v10350_v30  ;;  %v2086_v43 = vadd.f32 %v8523_v50, %v2048_v8 }
 0x1ae   : > { %v2010_v34 = vadd.f32 %v2009_v52, %v1960_v23  ;;  %v3045_v29 = vadd.f32 %v3029_v21, %v2997_v16  ;;  %v3329_v49 = vadd.f32 %v3313_v3, %v3281_v47  ;;  %v3124_v7 = vmul.f32 %v2788_v53, %v8591_v9  ;;  %v6756_v16 = vld [vmem:[#allocation4 + $0x44] sm:$0xf0] }
 0x1af   : > { %v2934_v12 = vmul.f32 %v2836_v19, %v10351_v55  ;;  %v3076_v6 = vmul.f32 %v2836_v19, %v8588_v33  ;;  %v3218_v57 = vmul.f32 %v2836_v19, %v8649_v63  ;;  %v3266_v62 = vmul.f32 %v2788_v53, %v8657_v35 }
 0x1b0   : > { %v2789_v20 = vmax.f32 %v2086_v43, 0.0  ;;  %v3187_v58 = vadd.f32 %v3171_v61, %v3139_v56  ;;  %v2049_v51 = vmul.f32 %v8559_v13, %v2010_v34  ;;  %v1914_v2 = vadd.f32 %v1913_v4, %v1864_v14  ;;  %v6301_v61 = vld [vmem:[#allocation4 + $0x40] sm:$0xf]  ;;  %v6755_v56 = vld [vmem:[#allocation4 + $0x44] sm:$0xf] }
 0x1b1   : > { %v3092_v41 = vadd.f32 %v3076_v6, %v3044_v46  ;;  %v3030_v36 = vmul.f32 %v2884_v1, %v8579_v15  ;;  %v3234_v0 = vadd.f32 %v3218_v57, %v3186_v44  ;;  %v3345_v24 = vadd.f32 %v3329_v49, %v8634_v40 }
 0x1b2   : > { %v2821_v11 = vrot.slane %v2789_v20, 7  ;;  %v2869_v8 = vrot.slane %v2789_v20, 1  ;;  %v2998_v25 = vadd.f32 %v2982_v10, %v2934_v12  ;;  %v3172_v23 = vmul.f32 %v2884_v1, %v8597_v42 }
 0x1b3   : > { %v3314_v53 = vmul.f32 %v9023_v5, %v2884_v1  ;;  %v3140_v52 = vadd.f32 %v3124_v7, %v3092_v41  ;;  %v3282_v37 = vadd.f32 %v3266_v62, %v3234_v0  ;;  %v2087_v21 = vadd.f32 %v8567_v48, %v2049_v51 }
 0x1b4   : > { %v2837_v46 = vmul.f32 %v7294_v38, %v2821_v11  ;;  %v2885_v44 = vmul.f32 %v7296_v39, %v2869_v8  ;;  %v2050_v47 = vmul.f32 %v8521_v26, %v1914_v2  ;;  %v6302_v3 = vor.u32 %v6756_v16, %v6301_v61 }
 0x1b5   : > { %v6306_v19 = vor.u32 %v6755_v56, %v6303_v59  ;;  %v3330_v43 = vadd.f32 %v3314_v53, %v3282_v37  ;;  %v3267_v1 = vmul.f32 %v2789_v20, %v8631_v17  ;;  %v2983_v4 = vmul.f32 %v2789_v20, %v8531_v18  ;;  %v2011_v18 = vpop.f32.mrf.mxu3  ;;  %v6758_v37 = vld [vmem:[#allocation4 + $0x54] sm:$0xf0]  ;;  %v6309_v56 = vld [vmem:[#allocation4 + $0x50] sm:$0xf] }
 0x1b6   : > { %v3077_v10 = vmul.f32 %v2837_v46, %v8548_v32  ;;  %v3219_v34 = vmul.f32 %v2837_v46, %v8612_v60  ;;  %v2935_v14 = vmul.f32 %v2837_v46, %v8528_v54  ;;  %v2790_v49 = vmax.f32 %v2087_v21, 0.0  ;;  %3686 = vmatmul.bf16.gmra.mxu0 %v6302_v3  ;;  %3784 = vmatmul.bf16.gmra.mxu2 %v6302_v3  ;;  %v1962_v54 = vpop.f32.mrf.mxu2 }
 0x1b7   : > { %v2088_v12 = vadd.f32 %v8523_v50, %v2050_v47  ;;  %3735 = vmatmul.bf16.gmra.mxu1 %v6306_v19  ;;  %v3346_v26 = vadd.f32 %v3330_v43, %v8672_v28  ;;  %v3125_v7 = vmul.f32 %v2789_v20, %v8556_v27  ;;  %v3046_v62 = vadd.f32 %v3030_v36, %v2998_v25 }
 0x1b8   : > { %v3093_v6 = vadd.f32 %v3077_v10, %v3045_v29  ;;  %v3235_v57 = vadd.f32 %v3219_v34, %v3187_v58  ;;  %v3315_v41 = vmul.f32 %v8998_v45, %v2885_v44  ;;  %v2822_v51 = vrot.slane %v2790_v49, 7  ;;  %3833 = vmatmul.bf16.gmra.mxu3 %v6306_v19 }
 0x1b9   : > { %v2870_v2 = vrot.slane %v2790_v49, 1  ;;  %v3188_v0 = vadd.f32 %v3172_v23, %v3140_v52  ;;  %v3357_v11 = vpack.c.bf16 %v3346_v26, %v3345_v24  ;;  %v3031_v8 = vmul.f32 %v2885_v44, %v10353_v22 }
 0x1ba   : > { %v3283_v50 = vadd.f32 %v3267_v1, %v3235_v57  ;;  %v2999_v16 = vadd.f32 %v2983_v4, %v2935_v14  ;;  %v2838_v29 = vmul.f32 %v7294_v38, %v2822_v51  ;;  %v2984_v20 = vmul.f32 %v2790_v49, %v10350_v30  ;;  %v6823_v14 = vld [vmem:[%s10194_s3 + $0x264] sm:$0xf] }
 0x1bb   : > { %v2791_v58 = vmax.f32 %v2088_v12, 0.0  ;;  %3365 = vst [vmem:[#allocation4 + $0x60] sm:$0xff] %v3357_v11  ;;  %v3141_v36 = vadd.f32 %v3125_v7, %v3093_v6  ;;  %v9173_v59 = vmul.f32 %v7296_v39, %v2870_v2  ;;  %v3126_v25 = vmul.f32 %v2790_v49, %v8591_v9  ;;  %v6839_v6 = vld [vmem:[%s10194_s3 + $0x2e4] sm:$0xf]  ;;  %v6612_v7 = vld [vmem:[%s10194_s3 + $0x260] sm:$0xf] }
 0x1bc   : > { %v2012_v53 = vadd.f32 %v2011_v18, %v1962_v54  ;;  %v3331_v23 = vadd.f32 %v3315_v41, %v3283_v50  ;;  %v2936_v24 = vmul.f32 %v2838_v29, %v10351_v55  ;;  %v3078_v22 = vmul.f32 %v2838_v29, %v8588_v33  ;;  %v6676_v2 = vld [vmem:[%s10194_s3 + $0x2e0] sm:$0xf]  ;;  %v6840_v54 = vld [vmem:[%s10194_s3 + $0x2e4] sm:$0xf0] }
 0x1bd   : > { %v3220_v52 = vmul.f32 %v2838_v29, %v8649_v63  ;;  %v3268_v46 = vmul.f32 %v2790_v49, %v8657_v35  ;;  %v2823_v30 = vrot.slane %v2791_v58, 7  ;;  %v2871_v21 = vrot.slane %v2791_v58, 1 }
 0x1be   : > { %v3173_v61 = vmul.f32 %v2885_v44, %v8564_v31  ;;  %v3094_v47 = vadd.f32 %v3078_v22, %v3046_v62  ;;  %v3047_v19 = vadd.f32 %v3031_v8, %v2999_v16  ;;  %v9181_v43 = vor.u32 %v6758_v37, %v6309_v56  ;;  %v6614_v44 = vld [vmem:[%s10194_s3 + $0x268] sm:$0xf0] }
 0x1bf   : > { %v3236_v3 = vadd.f32 %v3220_v52, %v3188_v0  ;;  %v3316_v10 = vmul.f32 %v9023_v5, %v9173_v59  ;;  %v2839_v55 = vmul.f32 %v7294_v38, %v2823_v30  ;;  %v2887_v34 = vmul.f32 %v7296_v39, %v2871_v21  ;;  %v6604_v21 = vld [vmem:[%s10194_s3 + $0x250] sm:$0xf] }
 0x1c0   : > { %v2051_v1 = vmul.f32 %v8559_v13, %v2012_v53  ;;  %v3347_v4 = vadd.f32 %v3331_v23, %v8634_v40  ;;  %v3000_v49 = vadd.f32 %v2984_v20, %v2936_v24  ;;  %v3127_v26 = vmul.f32 %v2791_v58, %v8556_v27  ;;  %v6678_v13 = vld [vmem:[%s10194_s3 + $0x2e8] sm:$0xf0]  ;;  %v6824_v27 = vld [vmem:[%s10194_s3 + $0x264] sm:$0xf0]  ;;  %v6757_v53 = vld [vmem:[#allocation4 + $0x54] sm:$0xf] }
 0x1c1   : > { %v3284_v12 = vadd.f32 %v3268_v46, %v3236_v3  ;;  %v3079_v57 = vmul.f32 %v2839_v55, %v8548_v32  ;;  %v3189_v62 = vadd.f32 %v3173_v61, %v3141_v36  ;;  %v3221_v41 = vmul.f32 %v2839_v55, %v8612_v60  ;;  %v6837_v23 = vld [vmem:[%s10194_s3 + $0x2d4] sm:$0xf]  ;;  %v6670_v24 = vld [vmem:[%s10194_s3 + $0x2d8] sm:$0xf0]  ;;  %v6822_v61 = vld [vmem:[%s10194_s3 + $0x254] sm:$0xf0] }
 0x1c2   : > { %v3269_v51 = vmul.f32 %v2791_v58, %v8631_v17  ;;  %v3142_v18 = vadd.f32 %v3126_v25, %v3094_v47  ;;  %v2089_v32 = vadd.f32 %v8567_v48, %v2051_v1  ;;  %v3032_v60 = vmul.f32 %v9173_v59, %v8579_v15  ;;  %v6311_v17 = vld [vmem:[#allocation4 + $0x58] sm:$0xf0]  ;;  %v6821_v25 = vld [vmem:[%s10194_s3 + $0x254] sm:$0xf]  ;;  %v6598_v1 = vld [vmem:[%s10194_s3 + $0x248] sm:$0xf0] }
 0x1c3   : > { %v3332_v0 = vadd.f32 %v3316_v10, %v3284_v12  ;;  %v3095_v11 = vadd.f32 %v3079_v57, %v3047_v19  ;;  %v3175_v50 = vmul.f32 %v2887_v34, %v8564_v31  ;;  %v6617_v8 = vor.u32 %v6823_v14, %v6614_v44  ;;  %v6606_v31 = vld [vmem:[%s10194_s3 + $0x258] sm:$0xf0]  ;;  %v6838_v19 = vld [vmem:[%s10194_s3 + $0x2d4] sm:$0xf0]  ;;  %v6819_v10 = vld [vmem:[%s10194_s3 + $0x244] sm:$0xf] }
 0x1c4   : > { %v6681_v16 = vor.u32 %v6839_v6, %v6678_v13  ;;  %v2792_v20 = vmax.f32 %v2089_v32, 0.0  ;;  %v6613_v58 = vor.u32 %v6824_v27, %v6612_v7  ;;  %v6677_v36 = vor.u32 %v6840_v54, %v6676_v2  ;;  %v6835_v14 = vld [vmem:[%s10194_s3 + $0x2c4] sm:$0xf]  ;;  %v6820_v6 = vld [vmem:[%s10194_s3 + $0x244] sm:$0xf0]  ;;  %v10354_v27 = vld [vmem:[#allocation11_spill] sm:$0xff] }
 0x1c5   : > { %v3348_v29 = vadd.f32 %v3332_v0, %v8672_v28  ;;  %v3143_v48 = vadd.f32 %v3127_v26, %v3095_v11  ;;  %v3237_v37 = vadd.f32 %v3221_v41, %v3189_v62  ;;  %5598 = vmatpush.bf16.msra.mxu2 %v6617_v8  ;;  %v6314_v15 = vor.u32 %v6757_v53, %v6311_v17  ;;  %v6662_v26 = vld [vmem:[%s10194_s3 + $0x2c8] sm:$0xf0]  ;;  %v6660_v41 = vld [vmem:[%s10194_s3 + $0x2c0] sm:$0xf]  ;;  %v6654_v17 = vld [vmem:[%s10194_s3 + $0x2b8] sm:$0xf0] }
 0x1c6   : > { %5647 = vmatpush.bf16.msra.mxu3 %v6681_v16  ;;  %v2824_v52 = vrot.slane %v2792_v20, 7  ;;  %v2872_v46 = vrot.slane %v2792_v20, 1  ;;  %v3174_v30 = vmul.f32 %v9173_v59, %v8597_v42  ;;  %5500 = vmatpush.bf16.msra.mxu0 %v6613_v58  ;;  %v3317_v47 = vmul.f32 %v8998_v45, %v2887_v34  ;;  %v6668_v59 = vld [vmem:[%s10194_s3 + $0x2d0] sm:$0xf] }
 0x1c7   : > { %v3358_v22 = vpack.c.bf16 %v3348_v29, %v3347_v4  ;;  %5549 = vmatpush.bf16.msra.mxu1 %v6677_v36  ;;  %v3191_v56 = vadd.f32 %v3175_v50, %v3143_v48  ;;  %v3048_v3 = vadd.f32 %v3032_v60, %v3000_v49  ;;  %3691 = vmatmul.bf16.gmra.mxu0 %v9181_v43  ;;  %v6588_v11 = vld [vmem:[%s10194_s3 + $0x230] sm:$0xf]  ;;  %v6818_v50 = vld [vmem:[%s10194_s3 + $0x234] sm:$0xf0] }
 0x1c8   : > { %3740 = vmatmul.bf16.gmra.mxu1 %v6314_v15  ;;  %v2840_v55 = vmul.f32 %v7294_v38, %v2824_v52  ;;  %v3190_v45 = vadd.f32 %v3174_v30, %v3142_v18  ;;  %3789 = vmatmul.bf16.gmra.mxu2 %v9181_v43  ;;  %v6609_v34 = vor.u32 %v6821_v25, %v6606_v31  ;;  %v6596_v43 = vld [vmem:[%s10194_s3 + $0x240] sm:$0xf]  ;;  %v6652_v25 = vld [vmem:[%s10194_s3 + $0x2b0] sm:$0xf]  ;;  %v6834_v48 = vld [vmem:[%s10194_s3 + $0x2b4] sm:$0xf0] }
 0x1c9   : > { %3366 = vst [vmem:[#allocation4 + $0x68] sm:$0xff] %v3358_v22  ;;  %3838 = vmatmul.bf16.gmra.mxu3 %v6314_v15  ;;  %v3285_v44 = vadd.f32 %v3269_v51, %v3237_v37  ;;  %v2888_v4 = vmul.f32 %v7296_v39, %v2872_v46  ;;  %v6673_v49 = vor.u32 %v6837_v23, %v6670_v24  ;;  %v6836_v51 = vld [vmem:[%s10194_s3 + $0x2c4] sm:$0xf0]  ;;  %v10355_v37 = vld [vmem:[#allocation16_spill] sm:$0xff] }
 0x1ca   : > { %v6605_v12 = vor.u32 %v6822_v61, %v6604_v21  ;;  %v3080_v13 = vmul.f32 %v2840_v55, %v8588_v33  ;;  %v3128_v7 = vmul.f32 %v2792_v20, %v8591_v9  ;;  %v3222_v57 = vmul.f32 %v2840_v55, %v8649_v63  ;;  %5599 = vmatpush.bf16.msra.mxu2 %v6609_v34  ;;  %v6817_v9 = vld [vmem:[%s10194_s3 + $0x234] sm:$0xf]  ;;  %v6590_v63 = vld [vmem:[%s10194_s3 + $0x238] sm:$0xf0]  ;;  %v6317_v46 = vld [vmem:[#allocation4 + $0x60] sm:$0xf] }
 0x1cb   : > { %v3270_v62 = vmul.f32 %v2792_v20, %v8657_v35  ;;  %v3239_v2 = vadd.f32 %v3191_v56, %v10354_v27  ;;  %5648 = vmatpush.bf16.msra.mxu3 %v6673_v49  ;;  %v6669_v33 = vor.u32 %v6838_v19, %v6668_v59  ;;  %v6601_v54 = vor.u32 %v6819_v10, %v6598_v1  ;;  %v6833_v35 = vld [vmem:[%s10194_s3 + $0x2b4] sm:$0xf]  ;;  %v9315_v21 = vld [vmem:[%s10192_s1 + $0x40] sm:$0xff]  ;;  %v10357_v10 = vld [vmem:[#allocation17_spill] sm:$0xff] }
 0x1cc   : > { %5501 = vmatpush.bf16.msra.mxu0 %v6605_v12  ;;  %v3096_v18 = vadd.f32 %v3080_v13, %v3048_v3  ;;  %v3238_v0 = vadd.f32 %v3222_v57, %v3190_v45  ;;  %v6665_v32 = vor.u32 %v6835_v14, %v6662_v26  ;;  %v6597_v60 = vor.u32 %v6820_v6, %v6596_v43  ;;  %v10356_v56 = vld [vmem:[#allocation24_spill] sm:$0xff]  ;;  %v10358_v14 = vld [vmem:[#allocation18_spill] sm:$0xff] }
 0x1cd   : > { %v3333_v8 = vadd.f32 %v3317_v47, %v3285_v44  ;;  %v3176_v16 = vmul.f32 %v2888_v4, %v8597_v42  ;;  %5550 = vmatpush.bf16.msra.mxu1 %v6669_v33  ;;  %v6661_v29 = vor.u32 %v6836_v51, %v6660_v41  ;;  %v3318_v36 = vmul.f32 %v9023_v5, %v2888_v4  ;;  %v6459_v5 = vld [vmem:[%s10195_s4 + $0x1] ss:$4 sm:$0x3]  ;;  %v6582_v51 = vld [vmem:[%s10194_s3 + $0x228] sm:$0xf0] }
 0x1ce   : > { %v3144_v20 = vadd.f32 %v3128_v7, %v3096_v18  ;;  %v3286_v58 = vadd.f32 %v3270_v62, %v3238_v0  ;;  %5600 = vmatpush.bf16.msra.mxu2 %v6601_v54  ;;  %v6593_v53 = vor.u32 %v6817_v9, %v6590_v63  ;;  %v3287_v15 = vadd.f32 %v3239_v2, %v10355_v37  ;;  %v6759_v59 = vld [vmem:[#allocation4 + $0x64] sm:$0xf]  ;;  %v10359_v7 = vld [vmem:[#allocation25_spill] sm:$0xff] }
 0x1cf   : > { %5649 = vmatpush.bf16.msra.mxu3 %v6665_v32  ;;  %v6657_v42 = vor.u32 %v6833_v35, %v6654_v17  ;;  %v6589_v31 = vor.u32 %v6818_v50, %v6588_v11  ;;  %v6653_v30 = vor.u32 %v6834_v48, %v6652_v25  ;;  %v3349_v61 = vadd.f32 %v3333_v8, %v8634_v40  ;;  %v6460_v19 = vld [vmem:[%s10196_s5 + $0x1] ss:$4 sm:$0x3]  ;;  %v9339_v62 = vld [vmem:[%s10192_s1 + $0x48] sm:$0xff] }
 0x1d0   : > { %5502 = vmatpush.bf16.msra.mxu0 %v6597_v60  ;;  %v3192_v23 = vadd.f32 %v3176_v16, %v3144_v20  ;;  %v3334_v24 = vadd.f32 %v3318_v36, %v3286_v58  ;;  %v6760_v22 = vld [vmem:[#allocation4 + $0x64] sm:$0xf0]  ;;  %v6319_v52 = vld [vmem:[#allocation4 + $0x68] sm:$0xf0]  ;;  %v3335_v55 = vadd.f32 %v3287_v15, %v10357_v10  ;;  %v9324_v1 = vperm.slane %v6459_v5, 0 }
 0x1d1   : > { %5551 = vmatpush.bf16.msra.mxu1 %v6661_v29  ;;  %v6318_v45 = vor.u32 %v6760_v22, %v6317_v46  ;;  %v6322_v34 = vor.u32 %v6759_v59, %v6319_v52  ;;  %v9328_v26 = vperm.slane %v9315_v21, 0  ;;  %v9331_v43 = vperm.slane %v9315_v21, 1  ;;  %v6815_v41 = vld [vmem:[%s10194_s3 + $0x224] sm:$0xf]  ;;  %v6646_v54 = vld [vmem:[%s10194_s3 + $0x2a8] sm:$0xf0] }
 0x1d2   : > { %v3240_v47 = vadd.f32 %v3192_v23, %v10356_v56  ;;  %v3350_v3 = vadd.f32 %v3334_v24, %v8672_v28  ;;  %5601 = vmatpush.bf16.msra.mxu2 %v6593_v53  ;;  %v9333_v13 = vperm.slane %v6460_v19, 0  ;;  %v3351_v27 = vadd.f32 %v3335_v55, %v8634_v40  ;;  %v6831_v33 = vld [vmem:[%s10194_s3 + $0x2a4] sm:$0xf] }
 0x1d3   : > { %5650 = vmatpush.bf16.msra.mxu3 %v6657_v42  ;;  %v4133_v63 = vmul.f32 0.0, %v9328_v26  ;;  %v4183_v40 = vmul.f32 0.0, %v9331_v43  ;;  %v9359_v35 = vperm.slane %v9315_v21, 2  ;;  %v9363_v0 = vperm.slane %v9339_v62, 0 }
 0x1d4   : > { %5503 = vmatpush.bf16.msra.mxu0 %v6589_v31  ;;  %v3288_v44 = vadd.f32 %v3240_v47, %v10358_v14  ;;  %v3359_v4 = vpack.c.bf16 %v3350_v3, %v3349_v61  ;;  %v3667_v49 = vpop.f32.mrf.mxu0  ;;  %v3716_v12 = vpop.f32.mrf.mxu1  ;;  %v9366_v32 = vperm.slane %v9339_v62, 1  ;;  %v6585_v60 = vor.u32 %v6815_v41, %v6582_v51 }
 0x1d5   : > { %5552 = vmatpush.bf16.msra.mxu1 %v6653_v30  ;;  %v3717_v6 = vadd.f32 %v3716_v12, %v3667_v49  ;;  %10360 = vst [vmem:[#allocation14_spill] sm:$0xff] %v9359_v35  ;;  %v6649_v11 = vor.u32 %v6831_v33, %v6646_v54  ;;  %v9371_v8 = vperm.slane %v9315_v21, 3  ;;  %v4199_v20 = vadd.f32 %v4183_v40, %v4133_v63  ;;  %v6465_v49 = vld [vmem:[%s10193_s2 + $0x2] ss:$4 sm:$0x3] }
 0x1d6   : > { %v3336_v57 = vadd.f32 %v3288_v44, %v10359_v7  ;;  %3367 = vst [vmem:[#allocation4 + $0x70] sm:$0xff] %v3359_v4  ;;  %5602 = vmatpush.bf16.msra.mxu2 %v6585_v60  ;;  %v4233_v58 = vmul.f32 0.0, %v9359_v35  ;;  %v9374_v53 = vperm.slane %v6460_v19, 1  ;;  %v4134_v15 = vmul.f32 0.0, %v9363_v0  ;;  %v6816_v63 = vld [vmem:[%s10194_s3 + $0x224] sm:$0xf0] }
 0x1d7   : > { %3696 = vmatmul.bf16.gmra.mxu0 %v6318_v45  ;;  %v3861_v2 = vmul.f32 %v9324_v1, %v3717_v6  ;;  %5651 = vmatpush.bf16.msra.mxu3 %v6649_v11  ;;  %v4184_v42 = vmul.f32 0.0, %v9366_v32  ;;  %v9379_v31 = vperm.slane %v9339_v62, 2  ;;  %v9387_v52 = vperm.slane %v9315_v21, 5  ;;  %v6644_v40 = vld [vmem:[%s10194_s3 + $0x2a0] sm:$0xf] }
 0x1d8   : > { %3745 = vmatmul.bf16.gmra.mxu1 %v6322_v34  ;;  %v3352_v9 = vadd.f32 %v3336_v57, %v8672_v28  ;;  %3794 = vmatmul.bf16.gmra.mxu2 %v6318_v45  ;;  %v9368_v28 = vperm.slane %v6459_v5, 1  ;;  %v9382_v5 = vperm.slane %v9315_v21, 4  ;;  %v9390_v46 = vperm.slane %v9339_v62, 3 }
 0x1d9   : > { %3843 = vmatmul.bf16.gmra.mxu3 %v6322_v34  ;;  %v3900_v18 = vadd.f32 %v9333_v13, %v3861_v2  ;;  %v9393_v30 = vperm.slane %v9339_v62, 4  ;;  %v9395_v56 = vadd.f32 %v4233_v58, %v4199_v20  ;;  %v4200_v19 = vadd.f32 %v4184_v42, %v4134_v15  ;;  %v6832_v20 = vld [vmem:[%s10194_s3 + $0x2a4] sm:$0xf0] }
 0x1da   : > { %v3360_v17 = vpack.c.bf16 %v3352_v9, %v3351_v27  ;;  %v4234_v10 = vmul.f32 0.0, %v9379_v31  ;;  %v9402_v55 = vperm.slane %v9339_v62, 5  ;;  %v9410_v12 = vperm.slane %v9315_v21, 6  ;;  %v6580_v27 = vld [vmem:[%s10194_s3 + $0x220] sm:$0xf] }
 0x1db   : > { %v3987_v50 = vmax.f32 %v3900_v18, 0.0  ;;  %v3765_v16 = vpop.f32.mrf.mxu2  ;;  %v3814_v29 = vpop.f32.mrf.mxu3  ;;  %10361 = vst [vmem:[#allocation26_spill] sm:$0xff] %v9395_v56  ;;  %v6581_v42 = vor.u32 %v6816_v63, %v6580_v27 }
 0x1dc   : > { %3368 = vst [vmem:[#allocation4 + $0x78] sm:$0xff] %v3360_v17  ;;  %v3815_v36 = vadd.f32 %v3814_v29, %v3765_v16  ;;  %v3669_v25 = vpop.f32.mrf.mxu0  ;;  %v3718_v48 = vpop.f32.mrf.mxu1  ;;  %v9424_v16 = vadd.f32 %v4234_v10, %v4200_v19  ;;  %v9427_v29 = vperm.slane %v9315_v21, 7 }
 0x1dd   : > { %v4019_v37 = vrot.slane %v3987_v50, 7  ;;  %v3719_v24 = vadd.f32 %v3718_v48, %v3669_v25  ;;  %v4067_v61 = vrot.slane %v3987_v50, 1  ;;  %v6325_v45 = vld [vmem:[#allocation4 + $0x70] sm:$0xf]  ;;  %v6761_v34 = vld [vmem:[#allocation4 + $0x74] sm:$0xf]  ;;  %v4185_v57 = vmul.f32 %v9331_v43, %v3987_v50  ;;  %5504 = vmatpush.bf16.msra.mxu0 %v6581_v42 }
 0x1de   : > { %v3862_v23 = vmul.f32 %v9368_v28, %v3815_v36  ;;  %10362 = vst [vmem:[#allocation8_spill] sm:$0xff] %v9424_v16  ;;  %v4333_v36 = vmul.f32 %v9382_v5, %v3987_v50  ;;  %v6574_v42 = vld [vmem:[%s10194_s3 + $0x218] sm:$0xf0] }
 0x1df   : > { %v4035_v22 = vmul.f32 %v7294_v38, %v4019_v37  ;;  %v3863_v3 = vmul.f32 %v9324_v1, %v3719_v24  ;;  %v4083_v2 = vmul.f32 %v7296_v39, %v4067_v61  ;;  %v9434_v37 = vperm.slane %v6465_v49, 0 }
 0x1e0   : > { %v3901_v47 = vadd.f32 %v9374_v53, %v3862_v23  ;;  %v6645_v23 = vor.u32 %v6832_v20, %v6644_v40 }
 0x1e1   : > { %v4283_v59 = vmul.f32 %v9371_v8, %v4035_v22  ;;  %v4135_v14 = vmul.f32 %v9328_v26, %v4035_v22  ;;  %v3902_v4 = vadd.f32 %v9333_v13, %v3863_v3  ;;  %v4235_v21 = vmul.f32 %v9359_v35, %v4083_v2 }
 0x1e2   : > { %v3988_v44 = vmax.f32 %v3901_v47, 0.0  ;;  %v9440_v47 = vperm.slane %v9339_v62, 6  ;;  %v9443_v3 = vperm.slane %v9339_v62, 7  ;;  %5553 = vmatpush.bf16.msra.mxu1 %v6645_v23  ;;  %v4383_v10 = vmul.f32 %v9387_v52, %v4083_v2 }
 0x1e3   : > { %v6762_v6 = vld [vmem:[#allocation4 + $0x74] sm:$0xf0]  ;;  %v6327_v7 = vld [vmem:[#allocation4 + $0x78] sm:$0xf0]  ;;  %v3767_v41 = vpop.f32.mrf.mxu2  ;;  %v3816_v51 = vpop.f32.mrf.mxu3  ;;  %v4299_v33 = vadd.f32 %v4283_v59, %v9395_v56  ;;  %v4201_v58 = vadd.f32 %v4185_v57, %v4135_v14  ;;  %v3989_v48 = vmax.f32 %v3902_v4, 0.0  ;;  %v9445_v59 = vperm.slane %v6465_v49, 1 }
 0x1e4   : > { %v4020_v54 = vrot.slane %v3988_v44, 7  ;;  %v4068_v9 = vrot.slane %v3988_v44, 1  ;;  %v3672_v18 = vpop.f32.mrf.mxu0  ;;  %v3721_v60 = vpop.f32.mrf.mxu1  ;;  %v6326_v17 = vor.u32 %v6762_v6, %v6325_v45  ;;  %v6330_v11 = vor.u32 %v6761_v34, %v6327_v7 }
 0x1e5   : > { %v3817_v15 = vadd.f32 %v3816_v51, %v3767_v41  ;;  %v4349_v24 = vadd.f32 %v4333_v36, %v4299_v33  ;;  %v4021_v61 = vrot.slane %v3989_v48, 7  ;;  %v4251_v19 = vadd.f32 %v4235_v21, %v4201_v58  ;;  %v9466_v36 = vld [vmem:[%s10192_s1 + $0x50] ss:$0 sm:$0xff] }
 0x1e6   : > { %v4036_v25 = vmul.f32 %v7294_v38, %v4020_v54  ;;  %v4084_v22 = vmul.f32 %v7296_v39, %v4068_v9  ;;  %v4186_v14 = vmul.f32 %v9366_v32, %v3988_v44  ;;  %v4069_v4 = vrot.slane %v3989_v48, 1 }
 0x1e7   : > { %3701 = vmatmul.bf16.gmra.mxu0 %v6326_v17  ;;  %v4037_v34 = vmul.f32 %v7294_v38, %v4021_v61  ;;  %v3864_v6 = vmul.f32 %v9368_v28, %v3817_v15  ;;  %v3722_v7 = vadd.f32 %v3721_v60, %v3672_v18  ;;  %v4399_v57 = vadd.f32 %v4383_v10, %v4349_v24  ;;  %v6813_v15 = vld [vmem:[%s10194_s3 + $0x214] sm:$0xf] }
 0x1e8   : > { %3750 = vmatmul.bf16.gmra.mxu1 %v6330_v11  ;;  %3799 = vmatmul.bf16.gmra.mxu2 %v6326_v17  ;;  %v4284_v50 = vmul.f32 %v9390_v46, %v4036_v25  ;;  %v4136_v45 = vmul.f32 %v9363_v0, %v4036_v25  ;;  %v4236_v62 = vmul.f32 %v9379_v31, %v4084_v22 }
 0x1e9   : > { %3848 = vmatmul.bf16.gmra.mxu3 %v6330_v11  ;;  %v4334_v49 = vmul.f32 %v9393_v30, %v3988_v44  ;;  %v4285_v41 = vmul.f32 %v9371_v8, %v4037_v34  ;;  %v4137_v27 = vmul.f32 %v9328_v26, %v4037_v34  ;;  %v4187_v2 = vmul.f32 %v9331_v43, %v3989_v48 }
 0x1ea   : > { %v4300_v51 = vadd.f32 %v4284_v50, %v9424_v16  ;;  %v4433_v33 = vmul.f32 %v9410_v12, %v4037_v34  ;;  %v4202_v63 = vadd.f32 %v4186_v14, %v4136_v45  ;;  %v4335_v18 = vmul.f32 %v9382_v5, %v3989_v48 }
 0x1eb   : > { %v3770_v54 = vpop.f32.mrf.mxu2  ;;  %v4301_v40 = vadd.f32 %v4285_v41, %v4251_v19  ;;  %v3903_v60 = vadd.f32 %v9374_v53, %v3864_v6  ;;  %v4085_v11 = vmul.f32 %v7296_v39, %v4069_v4  ;;  %v4483_v58 = vmul.f32 %v9427_v29, %v3989_v48 }
 0x1ec   : > { %v3819_v9 = vpop.f32.mrf.mxu3  ;;  %v3674_v17 = vpop.f32.mrf.mxu0  ;;  %v4449_v20 = vadd.f32 %v4433_v33, %v4399_v57  ;;  %v3865_v25 = vmul.f32 %v9324_v1, %v3722_v7  ;;  %v6577_v61 = vor.u32 %v6813_v15, %v6574_v42  ;;  %v4350_v48 = vadd.f32 %v4334_v49, %v4300_v51 }
 0x1ed   : > { %v3723_v44 = vpop.f32.mrf.mxu1  ;;  %v3990_v23 = vmax.f32 %v3903_v60, 0.0  ;;  %v3820_v21 = vadd.f32 %v3819_v9, %v3770_v54  ;;  %v4203_v50 = vadd.f32 %v4187_v2, %v4137_v27  ;;  %v4384_v45 = vmul.f32 %v9402_v55, %v4084_v22  ;;  %v9489_v60 = vld [vmem:[%s10192_s1 + $0x58] ss:$0 sm:$0xff] }
 0x1ee   : > { %v3724_v24 = vadd.f32 %v3723_v44, %v3674_v17  ;;  %v4499_v19 = vadd.f32 %v4483_v58, %v4449_v20  ;;  %v3904_v10 = vadd.f32 %v9333_v13, %v3865_v25  ;;  %v4351_v34 = vadd.f32 %v4335_v18, %v4301_v40  ;;  %5603 = vmatpush.bf16.msra.mxu2 %v6577_v61 }
 0x1ef   : > { %v4022_v14 = vrot.slane %v3990_v23, 7  ;;  %v4070_v4 = vrot.slane %v3990_v23, 1  ;;  %v4252_v6 = vadd.f32 %v4236_v62, %v4202_v63  ;;  %v4237_v7 = vmul.f32 %v9359_v35, %v4085_v11 }
 0x1f0   : > { %v4533_v57 = vmul.f32 %v9466_v36, %v4085_v11  ;;  %v3991_v41 = vmax.f32 %v3904_v10, 0.0  ;;  %v4385_v33 = vmul.f32 %v9387_v52, %v4085_v11  ;;  %v3866_v51 = vmul.f32 %v9368_v28, %v3820_v21 }
 0x1f1   : > { %v4038_v49 = vmul.f32 %v7294_v38, %v4022_v14  ;;  %v3867_v27 = vmul.f32 %v9324_v1, %v3724_v24  ;;  %v4400_v2 = vadd.f32 %v4384_v45, %v4350_v48  ;;  %v4253_v22 = vadd.f32 %v4237_v7, %v4203_v50 }
 0x1f2   : > { %v4549_v54 = vadd.f32 %v4533_v57, %v4499_v19  ;;  %v4023_v9 = vrot.slane %v3991_v41, 7  ;;  %v4401_v40 = vadd.f32 %v4385_v33, %v4351_v34  ;;  %v4086_v62 = vmul.f32 %v7296_v39, %v4070_v4  ;;  %v6638_v34 = vld [vmem:[%s10194_s3 + $0x298] sm:$0xf0] }
 0x1f3   : > { %v4188_v63 = vmul.f32 %v9366_v32, %v3990_v23  ;;  %v4286_v18 = vmul.f32 %v9390_v46, %v4038_v49  ;;  %v4138_v17 = vmul.f32 %v9363_v0, %v4038_v49  ;;  %v4434_v44 = vmul.f32 %v9440_v47, %v4038_v49 }
 0x1f4   : > { %v4039_v11 = vmul.f32 %v7294_v38, %v4023_v9  ;;  %v4071_v20 = vrot.slane %v3991_v41, 1  ;;  %v4336_v58 = vmul.f32 %v9393_v30, %v3990_v23  ;;  %v4484_v25 = vmul.f32 %v9443_v3, %v3990_v23  ;;  %v6829_v23 = vld [vmem:[%s10194_s3 + $0x294] sm:$0xf] }
 0x1f5   : > { %v3905_v15 = vadd.f32 %v9374_v53, %v3866_v51  ;;  %v3906_v42 = vadd.f32 %v9333_v13, %v3867_v27  ;;  %v4570_v21 = vadd.f32 %v9434_v37, %v4549_v54  ;;  %v4302_v24 = vadd.f32 %v4286_v18, %v4252_v6  ;;  %v3772_v18 = vpop.f32.mrf.mxu2 }
 0x1f6   : > { %v4450_v61 = vadd.f32 %v4434_v44, %v4400_v2  ;;  %v4287_v48 = vmul.f32 %v9371_v8, %v4039_v11  ;;  %v4534_v50 = vmul.f32 %v9489_v60, %v4086_v62  ;;  %v4139_v19 = vmul.f32 %v9328_v26, %v4039_v11  ;;  %v3821_v44 = vpop.f32.mrf.mxu3 }
 0x1f7   : > { %v4189_v10 = vmul.f32 %v9331_v43, %v3991_v41  ;;  %v4435_v45 = vmul.f32 %v9410_v12, %v4039_v11  ;;  %v4204_v14 = vadd.f32 %v4188_v63, %v4138_v17  ;;  %v4087_v6 = vmul.f32 %v7296_v39, %v4071_v20  ;;  %v3726_v20 = vpop.f32.mrf.mxu1 }
 0x1f8   : > { %v4500_v4 = vadd.f32 %v4484_v25, %v4450_v61  ;;  %v4303_v7 = vadd.f32 %v4287_v48, %v4253_v22  ;;  %v4485_v33 = vmul.f32 %v9427_v29, %v3991_v41  ;;  %v3992_v49 = vmax.f32 %v3905_v15, 0.0  ;;  %v3677_v25 = vpop.f32.mrf.mxu0 }
 0x1f9   : > { %v4451_v57 = vadd.f32 %v4435_v45, %v4401_v40  ;;  %v9512_v51 = vmax.f32 %v3906_v42, 0.0  ;;  %v4352_v27 = vadd.f32 %v4336_v58, %v4302_v24  ;;  %v4337_v54 = vmul.f32 %v9382_v5, %v3991_v41 }
 0x1fa   : > { %v4550_v2 = vadd.f32 %v4534_v50, %v4500_v4  ;;  %v6641_v9 = vor.u32 %v6829_v23, %v6638_v34  ;;  %v4205_v11 = vadd.f32 %v4189_v10, %v4139_v19  ;;  %v4024_v63 = vrot.slane %v3992_v49, 7 }
 0x1fb   : > { %v4501_v16 = vadd.f32 %v4485_v33, %v4451_v57  ;;  %v4072_v17 = vrot.slane %v3992_v49, 1  ;;  %v4238_v22 = vmul.f32 %v9379_v31, %v4086_v62  ;;  %v4386_v40 = vmul.f32 %v9402_v55, %v4086_v62 }
 0x1fc   : > { %v4571_v15 = vadd.f32 %v9445_v59, %v4550_v2  ;;  %v4353_v42 = vadd.f32 %v4337_v54, %v4303_v7  ;;  %5652 = vmatpush.bf16.msra.mxu3 %v6641_v9  ;;  %v4239_v58 = vmul.f32 %v9359_v35, %v4087_v6  ;;  %v4535_v41 = vmul.f32 %v9466_v36, %v4087_v6 }
 0x1fd   : > { %v4040_v24 = vmul.f32 %v7294_v38, %v4024_v63  ;;  %v4025_v61 = vrot.slane %v9512_v51, 7  ;;  %v4254_v48 = vadd.f32 %v4238_v22, %v4204_v14  ;;  %v4402_v50 = vadd.f32 %v4386_v40, %v4352_v27  ;;  %v6814_v63 = vld [vmem:[%s10194_s3 + $0x214] sm:$0xf0] }
 0x1fe   : > { %v4586_v19 = vpack.c.bf16 %v4571_v15, %v4570_v21  ;;  %v4387_v10 = vmul.f32 %v9387_v52, %v4087_v6  ;;  %v4255_v45 = vadd.f32 %v4239_v58, %v4205_v11  ;;  %v4551_v23 = vadd.f32 %v4535_v41, %v4501_v16  ;;  %v6572_v11 = vld [vmem:[%s10194_s3 + $0x210] sm:$0xf] }
 0x1ff   : > { %v4088_v62 = vmul.f32 %v7296_v39, %v4072_v17  ;;  %v4190_v34 = vmul.f32 %v9366_v32, %v3992_v49  ;;  %v4288_v7 = vmul.f32 %v9390_v46, %v4040_v24  ;;  %v4436_v57 = vmul.f32 %v9440_v47, %v4040_v24 }
 0x200   : > { %4594 = vst [vmem:[#allocation4] sm:$0xff] %v4586_v19  ;;  %v4403_v4 = vadd.f32 %v4387_v10, %v4353_v42  ;;  %v4041_v33 = vmul.f32 %v7294_v38, %v4025_v61  ;;  %v4140_v14 = vmul.f32 %v9363_v0, %v4040_v24  ;;  %v4338_v21 = vmul.f32 %v9393_v30, %v3992_v49  ;;  %v6636_v24 = vld [vmem:[%s10194_s3 + $0x290] sm:$0xf]  ;;  %v6830_v61 = vld [vmem:[%s10194_s3 + $0x294] sm:$0xf0]  ;;  %v3824_v19 = vpop.f32.mrf.mxu3 }
 0x201   : > { %v4486_v6 = vmul.f32 %v9443_v3, %v3992_v49  ;;  %v4073_v16 = vrot.slane %v9512_v51, 1  ;;  %v4452_v27 = vadd.f32 %v4436_v57, %v4402_v50  ;;  %v4191_v2 = vmul.f32 %v9331_v43, %v9512_v51  ;;  %v3775_v50 = vpop.f32.mrf.mxu2 }
 0x202   : > { %v4289_v54 = vmul.f32 %v9371_v8, %v4041_v33  ;;  %v4437_v9 = vmul.f32 %v9410_v12, %v4041_v33  ;;  %v4572_v49 = vadd.f32 %v9434_v37, %v4551_v23  ;;  %v4240_v17 = vmul.f32 %v9379_v31, %v4088_v62 }
 0x203   : > { %v9545_v22 = vmul.f32 %v9402_v55, %v4088_v62  ;;  %v4339_v40 = vmul.f32 %v9382_v5, %v9512_v51  ;;  %v4304_v15 = vadd.f32 %v4288_v7, %v4254_v48  ;;  %v4502_v42 = vadd.f32 %v4486_v6, %v4452_v27  ;;  %v3679_v48 = vpop.f32.mrf.mxu0  ;;  %v3728_v7 = vpop.f32.mrf.mxu1 }
 0x204   : > { %v4536_v58 = vmul.f32 %v9489_v60, %v4088_v62  ;;  %v4453_v41 = vadd.f32 %v4437_v9, %v4403_v4  ;;  %v4206_v10 = vadd.f32 %v4190_v34, %v4140_v14  ;;  %v4089_v23 = vmul.f32 %v7296_v39, %v4073_v16  ;;  %v6811_v9 = vld [vmem:[%s10194_s3 + $0x204] sm:$0xf]  ;;  %v6566_v34 = vld [vmem:[%s10194_s3 + $0x208] sm:$0xf0] }
 0x205   : > { %v3822_v57 = vadd.f32 %v3821_v44, %v3772_v18  ;;  %v6573_v56 = vor.u32 %v6814_v63, %v6572_v11  ;;  %v4141_v62 = vmul.f32 %v9328_v26, %v4041_v33  ;;  %v4305_v4 = vadd.f32 %v4289_v54, %v4255_v45  ;;  %v6827_v45 = vld [vmem:[%s10194_s3 + $0x284] sm:$0xf] }
 0x206   : > { %v4552_v6 = vadd.f32 %v4536_v58, %v4502_v42  ;;  %v4487_v27 = vmul.f32 %v9427_v29, %v9512_v51  ;;  %v6637_v44 = vor.u32 %v6830_v61, %v6636_v24  ;;  %v3727_v14 = vadd.f32 %v3726_v20, %v3677_v25  ;;  %v6630_v51 = vld [vmem:[%s10194_s3 + $0x288] sm:$0xf0] }
 0x207   : > { %v3868_v18 = vmul.f32 %v9368_v28, %v3822_v57  ;;  %5505 = vmatpush.bf16.msra.mxu0 %v6573_v56  ;;  %v3825_v16 = vadd.f32 %v3824_v19, %v3775_v50  ;;  %v4354_v33 = vadd.f32 %v4338_v21, %v4304_v15  ;;  %v3729_v63 = vadd.f32 %v3728_v7, %v3679_v48  ;;  %v6564_v56 = vld [vmem:[%s10194_s3 + $0x200] sm:$0xf]  ;;  %v6812_v21 = vld [vmem:[%s10194_s3 + $0x204] sm:$0xf0] }
 0x208   : > { %v4573_v54 = vadd.f32 %v9445_v59, %v4552_v6  ;;  %v4503_v11 = vadd.f32 %v4487_v27, %v4453_v41  ;;  %5554 = vmatpush.bf16.msra.mxu1 %v6637_v44  ;;  %v3869_v20 = vmul.f32 %v9324_v1, %v3727_v14  ;;  %v6569_v58 = vor.u32 %v6811_v9, %v6566_v34  ;;  %v6628_v15 = vld [vmem:[%s10194_s3 + $0x280] sm:$0xf]  ;;  %v6828_v41 = vld [vmem:[%s10194_s3 + $0x284] sm:$0xf0] }
 0x209   : > { %v3907_v25 = vadd.f32 %v9374_v53, %v3868_v18  ;;  %v3870_v42 = vmul.f32 %v9368_v28, %v3825_v16  ;;  %v4207_v61 = vadd.f32 %v4191_v2, %v4141_v62  ;;  %v4537_v50 = vmul.f32 %v9466_v36, %v4089_v23  ;;  %v3777_v14 = vpop.f32.mrf.mxu2  ;;  %v3826_v16 = vpop.f32.mrf.mxu3 }
 0x20a   : > { %v4587_v24 = vpack.c.bf16 %v4573_v54, %v4572_v49  ;;  %v6633_v19 = vor.u32 %v6827_v45, %v6630_v51  ;;  %v4355_v57 = vadd.f32 %v4339_v40, %v4305_v4  ;;  %v3908_v7 = vadd.f32 %v9333_v13, %v3869_v20  ;;  %5604 = vmatpush.bf16.msra.mxu2 %v6569_v58 }
 0x20b   : > { %v3994_v48 = vmax.f32 %v3907_v25, 0.0  ;;  %v3909_v6 = vadd.f32 %v9374_v53, %v3870_v42  ;;  %v3871_v27 = vmul.f32 %v9324_v1, %v3729_v63  ;;  %v6565_v9 = vor.u32 %v6812_v21, %v6564_v56 }
 0x20c   : > { %4595 = vst [vmem:[#allocation4 + $0x8] sm:$0xff] %v4587_v24  ;;  %5653 = vmatpush.bf16.msra.mxu3 %v6633_v19  ;;  %v6629_v34 = vor.u32 %v6828_v41, %v6628_v15  ;;  %v4241_v18 = vmul.f32 %v9359_v35, %v4089_v23  ;;  %v4553_v49 = vadd.f32 %v4537_v50, %v4503_v11  ;;  %v3995_v4 = vmax.f32 %v3908_v7, 0.0 }
 0x20d   : > { %v4026_v2 = vrot.slane %v3994_v48, 7  ;;  %v4074_v62 = vrot.slane %v3994_v48, 1  ;;  %v4256_v44 = vadd.f32 %v4240_v17, %v4206_v10  ;;  %v4389_v40 = vmul.f32 %v9387_v52, %v4089_v23  ;;  %5506 = vmatpush.bf16.msra.mxu0 %v6565_v9 }
 0x20e   : > { %5555 = vmatpush.bf16.msra.mxu1 %v6629_v34  ;;  %v4404_v45 = vadd.f32 %v9545_v22, %v4354_v33  ;;  %v4257_v51 = vadd.f32 %v4241_v18, %v4207_v61  ;;  %v3996_v63 = vmax.f32 %v3909_v6, 0.0  ;;  %v4027_v11 = vrot.slane %v3995_v4, 7 }
 0x20f   : > { %v4042_v54 = vmul.f32 %v7294_v38, %v4026_v2  ;;  %v4405_v56 = vadd.f32 %v4389_v40, %v4355_v57  ;;  %v4090_v25 = vmul.f32 %v7296_v39, %v4074_v62  ;;  %v3910_v20 = vadd.f32 %v9333_v13, %v3871_v27 }
 0x210   : > { %v4574_v17 = vadd.f32 %v9434_v37, %v4553_v49  ;;  %v3827_v42 = vadd.f32 %v3826_v16, %v3777_v14  ;;  %v4192_v58 = vmul.f32 %v9366_v32, %v3994_v48  ;;  %v4043_v33 = vmul.f32 %v7294_v38, %v4027_v11 }
 0x211   : > { %v4142_v10 = vmul.f32 %v9363_v0, %v4042_v54  ;;  %v4290_v23 = vmul.f32 %v9390_v46, %v4042_v54  ;;  %v4438_v22 = vmul.f32 %v9440_v47, %v4042_v54  ;;  %v4075_v21 = vrot.slane %v3995_v4, 1 }
 0x212   : > { %v4340_v41 = vmul.f32 %v9393_v30, %v3994_v48  ;;  %v4488_v24 = vmul.f32 %v9443_v3, %v3994_v48  ;;  %v4028_v61 = vrot.slane %v3996_v63, 7  ;;  %v4242_v19 = vmul.f32 %v9379_v31, %v4090_v25 }
 0x213   : > { %v4306_v15 = vadd.f32 %v4290_v23, %v4256_v44  ;;  %v4208_v50 = vadd.f32 %v4192_v58, %v4142_v10  ;;  %v4454_v57 = vadd.f32 %v4438_v22, %v4404_v45  ;;  %v9608_v7 = vmax.f32 %v3910_v20, 0.0 }
 0x214   : > { %v4390_v27 = vmul.f32 %v9402_v55, %v4090_v25  ;;  %v4291_v9 = vmul.f32 %v9371_v8, %v4043_v33  ;;  %v4439_v34 = vmul.f32 %v9410_v12, %v4043_v33  ;;  %v4538_v49 = vmul.f32 %v9489_v60, %v4090_v25 }
 0x215   : > { %v4356_v6 = vadd.f32 %v4340_v41, %v4306_v15  ;;  %v4504_v18 = vadd.f32 %v4488_v24, %v4454_v57  ;;  %v4091_v2 = vmul.f32 %v7296_v39, %v4075_v21  ;;  %v4489_v48 = vmul.f32 %v9427_v29, %v3995_v4 }
 0x216   : > { %v4143_v62 = vmul.f32 %v9328_v26, %v4043_v33  ;;  %v4455_v44 = vadd.f32 %v4439_v34, %v4405_v56  ;;  %v4044_v40 = vmul.f32 %v7294_v38, %v4028_v61  ;;  %v4076_v14 = vrot.slane %v3996_v63, 1 }
 0x217   : > { %v4258_v16 = vadd.f32 %v4242_v19, %v4208_v50  ;;  %v4554_v45 = vadd.f32 %v4538_v49, %v4504_v18  ;;  %v4193_v54 = vmul.f32 %v9331_v43, %v3995_v4  ;;  %v3872_v11 = vmul.f32 %v9368_v28, %v3827_v42 }
 0x218   : > { %v4406_v20 = vadd.f32 %v4390_v27, %v4356_v6  ;;  %v4307_v10 = vadd.f32 %v4291_v9, %v4257_v51  ;;  %v4505_v23 = vadd.f32 %v4489_v48, %v4455_v44  ;;  %v4292_v25 = vmul.f32 %v9390_v46, %v4044_v40 }
 0x219   : > { %v4575_v21 = vadd.f32 %v9445_v59, %v4554_v45  ;;  %v4092_v56 = vmul.f32 %v7296_v39, %v4076_v14  ;;  %v4144_v33 = vmul.f32 %v9363_v0, %v4044_v40  ;;  %v4440_v15 = vmul.f32 %v9440_v47, %v4044_v40 }
 0x21a   : > { %v3682_v58 = vpop.f32.mrf.mxu0  ;;  %v4209_v41 = vadd.f32 %v4193_v54, %v4143_v62  ;;  %v4341_v24 = vmul.f32 %v9382_v5, %v3995_v4  ;;  %v4539_v42 = vmul.f32 %v9466_v36, %v4091_v2  ;;  %v4308_v61 = vadd.f32 %v4292_v25, %v4258_v16 }
 0x21b   : > { %v3731_v22 = vpop.f32.mrf.mxu1  ;;  %v4588_v51 = vpack.c.bf16 %v4575_v21, %v4574_v17  ;;  %v4194_v50 = vmul.f32 %v9366_v32, %v3996_v63  ;;  %v4456_v19 = vadd.f32 %v4440_v15, %v4406_v20  ;;  %v4490_v57 = vmul.f32 %v9443_v3, %v3996_v63 }
 0x21c   : > { %v4243_v6 = vmul.f32 %v9359_v35, %v4091_v2  ;;  %v4357_v27 = vadd.f32 %v4341_v24, %v4307_v10  ;;  %v4555_v9 = vadd.f32 %v4539_v42, %v4505_v23  ;;  %v4342_v34 = vmul.f32 %v9393_v30, %v3996_v63 }
 0x21d   : > { %4596 = vst [vmem:[#allocation4 + $0x10] sm:$0xff] %v4588_v51  ;;  %v4210_v18 = vadd.f32 %v4194_v50, %v4144_v33  ;;  %v4506_v49 = vadd.f32 %v4490_v57, %v4456_v19  ;;  %v4540_v4 = vmul.f32 %v9489_v60, %v4092_v56  ;;  %v4029_v48 = vrot.slane %v9608_v7, 7 }
 0x21e   : > { %v4259_v62 = vadd.f32 %v4243_v6, %v4209_v41  ;;  %v4391_v17 = vmul.f32 %v9387_v52, %v4091_v2  ;;  %v4358_v44 = vadd.f32 %v4342_v34, %v4308_v61  ;;  %v3911_v40 = vadd.f32 %v9374_v53, %v3872_v11 }
 0x21f   : > { %v4244_v14 = vmul.f32 %v9379_v31, %v4092_v56  ;;  %v4556_v16 = vadd.f32 %v4540_v4, %v4506_v49  ;;  %v4045_v45 = vmul.f32 %v7294_v38, %v4029_v48  ;;  %v4077_v63 = vrot.slane %v9608_v7, 1 }
 0x220   : > { %v4407_v54 = vadd.f32 %v4391_v17, %v4357_v27  ;;  %v4576_v20 = vadd.f32 %v9434_v37, %v4555_v9  ;;  %v4392_v10 = vmul.f32 %v9402_v55, %v4092_v56  ;;  %v3998_v23 = vmax.f32 %v3911_v40, 0.0 }
 0x221   : > { %v4260_v25 = vadd.f32 %v4244_v14, %v4210_v18  ;;  %v4577_v21 = vadd.f32 %v9445_v59, %v4556_v16  ;;  %v4195_v2 = vmul.f32 %v9331_v43, %v9608_v7  ;;  %v4293_v11 = vmul.f32 %v9371_v8, %v4045_v45 }
 0x222   : > { %v3780_v33 = vpop.f32.mrf.mxu2  ;;  %v3829_v15 = vpop.f32.mrf.mxu3  ;;  %v4408_v41 = vadd.f32 %v4392_v10, %v4358_v44  ;;  %v4343_v24 = vmul.f32 %v9382_v5, %v9608_v7  ;;  %v4441_v42 = vmul.f32 %v9410_v12, %v4045_v45  ;;  %v4030_v61 = vrot.slane %v3998_v23, 7 }
 0x223   : > { %v3684_v51 = vpop.f32.mrf.mxu0  ;;  %v3733_v56 = vpop.f32.mrf.mxu1  ;;  %v4589_v50 = vpack.c.bf16 %v4577_v21, %v4576_v20  ;;  %v4093_v19 = vmul.f32 %v7296_v39, %v4077_v63  ;;  %v4145_v57 = vmul.f32 %v9328_v26, %v4045_v45  ;;  %v4078_v6 = vrot.slane %v3998_v23, 1 }
 0x224   : > { %v4457_v27 = vadd.f32 %v4441_v42, %v4407_v54  ;;  %v4491_v9 = vmul.f32 %v9427_v29, %v9608_v7  ;;  %v4046_v34 = vmul.f32 %v7294_v38, %v4030_v61  ;;  %v3732_v18 = vadd.f32 %v3731_v22, %v3682_v58 }
 0x225   : > { %4597 = vst [vmem:[#allocation4 + $0x18] sm:$0xff] %v4589_v50  ;;  %v4309_v49 = vadd.f32 %v4293_v11, %v4259_v62  ;;  %v3830_v4 = vadd.f32 %v3829_v15, %v3780_v33  ;;  %v3734_v48 = vadd.f32 %v3733_v56, %v3684_v51  ;;  %v9653_v17 = vmul.f32 0.0, %v9410_v12  ;;  %v6796_v33 = vld [vmem:[#allocation4 + $0x4] sm:$0xf0]  ;;  %v6502_v15 = vld [vmem:[#allocation4 + $0x8] sm:$0xf0] }
 0x226   : > { %v4507_v44 = vadd.f32 %v4491_v9, %v4457_v27  ;;  %v4094_v40 = vmul.f32 %v7296_v39, %v4078_v6  ;;  %v4294_v14 = vmul.f32 %v9390_v46, %v4046_v34  ;;  %v4442_v16 = vmul.f32 %v9440_v47, %v4046_v34  ;;  %v6795_v6 = vld [vmem:[#allocation4 + $0x4] sm:$0xf] }
 0x227   : > { %v4211_v45 = vadd.f32 %v4195_v2, %v4145_v57  ;;  %v4245_v7 = vmul.f32 %v9359_v35, %v4093_v19  ;;  %v4393_v63 = vmul.f32 %v9387_v52, %v4093_v19  ;;  %v4541_v58 = vmul.f32 %v9466_v36, %v4093_v19  ;;  %v6500_v57 = vld [vmem:[#allocation4] sm:$0xf] }
 0x228   : > { %v4146_v22 = vmul.f32 %v9363_v0, %v4046_v34  ;;  %v4196_v62 = vmul.f32 %v9366_v32, %v3998_v23  ;;  %v4458_v54 = vadd.f32 %v4442_v16, %v4408_v41  ;;  %v4492_v20 = vmul.f32 %v9443_v3, %v3998_v23 }
 0x229   : > { %v4310_v10 = vadd.f32 %v4294_v14, %v4260_v25  ;;  %v3873_v21 = vmul.f32 %v9324_v1, %v3732_v18  ;;  %v3874_v11 = vmul.f32 %v9368_v28, %v3830_v4  ;;  %v3875_v2 = vmul.f32 %v9324_v1, %v3734_v48 }
 0x22a   : > { %v4359_v42 = vadd.f32 %v4343_v24, %v4309_v49  ;;  %v4557_v61 = vadd.f32 %v4541_v58, %v4507_v44  ;;  %v4508_v51 = vadd.f32 %v4492_v20, %v4458_v54  ;;  %v4542_v56 = vmul.f32 %v9489_v60, %v4094_v40  ;;  %v3782_v44 = vpop.f32.mrf.mxu2  ;;  %v3831_v14 = vpop.f32.mrf.mxu3 }
 0x22b   : > { %v4344_v50 = vmul.f32 %v9393_v30, %v3998_v23  ;;  %v3912_v41 = vadd.f32 %v9333_v13, %v3873_v21  ;;  %v3913_v19 = vadd.f32 %v9374_v53, %v3874_v11  ;;  %v3914_v25 = vadd.f32 %v9333_v13, %v3875_v2 }
 0x22c   : > { %v4261_v27 = vadd.f32 %v4245_v7, %v4211_v45  ;;  %v4558_v9 = vadd.f32 %v4542_v56, %v4508_v51  ;;  %v6501_v34 = vor.u32 %v6796_v33, %v6500_v57  ;;  %v6505_v18 = vor.u32 %v6795_v6, %v6502_v15 }
 0x22d   : > { %v4212_v4 = vadd.f32 %v4196_v62, %v4146_v22  ;;  %v4360_v24 = vadd.f32 %v4344_v50, %v4310_v10  ;;  %v3999_v49 = vmax.f32 %v3912_v41, 0.0  ;;  %v9672_v48 = vmax.f32 %v3913_v19, 0.0 }
 0x22e   : > { %v4409_v23 = vadd.f32 %v4393_v63, %v4359_v42  ;;  %v4578_v16 = vadd.f32 %v9434_v37, %v4557_v61  ;;  %v4579_v58 = vadd.f32 %v9445_v59, %v4558_v9  ;;  %v9676_v54 = vmax.f32 %v3914_v25, 0.0  ;;  %5507 = vmatmul.bf16.vlgmr.msra.gmra.mxu0 %v6501_v34  ;;  %5556 = vmatmul.bf16.vlgmr.msra.gmra.mxu1 %v6505_v18 }
 0x22f   : > { %v4246_v45 = vmul.f32 %v9379_v31, %v4094_v40  ;;  %v4394_v7 = vmul.f32 %v9402_v55, %v4094_v40  ;;  %v4031_v22 = vrot.slane %v3999_v49, 7  ;;  %v4079_v62 = vrot.slane %v3999_v49, 1  ;;  %5605 = vmatmul.bf16.vlgmr.msra.gmra.mxu2 %v6501_v34  ;;  %5654 = vmatmul.bf16.vlgmr.msra.gmra.mxu3 %v6505_v18 }
 0x230   : > { %v4590_v20 = vpack.c.bf16 %v4579_v58, %v4578_v16  ;;  %v4032_v10 = vrot.slane %v9672_v48, 7  ;;  %v4080_v63 = vrot.slane %v9672_v48, 1  ;;  %v9683_v21 = vmul.f32 0.0, %v9427_v29 }
 0x231   : > { %v4262_v11 = vadd.f32 %v4246_v45, %v4212_v4  ;;  %v4410_v2 = vadd.f32 %v4394_v7, %v4360_v24  ;;  %v4047_v33 = vmul.f32 %v7294_v38, %v4031_v22  ;;  %v9687_v15 = vmul.f32 0.0, %v9466_v36  ;;  %v6798_v22 = vld [vmem:[#allocation4 + $0x14] sm:$0xf0] }
 0x232   : > { %10363 = vst [vmem:[#allocation19_spill] sm:$0xff] %v9683_v21  ;;  %v4197_v40 = vmul.f32 %v9331_v43, %v3999_v49  ;;  %v4048_v42 = vmul.f32 %v7294_v38, %v4032_v10  ;;  %v4033_v61 = vrot.slane %v9676_v54, 7  ;;  %v3832_v51 = vadd.f32 %v3831_v14, %v3782_v44 }
 0x233   : > { %10364 = vst [vmem:[#allocation20_spill] sm:$0xff] %v9687_v15  ;;  %v4095_v56 = vmul.f32 %v7296_v39, %v4079_v62  ;;  %v4147_v50 = vmul.f32 %v9328_v26, %v4047_v33  ;;  %v4295_v41 = vmul.f32 %v9371_v8, %v4047_v33  ;;  %v4443_v19 = vmul.f32 %v9410_v12, %v4047_v33  ;;  %v3687_v45 = vpop.f32.mrf.mxu0 }
 0x234   : > { %4598 = vst [vmem:[#allocation4 + $0x20] sm:$0xff] %v4590_v20  ;;  %v4493_v25 = vmul.f32 %v9427_v29, %v3999_v49  ;;  %v9698_v57 = vmul.f32 %v7296_v39, %v4080_v63  ;;  %v4444_v6 = vmul.f32 %v9440_v47, %v4048_v42  ;;  %v9702_v9 = vmul.f32 0.0, %v9440_v47  ;;  %v3736_v7 = vpop.f32.mrf.mxu1 }
 0x235   : > { %v4213_v34 = vadd.f32 %v4197_v40, %v4147_v50  ;;  %v4311_v18 = vadd.f32 %v4295_v41, %v4261_v27  ;;  %v4459_v4 = vadd.f32 %v4443_v19, %v4409_v23  ;;  %v4049_v24 = vmul.f32 %v7294_v38, %v4033_v61  ;;  %v6508_v61 = vld [vmem:[#allocation4 + $0x10] sm:$0xf] }
 0x236   : > { %10365 = vst [vmem:[#allocation21_spill] sm:$0xff] %v9702_v9  ;;  %v4345_v44 = vmul.f32 %v9382_v5, %v3999_v49  ;;  %v4460_v14 = vadd.f32 %v4444_v6, %v4410_v2  ;;  %v4494_v16 = vmul.f32 %v9443_v3, %v9672_v48  ;;  %v4081_v58 = vrot.slane %v9676_v54, 1 }
 0x237   : > { %v4509_v62 = vadd.f32 %v4493_v25, %v4459_v4  ;;  %v4543_v20 = vmul.f32 %v9466_v36, %v4095_v56  ;;  %v4247_v10 = vmul.f32 %v9359_v35, %v4095_v56  ;;  %v4297_v27 = vmul.f32 %v9371_v8, %v4049_v24 }
 0x238   : > { %v4361_v33 = vadd.f32 %v4345_v44, %v4311_v18  ;;  %v4296_v49 = vmul.f32 %v9390_v46, %v4048_v42  ;;  %v4510_v2 = vadd.f32 %v4494_v16, %v4460_v14  ;;  %v4544_v40 = vmul.f32 %v9489_v60, %v9698_v57 }
 0x239   : > { %v3785_v23 = vpop.f32.mrf.mxu2  ;;  %v4559_v50 = vadd.f32 %v4543_v20, %v4509_v62  ;;  %v4097_v41 = vmul.f32 %v7296_v39, %v4081_v58  ;;  %v4263_v19 = vadd.f32 %v4247_v10, %v4213_v34  ;;  %v6509_v25 = vor.u32 %v6798_v22, %v6508_v61 }
 0x23a   : > { %v4198_v6 = vmul.f32 %v9366_v32, %v9672_v48  ;;  %v4560_v4 = vadd.f32 %v4544_v40, %v4510_v2  ;;  %v4395_v35 = vmul.f32 %v9387_v52, %v4095_v56  ;;  %v4445_v18 = vmul.f32 %v9410_v12, %v4049_v24  ;;  %v6510_v40 = vld [vmem:[#allocation4 + $0x18] sm:$0xf0] }
 0x23b   : > { %v3834_v63 = vpop.f32.mrf.mxu3  ;;  %v4148_v44 = vmul.f32 %v9363_v0, %v4048_v42  ;;  %v4313_v14 = vadd.f32 %v4297_v27, %v4263_v19  ;;  %v4347_v16 = vmul.f32 %v9382_v5, %v9676_v54  ;;  %v3876_v62 = vmul.f32 %v9368_v28, %v3832_v51 }
 0x23c   : > { %v4580_v58 = vadd.f32 %v9434_v37, %v4559_v50  ;;  %v4312_v34 = vadd.f32 %v4296_v49, %v4262_v11  ;;  %v4581_v22 = vadd.f32 %v9445_v59, %v4560_v4  ;;  %v4411_v20 = vadd.f32 %v4395_v35, %v4361_v33  ;;  %v6797_v35 = vld [vmem:[#allocation4 + $0x14] sm:$0xf]  ;;  %v3689_v4 = vpop.f32.mrf.mxu0 }
 0x23d   : > { %v4363_v10 = vadd.f32 %v4347_v16, %v4313_v14  ;;  %v4397_v2 = vmul.f32 %v9387_v52, %v4097_v41  ;;  %v3915_v56 = vadd.f32 %v9374_v53, %v3876_v62  ;;  %v3737_v24 = vadd.f32 %v3736_v7, %v3687_v45 }
 0x23e   : > { %v4346_v42 = vmul.f32 %v9393_v30, %v9672_v48  ;;  %v4591_v27 = vpack.c.bf16 %v4581_v22, %v4580_v58  ;;  %v4461_v61 = vadd.f32 %v4445_v18, %v4411_v20  ;;  %v3835_v19 = vadd.f32 %v3834_v63, %v3785_v23  ;;  %5512 = vmatmul.bf16.gmra.mxu0 %v6509_v25  ;;  %v3738_v48 = vpop.f32.mrf.mxu1 }
 0x23f   : > { %v4214_v51 = vadd.f32 %v4198_v6, %v4148_v44  ;;  %v4413_v50 = vadd.f32 %v4397_v2, %v4363_v10  ;;  %v4002_v11 = vmax.f32 %v3915_v56, 0.0  ;;  %v3877_v49 = vmul.f32 %v9324_v1, %v3737_v24  ;;  %5610 = vmatmul.bf16.gmra.mxu2 %v6509_v25 }
 0x240   : > { %v4362_v33 = vadd.f32 %v4346_v42, %v4312_v34  ;;  %4599 = vst [vmem:[#allocation4 + $0x28] sm:$0xff] %v4591_v27  ;;  %v4495_v45 = vmul.f32 %v9427_v29, %v9676_v54  ;;  %v3878_v7 = vmul.f32 %v9368_v28, %v3835_v19  ;;  %v6513_v14 = vor.u32 %v6797_v35, %v6510_v40 }
 0x241   : > { %v4463_v23 = vadd.f32 %v9653_v17, %v4413_v50  ;;  %v4034_v63 = vrot.slane %v4002_v11, 7  ;;  %v4082_v6 = vrot.slane %v4002_v11, 1  ;;  %v4248_v18 = vmul.f32 %v9379_v31, %v9698_v57  ;;  %v3787_v44 = vpop.f32.mrf.mxu2 }
 0x242   : > { %v4511_v25 = vadd.f32 %v4495_v45, %v4461_v61  ;;  %v4545_v62 = vmul.f32 %v9466_v36, %v4097_v41  ;;  %v3916_v58 = vadd.f32 %v9333_v13, %v3877_v49  ;;  %v3917_v54 = vadd.f32 %v9374_v53, %v3878_v7  ;;  %5561 = vmatmul.bf16.gmra.mxu1 %v6513_v14 }
 0x243   : > { %v3836_v16 = vpop.f32.mrf.mxu3  ;;  %v4050_v34 = vmul.f32 %v7294_v38, %v4034_v63  ;;  %v4264_v22 = vadd.f32 %v4248_v18, %v4214_v51  ;;  %v4396_v20 = vmul.f32 %v9402_v55, %v9698_v57  ;;  %v3739_v10 = vadd.f32 %v3738_v48, %v3689_v4  ;;  %5659 = vmatmul.bf16.gmra.mxu3 %v6513_v14 }
 0x244   : > { %v4513_v2 = vadd.f32 %v9683_v21, %v4463_v23  ;;  %v4618_v56 = vmax.f32 %v3916_v58, 0.0  ;;  %v4619_v24 = vmax.f32 %v3917_v54, 0.0  ;;  %v3837_v40 = vadd.f32 %v3836_v16, %v3787_v44  ;;  %v6799_v21 = vld [vmem:[#allocation4 + $0x24] sm:$0xf] }
 0x245   : > { %v4098_v36 = vmul.f32 %v7296_v39, %v4082_v6  ;;  %v4298_v41 = vmul.f32 %v9390_v46, %v4050_v34  ;;  %v4412_v42 = vadd.f32 %v4396_v20, %v4362_v33  ;;  %v4446_v27 = vmul.f32 %v9440_v47, %v4050_v34 }
 0x246   : > { %v4561_v61 = vadd.f32 %v4545_v62, %v4511_v25  ;;  %v4348_v19 = vmul.f32 %v9393_v30, %v4002_v11  ;;  %v9749_v51 = vmul.f32 0.0, %v9443_v3  ;;  %v4650_v57 = vrot.slane %v4618_v56, 7 }
 0x247   : > { %v4314_v50 = vadd.f32 %v4298_v41, %v4264_v22  ;;  %v4462_v49 = vadd.f32 %v4446_v27, %v4412_v42  ;;  %v4496_v35 = vmul.f32 %v9443_v3, %v4002_v11  ;;  %v3879_v45 = vmul.f32 %v9324_v1, %v3739_v10  ;;  %v10368_v41 = vld [vmem:[#allocation26_spill] sm:$0xff]  ;;  %v3692_v27 = vpop.f32.mrf.mxu0 }
 0x248   : > { %10366 = vst [vmem:[#allocation22_spill] sm:$0xff] %v9749_v51  ;;  %v4563_v7 = vadd.f32 %v9687_v15, %v4513_v2  ;;  %v4666_v4 = vmul.f32 %v7294_v38, %v4650_v57  ;;  %v4651_v33 = vrot.slane %v4619_v24, 7  ;;  %v3880_v48 = vmul.f32 %v9368_v28, %v3837_v40  ;;  %v6516_v15 = vld [vmem:[#allocation4 + $0x20] sm:$0xf] }
 0x249   : > { %v4364_v14 = vadd.f32 %v4348_v19, %v4314_v50  ;;  %v4398_v23 = vmul.f32 %v9402_v55, %v4098_v36  ;;  %v4512_v63 = vadd.f32 %v4496_v35, %v4462_v49  ;;  %v4546_v6 = vmul.f32 %v9489_v60, %v4098_v36 }
 0x24a   : > { %v4582_v18 = vadd.f32 %v9434_v37, %v4561_v61  ;;  %v9760_v44 = vmul.f32 0.0, %v9489_v60  ;;  %v4698_v11 = vrot.slane %v4618_v56, 1  ;;  %v4906_v16 = vmul.f32 %v4666_v4, %v9371_v8  ;;  %v3741_v61 = vpop.f32.mrf.mxu1 }
 0x24b   : > { %v4414_v25 = vadd.f32 %v4398_v23, %v4364_v14  ;;  %v4562_v62 = vadd.f32 %v4546_v6, %v4512_v63  ;;  %v4812_v58 = vmul.f32 %v4618_v56, %v9331_v43  ;;  %v4667_v54 = vmul.f32 %v7294_v38, %v4651_v33  ;;  %v10369_v14 = vld [vmem:[#allocation8_spill] sm:$0xff] }
 0x24c   : > { %10367 = vst [vmem:[#allocation23_spill] sm:$0xff] %v9760_v44  ;;  %v4764_v34 = vmul.f32 %v4666_v4, %v9328_v26  ;;  %v4699_v22 = vrot.slane %v4619_v24, 1  ;;  %v3918_v20 = vadd.f32 %v9333_v13, %v3879_v45  ;;  %v3919_v10 = vadd.f32 %v9374_v53, %v3880_v48 }
 0x24d   : > { %v4584_v2 = vadd.f32 %v9434_v37, %v4563_v7  ;;  %v4464_v40 = vadd.f32 %v9702_v9, %v4414_v25  ;;  %v4583_v36 = vadd.f32 %v9445_v59, %v4562_v62  ;;  %v4922_v42 = vadd.f32 %v4906_v16, %v10368_v41  ;;  %v10370_v25 = vld [vmem:[#allocation14_spill] sm:$0xff] }
 0x24e   : > { %v4714_v19 = vmul.f32 %v7296_v39, %v4698_v11  ;;  %v4954_v57 = vmul.f32 %v4618_v56, %v9382_v5  ;;  %v4765_v50 = vmul.f32 %v4667_v54, %v9363_v0  ;;  %v4907_v49 = vmul.f32 %v4667_v54, %v9390_v46 }
 0x24f   : > { %v4514_v35 = vadd.f32 %v9749_v51, %v4464_v40  ;;  %v4592_v45 = vpack.c.bf16 %v4583_v36, %v4582_v18  ;;  %v4813_v7 = vmul.f32 %v4619_v24, %v9366_v32  ;;  %v4620_v4 = vmax.f32 %v3918_v20, 0.0 }
 0x250   : > { %v4828_v33 = vadd.f32 %v4812_v58, %v4764_v34  ;;  %v4715_v48 = vmul.f32 %v7296_v39, %v4699_v22  ;;  %v4923_v23 = vadd.f32 %v4907_v49, %v10369_v14  ;;  %v4621_v63 = vmax.f32 %v3919_v10, 0.0  ;;  %v3839_v14 = vpop.f32.mrf.mxu3 }
 0x251   : > { %v4564_v6 = vadd.f32 %v9760_v44, %v4514_v35  ;;  %4600 = vst [vmem:[#allocation4 + $0x30] sm:$0xff] %v4592_v45  ;;  %v4970_v56 = vadd.f32 %v4954_v57, %v4922_v42  ;;  %v4955_v11 = vmul.f32 %v4619_v24, %v9393_v30  ;;  %v4652_v16 = vrot.slane %v4620_v4, 7 }
 0x252   : > { %v4860_v62 = vmul.f32 %v4714_v19, %v10370_v25  ;;  %v5002_v18 = vmul.f32 %v4714_v19, %v9387_v52  ;;  %v4829_v54 = vadd.f32 %v4813_v7, %v4765_v50  ;;  %v4700_v40 = vrot.slane %v4620_v4, 1  ;;  %v3790_v7 = vpop.f32.mrf.mxu2 }
 0x253   : > { %v4585_v58 = vadd.f32 %v9445_v59, %v4564_v6  ;;  %v4971_v34 = vadd.f32 %v4955_v11, %v4923_v23  ;;  %v4668_v22 = vmul.f32 %v7294_v38, %v4652_v16  ;;  %v4653_v20 = vrot.slane %v4621_v63, 7 }
 0x254   : > { %v4876_v10 = vadd.f32 %v4860_v62, %v4828_v33  ;;  %v4861_v36 = vmul.f32 %v4715_v48, %v9379_v31  ;;  %v4701_v41 = vrot.slane %v4621_v63, 1  ;;  %v5018_v57 = vadd.f32 %v5002_v18, %v4970_v56  ;;  %v3694_v56 = vpop.f32.mrf.mxu0 }
 0x255   : > { %v4593_v42 = vpack.c.bf16 %v4585_v58, %v4584_v2  ;;  %v5003_v24 = vmul.f32 %v4715_v48, %v9402_v55  ;;  %v3742_v49 = vadd.f32 %v3741_v61, %v3692_v27  ;;  %v4716_v19 = vmul.f32 %v7296_v39, %v4700_v40  ;;  %v3743_v48 = vpop.f32.mrf.mxu1 }
 0x256   : > { %v4877_v35 = vadd.f32 %v4861_v36, %v4829_v54  ;;  %v5050_v50 = vmul.f32 %v4668_v22, %v9410_v12  ;;  %v4669_v45 = vmul.f32 %v7294_v38, %v4653_v20  ;;  %v4814_v33 = vmul.f32 %v4620_v4, %v9331_v43 }
 0x257   : > { %4601 = vst [vmem:[#allocation4 + $0x38] sm:$0xff] %v4593_v42  ;;  %v5019_v23 = vadd.f32 %v5003_v24, %v4971_v34  ;;  %v4908_v6 = vmul.f32 %v4668_v22, %v9371_v8  ;;  %v5098_v2 = vmul.f32 %v4620_v4, %v9427_v29  ;;  %v4717_v61 = vmul.f32 %v7296_v39, %v4701_v41  ;;  %v9804_v34 = vld [vmem:[%s10192_s1 + $0x50] ss:$0 sm:$0xff]  ;;  %v6800_v42 = vld [vmem:[#allocation4 + $0x24] sm:$0xf0] }
 0x258   : > { %v5066_v27 = vadd.f32 %v5050_v50, %v5018_v57  ;;  %v4909_v11 = vmul.f32 %v4669_v45, %v9390_v46  ;;  %v5051_v16 = vmul.f32 %v4669_v45, %v9440_v47  ;;  %v4766_v62 = vmul.f32 %v4668_v22, %v9328_v26  ;;  %v6518_v50 = vld [vmem:[#allocation4 + $0x28] sm:$0xf0] }
 0x259   : > { %v4956_v18 = vmul.f32 %v4620_v4, %v9382_v5  ;;  %v4815_v54 = vmul.f32 %v4621_v63, %v9366_v32  ;;  %v4957_v40 = vmul.f32 %v4621_v63, %v9393_v30  ;;  %v5146_v20 = vmul.f32 %v9804_v34, %v4716_v19 }
 0x25a   : > { %v5114_v58 = vadd.f32 %v5098_v2, %v5066_v27  ;;  %v5067_v36 = vadd.f32 %v5051_v16, %v5019_v23  ;;  %v5099_v41 = vmul.f32 %v4621_v63, %v9443_v3  ;;  %v4924_v57 = vadd.f32 %v4908_v6, %v4876_v10 }
 0x25b   : > { %v4767_v22 = vmul.f32 %v4669_v45, %v9363_v0  ;;  %v3881_v4 = vmul.f32 %v9324_v1, %v3742_v49  ;;  %v3840_v24 = vadd.f32 %v3839_v14, %v3790_v7  ;;  %v4925_v2 = vadd.f32 %v4909_v11, %v4877_v35 }
 0x25c   : > { %v5162_v44 = vadd.f32 %v5146_v20, %v5114_v58  ;;  %v5115_v27 = vadd.f32 %v5099_v41, %v5067_v36  ;;  %v5147_v51 = vmul.f32 %v9489_v60, %v4717_v61  ;;  %v3744_v16 = vadd.f32 %v3743_v48, %v3694_v56 }
 0x25d   : > { %v3920_v9 = vadd.f32 %v9333_v13, %v3881_v4  ;;  %v3882_v23 = vmul.f32 %v9368_v28, %v3840_v24  ;;  %v6517_v63 = vor.u32 %v6800_v42, %v6516_v15  ;;  %v4830_v10 = vadd.f32 %v4814_v33, %v4766_v62  ;;  %v3792_v15 = vpop.f32.mrf.mxu2  ;;  %v3841_v33 = vpop.f32.mrf.mxu3 }
 0x25e   : > { %v4862_v45 = vmul.f32 %v4716_v19, %v10370_v25  ;;  %v5163_v6 = vadd.f32 %v5147_v51, %v5115_v27  ;;  %v6521_v49 = vor.u32 %v6799_v21, %v6518_v50  ;;  %v4972_v7 = vadd.f32 %v4956_v18, %v4924_v57  ;;  %v3697_v62 = vpop.f32.mrf.mxu0  ;;  %v3746_v18 = vpop.f32.mrf.mxu1 }
 0x25f   : > { %v4622_v14 = vmax.f32 %v3920_v9, 0.0  ;;  %v3921_v35 = vadd.f32 %v9374_v53, %v3882_v23  ;;  %v3883_v11 = vmul.f32 %v9324_v1, %v3744_v16  ;;  %5517 = vmatmul.bf16.gmra.mxu0 %v6517_v63  ;;  %5615 = vmatmul.bf16.gmra.mxu2 %v6517_v63  ;;  %v5178_v60 = vadd.f32 %v5162_v44, %v9434_v37 }
 0x260   : > { %v4831_v58 = vadd.f32 %v4815_v54, %v4767_v22  ;;  %v5179_v56 = vadd.f32 %v5163_v6, %v9445_v59  ;;  %5566 = vmatmul.bf16.gmra.mxu1 %v6521_v49  ;;  %5664 = vmatmul.bf16.gmra.mxu3 %v6521_v49  ;;  %v5004_v51 = vmul.f32 %v4716_v19, %v9387_v52 }
 0x261   : > { %v4973_v21 = vadd.f32 %v4957_v40, %v4925_v2  ;;  %v4654_v48 = vrot.slane %v4622_v14, 7  ;;  %v4702_v9 = vrot.slane %v4622_v14, 1  ;;  %v4878_v20 = vadd.f32 %v4862_v45, %v4830_v10 }
 0x262   : > { %v4863_v36 = vmul.f32 %v4717_v61, %v9379_v31  ;;  %v5194_v41 = vpack.c.bf16 %v5179_v56, %v5178_v60  ;;  %v4623_v42 = vmax.f32 %v3921_v35, 0.0  ;;  %v5020_v44 = vadd.f32 %v5004_v51, %v4972_v7 }
 0x263   : > { %v5005_v54 = vmul.f32 %v4717_v61, %v9402_v55  ;;  %v4670_v57 = vmul.f32 %v7294_v38, %v4654_v48  ;;  %v3922_v22 = vadd.f32 %v9333_v13, %v3883_v11  ;;  %v3842_v40 = vadd.f32 %v3841_v33, %v3792_v15 }
 0x264   : > { %v4879_v4 = vadd.f32 %v4863_v36, %v4831_v58  ;;  %5202 = vst [vmem:[#allocation4 + $0x40] sm:$0xff] %v5194_v41  ;;  %v4655_v19 = vrot.slane %v4623_v42, 7  ;;  %v3747_v24 = vadd.f32 %v3746_v18, %v3697_v62  ;;  %v4718_v2 = vmul.f32 %v7296_v39, %v4702_v9 }
 0x265   : > { %v5021_v50 = vadd.f32 %v5005_v54, %v4973_v21  ;;  %v4910_v27 = vmul.f32 %v4670_v57, %v9371_v8  ;;  %v4703_v23 = vrot.slane %v4623_v42, 1  ;;  %v4768_v16 = vmul.f32 %v4670_v57, %v9328_v26 }
 0x266   : > { %v4816_v63 = vmul.f32 %v4622_v14, %v9331_v43  ;;  %v5052_v61 = vmul.f32 %v4670_v57, %v9410_v12  ;;  %v4671_v10 = vmul.f32 %v7294_v38, %v4655_v19  ;;  %v4958_v6 = vmul.f32 %v4622_v14, %v9382_v5 }
 0x267   : > { %v4926_v45 = vadd.f32 %v4910_v27, %v4878_v20  ;;  %v5100_v49 = vmul.f32 %v4622_v14, %v9427_v29  ;;  %v4624_v7 = vmax.f32 %v3922_v22, 0.0  ;;  %v3884_v60 = vmul.f32 %v9368_v28, %v3842_v40  ;;  %v9846_v40 = vld [vmem:[%s10192_s1 + $0x58] ss:$0 sm:$0xff] }
 0x268   : > { %v5068_v35 = vadd.f32 %v5052_v61, %v5020_v44  ;;  %v4911_v11 = vmul.f32 %v4671_v10, %v9390_v46  ;;  %v3885_v58 = vmul.f32 %v9324_v1, %v3747_v24  ;;  %v5148_v56 = vmul.f32 %v9804_v34, %v4718_v2 }
 0x269   : > { %v4719_v15 = vmul.f32 %v7296_v39, %v4703_v23  ;;  %v4817_v33 = vmul.f32 %v4623_v42, %v9366_v32  ;;  %v5053_v51 = vmul.f32 %v4671_v10, %v9440_v47  ;;  %v4832_v21 = vadd.f32 %v4816_v63, %v4768_v16 }
 0x26a   : > { %v4974_v48 = vadd.f32 %v4958_v6, %v4926_v45  ;;  %v5116_v9 = vadd.f32 %v5100_v49, %v5068_v35  ;;  %v4769_v14 = vmul.f32 %v4671_v10, %v9363_v0  ;;  %v4927_v62 = vadd.f32 %v4911_v11, %v4879_v4 }
 0x26b   : > { %v5069_v18 = vadd.f32 %v5053_v51, %v5021_v50  ;;  %v5101_v20 = vmul.f32 %v4623_v42, %v9443_v3  ;;  %v4656_v36 = vrot.slane %v4624_v7, 7  ;;  %v4864_v41 = vmul.f32 %v4718_v2, %v10370_v25 }
 0x26c   : > { %v5006_v44 = vmul.f32 %v4718_v2, %v9387_v52  ;;  %v4959_v54 = vmul.f32 %v4623_v42, %v9393_v30  ;;  %v4704_v57 = vrot.slane %v4624_v7, 1  ;;  %v5164_v22 = vadd.f32 %v5148_v56, %v5116_v9  ;;  %v3795_v9 = vpop.f32.mrf.mxu2 }
 0x26d   : > { %v5117_v19 = vadd.f32 %v5101_v20, %v5069_v18  ;;  %v5149_v4 = vmul.f32 %v9846_v40, %v4719_v15  ;;  %v4672_v24 = vmul.f32 %v7294_v38, %v4656_v36  ;;  %v4880_v50 = vadd.f32 %v4864_v41, %v4832_v21 }
 0x26e   : > { %v5022_v27 = vadd.f32 %v5006_v44, %v4974_v48  ;;  %v4833_v23 = vadd.f32 %v4817_v33, %v4769_v14  ;;  %v3923_v16 = vadd.f32 %v9374_v53, %v3884_v60  ;;  %v4975_v2 = vadd.f32 %v4959_v54, %v4927_v62  ;;  %v3844_v14 = vpop.f32.mrf.mxu3 }
 0x26f   : > { %v5165_v63 = vadd.f32 %v5149_v4, %v5117_v19  ;;  %v4818_v42 = vmul.f32 %v4624_v7, %v9331_v43  ;;  %v4912_v61 = vmul.f32 %v4672_v24, %v9371_v8  ;;  %v4720_v10 = vmul.f32 %v7296_v39, %v4704_v57 }
 0x270   : > { %v4770_v45 = vmul.f32 %v4672_v24, %v9328_v26  ;;  %v5054_v6 = vmul.f32 %v4672_v24, %v9410_v12  ;;  %v4625_v49 = vmax.f32 %v3923_v16, 0.0  ;;  %v5180_v35 = vadd.f32 %v5164_v22, %v9434_v37 }
 0x271   : > { %v5181_v11 = vadd.f32 %v5165_v63, %v9445_v59  ;;  %v4928_v56 = vadd.f32 %v4912_v61, %v4880_v50  ;;  %v3924_v60 = vadd.f32 %v9333_v13, %v3885_v58  ;;  %v5102_v51 = vmul.f32 %v4624_v7, %v9427_v29 }
 0x272   : > { %v5070_v33 = vadd.f32 %v5054_v6, %v5022_v27  ;;  %v4657_v21 = vrot.slane %v4625_v49, 7  ;;  %v4705_v48 = vrot.slane %v4625_v49, 1  ;;  %v4865_v62 = vmul.f32 %v4719_v15, %v9379_v31 }
 0x273   : > { %v5195_v18 = vpack.c.bf16 %v5181_v11, %v5180_v35  ;;  %v4960_v20 = vmul.f32 %v4624_v7, %v9382_v5  ;;  %v5007_v36 = vmul.f32 %v4719_v15, %v9402_v55  ;;  %v4834_v41 = vadd.f32 %v4818_v42, %v4770_v45  ;;  %v3699_v42 = vpop.f32.mrf.mxu0 }
 0x274   : > { %v5118_v44 = vadd.f32 %v5102_v51, %v5070_v33  ;;  %v4673_v54 = vmul.f32 %v7294_v38, %v4657_v21  ;;  %v4881_v57 = vadd.f32 %v4865_v62, %v4833_v23  ;;  %v4626_v22 = vmax.f32 %v3924_v60, 0.0  ;;  %v3748_v23 = vpop.f32.mrf.mxu1 }
 0x275   : > { %5203 = vst [vmem:[#allocation4 + $0x48] sm:$0xff] %v5195_v18  ;;  %v4976_v58 = vadd.f32 %v4960_v20, %v4928_v56  ;;  %v3845_v19 = vadd.f32 %v3844_v14, %v3795_v9  ;;  %v5023_v4 = vadd.f32 %v5007_v36, %v4975_v2  ;;  %v4866_v24 = vmul.f32 %v4720_v10, %v10370_v25  ;;  %v6802_v18 = vld [vmem:[#allocation4 + $0x34] sm:$0xf0]  ;;  %v6526_v20 = vld [vmem:[#allocation4 + $0x38] sm:$0xf0] }
 0x276   : > { %v5150_v50 = vmul.f32 %v9804_v34, %v4720_v10  ;;  %v4721_v27 = vmul.f32 %v7296_v39, %v4705_v48  ;;  %v5008_v7 = vmul.f32 %v4720_v10, %v9387_v52  ;;  %v4819_v15 = vmul.f32 %v4625_v49, %v9366_v32 }
 0x277   : > { %v5055_v16 = vmul.f32 %v4673_v54, %v9440_v47  ;;  %v4658_v63 = vrot.slane %v4626_v22, 7  ;;  %v4882_v61 = vadd.f32 %v4866_v24, %v4834_v41  ;;  %v4913_v6 = vmul.f32 %v4673_v54, %v9390_v46  ;;  %v6524_v24 = vld [vmem:[#allocation4 + $0x30] sm:$0xf] }
 0x278   : > { %v5166_v45 = vadd.f32 %v5150_v50, %v5118_v44  ;;  %v4961_v2 = vmul.f32 %v4625_v49, %v9393_v30  ;;  %v5024_v35 = vadd.f32 %v5008_v7, %v4976_v58  ;;  %v5103_v56 = vmul.f32 %v4625_v49, %v9443_v3  ;;  %v6801_v50 = vld [vmem:[#allocation4 + $0x34] sm:$0xf]  ;;  %v3797_v7 = vpop.f32.mrf.mxu2 }
 0x279   : > { %v5071_v11 = vadd.f32 %v5055_v16, %v5023_v4  ;;  %v4674_v60 = vmul.f32 %v7294_v38, %v4658_v63  ;;  %v4771_v10 = vmul.f32 %v4673_v54, %v9363_v0  ;;  %v5151_v33 = vmul.f32 %v9846_v40, %v4721_v27  ;;  %v3846_v16 = vpop.f32.mrf.mxu3 }
 0x27a   : > { %v3886_v51 = vmul.f32 %v9368_v28, %v3845_v19  ;;  %v3749_v21 = vadd.f32 %v3748_v23, %v3699_v42  ;;  %v4706_v9 = vrot.slane %v4626_v22, 1  ;;  %v5182_v36 = vadd.f32 %v5166_v45, %v9434_v37 }
 0x27b   : > { %v5119_v48 = vadd.f32 %v5103_v56, %v5071_v11  ;;  %v4914_v14 = vmul.f32 %v4674_v60, %v9371_v8  ;;  %v5056_v62 = vmul.f32 %v4674_v60, %v9410_v12  ;;  %v4867_v49 = vmul.f32 %v4721_v27, %v9379_v31 }
 0x27c   : > { %v4929_v41 = vadd.f32 %v4913_v6, %v4881_v57  ;;  %v5009_v44 = vmul.f32 %v4721_v27, %v9402_v55  ;;  %v4772_v58 = vmul.f32 %v4674_v60, %v9328_v26  ;;  %v3925_v63 = vadd.f32 %v9374_v53, %v3886_v51 }
 0x27d   : > { %v5167_v54 = vadd.f32 %v5151_v33, %v5119_v48  ;;  %v4930_v19 = vadd.f32 %v4914_v14, %v4882_v61  ;;  %v5072_v4 = vadd.f32 %v5056_v62, %v5024_v35  ;;  %v3887_v42 = vmul.f32 %v9324_v1, %v3749_v21  ;;  %v3702_v48 = vpop.f32.mrf.mxu0  ;;  %v3751_v14 = vpop.f32.mrf.mxu1 }
 0x27e   : > { %v6525_v23 = vor.u32 %v6802_v18, %v6524_v24  ;;  %v6529_v45 = vor.u32 %v6801_v50, %v6526_v20  ;;  %v4722_v57 = vmul.f32 %v7296_v39, %v4706_v9  ;;  %v4820_v27 = vmul.f32 %v4626_v22, %v9331_v43 }
 0x27f   : > { %v5183_v11 = vadd.f32 %v5167_v54, %v9445_v59  ;;  %v4962_v6 = vmul.f32 %v4626_v22, %v9382_v5  ;;  %v5104_v61 = vmul.f32 %v4626_v22, %v9427_v29  ;;  %v4627_v35 = vmax.f32 %v3925_v63, 0.0 }
 0x280   : > { %v3926_v56 = vadd.f32 %v9333_v13, %v3887_v42  ;;  %5522 = vmatmul.bf16.gmra.mxu0 %v6525_v23  ;;  %5571 = vmatmul.bf16.gmra.mxu1 %v6529_v45  ;;  %v3847_v60 = vadd.f32 %v3846_v16, %v3797_v7  ;;  %v4835_v33 = vadd.f32 %v4819_v15, %v4771_v10 }
 0x281   : > { %v4977_v51 = vadd.f32 %v4961_v2, %v4929_v41  ;;  %v5196_v21 = vpack.c.bf16 %v5183_v11, %v5182_v36  ;;  %5620 = vmatmul.bf16.gmra.mxu2 %v6525_v23  ;;  %5669 = vmatmul.bf16.gmra.mxu3 %v6529_v45  ;;  %v4836_v9 = vadd.f32 %v4820_v27, %v4772_v58  ;;  %v4659_v20 = vrot.slane %v4627_v35, 7  ;;  %v3849_v27 = vpop.f32.mrf.mxu3 }
 0x282   : > { %v4978_v62 = vadd.f32 %v4962_v6, %v4930_v19  ;;  %v5120_v18 = vadd.f32 %v5104_v61, %v5072_v4  ;;  %v4868_v22 = vmul.f32 %v4722_v57, %v10370_v25  ;;  %v5010_v54 = vmul.f32 %v4722_v57, %v9387_v52 }
 0x283   : > { %5204 = vst [vmem:[#allocation4 + $0x50] sm:$0xff] %v5196_v21  ;;  %v4707_v24 = vrot.slane %v4627_v35, 1  ;;  %v4628_v50 = vmax.f32 %v3926_v56, 0.0  ;;  %v5152_v7 = vmul.f32 %v9804_v34, %v4722_v57  ;;  %v4675_v15 = vmul.f32 %v7294_v38, %v4659_v20  ;;  %v3800_v57 = vpop.f32.mrf.mxu2 }
 0x284   : > { %v3888_v2 = vmul.f32 %v9368_v28, %v3847_v60  ;;  %v3752_v10 = vadd.f32 %v3751_v14, %v3702_v48  ;;  %v4883_v36 = vadd.f32 %v4867_v49, %v4835_v33  ;;  %v5025_v41 = vadd.f32 %v5009_v44, %v4977_v51 }
 0x285   : > { %v4660_v58 = vrot.slane %v4628_v50, 7  ;;  %v4884_v19 = vadd.f32 %v4868_v22, %v4836_v9  ;;  %v5026_v4 = vadd.f32 %v5010_v54, %v4978_v62  ;;  %v5168_v16 = vadd.f32 %v5152_v7, %v5120_v18 }
 0x286   : > { %v4821_v63 = vmul.f32 %v4627_v35, %v9366_v32  ;;  %v4723_v42 = vmul.f32 %v7296_v39, %v4707_v24  ;;  %v4915_v23 = vmul.f32 %v4675_v15, %v9390_v46  ;;  %v5057_v45 = vmul.f32 %v4675_v15, %v9440_v47 }
 0x287   : > { %v4676_v11 = vmul.f32 %v7294_v38, %v4660_v58  ;;  %v4963_v6 = vmul.f32 %v4627_v35, %v9393_v30  ;;  %v4708_v49 = vrot.slane %v4628_v50, 1  ;;  %v3927_v44 = vadd.f32 %v9374_v53, %v3888_v2 }
 0x288   : > { %v3889_v61 = vmul.f32 %v9324_v1, %v3752_v10  ;;  %v4773_v56 = vmul.f32 %v4675_v15, %v9363_v0  ;;  %v5073_v60 = vadd.f32 %v5057_v45, %v5025_v41  ;;  %v5105_v33 = vmul.f32 %v4627_v35, %v9443_v3  ;;  %v6804_v45 = vld [vmem:[#allocation4 + $0x44] sm:$0xf0] }
 0x289   : > { %v4916_v51 = vmul.f32 %v4676_v11, %v9371_v8  ;;  %v5184_v21 = vadd.f32 %v5168_v16, %v9434_v37  ;;  %v4822_v48 = vmul.f32 %v4628_v50, %v9331_v43  ;;  %v5058_v14 = vmul.f32 %v4676_v11, %v9410_v12 }
 0x28a   : > { %v3850_v9 = vadd.f32 %v3849_v27, %v3800_v57  ;;  %v4931_v62 = vadd.f32 %v4915_v23, %v4883_v36  ;;  %v5121_v18 = vadd.f32 %v5105_v33, %v5073_v60  ;;  %v5153_v20 = vmul.f32 %v9846_v40, %v4723_v42 }
 0x28b   : > { %v4964_v22 = vmul.f32 %v4628_v50, %v9382_v5  ;;  %v4724_v54 = vmul.f32 %v7296_v39, %v4708_v49  ;;  %v4774_v24 = vmul.f32 %v4676_v11, %v9328_v26  ;;  %v4629_v35 = vmax.f32 %v3927_v44, 0.0 }
 0x28c   : > { %v3928_v7 = vadd.f32 %v9333_v13, %v3889_v61  ;;  %v4837_v15 = vadd.f32 %v4821_v63, %v4773_v56  ;;  %v4869_v2 = vmul.f32 %v4723_v42, %v9379_v31  ;;  %v5169_v10 = vadd.f32 %v5153_v20, %v5121_v18 }
 0x28d   : > { %v4932_v41 = vadd.f32 %v4916_v51, %v4884_v19  ;;  %v5011_v58 = vmul.f32 %v4723_v42, %v9402_v55  ;;  %v5074_v36 = vadd.f32 %v5058_v14, %v5026_v4  ;;  %v4661_v16 = vrot.slane %v4629_v35, 7  ;;  %v6532_v19 = vld [vmem:[#allocation4 + $0x40] sm:$0xf] }
 0x28e   : > { %v3890_v23 = vmul.f32 %v9368_v28, %v3850_v9  ;;  %v4979_v57 = vadd.f32 %v4963_v6, %v4931_v62  ;;  %v5185_v27 = vadd.f32 %v5169_v10, %v9445_v59  ;;  %v5106_v11 = vmul.f32 %v4628_v50, %v9427_v29 }
 0x28f   : > { %v4709_v49 = vrot.slane %v4629_v35, 1  ;;  %v4838_v44 = vadd.f32 %v4822_v48, %v4774_v24  ;;  %v4870_v63 = vmul.f32 %v4724_v54, %v10370_v25  ;;  %v4677_v61 = vmul.f32 %v7294_v38, %v4661_v16  ;;  %v3704_v16 = vpop.f32.mrf.mxu0 }
 0x290   : > { %v9922_v56 = vmax.f32 %v3928_v7, 0.0  ;;  %v4885_v42 = vadd.f32 %v4869_v2, %v4837_v15  ;;  %v5197_v4 = vpack.c.bf16 %v5185_v27, %v5184_v21  ;;  %v4980_v60 = vadd.f32 %v4964_v22, %v4932_v41 }
 0x291   : > { %v6533_v33 = vor.u32 %v6804_v45, %v6532_v19  ;;  %v5012_v51 = vmul.f32 %v4724_v54, %v9387_v52  ;;  %v5122_v6 = vadd.f32 %v5106_v11, %v5074_v36  ;;  %v4917_v14 = vmul.f32 %v4677_v61, %v9390_v46 }
 0x292   : > { %v3929_v50 = vadd.f32 %v9374_v53, %v3890_v23  ;;  %v5027_v9 = vadd.f32 %v5011_v58, %v4979_v57  ;;  %5205 = vst [vmem:[#allocation4 + $0x58] sm:$0xff] %v5197_v4  ;;  %v4725_v48 = vmul.f32 %v7296_v39, %v4709_v49  ;;  %v5059_v62 = vmul.f32 %v4677_v61, %v9440_v47  ;;  %v3753_v23 = vpop.f32.mrf.mxu1 }
 0x293   : > { %v4662_v18 = vrot.slane %v9922_v56, 7  ;;  %5527 = vmatmul.bf16.gmra.mxu0 %v6533_v33  ;;  %v4886_v20 = vadd.f32 %v4870_v63, %v4838_v44  ;;  %v5154_v21 = vmul.f32 %v9804_v34, %v4724_v54  ;;  %v4933_v22 = vadd.f32 %v4917_v14, %v4885_v42  ;;  %5625 = vmatmul.bf16.gmra.mxu2 %v6533_v33 }
 0x294   : > { %v5028_v24 = vadd.f32 %v5012_v51, %v4980_v60  ;;  %v5075_v7 = vadd.f32 %v5059_v62, %v5027_v9  ;;  %v5107_v15 = vmul.f32 %v4629_v35, %v9443_v3  ;;  %v4965_v41 = vmul.f32 %v4629_v35, %v9393_v30 }
 0x295   : > { %v4678_v2 = vmul.f32 %v7294_v38, %v4662_v18  ;;  %v5170_v10 = vadd.f32 %v5154_v21, %v5122_v6  ;;  %v4710_v58 = vrot.slane %v9922_v56, 1  ;;  %v9935_v36 = vmax.f32 %v3929_v50, 0.0 }
 0x296   : > { %v4775_v45 = vmul.f32 %v4677_v61, %v9363_v0  ;;  %v5123_v54 = vadd.f32 %v5107_v15, %v5075_v7  ;;  %v5155_v57 = vmul.f32 %v9846_v40, %v4725_v48  ;;  %v4823_v11 = vmul.f32 %v4629_v35, %v9366_v32 }
 0x297   : > { %v5060_v27 = vmul.f32 %v4678_v2, %v9410_v12  ;;  %v4981_v49 = vadd.f32 %v4965_v41, %v4933_v22  ;;  %v4663_v44 = vrot.slane %v9935_v36, 7  ;;  %v4711_v63 = vrot.slane %v9935_v36, 1 }
 0x298   : > { %v5013_v19 = vmul.f32 %v4725_v48, %v9402_v55  ;;  %v5171_v42 = vadd.f32 %v5155_v57, %v5123_v54  ;;  %v3754_v60 = vadd.f32 %v3753_v23, %v3704_v16  ;;  %v4726_v33 = vmul.f32 %v7296_v39, %v4710_v58  ;;  %v3802_v58 = vpop.f32.mrf.mxu2  ;;  %v6803_v57 = vld [vmem:[#allocation4 + $0x44] sm:$0xf] }
 0x299   : > { %v5076_v4 = vadd.f32 %v5060_v27, %v5028_v24  ;;  %v4918_v61 = vmul.f32 %v4678_v2, %v9371_v8  ;;  %v5108_v51 = vmul.f32 %v9922_v56, %v9427_v29  ;;  %v4679_v6 = vmul.f32 %v7294_v38, %v4663_v44  ;;  %v6534_v24 = vld [vmem:[#allocation4 + $0x48] sm:$0xf0]  ;;  %v6806_v27 = vld [vmem:[#allocation4 + $0x54] sm:$0xf0] }
 0x29a   : > { %v5186_v35 = vadd.f32 %v5170_v10, %v9434_v37  ;;  %v4839_v14 = vadd.f32 %v4823_v11, %v4775_v45  ;;  %v4871_v50 = vmul.f32 %v4725_v48, %v9379_v31  ;;  %v5187_v9 = vadd.f32 %v5171_v42, %v9445_v59  ;;  %v3851_v48 = vpop.f32.mrf.mxu3 }
 0x29b   : > { %v5029_v62 = vadd.f32 %v5013_v19, %v4981_v49  ;;  %v5124_v18 = vadd.f32 %v5108_v51, %v5076_v4  ;;  %v9953_v21 = vmul.f32 %v7296_v39, %v4711_v63  ;;  %v5061_v22 = vmul.f32 %v4679_v6, %v9440_v47  ;;  %v6540_v63 = vld [vmem:[#allocation4 + $0x50] sm:$0xf] }
 0x29c   : > { %v5198_v7 = vpack.c.bf16 %v5187_v9, %v5186_v35  ;;  %v4776_v15 = vmul.f32 %v4678_v2, %v9328_v26  ;;  %v4824_v41 = vmul.f32 %v9922_v56, %v9331_v43  ;;  %v3891_v10 = vmul.f32 %v9324_v1, %v3754_v60 }
 0x29d   : > { %v4934_v16 = vadd.f32 %v4918_v61, %v4886_v20  ;;  %v5156_v23 = vmul.f32 %v9804_v34, %v4726_v33  ;;  %v5077_v45 = vadd.f32 %v5061_v22, %v5029_v62  ;;  %v5109_v54 = vmul.f32 %v9935_v36, %v9443_v3 }
 0x29e   : > { %5206 = vst [vmem:[#allocation4 + $0x60] sm:$0xff] %v5198_v7  ;;  %v4966_v26 = vmul.f32 %v9922_v56, %v9382_v5  ;;  %v4919_v2 = vmul.f32 %v4679_v6, %v9390_v46  ;;  %v3930_v43 = vadd.f32 %v9333_v13, %v3891_v10  ;;  %v6537_v1 = vor.u32 %v6803_v57, %v6534_v24 }
 0x29f   : > { %v5172_v11 = vadd.f32 %v5156_v23, %v5124_v18  ;;  %v5125_v49 = vadd.f32 %v5109_v54, %v5077_v45  ;;  %v5157_v20 = vmul.f32 %v9846_v40, %v9953_v21  ;;  %v3852_v44 = vadd.f32 %v3851_v48, %v3802_v58 }
 0x2a0   : > { %v4887_v19 = vadd.f32 %v4871_v50, %v4839_v14  ;;  %v4632_v42 = vmax.f32 %v3930_v43, 0.0  ;;  %5576 = vmatmul.bf16.gmra.mxu1 %v6537_v1  ;;  %5674 = vmatmul.bf16.gmra.mxu3 %v6537_v1  ;;  %v6541_v4 = vor.u32 %v6806_v27, %v6540_v63  ;;  %v4840_v60 = vadd.f32 %v4824_v41, %v4776_v15 }
 0x2a1   : > { %v4982_v61 = vadd.f32 %v4966_v26, %v4934_v16  ;;  %v5173_v56 = vadd.f32 %v5157_v20, %v5125_v49  ;;  %v3892_v51 = vmul.f32 %v9368_v28, %v3852_v44  ;;  %v4777_v13 = vmul.f32 %v4679_v6, %v9363_v0 }
 0x2a2   : > { %v4664_v35 = vrot.slane %v4632_v42, 7  ;;  %v4712_v9 = vrot.slane %v4632_v42, 1  ;;  %v4872_v62 = vmul.f32 %v4726_v33, %v10370_v25  ;;  %v5188_v18 = vadd.f32 %v5172_v11, %v9434_v37 }
 0x2a3   : > { %5532 = vmatmul.bf16.gmra.mxu0 %v6541_v4  ;;  %v4935_v22 = vadd.f32 %v4919_v2, %v4887_v19  ;;  %v5189_v14 = vadd.f32 %v5173_v56, %v9445_v59  ;;  %v3931_v50 = vadd.f32 %v9374_v53, %v3892_v51  ;;  %5630 = vmatmul.bf16.gmra.mxu2 %v6541_v4 }
 0x2a4   : > { %v4825_v24 = vmul.f32 %v9935_v36, %v9366_v32  ;;  %v4680_v28 = vmul.f32 %v7294_v38, %v4664_v35  ;;  %v5014_v0 = vmul.f32 %v4726_v33, %v9387_v52  ;;  %v4967_v6 = vmul.f32 %v9935_v36, %v9393_v30 }
 0x2a5   : > { %v5199_v25 = vpack.c.bf16 %v5189_v14, %v5188_v18  ;;  %v4888_v7 = vadd.f32 %v4872_v62, %v4840_v60  ;;  %v4633_v15 = vmax.f32 %v3931_v50, 0.0  ;;  %v4728_v41 = vmul.f32 %v7296_v39, %v4712_v9  ;;  %v6548_v4 = vld [vmem:[#allocation4 + $0x60] sm:$0xf] }
 0x2a6   : > { %v4920_v10 = vmul.f32 %v4680_v28, %v9371_v8  ;;  %v5030_v58 = vadd.f32 %v5014_v0, %v4982_v61  ;;  %v5062_v53 = vmul.f32 %v4680_v28, %v9410_v12  ;;  %v4841_v48 = vadd.f32 %v4825_v24, %v4777_v13  ;;  %v6542_v12 = vld [vmem:[#allocation4 + $0x58] sm:$0xf0]  ;;  %v10372_v0 = vld [vmem:[#allocation21_spill] sm:$0xff] }
 0x2a7   : > { %v4983_v16 = vadd.f32 %v4967_v6, %v4935_v22  ;;  %5207 = vst [vmem:[#allocation4 + $0x68] sm:$0xff] %v5199_v25  ;;  %v4665_v32 = vrot.slane %v4633_v15, 7  ;;  %v4713_v23 = vrot.slane %v4633_v15, 1  ;;  %v4968_v33 = vmul.f32 %v4632_v42, %v9382_v5 }
 0x2a8   : > { %v4936_v45 = vadd.f32 %v4920_v10, %v4888_v7  ;;  %v5078_v54 = vadd.f32 %v5062_v53, %v5030_v58  ;;  %v5110_v36 = vmul.f32 %v4632_v42, %v9427_v29  ;;  %v4873_v27 = vmul.f32 %v9953_v21, %v9379_v31  ;;  %v10373_v58 = vld [vmem:[#allocation20_spill] sm:$0xff] }
 0x2a9   : > { %v4681_v57 = vmul.f32 %v7294_v38, %v4665_v32  ;;  %v5015_v8 = vmul.f32 %v9953_v21, %v9402_v55  ;;  %v5016_v2 = vmul.f32 %v4728_v41, %v9387_v52  ;;  %v4729_v1 = vmul.f32 %v7296_v39, %v4713_v23  ;;  %v6805_v38 = vld [vmem:[#allocation4 + $0x54] sm:$0xf] }
 0x2aa   : > { %v4984_v26 = vadd.f32 %v4968_v33, %v4936_v45  ;;  %v5126_v43 = vadd.f32 %v5110_v36, %v5078_v54  ;;  %v4889_v11 = vadd.f32 %v4873_v27, %v4841_v48  ;;  %v5158_v31 = vmul.f32 %v9804_v34, %v4728_v41  ;;  %v10371_v34 = vld [vmem:[#allocation19_spill] sm:$0xff]  ;;  %v5805_v41 = vld [vmem:[%s7325_s10] sm:$0xff]  ;;  %v10374_v48 = vld [vmem:[#allocation22_spill] sm:$0xff] }
 0x2ab   : > { %v4921_v5 = vmul.f32 %v4681_v57, %v9390_v46  ;;  %v5031_v49 = vadd.f32 %v5015_v8, %v4983_v16  ;;  %v5063_v29 = vmul.f32 %v4681_v57, %v9440_v47  ;;  %v6545_v44 = vor.u32 %v6805_v38, %v6542_v12  ;;  %v5557_v35 = vpop.f32.mrf.mxu1  ;;  %v5806_v45 = vld [vmem:[%s7325_s10 + $0x8] sm:$0xff]  ;;  %v10375_v54 = vld [vmem:[#allocation23_spill] sm:$0xff]  ;;  %v6807_v38 = vld [vmem:[#allocation4 + $0x64] sm:$0xf] }
 0x2ac   : > { %v5032_v20 = vadd.f32 %v5016_v2, %v4984_v26  ;;  %v4969_v63 = vmul.f32 %v4633_v15, %v9393_v30  ;;  %v5111_v52 = vmul.f32 %v4633_v15, %v9443_v3  ;;  %v5174_v42 = vadd.f32 %v5158_v31, %v5126_v43  ;;  %v5508_v30 = vpop.f32.mrf.mxu0  ;;  %v6690_v3 = vld [vmem:[%s10195_s4 + $0x2] ss:$4 sm:$0x3] }
 0x2ad   : > { %v4937_v21 = vadd.f32 %v4921_v5, %v4889_v11  ;;  %v5079_v19 = vadd.f32 %v5063_v29, %v5031_v49  ;;  %v5017_v46 = vmul.f32 %v4729_v1, %v9402_v55  ;;  %v5159_v56 = vmul.f32 %v9846_v40, %v4729_v1  ;;  %v6691_v55 = vld [vmem:[%s10196_s5 + $0x2] ss:$4 sm:$0x3] }
 0x2ae   : > { %v5080_v39 = vadd.f32 %v5032_v20, %v9653_v17  ;;  %v6808_v60 = vld [vmem:[#allocation4 + $0x64] sm:$0xf0]  ;;  %v5558_v40 = vadd.f32 %v5557_v35, %v5508_v30  ;;  %v10009_v62 = vperm.slane %v6690_v3, 0  ;;  %v5190_v14 = vadd.f32 %v5174_v42, %v9434_v37  ;;  %v6550_v43 = vld [vmem:[#allocation4 + $0x68] sm:$0xf0] }
 0x2af   : > { %v4985_v47 = vadd.f32 %v4969_v63, %v4937_v21  ;;  %v5127_v61 = vadd.f32 %v5111_v52, %v5079_v19  ;;  %v6549_v51 = vor.u32 %v6808_v60, %v6548_v4  ;;  %v10012_v50 = vperm.slane %v6691_v55, 0  ;;  %v5808_v21 = vld [vmem:[%s7325_s10 + $0x18] sm:$0xff] }
 0x2b0   : > { %v5128_v13 = vadd.f32 %v5080_v39, %v10371_v34  ;;  %5581 = vmatmul.bf16.gmra.mxu1 %v6545_v44  ;;  %5679 = vmatmul.bf16.gmra.mxu3 %v6545_v44  ;;  %v10014_v28 = vperm.slane %v6690_v3, 1  ;;  %v5702_v7 = vmul.f32 %v10009_v62, %v5558_v40  ;;  %v10021_v15 = vperm.slane %v6691_v55, 1 }
 0x2b1   : > { %v5033_v17 = vadd.f32 %v5017_v46, %v4985_v47  ;;  %v5175_v9 = vadd.f32 %v5159_v56, %v5127_v61  ;;  %v5809_v56 = vld [vmem:[%s7325_s10 + $0x20] sm:$0xff] }
 0x2b2   : > { %v5606_v18 = vpop.f32.mrf.mxu2  ;;  %v5655_v22 = vpop.f32.mrf.mxu3  ;;  %v5176_v53 = vadd.f32 %v5128_v13, %v10373_v58  ;;  %v5741_v23 = vadd.f32 %v10012_v50, %v5702_v7 }
 0x2b3   : > { %5537 = vmatmul.bf16.gmra.mxu0 %v6549_v51  ;;  %v5656_v24 = vadd.f32 %v5655_v22, %v5606_v18  ;;  %v5081_v6 = vadd.f32 %v5033_v17, %v10372_v0  ;;  %v5191_v25 = vadd.f32 %v5175_v9, %v9445_v59  ;;  %5635 = vmatmul.bf16.gmra.mxu2 %v6549_v51  ;;  %v5559_v12 = vpop.f32.mrf.mxu1  ;;  %v5810_v9 = vld [vmem:[%s7325_s10 + $0x28] sm:$0xff] }
 0x2b4   : > { %v5869_v57 = vadd.f32 %v5805_v41, %v5741_v23  ;;  %v5510_v8 = vpop.f32.mrf.mxu0  ;;  %v5192_v26 = vadd.f32 %v5176_v53, %v9434_v37  ;;  %v6553_v37 = vor.u32 %v6807_v38, %v6550_v43 }
 0x2b5   : > { %v5703_v10 = vmul.f32 %v10014_v28, %v5656_v24  ;;  %v5129_v16 = vadd.f32 %v5081_v6, %v10374_v48  ;;  %v5200_v32 = vpack.c.bf16 %v5191_v25, %v5190_v14  ;;  %v5560_v1 = vadd.f32 %v5559_v12, %v5510_v8  ;;  %v5811_v6 = vld [vmem:[%s7325_s10 + $0x30] sm:$0xff] }
 0x2b6   : > { %5901 = vst [vmem:[%s10033_s11] sm:$0xff] %v5869_v57  ;;  %v5813_v57 = vld [vmem:[%s7325_s10 + $0x40] sm:$0xff] }
 0x2b7   : > { %v5742_v33 = vadd.f32 %v10021_v15, %v5703_v10  ;;  %v5177_v36 = vadd.f32 %v5129_v16, %v10375_v54  ;;  %5208 = vst [vmem:[#allocation4 + $0x70] sm:$0xff] %v5200_v32  ;;  %v5704_v20 = vmul.f32 %v10009_v62, %v5560_v1  ;;  %v5812_v16 = vld [vmem:[%s7325_s10 + $0x38] sm:$0xff] }
 0x2b9   : > { %v5870_v27 = vadd.f32 %v5806_v45, %v5742_v33  ;;  %v5193_v2 = vadd.f32 %v5177_v36, %v9445_v59  ;;  %v5807_v59 = vld [vmem:[%s7325_s10 + $0x10] sm:$0xff]  ;;  %v5743_v44 = vadd.f32 %v10012_v50, %v5704_v20 }
 0x2ba   : > { %v5608_v11 = vpop.f32.mrf.mxu2  ;;  %v5657_v5 = vpop.f32.mrf.mxu3  ;;  %v5815_v20 = vld [vmem:[%s7325_s10 + $0x50] sm:$0xff] }
 0x2bb   : > { %5902 = vst [vmem:[%s10033_s11 + $0x8] sm:$0xff] %v5870_v27  ;;  %v5658_v49 = vadd.f32 %v5657_v5, %v5608_v11  ;;  %v5201_v29 = vpack.c.bf16 %v5193_v2, %v5192_v26  ;;  %v5871_v19 = vadd.f32 %v5807_v59, %v5743_v44 }
 0x2bc   : > { %v5513_v39 = vpop.f32.mrf.mxu0 }
 0x2bd   : > { %v5705_v31 = vmul.f32 %v10014_v28, %v5658_v49  ;;  %5209 = vst [vmem:[#allocation4 + $0x78] sm:$0xff] %v5201_v29  ;;  %v5814_v49 = vld [vmem:[%s7325_s10 + $0x48] sm:$0xff] }
 0x2be   : > { %5903 = vst [vmem:[%s10033_s11 + $0x10] sm:$0xff] %v5871_v19  ;;  %v6556_v47 = vld [vmem:[#allocation4 + $0x70] sm:$0xf]  ;;  %v6809_v25 = vld [vmem:[#allocation4 + $0x74] sm:$0xf] }
 0x2bf   : > { %v5744_v63 = vadd.f32 %v10021_v15, %v5705_v31  ;;  %v5562_v42 = vpop.f32.mrf.mxu1 }
 0x2c0   : > { %5586 = vmatmul.bf16.gmra.mxu1 %v6553_v37  ;;  %5684 = vmatmul.bf16.gmra.mxu3 %v6553_v37  ;;  %v5563_v46 = vadd.f32 %v5562_v42, %v5513_v39 }
 0x2c1   : > { %v5872_v52 = vadd.f32 %v5808_v21, %v5744_v63 }
 0x2c2   : > { %v5611_v4 = vpop.f32.mrf.mxu2  ;;  %v5706_v60 = vmul.f32 %v10009_v62, %v5563_v46 }
 0x2c3   : > { %5904 = vst [vmem:[%s10033_s11 + $0x18] sm:$0xff] %v5872_v52  ;;  %v5816_v52 = vld [vmem:[%s7325_s10 + $0x58] sm:$0xff] }
 0x2c4   : > { %v6810_v61 = vld [vmem:[#allocation4 + $0x74] sm:$0xf0]  ;;  %v5745_v34 = vadd.f32 %v10012_v50, %v5706_v60  ;;  %v5515_v55 = vpop.f32.mrf.mxu0  ;;  %v6558_v22 = vld [vmem:[#allocation4 + $0x78] sm:$0xf0] }
 0x2c5   : > { %v6557_v51 = vor.u32 %v6810_v61, %v6556_v47  ;;  %v6561_v10 = vor.u32 %v6809_v25, %v6558_v22  ;;  %v5817_v61 = vld [vmem:[%s7325_s10 + $0x60] sm:$0xff]  ;;  %v5819_v22 = vld [vmem:[%s7325_s10 + $0x70] sm:$0xff] }
 0x2c6   : > { %v5660_v13 = vpop.f32.mrf.mxu3  ;;  %v5873_v35 = vadd.f32 %v5809_v56, %v5745_v34 }
 0x2c7   : > { %v5661_v30 = vadd.f32 %v5660_v13, %v5611_v4  ;;  %5542 = vmatmul.bf16.gmra.mxu0 %v6557_v51  ;;  %5640 = vmatmul.bf16.gmra.mxu2 %v6557_v51  ;;  %v5564_v17 = vpop.f32.mrf.mxu1 }
 0x2c8   : > { %5905 = vst [vmem:[%s10033_s11 + $0x20] sm:$0xff] %v5873_v35  ;;  %v5565_v40 = vadd.f32 %v5564_v17, %v5515_v55 }
 0x2c9   : > { %v5707_v3 = vmul.f32 %v10014_v28, %v5661_v30 }
 0x2ca   : > { %v5708_v14 = vmul.f32 %v10009_v62, %v5565_v40  ;;  %v5613_v24 = vpop.f32.mrf.mxu2 }
 0x2cb   : > { %v5746_v18 = vadd.f32 %v10021_v15, %v5707_v3 }
 0x2cc   : > { %v5747_v7 = vadd.f32 %v10012_v50, %v5708_v14 }
 0x2cd   : > { %v5874_v0 = vadd.f32 %v5810_v9, %v5746_v18  ;;  %v5818_v9 = vld [vmem:[%s7325_s10 + $0x68] sm:$0xff] }
 0x2ce   : > { %v5662_v41 = vpop.f32.mrf.mxu3  ;;  %v5875_v53 = vadd.f32 %v5811_v6, %v5747_v7 }
 0x2cf   : > { %5906 = vst [vmem:[%s10033_s11 + $0x28] sm:$0xff] %v5874_v0  ;;  %v5663_v58 = vadd.f32 %v5662_v41, %v5613_v24 }
 0x2d0   : > { %5591 = vmatmul.bf16.gmra.mxu1 %v6561_v10  ;;  %5689 = vmatmul.bf16.gmra.mxu3 %v6561_v10  ;;  %5907 = vst [vmem:[%s10033_s11 + $0x30] sm:$0xff] %v5875_v53  ;;  %v5820_v10 = vld [vmem:[%s7325_s10 + $0x78] sm:$0xff] }
 0x2d1   : > { %v5709_v48 = vmul.f32 %v10014_v28, %v5663_v58 }
 0x2d3   : > { %v5748_v32 = vadd.f32 %v10021_v15, %v5709_v48 }
 0x2d5   : > { %v5876_v23 = vadd.f32 %v5812_v16, %v5748_v32 }
 0x2d7   : > { %5908 = vst [vmem:[%s10033_s11 + $0x38] sm:$0xff] %v5876_v23 }
 0x2dc   : > { %v5518_v45 = vpop.f32.mrf.mxu0 }
 0x2dd   : > { %v5567_v33 = vpop.f32.mrf.mxu1 }
 0x2de   : > { %v5568_v54 = vadd.f32 %v5567_v33, %v5518_v45 }
 0x2e0   : > { %v5710_v36 = vmul.f32 %v10009_v62, %v5568_v54 }
 0x2e2   : > { %v5749_v27 = vadd.f32 %v10012_v50, %v5710_v36  ;;  %v5616_v8 = vpop.f32.mrf.mxu2  ;;  %v5821_v36 = vld [vmem:[%s7325_s10 + $0x80] sm:$0xff] }
 0x2e3   : > { %v5665_v12 = vpop.f32.mrf.mxu3 }
 0x2e4   : > { %v5877_v26 = vadd.f32 %v5813_v57, %v5749_v27  ;;  %v5666_v2 = vadd.f32 %v5665_v12, %v5616_v8  ;;  %v5520_v43 = vpop.f32.mrf.mxu0 }
 0x2e5   : > { %v5569_v1 = vpop.f32.mrf.mxu1 }
 0x2e6   : > { %5909 = vst [vmem:[%s10033_s11 + $0x40] sm:$0xff] %v5877_v26  ;;  %v5711_v11 = vmul.f32 %v10014_v28, %v5666_v2  ;;  %v5570_v5 = vadd.f32 %v5569_v1, %v5520_v43 }
 0x2e8   : > { %v5750_v29 = vadd.f32 %v10021_v15, %v5711_v11  ;;  %v5712_v38 = vmul.f32 %v10009_v62, %v5570_v5  ;;  %v5822_v11 = vld [vmem:[%s7325_s10 + $0x88] sm:$0xff] }
 0x2ea   : > { %v5878_v37 = vadd.f32 %v5814_v49, %v5750_v29  ;;  %v5751_v59 = vadd.f32 %v10012_v50, %v5712_v38  ;;  %v5618_v31 = vpop.f32.mrf.mxu2  ;;  %v5823_v38 = vld [vmem:[%s7325_s10 + $0x90] sm:$0xff] }
 0x2eb   : > { %v5667_v44 = vpop.f32.mrf.mxu3 }
 0x2ec   : > { %5910 = vst [vmem:[%s10033_s11 + $0x48] sm:$0xff] %v5878_v37  ;;  %v5879_v21 = vadd.f32 %v5815_v20, %v5751_v59  ;;  %v5668_v63 = vadd.f32 %v5667_v44, %v5618_v31 }
 0x2ee   : > { %5911 = vst [vmem:[%s10033_s11 + $0x50] sm:$0xff] %v5879_v21  ;;  %v5713_v19 = vmul.f32 %v10014_v28, %v5668_v63 }
 0x2f0   : > { %v5752_v39 = vadd.f32 %v10021_v15, %v5713_v19 }
 0x2f2   : > { %v5880_v42 = vadd.f32 %v5816_v52, %v5752_v39  ;;  %v5824_v39 = vld [vmem:[%s7325_s10 + $0x98] sm:$0xff] }
 0x2f4   : > { %5912 = vst [vmem:[%s10033_s11 + $0x58] sm:$0xff] %v5880_v42 }
 0x2fd   : > { %v5523_v46 = vpop.f32.mrf.mxu0  ;;  %v5572_v4 = vpop.f32.mrf.mxu1 }
 0x2fe   : > { %v5573_v60 = vadd.f32 %v5572_v4, %v5523_v46  ;;  %v5825_v4 = vld [vmem:[%s7325_s10 + $0xa0] sm:$0xff] }
 0x300   : > { %v5714_v47 = vmul.f32 %v10009_v62, %v5573_v60 }
 0x302   : > { %v5753_v56 = vadd.f32 %v10012_v50, %v5714_v47 }
 0x304   : > { %v5881_v51 = vadd.f32 %v5817_v61, %v5753_v56  ;;  %v5621_v34 = vpop.f32.mrf.mxu2  ;;  %v5670_v13 = vpop.f32.mrf.mxu3 }
 0x305   : > { %v5671_v30 = vadd.f32 %v5670_v13, %v5621_v34  ;;  %v5525_v35 = vpop.f32.mrf.mxu0  ;;  %v5574_v3 = vpop.f32.mrf.mxu1 }
 0x306   : > { %5913 = vst [vmem:[%s10033_s11 + $0x60] sm:$0xff] %v5881_v51  ;;  %v5575_v55 = vadd.f32 %v5574_v3, %v5525_v35 }
 0x307   : > { %v5715_v17 = vmul.f32 %v10014_v28, %v5671_v30 }
 0x308   : > { %v5716_v40 = vmul.f32 %v10009_v62, %v5575_v55  ;;  %v5826_v55 = vld [vmem:[%s7325_s10 + $0xa8] sm:$0xff] }
 0x309   : > { %v5754_v18 = vadd.f32 %v10021_v15, %v5715_v17 }
 0x30a   : > { %v5755_v14 = vadd.f32 %v10012_v50, %v5716_v40  ;;  %v5827_v40 = vld [vmem:[%s7325_s10 + $0xb0] sm:$0xff] }
 0x30b   : > { %v5882_v24 = vadd.f32 %v5818_v9, %v5754_v18 }
 0x30c   : > { %v5883_v0 = vadd.f32 %v5819_v22, %v5755_v14  ;;  %v5623_v6 = vpop.f32.mrf.mxu2  ;;  %v5672_v25 = vpop.f32.mrf.mxu3 }
 0x30d   : > { %5914 = vst [vmem:[%s10033_s11 + $0x68] sm:$0xff] %v5882_v24  ;;  %v5673_v7 = vadd.f32 %v5672_v25, %v5623_v6 }
 0x30e   : > { %5915 = vst [vmem:[%s10033_s11 + $0x70] sm:$0xff] %v5883_v0 }
 0x30f   : > { %v5717_v41 = vmul.f32 %v10014_v28, %v5673_v7 }
 0x310   : > { %v5528_v58 = vpop.f32.mrf.mxu0 }
 0x311   : > { %v5756_v53 = vadd.f32 %v10021_v15, %v5717_v41 }
 0x313   : > { %v5884_v48 = vadd.f32 %v5820_v10, %v5756_v53  ;;  %v5828_v10 = vld [vmem:[%s7325_s10 + $0xb8] sm:$0xff] }
 0x315   : > { %5916 = vst [vmem:[%s10033_s11 + $0x78] sm:$0xff] %v5884_v48 }
 0x316   : > { %v5626_v16 = vpop.f32.mrf.mxu2 }
 0x318   : > { %v5530_v32 = vpop.f32.mrf.mxu0 }
 0x31d   : > { %v5577_v23 = vpop.f32.mrf.mxu1 }
 0x31e   : > { %v5578_v45 = vadd.f32 %v5577_v23, %v5528_v58  ;;  %v5628_v33 = vpop.f32.mrf.mxu2 }
 0x320   : > { %v5718_v54 = vmul.f32 %v10009_v62, %v5578_v45  ;;  %v5533_v57 = vpop.f32.mrf.mxu0 }
 0x322   : > { %v5757_v27 = vadd.f32 %v10012_v50, %v5718_v54 }
 0x323   : > { %v5675_v8 = vpop.f32.mrf.mxu3 }
 0x324   : > { %v5885_v12 = vadd.f32 %v5821_v36, %v5757_v27  ;;  %v5676_v26 = vadd.f32 %v5675_v8, %v5626_v16  ;;  %v5829_v16 = vld [vmem:[%s7325_s10 + $0xc0] sm:$0xff] }
 0x325   : > { %v5579_v2 = vpop.f32.mrf.mxu1 }
 0x326   : > { %5917 = vst [vmem:[%s10033_s11 + $0x80] sm:$0xff] %v5885_v12  ;;  %v5719_v43 = vmul.f32 %v10014_v28, %v5676_v26  ;;  %v5580_v1 = vadd.f32 %v5579_v2, %v5530_v32  ;;  %v5631_v5 = vpop.f32.mrf.mxu2  ;;  %v5830_v12 = vld [vmem:[%s7325_s10 + $0xc8] sm:$0xff] }
 0x328   : > { %v5758_v49 = vadd.f32 %v10021_v15, %v5719_v43  ;;  %v5720_v29 = vmul.f32 %v10009_v62, %v5580_v1  ;;  %v5535_v31 = vpop.f32.mrf.mxu0  ;;  %v5831_v43 = vld [vmem:[%s7325_s10 + $0xd0] sm:$0xff] }
 0x32a   : > { %v5886_v20 = vadd.f32 %v5822_v11, %v5758_v49  ;;  %v5759_v37 = vadd.f32 %v10012_v50, %v5720_v29 }
 0x32b   : > { %v5677_v59 = vpop.f32.mrf.mxu3 }
 0x32c   : > { %5918 = vst [vmem:[%s10033_s11 + $0x88] sm:$0xff] %v5886_v20  ;;  %v5887_v44 = vadd.f32 %v5823_v38, %v5759_v37  ;;  %v5678_v21 = vadd.f32 %v5677_v59, %v5628_v33 }
 0x32d   : > { %v5582_v63 = vpop.f32.mrf.mxu1 }
 0x32e   : > { %5919 = vst [vmem:[%s10033_s11 + $0x90] sm:$0xff] %v5887_v44  ;;  %v5721_v19 = vmul.f32 %v10014_v28, %v5678_v21  ;;  %v5583_v52 = vadd.f32 %v5582_v63, %v5533_v57  ;;  %v5633_v60 = vpop.f32.mrf.mxu2 }
 0x330   : > { %v5760_v42 = vadd.f32 %v10021_v15, %v5721_v19  ;;  %v5722_v46 = vmul.f32 %v10009_v62, %v5583_v52  ;;  %v5538_v30 = vpop.f32.mrf.mxu0  ;;  %v5833_v19 = vld [vmem:[%s7325_s10 + $0xe0] sm:$0xff] }
 0x332   : > { %v5888_v47 = vadd.f32 %v5824_v39, %v5760_v42  ;;  %v5761_v61 = vadd.f32 %v10012_v50, %v5722_v46 }
 0x333   : > { %v5680_v56 = vpop.f32.mrf.mxu3 }
 0x334   : > { %5920 = vst [vmem:[%s10033_s11 + $0x98] sm:$0xff] %v5888_v47  ;;  %v5889_v51 = vadd.f32 %v5825_v4, %v5761_v61  ;;  %v5681_v34 = vadd.f32 %v5680_v56, %v5631_v5 }
 0x335   : > { %v5584_v13 = vpop.f32.mrf.mxu1 }
 0x336   : > { %5921 = vst [vmem:[%s10033_s11 + $0xa0] sm:$0xff] %v5889_v51  ;;  %v5723_v35 = vmul.f32 %v10014_v28, %v5681_v34  ;;  %v5585_v3 = vadd.f32 %v5584_v13, %v5535_v31  ;;  %v5636_v24 = vpop.f32.mrf.mxu2  ;;  %v5832_v31 = vld [vmem:[%s7325_s10 + $0xd8] sm:$0xff]  ;;  %v5834_v51 = vld [vmem:[%s7325_s10 + $0xe8] sm:$0xff] }
 0x338   : > { %v5762_v17 = vadd.f32 %v10021_v15, %v5723_v35  ;;  %v5724_v9 = vmul.f32 %v10009_v62, %v5585_v3  ;;  %v5540_v58 = vpop.f32.mrf.mxu0 }
 0x33a   : > { %v5890_v18 = vadd.f32 %v5826_v55, %v5762_v17  ;;  %v5763_v22 = vadd.f32 %v10012_v50, %v5724_v9 }
 0x33b   : > { %v5682_v14 = vpop.f32.mrf.mxu3 }
 0x33c   : > { %5922 = vst [vmem:[%s10033_s11 + $0xa8] sm:$0xff] %v5890_v18  ;;  %v5891_v0 = vadd.f32 %v5827_v40, %v5763_v22  ;;  %v5683_v6 = vadd.f32 %v5682_v14, %v5633_v60  ;;  %v5836_v18 = vld [vmem:[%s7325_s10 + $0xf8] sm:$0xff] }
 0x33d   : > { %v5587_v25 = vpop.f32.mrf.mxu1 }
 0x33e   : > { %5923 = vst [vmem:[%s10033_s11 + $0xb0] sm:$0xff] %v5891_v0  ;;  %v5725_v7 = vmul.f32 %v10014_v28, %v5683_v6  ;;  %v5588_v41 = vadd.f32 %v5587_v25, %v5538_v30  ;;  %v5638_v57 = vpop.f32.mrf.mxu2  ;;  %v5835_v30 = vld [vmem:[%s7325_s10 + $0xf0] sm:$0xff] }
 0x340   : > { %v5764_v53 = vadd.f32 %v10021_v15, %v5725_v7  ;;  %v5726_v48 = vmul.f32 %v10009_v62, %v5588_v41 }
 0x342   : > { %v5892_v32 = vadd.f32 %v5828_v10, %v5764_v53  ;;  %v5765_v23 = vadd.f32 %v10012_v50, %v5726_v48 }
 0x343   : > { %v5685_v45 = vpop.f32.mrf.mxu3 }
 0x344   : > { %5924 = vst [vmem:[%s10033_s11 + $0xb8] sm:$0xff] %v5892_v32  ;;  %v5893_v33 = vadd.f32 %v5829_v16, %v5765_v23  ;;  %v5686_v54 = vadd.f32 %v5685_v45, %v5636_v24  ;;  %v5543_v1 = vpop.f32.mrf.mxu0 }
 0x345   : > { %v5589_v36 = vpop.f32.mrf.mxu1 }
 0x346   : > { %5925 = vst [vmem:[%s10033_s11 + $0xc0] sm:$0xff] %v5893_v33  ;;  %v5727_v27 = vmul.f32 %v10014_v28, %v5686_v54  ;;  %v5590_v8 = vadd.f32 %v5589_v36, %v5540_v58 }
 0x348   : > { %v5766_v26 = vadd.f32 %v10021_v15, %v5727_v27  ;;  %v5728_v2 = vmul.f32 %v10009_v62, %v5590_v8 }
 0x34a   : > { %v5894_v11 = vadd.f32 %v5830_v12, %v5766_v26  ;;  %v5767_v5 = vadd.f32 %v10012_v50, %v5728_v2  ;;  %v5641_v44 = vpop.f32.mrf.mxu2 }
 0x34b   : > { %v5687_v49 = vpop.f32.mrf.mxu3 }
 0x34c   : > { %5926 = vst [vmem:[%s10033_s11 + $0xc8] sm:$0xff] %v5894_v11  ;;  %v5895_v29 = vadd.f32 %v5831_v43, %v5767_v5  ;;  %v5688_v38 = vadd.f32 %v5687_v49, %v5638_v57  ;;  %v5545_v46 = vpop.f32.mrf.mxu0 }
 0x34d   : > { %v5592_v20 = vpop.f32.mrf.mxu1 }
 0x34e   : > { %5927 = vst [vmem:[%s10033_s11 + $0xd0] sm:$0xff] %v5895_v29  ;;  %v5729_v37 = vmul.f32 %v10014_v28, %v5688_v38  ;;  %v5593_v59 = vadd.f32 %v5592_v20, %v5543_v1 }
 0x350   : > { %v5768_v21 = vadd.f32 %v10021_v15, %v5729_v37  ;;  %v5730_v63 = vmul.f32 %v10009_v62, %v5593_v59 }
 0x352   : > { %v5896_v52 = vadd.f32 %v5832_v31, %v5768_v21  ;;  %v5769_v39 = vadd.f32 %v10012_v50, %v5730_v63  ;;  %v5643_v35 = vpop.f32.mrf.mxu2 }
 0x353   : > { %v5690_v42 = vpop.f32.mrf.mxu3 }
 0x354   : > { %5928 = vst [vmem:[%s10033_s11 + $0xd8] sm:$0xff] %v5896_v52  ;;  %v5897_v4 = vadd.f32 %v5833_v19, %v5769_v39  ;;  %v5691_v60 = vadd.f32 %v5690_v42, %v5641_v44 }
 0x355   : > { %v5594_v47 = vpop.f32.mrf.mxu1 }
 0x356   : > { %5929 = vst [vmem:[%s10033_s11 + $0xe0] sm:$0xff] %v5897_v4  ;;  %v5731_v61 = vmul.f32 %v10014_v28, %v5691_v60  ;;  %v5595_v56 = vadd.f32 %v5594_v47, %v5545_v46 }
 0x358   : > { %v5770_v34 = vadd.f32 %v10021_v15, %v5731_v61  ;;  %v5732_v13 = vmul.f32 %v10009_v62, %v5595_v56 }
 0x35a   : > { %v5898_v3 = vadd.f32 %v5834_v51, %v5770_v34  ;;  %v5771_v55 = vadd.f32 %v10012_v50, %v5732_v13 }
 0x35b   : > { %v5692_v17 = vpop.f32.mrf.mxu3 }
 0x35c   : > { %5930 = vst [vmem:[%s10033_s11 + $0xe8] sm:$0xff] %v5898_v3  ;;  %v5899_v9 = vadd.f32 %v5835_v30, %v5771_v55  ;;  %v5693_v40 = vadd.f32 %v5692_v17, %v5643_v35 }
 0x35e   : > { %5931 = vst [vmem:[%s10033_s11 + $0xf0] sm:$0xff] %v5899_v9  ;;  %v5733_v62 = vmul.f32 %v10014_v28, %v5693_v40 }
 0x360   : > { %v5772_v22 = vadd.f32 %v10021_v15, %v5733_v62 }
 0x362   : > { %v5900_v50 = vadd.f32 %v5836_v18, %v5772_v22 }
 0x364   : > { %5932 = vst [vmem:[%s10033_s11 + $0xf8] sm:$0xff] %v5900_v50 }
 0x365   : > { %6926 = shalt.err (!%p6923_p3)
}
 0x366   : > { %s6964_s19 = smov 256   ;;  %s6965_s11 = smov 16  }
 0x367   : > { %6845 = dma.vmem_to_hbm [thread:$0]  (%p7039_p5), %s5948_s25, 4096, %s5950_s16, %s5934_s17, %s6964_s19, %s6964_s19, %s6965_s11  }
 0x368 PF: > { %p6851_p4 = scmp.ge.s32.totalorder %s6961_s24, 2  ;;  %s5964_s12 = sand.u32 1, %s6949_s21  }
 0x369   : > { %s5965_s13 = scalar_lea.sflag [#allocation6], %s5964_s12 }
 0x36a   : > { %p6848_p7 = pnand %p6851_p4, %p7043_p6 }
 0x36c   : > { %p6849_p8 = pneg %p6848_p7 }
 0x36e   : > { %6944 = dma.done.wait (%p6849_p8), %s5965_s13, 4096  }
 0x36f   : > { %6946 = vsyncadd (%p6849_p8), %s5965_s13, 4294963200  ;;  %p16_p9 = scmp.ge.s32.totalorder %s7026_s27, 4   ;;  %s10376_s21 = smov %s6953_s22 }
 0x370   : > { %s10377_s22 = smov %s6957_s23  ;;  %s10378_s23 = smov %s7037_s30 }
 0x371   : > { %s10379_s24 = smov %s7026_s27  ;;  %18 = sbr.rel (!%p16_p9) target bundleno = 3 (0x3), region = 100 }
 0x376   :  { %5971 = vsyncpa [#allocation6], 1 }
 0x377   :  { %5973 = vsyncpa [#allocation6 + $0x1], 1 }

</bundles_post_ra>
